<compile_context>
chip_gen: v5e
topology: v5e:2x2
jax: 0.10.0
libtpu: 0.0.40
codegen_flags: <defaults>
</compile_context>

<pallas_src>
import functools

import jax
import jax.numpy as jnp
from jax import lax
from jax.experimental import pallas as pl
from jax.experimental.pallas import tpu as pltpu


# ----------------------------- configuration (small) -----------------------
HIDDEN = 128            # hidden_size
INTER = 256             # intermediate_size
NUM_LAYERS = 2          # num_hidden_layers
NUM_HEADS = 4           # num_attention_heads
HEAD_DIM = HIDDEN // NUM_HEADS
NUM_CHANNELS = 3
IMAGE_SIZE = 32
PATCH_SIZE = 8
LAYER_NORM_EPS = 1e-6
NUM_PATCHES = (IMAGE_SIZE // PATCH_SIZE) ** 2            # 16
PATCH_DIM = NUM_CHANNELS * PATCH_SIZE * PATCH_SIZE       # 192
PATCH_DIM_PAD = 256                                      # zero-padded K (2 x 128)
BATCH = 2
SCALE = HEAD_DIM ** (-0.5)


# ----------------------------- fused Pallas kernel --------------------------
def _siglip_fused_kernel(
        patches_ref, pw_ref, pos_ref,
        ln1g_ref, ln1b_ref, wqkv_ref, bqkv_ref, wo_ref, bo_ref,
        ln2g_ref, ln2b_ref, w1_ref, b1_ref, w2_ref, b2_ref,
        postg_ref, postb_ref,
        out_ref,
        *, eps, num_layers, num_heads, head_dim, batch, seq):
    """Single invocation: whole (B*S, E) activation slab + all weights in VMEM."""
    cdt = jnp.bfloat16                       # MXU operand dtype (f32 accumulation)

    def layer_norm(x, g, b):                 # f32 throughout
        mean = jnp.mean(x, axis=-1, keepdims=True)
        var = jnp.mean(jnp.square(x - mean), axis=-1, keepdims=True)
        return (x - mean) * lax.rsqrt(var + eps) * g + b

    # ---- patch embedding: conv-as-matmul (+ pos emb, conv bias pre-folded) ----
    h = jnp.dot(patches_ref[...], pw_ref[...],
                preferred_element_type=jnp.float32)
    h = h + pos_ref[...]                                           # (B*S, E) f32

    M, E = h.shape
    B, S, H, D = batch, seq, num_heads, head_dim

    def split_heads(t):                       # (B*S, E) -> (B*H, S, D) bf16
        return (t.reshape(B, S, H, D)
                 .transpose(0, 2, 1, 3)
                 .reshape(B * H, S, D)
                 .astype(cdt))

    # ---- encoder layers (fully unrolled; stacked weights are VMEM-resident) ----
    for l in range(num_layers):
        # --- self attention block ---
        ln1 = layer_norm(h, ln1g_ref[l], ln1b_ref[l])
        qkv = jnp.dot(ln1.astype(cdt), wqkv_ref[l],
                      preferred_element_type=jnp.float32) + bqkv_ref[l]
        q, k, v = qkv[:, 0:E], qkv[:, E:2 * E], qkv[:, 2 * E:3 * E]
        qh, kh, vh = split_heads(q), split_heads(k), split_heads(v)

        # softmax scale already folded into the Q columns of wqkv / bqkv
        s = jnp.einsum('nqd,nkd->nqk', qh, kh,
                       preferred_element_type=jnp.float32)         # (B*H, S, S)
        s = s - jnp.max(s, axis=-1, keepdims=True)
        p = jnp.exp(s)
        p = p / jnp.sum(p, axis=-1, keepdims=True)                 # exact f32 softmax
        o = jnp.einsum('nqk,nkd->nqd', p.astype(cdt), vh,
                       preferred_element_type=jnp.float32)         # (B*H, S, D)
        attn = (o.reshape(B, H, S, D).transpose(0, 2, 1, 3).reshape(M, E))

        attn = jnp.dot(attn.astype(cdt), wo_ref[l],
                       preferred_element_type=jnp.float32) + bo_ref[l]
        h = h + attn                                               # residual 1

        # --- MLP block ---
        ln2 = layer_norm(h, ln2g_ref[l], ln2b_ref[l])
        m = jnp.dot(ln2.astype(cdt), w1_ref[l],
                    preferred_element_type=jnp.float32) + b1_ref[l]
        m = jax.nn.gelu(m, approximate=True)                       # tanh GELU (f32)
        m = jnp.dot(m.astype(cdt), w2_ref[l],
                    preferred_element_type=jnp.float32) + b2_ref[l]
        h = h + m                                                  # residual 2

    # ---- post layernorm ----
    out_ref[...] = layer_norm(h, postg_ref[...], postb_ref[...]).astype(out_ref.dtype)


# ----------------------------- wrapper ---------------------------------------
@jax.jit
def siglip_vision_transformer(pixel_values, params):
    B = pixel_values.shape[0]
    S, E, I, L, H, D = NUM_PATCHES, HIDDEN, INTER, NUM_LAYERS, NUM_HEADS, HEAD_DIM
    KPAD = PATCH_DIM_PAD

    # patch extraction (reshape/transpose glue; kernel_size == stride)
    hp, wp = IMAGE_SIZE // PATCH_SIZE, IMAGE_SIZE // PATCH_SIZE
    patches = pixel_values.reshape(B, NUM_CHANNELS, hp, PATCH_SIZE, wp, PATCH_SIZE)
    patches = patches.transpose(0, 2, 4, 1, 3, 5).reshape(B * S, PATCH_DIM)
    patches = jnp.pad(patches, ((0, 0), (0, KPAD - PATCH_DIM))).astype(jnp.bfloat16)

    # fold conv bias into the position embedding and tile it over the batch
    pos_eff = jnp.tile(params["pos_emb"] + params["patch_b"], (B, 1))   # (B*S, E) f32

    weights = (params["patch_w"], pos_eff,
               params["ln1_g"], params["ln1_b"], params["wqkv"], params["bqkv"],
               params["wo"], params["bo"], params["ln2_g"], params["ln2_b"],
               params["w1"], params["b1"], params["w2"], params["b2"],
               params["post_g"], params["post_b"])

    # advisory cost estimate so XLA can overlap the custom call
    flops = 2 * B * S * KPAD * E
    flops += L * B * (2 * S * E * 3 * E          # fused QKV
                      + 2 * 2 * H * S * S * D    # scores + PV
                      + 2 * S * E * E            # out proj
                      + 2 * 2 * S * E * I)       # fc1 + fc2
    transcendentals = L * B * (H * S * S + S * I)
    bytes_accessed = int(patches.size * 2 + B * S * E * 4
                         + sum(int(w.size) * w.dtype.itemsize for w in weights))
    cost = pl.CostEstimate(flops=flops, transcendentals=transcendentals,
                           bytes_accessed=bytes_accessed)

    kernel = functools.partial(
        _siglip_fused_kernel, eps=LAYER_NORM_EPS, num_layers=L,
        num_heads=H, head_dim=D, batch=B, seq=S)

    # Single grid step: every input is whole-array VMEM-resident (no blocking,
    # no per-step double-buffering of the 16 broadcast weights).
    out = pl.pallas_call(
        kernel,
        out_shape=jax.ShapeDtypeStruct((B * S, E), jnp.float32),
        cost_estimate=cost,
    )(patches, *weights)
    return out.reshape(B, S, E)


# ----------------------------- parameter init -------------------------------
def init_params(key):
    def nrm(k, shape, scale=0.02):
        return jax.random.normal(k, shape, dtype=jnp.float32) * scale

    keys = jax.random.split(key, 4)
    L, E, I = NUM_LAYERS, HIDDEN, INTER

    # conv weight stored flattened to (C*P*P, E) == torch_w.reshape(E, -1).T,
    # zero-padded along K to PATCH_DIM_PAD (matmul result is unchanged).
    patch_w = nrm(keys[0], (PATCH_DIM, E))
    patch_w = jnp.pad(patch_w, ((0, PATCH_DIM_PAD - PATCH_DIM), (0, 0)))

    lk = jax.random.split(keys[3], 8)

    # q/k/v projections concatenated along the output dim -> one wide matmul.
    # Softmax scale (head_dim ** -0.5) folded into the Q columns.
    wqkv = nrm(lk[0], (L, E, 3 * E))
    wqkv = wqkv.at[:, :, :E].multiply(SCALE)
    bqkv = nrm(lk[1], (L, 1, 3 * E))
    bqkv = bqkv.at[:, :, :E].multiply(SCALE)

    bf16 = jnp.bfloat16
    params = {
        "patch_w": patch_w.astype(bf16),
        "patch_b": nrm(keys[1], (1, E)),                 # f32; folded into pos_emb
        "pos_emb": nrm(keys[2], (NUM_PATCHES, E)),       # f32
        # per-layer weights stacked along a leading layer axis
        "ln1_g": jnp.ones((L, 1, E), jnp.float32),
        "ln1_b": jnp.zeros((L, 1, E), jnp.float32),
        "wqkv": wqkv.astype(bf16),
        "bqkv": bqkv,                                    # f32 bias (added post-acc)
        "wo": nrm(lk[2], (L, E, E)).astype(bf16),
        "bo": nrm(lk[3], (L, 1, E)),
        "ln2_g": jnp.ones((L, 1, E), jnp.float32),
        "ln2_b": jnp.zeros((L, 1, E), jnp.float32),
        "w1": nrm(lk[4], (L, E, I)).astype(bf16),
        "b1": nrm(lk[5], (L, 1, I)),
        "w2": nrm(lk[6], (L, I, E)).astype(bf16),
        "b2": nrm(lk[7], (L, 1, E)),
        "post_g": jnp.ones((1, E), jnp.float32),
        "post_b": jnp.zeros((1, E), jnp.float32),
    }
    return params


# ----------------------------- main ------------------------------------------
if __name__ == "__main__":
    key = jax.random.PRNGKey(0)
    k_px, k_par = jax.random.split(key)
    pixel_values = jax.random.normal(
        k_px, (BATCH, NUM_CHANNELS, IMAGE_SIZE, IMAGE_SIZE), dtype=jnp.float32)
    params = init_params(k_par)

    out = siglip_vision_transformer(pixel_values, params)
    jax.block_until_ready(out)
    assert out.shape == (BATCH, NUM_PATCHES, HIDDEN)
    assert bool(jnp.all(jnp.isfinite(out)))
    print("KERNEL_OK")
</pallas_src>

<mosaic_0001>
module attributes {stable_mosaic.version = 11 : i64} {
  func.func @_siglip_fused_kernel(%arg0: memref<32x256xbf16, #tpu.memory_space<vmem>>, %arg1: memref<256x128xbf16, #tpu.memory_space<vmem>>, %arg2: memref<32x128xf32, #tpu.memory_space<vmem>>, %arg3: memref<2x1x128xf32, #tpu.memory_space<vmem>>, %arg4: memref<2x1x128xf32, #tpu.memory_space<vmem>>, %arg5: memref<2x128x384xbf16, #tpu.memory_space<vmem>>, %arg6: memref<2x1x384xf32, #tpu.memory_space<vmem>>, %arg7: memref<2x128x128xbf16, #tpu.memory_space<vmem>>, %arg8: memref<2x1x128xf32, #tpu.memory_space<vmem>>, %arg9: memref<2x1x128xf32, #tpu.memory_space<vmem>>, %arg10: memref<2x1x128xf32, #tpu.memory_space<vmem>>, %arg11: memref<2x128x256xbf16, #tpu.memory_space<vmem>>, %arg12: memref<2x1x256xf32, #tpu.memory_space<vmem>>, %arg13: memref<2x256x128xbf16, #tpu.memory_space<vmem>>, %arg14: memref<2x1x128xf32, #tpu.memory_space<vmem>>, %arg15: memref<1x128xf32, #tpu.memory_space<vmem>>, %arg16: memref<1x128xf32, #tpu.memory_space<vmem>>, %arg17: memref<32x128xf32, #tpu.memory_space<vmem>>) attributes {dimension_semantics = [], scalar_prefetch = 0 : i64, scratch_operands = 0 : i64, tpu.core_type = #tpu.core_type<tc>} {
    %c0 = arith.constant 0 : index
    %c0_0 = arith.constant 0 : index
    %0 = vector.load %arg0[%c0, %c0_0] : memref<32x256xbf16, #tpu.memory_space<vmem>>, vector<32x256xbf16>
    %c0_1 = arith.constant 0 : index
    %c0_2 = arith.constant 0 : index
    %1 = vector.load %arg1[%c0_1, %c0_2] : memref<256x128xbf16, #tpu.memory_space<vmem>>, vector<256x128xbf16>
    %cst = arith.constant dense<0.000000e+00> : vector<32x128xf32>
    %2 = tpu.matmul %0, %1, %cst {dimension_numbers = #tpu.dot_dimension_numbers<[1], [0], [0], [1], [0, 0, 1, 1], [], []>} : vector<32x256xbf16>, vector<256x128xbf16>, vector<32x128xf32> -> vector<32x128xf32>
    %c0_3 = arith.constant 0 : index
    %c0_4 = arith.constant 0 : index
    %3 = vector.load %arg2[%c0_3, %c0_4] : memref<32x128xf32, #tpu.memory_space<vmem>>, vector<32x128xf32>
    %4 = arith.addf %2, %3 : vector<32x128xf32>
    %c0_5 = arith.constant 0 : index
    %c0_6 = arith.constant 0 : index
    %c0_7 = arith.constant 0 : index
    %5 = vector.load %arg3[%c0_5, %c0_6, %c0_7] : memref<2x1x128xf32, #tpu.memory_space<vmem>>, vector<1x1x128xf32>
    %6 = vector.shape_cast %5 : vector<1x1x128xf32> to vector<1x128xf32>
    %c0_8 = arith.constant 0 : index
    %c0_9 = arith.constant 0 : index
    %c0_10 = arith.constant 0 : index
    %7 = vector.load %arg4[%c0_8, %c0_9, %c0_10] : memref<2x1x128xf32, #tpu.memory_space<vmem>>, vector<1x1x128xf32>
    %8 = vector.shape_cast %7 : vector<1x1x128xf32> to vector<1x128xf32>
    %cst_11 = arith.constant dense<0.000000e+00> : vector<32xf32>
    %9 = vector.multi_reduction <add>, %4, %cst_11 [1] : vector<32x128xf32> to vector<32xf32>
    %10 = vector.shape_cast %9 : vector<32xf32> to vector<32x1xf32>
    %cst_12 = arith.constant 1.280000e+02 : f32
    %11 = vector.broadcast %cst_12 : f32 to vector<32x1xf32>
    %12 = arith.divf %10, %11 : vector<32x1xf32>
    %13 = vector.broadcast %12 : vector<32x1xf32> to vector<32x128xf32>
    %14 = arith.subf %4, %13 : vector<32x128xf32>
    %15 = arith.mulf %14, %14 : vector<32x128xf32>
    %cst_13 = arith.constant dense<0.000000e+00> : vector<32xf32>
    %16 = vector.multi_reduction <add>, %15, %cst_13 [1] : vector<32x128xf32> to vector<32xf32>
    %17 = vector.shape_cast %16 : vector<32xf32> to vector<32x1xf32>
    %cst_14 = arith.constant 1.280000e+02 : f32
    %18 = vector.broadcast %cst_14 : f32 to vector<32x1xf32>
    %19 = arith.divf %17, %18 : vector<32x1xf32>
    %20 = vector.broadcast %12 : vector<32x1xf32> to vector<32x128xf32>
    %21 = arith.subf %4, %20 : vector<32x128xf32>
    %cst_15 = arith.constant 9.99999997E-7 : f32
    %22 = vector.broadcast %cst_15 : f32 to vector<32x1xf32>
    %23 = arith.addf %19, %22 : vector<32x1xf32>
    %24 = math.rsqrt %23 : vector<32x1xf32>
    %25 = vector.broadcast %24 : vector<32x1xf32> to vector<32x128xf32>
    %26 = arith.mulf %21, %25 : vector<32x128xf32>
    %27 = vector.broadcast %6 : vector<1x128xf32> to vector<32x128xf32>
    %28 = arith.mulf %26, %27 : vector<32x128xf32>
    %29 = vector.broadcast %8 : vector<1x128xf32> to vector<32x128xf32>
    %30 = arith.addf %28, %29 : vector<32x128xf32>
    %31 = arith.truncf %30 : vector<32x128xf32> to vector<32x128xbf16>
    %c0_16 = arith.constant 0 : index
    %c0_17 = arith.constant 0 : index
    %c0_18 = arith.constant 0 : index
    %32 = vector.load %arg5[%c0_16, %c0_17, %c0_18] : memref<2x128x384xbf16, #tpu.memory_space<vmem>>, vector<1x128x384xbf16>
    %33 = vector.shape_cast %32 : vector<1x128x384xbf16> to vector<128x384xbf16>
    %cst_19 = arith.constant dense<0.000000e+00> : vector<32x384xf32>
    %34 = tpu.matmul %31, %33, %cst_19 {dimension_numbers = #tpu.dot_dimension_numbers<[1], [0], [0], [1], [0, 0, 1, 1], [], []>} : vector<32x128xbf16>, vector<128x384xbf16>, vector<32x384xf32> -> vector<32x384xf32>
    %c0_20 = arith.constant 0 : index
    %c0_21 = arith.constant 0 : index
    %c0_22 = arith.constant 0 : index
    %35 = vector.load %arg6[%c0_20, %c0_21, %c0_22] : memref<2x1x384xf32, #tpu.memory_space<vmem>>, vector<1x1x384xf32>
    %36 = vector.shape_cast %35 : vector<1x1x384xf32> to vector<1x384xf32>
    %37 = vector.broadcast %36 : vector<1x384xf32> to vector<32x384xf32>
    %38 = arith.addf %34, %37 : vector<32x384xf32>
    %39 = vector.extract_strided_slice %38 {offsets = [0, 0], sizes = [32, 128], strides = [1, 1]} : vector<32x384xf32> to vector<32x128xf32>
    %40 = vector.extract_strided_slice %38 {offsets = [0, 128], sizes = [32, 128], strides = [1, 1]} : vector<32x384xf32> to vector<32x128xf32>
    %41 = vector.extract_strided_slice %38 {offsets = [0, 256], sizes = [32, 128], strides = [1, 1]} : vector<32x384xf32> to vector<32x128xf32>
    %42 = vector.shape_cast %39 : vector<32x128xf32> to vector<2x16x4x32xf32>
    %43 = tpu.transpose %42, [0, 2, 1, 3] : vector<2x16x4x32xf32> -> vector<2x4x16x32xf32>
    %44 = vector.shape_cast %43 : vector<2x4x16x32xf32> to vector<8x16x32xf32>
    %45 = arith.truncf %44 : vector<8x16x32xf32> to vector<8x16x32xbf16>
    %46 = vector.shape_cast %40 : vector<32x128xf32> to vector<2x16x4x32xf32>
    %47 = tpu.transpose %46, [0, 2, 1, 3] : vector<2x16x4x32xf32> -> vector<2x4x16x32xf32>
    %48 = vector.shape_cast %47 : vector<2x4x16x32xf32> to vector<8x16x32xf32>
    %49 = arith.truncf %48 : vector<8x16x32xf32> to vector<8x16x32xbf16>
    %50 = vector.shape_cast %41 : vector<32x128xf32> to vector<2x16x4x32xf32>
    %51 = tpu.transpose %50, [0, 2, 1, 3] : vector<2x16x4x32xf32> -> vector<2x4x16x32xf32>
    %52 = vector.shape_cast %51 : vector<2x4x16x32xf32> to vector<8x16x32xf32>
    %53 = arith.truncf %52 : vector<8x16x32xf32> to vector<8x16x32xbf16>
    "tpu.trace_start"() <{level = 10 : i32, message = "nqd,nkd->nqk"}> : () -> ()
    %cst_23 = arith.constant dense<0.000000e+00> : vector<8x16x16xf32>
    %54 = tpu.matmul %45, %49, %cst_23 {dimension_numbers = #tpu.dot_dimension_numbers<[2], [2], [1], [1], [0, 0, 0, 1, 1, 1], [0], [0]>} : vector<8x16x32xbf16>, vector<8x16x32xbf16>, vector<8x16x16xf32> -> vector<8x16x16xf32>
    "tpu.trace_stop"() : () -> ()
    %cst_24 = arith.constant dense<0xFF800000> : vector<8x16xf32>
    %55 = vector.multi_reduction <maximumf>, %54, %cst_24 [2] : vector<8x16x16xf32> to vector<8x16xf32>
    %56 = vector.shape_cast %55 : vector<8x16xf32> to vector<8x16x1xf32>
    %57 = vector.broadcast %56 : vector<8x16x1xf32> to vector<8x16x16xf32>
    %58 = arith.subf %54, %57 : vector<8x16x16xf32>
    %59 = math.exp %58 : vector<8x16x16xf32>
    %cst_25 = arith.constant dense<0.000000e+00> : vector<8x16xf32>
    %60 = vector.multi_reduction <add>, %59, %cst_25 [2] : vector<8x16x16xf32> to vector<8x16xf32>
    %61 = vector.shape_cast %60 : vector<8x16xf32> to vector<8x16x1xf32>
    %62 = vector.broadcast %61 : vector<8x16x1xf32> to vector<8x16x16xf32>
    %63 = arith.divf %59, %62 : vector<8x16x16xf32>
    %64 = arith.truncf %63 : vector<8x16x16xf32> to vector<8x16x16xbf16>
    "tpu.trace_start"() <{level = 10 : i32, message = "nqk,nkd->nqd"}> : () -> ()
    %cst_26 = arith.constant dense<0.000000e+00> : vector<8x16x32xf32>
    %65 = tpu.matmul %64, %53, %cst_26 {dimension_numbers = #tpu.dot_dimension_numbers<[2], [1], [1], [2], [0, 0, 0, 1, 1, 2], [0], [0]>} : vector<8x16x16xbf16>, vector<8x16x32xbf16>, vector<8x16x32xf32> -> vector<8x16x32xf32>
    "tpu.trace_stop"() : () -> ()
    %66 = vector.shape_cast %65 : vector<8x16x32xf32> to vector<2x4x16x32xf32>
    %67 = tpu.transpose %66, [0, 2, 1, 3] : vector<2x4x16x32xf32> -> vector<2x16x4x32xf32>
    %68 = vector.shape_cast %67 : vector<2x16x4x32xf32> to vector<32x128xf32>
    %69 = arith.truncf %68 : vector<32x128xf32> to vector<32x128xbf16>
    %c0_27 = arith.constant 0 : index
    %c0_28 = arith.constant 0 : index
    %c0_29 = arith.constant 0 : index
    %70 = vector.load %arg7[%c0_27, %c0_28, %c0_29] : memref<2x128x128xbf16, #tpu.memory_space<vmem>>, vector<1x128x128xbf16>
    %71 = vector.shape_cast %70 : vector<1x128x128xbf16> to vector<128x128xbf16>
    %cst_30 = arith.constant dense<0.000000e+00> : vector<32x128xf32>
    %72 = tpu.matmul %69, %71, %cst_30 {dimension_numbers = #tpu.dot_dimension_numbers<[1], [0], [0], [1], [0, 0, 1, 1], [], []>} : vector<32x128xbf16>, vector<128x128xbf16>, vector<32x128xf32> -> vector<32x128xf32>
    %c0_31 = arith.constant 0 : index
    %c0_32 = arith.constant 0 : index
    %c0_33 = arith.constant 0 : index
    %73 = vector.load %arg8[%c0_31, %c0_32, %c0_33] : memref<2x1x128xf32, #tpu.memory_space<vmem>>, vector<1x1x128xf32>
    %74 = vector.shape_cast %73 : vector<1x1x128xf32> to vector<1x128xf32>
    %75 = vector.broadcast %74 : vector<1x128xf32> to vector<32x128xf32>
    %76 = arith.addf %72, %75 : vector<32x128xf32>
    %77 = arith.addf %4, %76 : vector<32x128xf32>
    %c0_34 = arith.constant 0 : index
    %c0_35 = arith.constant 0 : index
    %c0_36 = arith.constant 0 : index
    %78 = vector.load %arg9[%c0_34, %c0_35, %c0_36] : memref<2x1x128xf32, #tpu.memory_space<vmem>>, vector<1x1x128xf32>
    %79 = vector.shape_cast %78 : vector<1x1x128xf32> to vector<1x128xf32>
    %c0_37 = arith.constant 0 : index
    %c0_38 = arith.constant 0 : index
    %c0_39 = arith.constant 0 : index
    %80 = vector.load %arg10[%c0_37, %c0_38, %c0_39] : memref<2x1x128xf32, #tpu.memory_space<vmem>>, vector<1x1x128xf32>
    %81 = vector.shape_cast %80 : vector<1x1x128xf32> to vector<1x128xf32>
    %cst_40 = arith.constant dense<0.000000e+00> : vector<32xf32>
    %82 = vector.multi_reduction <add>, %77, %cst_40 [1] : vector<32x128xf32> to vector<32xf32>
    %83 = vector.shape_cast %82 : vector<32xf32> to vector<32x1xf32>
    %cst_41 = arith.constant 1.280000e+02 : f32
    %84 = vector.broadcast %cst_41 : f32 to vector<32x1xf32>
    %85 = arith.divf %83, %84 : vector<32x1xf32>
    %86 = vector.broadcast %85 : vector<32x1xf32> to vector<32x128xf32>
    %87 = arith.subf %77, %86 : vector<32x128xf32>
    %88 = arith.mulf %87, %87 : vector<32x128xf32>
    %cst_42 = arith.constant dense<0.000000e+00> : vector<32xf32>
    %89 = vector.multi_reduction <add>, %88, %cst_42 [1] : vector<32x128xf32> to vector<32xf32>
    %90 = vector.shape_cast %89 : vector<32xf32> to vector<32x1xf32>
    %cst_43 = arith.constant 1.280000e+02 : f32
    %91 = vector.broadcast %cst_43 : f32 to vector<32x1xf32>
    %92 = arith.divf %90, %91 : vector<32x1xf32>
    %93 = vector.broadcast %85 : vector<32x1xf32> to vector<32x128xf32>
    %94 = arith.subf %77, %93 : vector<32x128xf32>
    %cst_44 = arith.constant 9.99999997E-7 : f32
    %95 = vector.broadcast %cst_44 : f32 to vector<32x1xf32>
    %96 = arith.addf %92, %95 : vector<32x1xf32>
    %97 = math.rsqrt %96 : vector<32x1xf32>
    %98 = vector.broadcast %97 : vector<32x1xf32> to vector<32x128xf32>
    %99 = arith.mulf %94, %98 : vector<32x128xf32>
    %100 = vector.broadcast %79 : vector<1x128xf32> to vector<32x128xf32>
    %101 = arith.mulf %99, %100 : vector<32x128xf32>
    %102 = vector.broadcast %81 : vector<1x128xf32> to vector<32x128xf32>
    %103 = arith.addf %101, %102 : vector<32x128xf32>
    %104 = arith.truncf %103 : vector<32x128xf32> to vector<32x128xbf16>
    %c0_45 = arith.constant 0 : index
    %c0_46 = arith.constant 0 : index
    %c0_47 = arith.constant 0 : index
    %105 = vector.load %arg11[%c0_45, %c0_46, %c0_47] : memref<2x128x256xbf16, #tpu.memory_space<vmem>>, vector<1x128x256xbf16>
    %106 = vector.shape_cast %105 : vector<1x128x256xbf16> to vector<128x256xbf16>
    %cst_48 = arith.constant dense<0.000000e+00> : vector<32x256xf32>
    %107 = tpu.matmul %104, %106, %cst_48 {dimension_numbers = #tpu.dot_dimension_numbers<[1], [0], [0], [1], [0, 0, 1, 1], [], []>} : vector<32x128xbf16>, vector<128x256xbf16>, vector<32x256xf32> -> vector<32x256xf32>
    %c0_49 = arith.constant 0 : index
    %c0_50 = arith.constant 0 : index
    %c0_51 = arith.constant 0 : index
    %108 = vector.load %arg12[%c0_49, %c0_50, %c0_51] : memref<2x1x256xf32, #tpu.memory_space<vmem>>, vector<1x1x256xf32>
    %109 = vector.shape_cast %108 : vector<1x1x256xf32> to vector<1x256xf32>
    %110 = vector.broadcast %109 : vector<1x256xf32> to vector<32x256xf32>
    %111 = arith.addf %107, %110 : vector<32x256xf32>
    %112 = arith.mulf %111, %111 : vector<32x256xf32>
    %113 = arith.mulf %111, %112 : vector<32x256xf32>
    %cst_52 = arith.constant 4.471500e-02 : f32
    %114 = vector.broadcast %cst_52 : f32 to vector<32x256xf32>
    %115 = arith.mulf %114, %113 : vector<32x256xf32>
    %116 = arith.addf %111, %115 : vector<32x256xf32>
    %cst_53 = arith.constant 0.797884583 : f32
    %117 = vector.broadcast %cst_53 : f32 to vector<32x256xf32>
    %118 = arith.mulf %117, %116 : vector<32x256xf32>
    %119 = math.tanh %118 : vector<32x256xf32>
    %cst_54 = arith.constant 1.000000e+00 : f32
    %120 = vector.broadcast %cst_54 : f32 to vector<32x256xf32>
    %121 = arith.addf %120, %119 : vector<32x256xf32>
    %cst_55 = arith.constant 5.000000e-01 : f32
    %122 = vector.broadcast %cst_55 : f32 to vector<32x256xf32>
    %123 = arith.mulf %122, %121 : vector<32x256xf32>
    %124 = arith.mulf %111, %123 : vector<32x256xf32>
    %125 = arith.truncf %124 : vector<32x256xf32> to vector<32x256xbf16>
    %c0_56 = arith.constant 0 : index
    %c0_57 = arith.constant 0 : index
    %c0_58 = arith.constant 0 : index
    %126 = vector.load %arg13[%c0_56, %c0_57, %c0_58] : memref<2x256x128xbf16, #tpu.memory_space<vmem>>, vector<1x256x128xbf16>
    %127 = vector.shape_cast %126 : vector<1x256x128xbf16> to vector<256x128xbf16>
    %cst_59 = arith.constant dense<0.000000e+00> : vector<32x128xf32>
    %128 = tpu.matmul %125, %127, %cst_59 {dimension_numbers = #tpu.dot_dimension_numbers<[1], [0], [0], [1], [0, 0, 1, 1], [], []>} : vector<32x256xbf16>, vector<256x128xbf16>, vector<32x128xf32> -> vector<32x128xf32>
    %c0_60 = arith.constant 0 : index
    %c0_61 = arith.constant 0 : index
    %c0_62 = arith.constant 0 : index
    %129 = vector.load %arg14[%c0_60, %c0_61, %c0_62] : memref<2x1x128xf32, #tpu.memory_space<vmem>>, vector<1x1x128xf32>
    %130 = vector.shape_cast %129 : vector<1x1x128xf32> to vector<1x128xf32>
    %131 = vector.broadcast %130 : vector<1x128xf32> to vector<32x128xf32>
    %132 = arith.addf %128, %131 : vector<32x128xf32>
    %133 = arith.addf %77, %132 : vector<32x128xf32>
    %c1 = arith.constant 1 : index
    %c0_63 = arith.constant 0 : index
    %c0_64 = arith.constant 0 : index
    %134 = vector.load %arg3[%c1, %c0_63, %c0_64] : memref<2x1x128xf32, #tpu.memory_space<vmem>>, vector<1x1x128xf32>
    %135 = vector.shape_cast %134 : vector<1x1x128xf32> to vector<1x128xf32>
    %c1_65 = arith.constant 1 : index
    %c0_66 = arith.constant 0 : index
    %c0_67 = arith.constant 0 : index
    %136 = vector.load %arg4[%c1_65, %c0_66, %c0_67] : memref<2x1x128xf32, #tpu.memory_space<vmem>>, vector<1x1x128xf32>
    %137 = vector.shape_cast %136 : vector<1x1x128xf32> to vector<1x128xf32>
    %cst_68 = arith.constant dense<0.000000e+00> : vector<32xf32>
    %138 = vector.multi_reduction <add>, %133, %cst_68 [1] : vector<32x128xf32> to vector<32xf32>
    %139 = vector.shape_cast %138 : vector<32xf32> to vector<32x1xf32>
    %cst_69 = arith.constant 1.280000e+02 : f32
    %140 = vector.broadcast %cst_69 : f32 to vector<32x1xf32>
    %141 = arith.divf %139, %140 : vector<32x1xf32>
    %142 = vector.broadcast %141 : vector<32x1xf32> to vector<32x128xf32>
    %143 = arith.subf %133, %142 : vector<32x128xf32>
    %144 = arith.mulf %143, %143 : vector<32x128xf32>
    %cst_70 = arith.constant dense<0.000000e+00> : vector<32xf32>
    %145 = vector.multi_reduction <add>, %144, %cst_70 [1] : vector<32x128xf32> to vector<32xf32>
    %146 = vector.shape_cast %145 : vector<32xf32> to vector<32x1xf32>
    %cst_71 = arith.constant 1.280000e+02 : f32
    %147 = vector.broadcast %cst_71 : f32 to vector<32x1xf32>
    %148 = arith.divf %146, %147 : vector<32x1xf32>
    %149 = vector.broadcast %141 : vector<32x1xf32> to vector<32x128xf32>
    %150 = arith.subf %133, %149 : vector<32x128xf32>
    %cst_72 = arith.constant 9.99999997E-7 : f32
    %151 = vector.broadcast %cst_72 : f32 to vector<32x1xf32>
    %152 = arith.addf %148, %151 : vector<32x1xf32>
    %153 = math.rsqrt %152 : vector<32x1xf32>
    %154 = vector.broadcast %153 : vector<32x1xf32> to vector<32x128xf32>
    %155 = arith.mulf %150, %154 : vector<32x128xf32>
    %156 = vector.broadcast %135 : vector<1x128xf32> to vector<32x128xf32>
    %157 = arith.mulf %155, %156 : vector<32x128xf32>
    %158 = vector.broadcast %137 : vector<1x128xf32> to vector<32x128xf32>
    %159 = arith.addf %157, %158 : vector<32x128xf32>
    %160 = arith.truncf %159 : vector<32x128xf32> to vector<32x128xbf16>
    %c1_73 = arith.constant 1 : index
    %c0_74 = arith.constant 0 : index
    %c0_75 = arith.constant 0 : index
    %161 = vector.load %arg5[%c1_73, %c0_74, %c0_75] : memref<2x128x384xbf16, #tpu.memory_space<vmem>>, vector<1x128x384xbf16>
    %162 = vector.shape_cast %161 : vector<1x128x384xbf16> to vector<128x384xbf16>
    %cst_76 = arith.constant dense<0.000000e+00> : vector<32x384xf32>
    %163 = tpu.matmul %160, %162, %cst_76 {dimension_numbers = #tpu.dot_dimension_numbers<[1], [0], [0], [1], [0, 0, 1, 1], [], []>} : vector<32x128xbf16>, vector<128x384xbf16>, vector<32x384xf32> -> vector<32x384xf32>
    %c1_77 = arith.constant 1 : index
    %c0_78 = arith.constant 0 : index
    %c0_79 = arith.constant 0 : index
    %164 = vector.load %arg6[%c1_77, %c0_78, %c0_79] : memref<2x1x384xf32, #tpu.memory_space<vmem>>, vector<1x1x384xf32>
    %165 = vector.shape_cast %164 : vector<1x1x384xf32> to vector<1x384xf32>
    %166 = vector.broadcast %165 : vector<1x384xf32> to vector<32x384xf32>
    %167 = arith.addf %163, %166 : vector<32x384xf32>
    %168 = vector.extract_strided_slice %167 {offsets = [0, 0], sizes = [32, 128], strides = [1, 1]} : vector<32x384xf32> to vector<32x128xf32>
    %169 = vector.extract_strided_slice %167 {offsets = [0, 128], sizes = [32, 128], strides = [1, 1]} : vector<32x384xf32> to vector<32x128xf32>
    %170 = vector.extract_strided_slice %167 {offsets = [0, 256], sizes = [32, 128], strides = [1, 1]} : vector<32x384xf32> to vector<32x128xf32>
    %171 = vector.shape_cast %168 : vector<32x128xf32> to vector<2x16x4x32xf32>
    %172 = tpu.transpose %171, [0, 2, 1, 3] : vector<2x16x4x32xf32> -> vector<2x4x16x32xf32>
    %173 = vector.shape_cast %172 : vector<2x4x16x32xf32> to vector<8x16x32xf32>
    %174 = arith.truncf %173 : vector<8x16x32xf32> to vector<8x16x32xbf16>
    %175 = vector.shape_cast %169 : vector<32x128xf32> to vector<2x16x4x32xf32>
    %176 = tpu.transpose %175, [0, 2, 1, 3] : vector<2x16x4x32xf32> -> vector<2x4x16x32xf32>
    %177 = vector.shape_cast %176 : vector<2x4x16x32xf32> to vector<8x16x32xf32>
    %178 = arith.truncf %177 : vector<8x16x32xf32> to vector<8x16x32xbf16>
    %179 = vector.shape_cast %170 : vector<32x128xf32> to vector<2x16x4x32xf32>
    %180 = tpu.transpose %179, [0, 2, 1, 3] : vector<2x16x4x32xf32> -> vector<2x4x16x32xf32>
    %181 = vector.shape_cast %180 : vector<2x4x16x32xf32> to vector<8x16x32xf32>
    %182 = arith.truncf %181 : vector<8x16x32xf32> to vector<8x16x32xbf16>
    "tpu.trace_start"() <{level = 10 : i32, message = "nqd,nkd->nqk"}> : () -> ()
    %cst_80 = arith.constant dense<0.000000e+00> : vector<8x16x16xf32>
    %183 = tpu.matmul %174, %178, %cst_80 {dimension_numbers = #tpu.dot_dimension_numbers<[2], [2], [1], [1], [0, 0, 0, 1, 1, 1], [0], [0]>} : vector<8x16x32xbf16>, vector<8x16x32xbf16>, vector<8x16x16xf32> -> vector<8x16x16xf32>
    "tpu.trace_stop"() : () -> ()
    %cst_81 = arith.constant dense<0xFF800000> : vector<8x16xf32>
    %184 = vector.multi_reduction <maximumf>, %183, %cst_81 [2] : vector<8x16x16xf32> to vector<8x16xf32>
    %185 = vector.shape_cast %184 : vector<8x16xf32> to vector<8x16x1xf32>
    %186 = vector.broadcast %185 : vector<8x16x1xf32> to vector<8x16x16xf32>
    %187 = arith.subf %183, %186 : vector<8x16x16xf32>
    %188 = math.exp %187 : vector<8x16x16xf32>
    %cst_82 = arith.constant dense<0.000000e+00> : vector<8x16xf32>
    %189 = vector.multi_reduction <add>, %188, %cst_82 [2] : vector<8x16x16xf32> to vector<8x16xf32>
    %190 = vector.shape_cast %189 : vector<8x16xf32> to vector<8x16x1xf32>
    %191 = vector.broadcast %190 : vector<8x16x1xf32> to vector<8x16x16xf32>
    %192 = arith.divf %188, %191 : vector<8x16x16xf32>
    %193 = arith.truncf %192 : vector<8x16x16xf32> to vector<8x16x16xbf16>
    "tpu.trace_start"() <{level = 10 : i32, message = "nqk,nkd->nqd"}> : () -> ()
    %cst_83 = arith.constant dense<0.000000e+00> : vector<8x16x32xf32>
    %194 = tpu.matmul %193, %182, %cst_83 {dimension_numbers = #tpu.dot_dimension_numbers<[2], [1], [1], [2], [0, 0, 0, 1, 1, 2], [0], [0]>} : vector<8x16x16xbf16>, vector<8x16x32xbf16>, vector<8x16x32xf32> -> vector<8x16x32xf32>
    "tpu.trace_stop"() : () -> ()
    %195 = vector.shape_cast %194 : vector<8x16x32xf32> to vector<2x4x16x32xf32>
    %196 = tpu.transpose %195, [0, 2, 1, 3] : vector<2x4x16x32xf32> -> vector<2x16x4x32xf32>
    %197 = vector.shape_cast %196 : vector<2x16x4x32xf32> to vector<32x128xf32>
    %198 = arith.truncf %197 : vector<32x128xf32> to vector<32x128xbf16>
    %c1_84 = arith.constant 1 : index
    %c0_85 = arith.constant 0 : index
    %c0_86 = arith.constant 0 : index
    %199 = vector.load %arg7[%c1_84, %c0_85, %c0_86] : memref<2x128x128xbf16, #tpu.memory_space<vmem>>, vector<1x128x128xbf16>
    %200 = vector.shape_cast %199 : vector<1x128x128xbf16> to vector<128x128xbf16>
    %cst_87 = arith.constant dense<0.000000e+00> : vector<32x128xf32>
    %201 = tpu.matmul %198, %200, %cst_87 {dimension_numbers = #tpu.dot_dimension_numbers<[1], [0], [0], [1], [0, 0, 1, 1], [], []>} : vector<32x128xbf16>, vector<128x128xbf16>, vector<32x128xf32> -> vector<32x128xf32>
    %c1_88 = arith.constant 1 : index
    %c0_89 = arith.constant 0 : index
    %c0_90 = arith.constant 0 : index
    %202 = vector.load %arg8[%c1_88, %c0_89, %c0_90] : memref<2x1x128xf32, #tpu.memory_space<vmem>>, vector<1x1x128xf32>
    %203 = vector.shape_cast %202 : vector<1x1x128xf32> to vector<1x128xf32>
    %204 = vector.broadcast %203 : vector<1x128xf32> to vector<32x128xf32>
    %205 = arith.addf %201, %204 : vector<32x128xf32>
    %206 = arith.addf %133, %205 : vector<32x128xf32>
    %c1_91 = arith.constant 1 : index
    %c0_92 = arith.constant 0 : index
    %c0_93 = arith.constant 0 : index
    %207 = vector.load %arg9[%c1_91, %c0_92, %c0_93] : memref<2x1x128xf32, #tpu.memory_space<vmem>>, vector<1x1x128xf32>
    %208 = vector.shape_cast %207 : vector<1x1x128xf32> to vector<1x128xf32>
    %c1_94 = arith.constant 1 : index
    %c0_95 = arith.constant 0 : index
    %c0_96 = arith.constant 0 : index
    %209 = vector.load %arg10[%c1_94, %c0_95, %c0_96] : memref<2x1x128xf32, #tpu.memory_space<vmem>>, vector<1x1x128xf32>
    %210 = vector.shape_cast %209 : vector<1x1x128xf32> to vector<1x128xf32>
    %cst_97 = arith.constant dense<0.000000e+00> : vector<32xf32>
    %211 = vector.multi_reduction <add>, %206, %cst_97 [1] : vector<32x128xf32> to vector<32xf32>
    %212 = vector.shape_cast %211 : vector<32xf32> to vector<32x1xf32>
    %cst_98 = arith.constant 1.280000e+02 : f32
    %213 = vector.broadcast %cst_98 : f32 to vector<32x1xf32>
    %214 = arith.divf %212, %213 : vector<32x1xf32>
    %215 = vector.broadcast %214 : vector<32x1xf32> to vector<32x128xf32>
    %216 = arith.subf %206, %215 : vector<32x128xf32>
    %217 = arith.mulf %216, %216 : vector<32x128xf32>
    %cst_99 = arith.constant dense<0.000000e+00> : vector<32xf32>
    %218 = vector.multi_reduction <add>, %217, %cst_99 [1] : vector<32x128xf32> to vector<32xf32>
    %219 = vector.shape_cast %218 : vector<32xf32> to vector<32x1xf32>
    %cst_100 = arith.constant 1.280000e+02 : f32
    %220 = vector.broadcast %cst_100 : f32 to vector<32x1xf32>
    %221 = arith.divf %219, %220 : vector<32x1xf32>
    %222 = vector.broadcast %214 : vector<32x1xf32> to vector<32x128xf32>
    %223 = arith.subf %206, %222 : vector<32x128xf32>
    %cst_101 = arith.constant 9.99999997E-7 : f32
    %224 = vector.broadcast %cst_101 : f32 to vector<32x1xf32>
    %225 = arith.addf %221, %224 : vector<32x1xf32>
    %226 = math.rsqrt %225 : vector<32x1xf32>
    %227 = vector.broadcast %226 : vector<32x1xf32> to vector<32x128xf32>
    %228 = arith.mulf %223, %227 : vector<32x128xf32>
    %229 = vector.broadcast %208 : vector<1x128xf32> to vector<32x128xf32>
    %230 = arith.mulf %228, %229 : vector<32x128xf32>
    %231 = vector.broadcast %210 : vector<1x128xf32> to vector<32x128xf32>
    %232 = arith.addf %230, %231 : vector<32x128xf32>
    %233 = arith.truncf %232 : vector<32x128xf32> to vector<32x128xbf16>
    %c1_102 = arith.constant 1 : index
    %c0_103 = arith.constant 0 : index
    %c0_104 = arith.constant 0 : index
    %234 = vector.load %arg11[%c1_102, %c0_103, %c0_104] : memref<2x128x256xbf16, #tpu.memory_space<vmem>>, vector<1x128x256xbf16>
    %235 = vector.shape_cast %234 : vector<1x128x256xbf16> to vector<128x256xbf16>
    %cst_105 = arith.constant dense<0.000000e+00> : vector<32x256xf32>
    %236 = tpu.matmul %233, %235, %cst_105 {dimension_numbers = #tpu.dot_dimension_numbers<[1], [0], [0], [1], [0, 0, 1, 1], [], []>} : vector<32x128xbf16>, vector<128x256xbf16>, vector<32x256xf32> -> vector<32x256xf32>
    %c1_106 = arith.constant 1 : index
    %c0_107 = arith.constant 0 : index
    %c0_108 = arith.constant 0 : index
    %237 = vector.load %arg12[%c1_106, %c0_107, %c0_108] : memref<2x1x256xf32, #tpu.memory_space<vmem>>, vector<1x1x256xf32>
    %238 = vector.shape_cast %237 : vector<1x1x256xf32> to vector<1x256xf32>
    %239 = vector.broadcast %238 : vector<1x256xf32> to vector<32x256xf32>
    %240 = arith.addf %236, %239 : vector<32x256xf32>
    %241 = arith.mulf %240, %240 : vector<32x256xf32>
    %242 = arith.mulf %240, %241 : vector<32x256xf32>
    %cst_109 = arith.constant 4.471500e-02 : f32
    %243 = vector.broadcast %cst_109 : f32 to vector<32x256xf32>
    %244 = arith.mulf %243, %242 : vector<32x256xf32>
    %245 = arith.addf %240, %244 : vector<32x256xf32>
    %cst_110 = arith.constant 0.797884583 : f32
    %246 = vector.broadcast %cst_110 : f32 to vector<32x256xf32>
    %247 = arith.mulf %246, %245 : vector<32x256xf32>
    %248 = math.tanh %247 : vector<32x256xf32>
    %cst_111 = arith.constant 1.000000e+00 : f32
    %249 = vector.broadcast %cst_111 : f32 to vector<32x256xf32>
    %250 = arith.addf %249, %248 : vector<32x256xf32>
    %cst_112 = arith.constant 5.000000e-01 : f32
    %251 = vector.broadcast %cst_112 : f32 to vector<32x256xf32>
    %252 = arith.mulf %251, %250 : vector<32x256xf32>
    %253 = arith.mulf %240, %252 : vector<32x256xf32>
    %254 = arith.truncf %253 : vector<32x256xf32> to vector<32x256xbf16>
    %c1_113 = arith.constant 1 : index
    %c0_114 = arith.constant 0 : index
    %c0_115 = arith.constant 0 : index
    %255 = vector.load %arg13[%c1_113, %c0_114, %c0_115] : memref<2x256x128xbf16, #tpu.memory_space<vmem>>, vector<1x256x128xbf16>
    %256 = vector.shape_cast %255 : vector<1x256x128xbf16> to vector<256x128xbf16>
    %cst_116 = arith.constant dense<0.000000e+00> : vector<32x128xf32>
    %257 = tpu.matmul %254, %256, %cst_116 {dimension_numbers = #tpu.dot_dimension_numbers<[1], [0], [0], [1], [0, 0, 1, 1], [], []>} : vector<32x256xbf16>, vector<256x128xbf16>, vector<32x128xf32> -> vector<32x128xf32>
    %c1_117 = arith.constant 1 : index
    %c0_118 = arith.constant 0 : index
    %c0_119 = arith.constant 0 : index
    %258 = vector.load %arg14[%c1_117, %c0_118, %c0_119] : memref<2x1x128xf32, #tpu.memory_space<vmem>>, vector<1x1x128xf32>
    %259 = vector.shape_cast %258 : vector<1x1x128xf32> to vector<1x128xf32>
    %260 = vector.broadcast %259 : vector<1x128xf32> to vector<32x128xf32>
    %261 = arith.addf %257, %260 : vector<32x128xf32>
    %262 = arith.addf %206, %261 : vector<32x128xf32>
    %c0_120 = arith.constant 0 : index
    %c0_121 = arith.constant 0 : index
    %263 = vector.load %arg15[%c0_120, %c0_121] : memref<1x128xf32, #tpu.memory_space<vmem>>, vector<1x128xf32>
    %c0_122 = arith.constant 0 : index
    %c0_123 = arith.constant 0 : index
    %264 = vector.load %arg16[%c0_122, %c0_123] : memref<1x128xf32, #tpu.memory_space<vmem>>, vector<1x128xf32>
    %cst_124 = arith.constant dense<0.000000e+00> : vector<32xf32>
    %265 = vector.multi_reduction <add>, %262, %cst_124 [1] : vector<32x128xf32> to vector<32xf32>
    %266 = vector.shape_cast %265 : vector<32xf32> to vector<32x1xf32>
    %cst_125 = arith.constant 1.280000e+02 : f32
    %267 = vector.broadcast %cst_125 : f32 to vector<32x1xf32>
    %268 = arith.divf %266, %267 : vector<32x1xf32>
    %269 = vector.broadcast %268 : vector<32x1xf32> to vector<32x128xf32>
    %270 = arith.subf %262, %269 : vector<32x128xf32>
    %271 = arith.mulf %270, %270 : vector<32x128xf32>
    %cst_126 = arith.constant dense<0.000000e+00> : vector<32xf32>
    %272 = vector.multi_reduction <add>, %271, %cst_126 [1] : vector<32x128xf32> to vector<32xf32>
    %273 = vector.shape_cast %272 : vector<32xf32> to vector<32x1xf32>
    %cst_127 = arith.constant 1.280000e+02 : f32
    %274 = vector.broadcast %cst_127 : f32 to vector<32x1xf32>
    %275 = arith.divf %273, %274 : vector<32x1xf32>
    %276 = vector.broadcast %268 : vector<32x1xf32> to vector<32x128xf32>
    %277 = arith.subf %262, %276 : vector<32x128xf32>
    %cst_128 = arith.constant 9.99999997E-7 : f32
    %278 = vector.broadcast %cst_128 : f32 to vector<32x1xf32>
    %279 = arith.addf %275, %278 : vector<32x1xf32>
    %280 = math.rsqrt %279 : vector<32x1xf32>
    %281 = vector.broadcast %280 : vector<32x1xf32> to vector<32x128xf32>
    %282 = arith.mulf %277, %281 : vector<32x128xf32>
    %283 = vector.broadcast %263 : vector<1x128xf32> to vector<32x128xf32>
    %284 = arith.mulf %282, %283 : vector<32x128xf32>
    %285 = vector.broadcast %264 : vector<1x128xf32> to vector<32x128xf32>
    %286 = arith.addf %284, %285 : vector<32x128xf32>
    %c0_129 = arith.constant 0 : index
    %c0_130 = arith.constant 0 : index
    %287 = vector.load %arg17[%c0_129, %c0_130] : memref<32x128xf32, #tpu.memory_space<vmem>>, vector<32x128xf32>
    tpu.vector_store %arg17[%c0_129, %c0_130], %286 {strides = array<i32>} : memref<32x128xf32, #tpu.memory_space<vmem>>, vector<32x128xf32>,
    return
  }
}

</mosaic_0001>

<bundles_post_ra>
// kernel: siglip_vision_transformer.1
= control target key start
LH: loop header
LB: loop body
LE: loop exit
PB: predicated region body
PF: predicated region fallthrough
CT: control target
= control target key end

     0   :  { %s13500_s0 = inlined_call_operand.vmem [shape: bf16[32,256], index: 0, kind: input, shape index: {}]   ;;  %s13501_s1 = inlined_call_operand.vmem [shape: bf16[256,128], index: 1, kind: input, shape index: {}]   ;;  %s13502_s2 = inlined_call_operand.vmem [shape: f32[32,128], index: 2, kind: input, shape index: {}]   ;;  %s13503_s3 = inlined_call_operand.vmem [shape: f32[2,1,128], index: 3, kind: input, shape index: {}]   ;;  %s13504_s4 = inlined_call_operand.vmem [shape: f32[2,1,128], index: 4, kind: input, shape index: {}]   ;;  %s13505_s5 = inlined_call_operand.vmem [shape: bf16[2,128,384], index: 5, kind: input, shape index: {}]   ;;  %s13506_s6 = inlined_call_operand.vmem [shape: f32[2,1,384], index: 6, kind: input, shape index: {}]   ;;  %s13507_s7 = inlined_call_operand.vmem [shape: bf16[2,128,128], index: 7, kind: input, shape index: {}]   ;;  %s13508_s8 = inlined_call_operand.vmem [shape: f32[2,1,128], index: 8, kind: input, shape index: {}]   ;;  %s13509_s9 = inlined_call_operand.vmem [shape: f32[2,1,128], index: 9, kind: input, shape index: {}]   ;;  %s13510_s10 = inlined_call_operand.vmem [shape: f32[2,1,128], index: 10, kind: input, shape index: {}]   ;;  %s13511_s11 = inlined_call_operand.vmem [shape: bf16[2,128,256], index: 11, kind: input, shape index: {}]   ;;  %s13512_s12 = inlined_call_operand.vmem [shape: f32[2,1,256], index: 12, kind: input, shape index: {}]   ;;  %s13513_s13 = inlined_call_operand.vmem [shape: bf16[2,256,128], index: 13, kind: input, shape index: {}]   ;;  %s13514_s14 = inlined_call_operand.vmem [shape: f32[2,1,128], index: 14, kind: input, shape index: {}]   ;;  %s13515_s15 = inlined_call_operand.vmem [shape: f32[1,128], index: 15, kind: input, shape index: {}]   ;;  %s13516_s16 = inlined_call_operand.vmem [shape: f32[1,128], index: 16, kind: input, shape index: {}]   ;;  %s13517_s17 = inlined_call_operand.hbm [shape: f32[32,128], index: 17, kind: output, shape index: {}]  }
   0x1   :  { %13547 = sst [smem:[#allocation21_spill]] %s13500_s0 }
   0x2   :  { %13548 = sst [smem:[#allocation22_spill]] %s13501_s1 }
   0x3   :  { %s13549_s26 = sld [smem:[#allocation22_spill]] }
   0x9   :  { %v8645_v0 = vld [vmem:[%s13549_s26 + $0x38] sm:$0xff]  ;;  %v8644_v2 = vld [vmem:[%s13549_s26 + $0x30] sm:$0xff]  ;;  %v8643_v4 = vld [vmem:[%s13549_s26 + $0x28] sm:$0xff] }
   0xa   :  { %v8653_v1 = vld [vmem:[%s13549_s26 + $0x78] sm:$0xff]  ;;  %214 = vmatpush.bf16.msra.mxu0 %v8645_v0  ;;  %v8652_v3 = vld [vmem:[%s13549_s26 + $0x70] sm:$0xff]  ;;  %v8651_v5 = vld [vmem:[%s13549_s26 + $0x68] sm:$0xff] }
   0xb   :  { %233 = vmatpush.bf16.msra.mxu1 %v8653_v1  ;;  %v8642_v6 = vld [vmem:[%s13549_s26 + $0x20] sm:$0xff] }
   0xc   :  { %v8650_v7 = vld [vmem:[%s13549_s26 + $0x60] sm:$0xff] }
   0xe   :  { %215 = vmatpush.bf16.msra.mxu0 %v8644_v2 }
   0xf   :  { %234 = vmatpush.bf16.msra.mxu1 %v8652_v3 }
  0x12   :  { %216 = vmatpush.bf16.msra.mxu0 %v8643_v4 }
  0x13   :  { %235 = vmatpush.bf16.msra.mxu1 %v8651_v5 }
  0x14   :  { %22 = vsyncpa [#allocation3], 0  ;;  %v8641_v8 = vld [vmem:[%s13549_s26 + $0x18] sm:$0xff]  ;;  %v8640_v10 = vld [vmem:[%s13549_s26 + $0x10] sm:$0xff]  ;;  %s13550_s30 = sld [smem:[#allocation21_spill]]  ;;  %v9273_v48 = vmov 128.0  }
  0x15   :  { %v8649_v9 = vld [vmem:[%s13549_s26 + $0x58] sm:$0xff]  ;;  %v8648_v11 = vld [vmem:[%s13549_s26 + $0x50] sm:$0xff]  ;;  %v8639_v12 = vld [vmem:[%s13549_s26 + $0x8] sm:$0xff]  ;;  %9045 = vrcp.f32 %v9273_v48  ;;  %s9274_s29 = smov 96   ;;  %s9275_s0 = smov 32   ;;  %vm623_vm13 = vcmask 1047556  }
  0x16   :  { %217 = vmatpush.bf16.msra.mxu0 %v8642_v6  ;;  %v8647_v13 = vld [vmem:[%s13549_s26 + $0x48] sm:$0xff]  ;;  %v8638_v14 = vld [vmem:[%s13549_s26] sm:$0xff]  ;;  %v96_v38 = vld [vmem:[%s13502_s2 + $0x10] sm:$0xff]  ;;  %s9276_s18 = smov 64   ;;  %vm2081_vm14 = vcmask 261120   ;;  %vm2312_vm15 = vcmask 130048  }
  0x17   :  { %236 = vmatpush.bf16.msra.mxu1 %v8650_v7  ;;  %v8646_v15 = vld [vmem:[%s13549_s26 + $0x40] sm:$0xff]  ;;  %v95_v33 = vld [vmem:[%s13502_s2 + $0x8] sm:$0xff]  ;;  %v97_v43 = vld [vmem:[%s13502_s2 + $0x18] sm:$0xff]  ;;  %s9280_s23 = smov 128   ;;  %s9281_s24 = smov 8  }
  0x18   :  { %v94_v28 = vld [vmem:[%s13502_s2] sm:$0xff]  ;;  %v8072_v7 = vld [vmem:[%s13505_s5 + $0xa8] sm:$0xf]  ;;  %v8664_v48 = vld [vmem:[%s13505_s5 + $0x50] sm:$0xf0] }
  0x1a   :  { %218 = vmatpush.bf16.msra.mxu0 %v8641_v8  ;;  %v7908_v16 = vld [vmem:[%s13550_s30] sm:$0xf]  ;;  %v8635_v17 = vld [vmem:[%s13550_s30 + $0x4] sm:$0xf0]  ;;  %v8634_v18 = vld [vmem:[%s13550_s30 + $0x4] sm:$0xf] }
  0x1b   :  { %237 = vmatpush.bf16.msra.mxu1 %v8649_v9  ;;  %v7910_v19 = vld [vmem:[%s13550_s30 + $0x8] sm:$0xf0]  ;;  %v7909_v20 = vor.u32 %v8635_v17, %v7908_v16  ;;  %v7916_v22 = vld [vmem:[%s13550_s30 + $0x10] sm:$0xf]  ;;  %v8637_v23 = vld [vmem:[%s13550_s30 + $0x14] sm:$0xf0]  ;;  %v9046_v49 = vpop.eup %9045 }
  0x1c   :  { %v7913_v21 = vor.u32 %v8634_v18, %v7910_v19  ;;  %v8636_v24 = vld [vmem:[%s13550_s30 + $0x14] sm:$0xf]  ;;  %v7918_v25 = vld [vmem:[%s13550_s30 + $0x18] sm:$0xf0]  ;;  %v7917_v26 = vor.u32 %v8637_v23, %v7916_v22  ;;  %v263_v50 = vmul.f32 128.0, %v9046_v49  ;;  %vm267_vm0 = vweird.f32 %v9046_v49 }
  0x1d   :  { %v7921_v27 = vor.u32 %v8636_v24, %v7918_v25  ;;  %v8676_v8 = vld [vmem:[%s13505_s5 + $0xb0] sm:$0xf0]  ;;  %v8675_v9 = vld [vmem:[%s13505_s5 + $0xac] sm:$0xf]  ;;  %v8060_v16 = vld [vmem:[%s13505_s5 + $0x90] sm:$0xf] }
  0x1e   :  { %219 = vmatpush.bf16.msra.mxu0 %v8640_v10  ;;  %v264_v51 = vsub.f32 1.0, %v263_v50  ;;  %v8073_v10 = vor.u32 %v8676_v8, %v8072_v7  ;;  %v8673_v17 = vld [vmem:[%s13505_s5 + $0x98] sm:$0xf0]  ;;  %v8672_v18 = vld [vmem:[%s13505_s5 + $0x94] sm:$0xf] }
  0x1f   :  { %238 = vmatpush.bf16.msra.mxu1 %v8648_v11  ;;  %v8074_v11 = vld [vmem:[%s13505_s5 + $0xb4] sm:$0xf0]  ;;  %v8061_v19 = vor.u32 %v8673_v17, %v8060_v16  ;;  %v8674_v22 = vld [vmem:[%s13505_s5 + $0xa0] sm:$0xf0]  ;;  %v8657_v8 = vld [vmem:[%s13505_s5 + $0x1c] sm:$0xf] }
  0x20   :  { %v265_v52 = vmul.f32 %v9046_v49, %v264_v51  ;;  %525 = vmatpush.bf16.msra.mxu2 %v8073_v10  ;;  %v8048_v25 = vld [vmem:[%s13505_s5 + $0x78] sm:$0xf]  ;;  %v8658_v7 = vld [vmem:[%s13505_s5 + $0x20] sm:$0xf0]  ;;  %v8002_v10 = vld [vmem:[%s13505_s5 + $0x24] sm:$0xf0] }
  0x21   :  { %v8026_v51 = vld [vmem:[%s13505_s5 + $0x54] sm:$0xf0]  ;;  %v7988_v17 = vld [vmem:[%s13505_s5] sm:$0xf] }
  0x22   :  { %220 = vmatpush.bf16.msra.mxu0 %v8639_v12  ;;  %v266_v53 = vadd.f32 %v9046_v49, %v265_v52  ;;  %v8080_v12 = vld [vmem:[%s13505_s5 + $0xb0] sm:$0xf] }
  0x23   :  { %239 = vmatpush.bf16.msra.mxu1 %v8647_v13  ;;  %v8677_v13 = vld [vmem:[%s13505_s5 + $0xb8] sm:$0xf0]  ;;  %v8032_v52 = vld [vmem:[%s13505_s5 + $0x50] sm:$0xf] }
  0x24   :  { %v9468_v54 = vsel %vm267_vm0, %v9046_v49, %v266_v53  ;;  %526 = vmatpush.bf16.msra.mxu2 %v8061_v19  ;;  %v8663_v49 = vld [vmem:[%s13505_s5 + $0x4c] sm:$0xf]  ;;  %v8665_v53 = vld [vmem:[%s13505_s5 + $0x58] sm:$0xf0]  ;;  %v8654_v19 = vld [vmem:[%s13505_s5 + $0x4] sm:$0xf] }
  0x25   :  { %13555 = vst [vmem:[#allocation9_spill] sm:$0xff] %v9468_v54 }
  0x26   :  { %221 = vmatpush.bf16.msra.mxu0 %v8638_v14  ;;  %v8077_v14 = vor.u32 %v8675_v9, %v8074_v11  ;;  %v8008_v11 = vld [vmem:[%s13505_s5 + $0x20] sm:$0xf] }
  0x27   :  { %240 = vmatpush.bf16.msra.mxu1 %v8646_v15  ;;  %v8081_v15 = vor.u32 %v8677_v13, %v8080_v12  ;;  %v8659_v12 = vld [vmem:[%s13505_s5 + $0x28] sm:$0xf0]  ;;  %v8005_v13 = vor.u32 %v8657_v8, %v8002_v10 }
  0x28   :  { %544 = vmatpush.bf16.msra.mxu3 %v8077_v14  ;;  %v8009_v14 = vor.u32 %v8659_v12, %v8008_v11 }
  0x29   :  { %222 = vmatmul.bf16.vlgmr.msra.gmra.mxu0 %v7909_v20  ;;  %v8062_v20 = vld [vmem:[%s13505_s5 + $0x9c] sm:$0xf0] }
  0x2a   :  { %241 = vmatmul.bf16.vlgmr.msra.gmra.mxu1 %v7913_v21  ;;  %563 = vmatpush.bf16.msrb.mxu0 %v8081_v15  ;;  %v8068_v21 = vld [vmem:[%s13505_s5 + $0x98] sm:$0xf]  ;;  %v8065_v23 = vor.u32 %v8672_v18, %v8062_v20  ;;  %v8655_v18 = vld [vmem:[%s13505_s5 + $0x8] sm:$0xf0] }
  0x2b   :  { %v8069_v24 = vor.u32 %v8674_v22, %v8068_v21  ;;  %v7989_v20 = vor.u32 %v8655_v18, %v7988_v17  ;;  %v7990_v21 = vld [vmem:[%s13505_s5 + $0xc] sm:$0xf0]  ;;  %v7996_v22 = vld [vmem:[%s13505_s5 + $0x8] sm:$0xf] }
  0x2c   :  { %545 = vmatpush.bf16.msra.mxu3 %v8065_v23  ;;  %v8656_v23 = vld [vmem:[%s13505_s5 + $0x10] sm:$0xf0] }
  0x2e   :  { %564 = vmatpush.bf16.msrb.mxu0 %v8069_v24 }
  0x39   :  { %227 = vmatmul.bf16.gmra.mxu0 %v7917_v26  ;;  %v8670_v26 = vld [vmem:[%s13505_s5 + $0x80] sm:$0xf0] }
  0x3a   :  { %246 = vmatmul.bf16.gmra.mxu1 %v7921_v27  ;;  %v8669_v27 = vld [vmem:[%s13505_s5 + $0x7c] sm:$0xf] }
  0xa6   :  { %v223_v29 = vpop.f32.mrf.mxu0 }
  0xa7   :  { %v242_v30 = vpop.f32.mrf.mxu1  ;;  %v224_v31 = vadd.f32 %v223_v29, %v94_v28  ;;  %v8049_v28 = vor.u32 %v8670_v26, %v8048_v25  ;;  %v8050_v29 = vld [vmem:[%s13505_s5 + $0x84] sm:$0xf0]  ;;  %v7993_v25 = vor.u32 %v8654_v19, %v7990_v21  ;;  %v7997_v26 = vor.u32 %v8656_v23, %v7996_v22 }
  0xa9   :  { %v9447_v32 = vadd.f32 %v242_v30, %v224_v31  ;;  %v8056_v30 = vld [vmem:[%s13505_s5 + $0x80] sm:$0xf]  ;;  %v8671_v31 = vld [vmem:[%s13505_s5 + $0x88] sm:$0xf0]  ;;  %527 = vmatpush.bf16.msra.mxu2 %v8049_v28 }
  0xab   :  { %13551 = vst [vmem:[#allocation5_spill] sm:$0xff] %v9447_v32  ;;  %254 = vadd.xlane.f32.xlu0 %v9447_v32 }
  0xae   :  { %v225_v34 = vpop.f32.mrf.mxu0 }
  0xaf   :  { %v244_v35 = vpop.f32.mrf.mxu1  ;;  %v226_v36 = vadd.f32 %v225_v34, %v95_v33  ;;  %v8053_v33 = vor.u32 %v8669_v27, %v8050_v29  ;;  %v8057_v34 = vor.u32 %v8671_v31, %v8056_v30 }
  0xb1   :  { %v9453_v37 = vadd.f32 %v244_v35, %v226_v36  ;;  %546 = vmatpush.bf16.msra.mxu3 %v8053_v33  ;;  %565 = vmatpush.bf16.msrb.mxu0 %v8057_v34  ;;  %v8036_v35 = vld [vmem:[%s13505_s5 + $0x60] sm:$0xf]  ;;  %v8667_v36 = vld [vmem:[%s13505_s5 + $0x68] sm:$0xf0] }
  0xb3   :  { %13552 = vst [vmem:[#allocation6_spill] sm:$0xff] %v9453_v37  ;;  %256 = vadd.xlane.f32.xlu0 %v9453_v37 }
  0xb6   :  { %v228_v39 = vpop.f32.mrf.mxu0 }
  0xb7   :  { %v247_v40 = vpop.f32.mrf.mxu1  ;;  %v229_v41 = vadd.f32 %v228_v39, %v96_v38  ;;  %v8666_v38 = vld [vmem:[%s13505_s5 + $0x64] sm:$0xf]  ;;  %v8037_v39 = vor.u32 %v8667_v36, %v8036_v35 }
  0xb9   :  { %v9459_v42 = vadd.f32 %v247_v40, %v229_v41  ;;  %v8038_v40 = vld [vmem:[%s13505_s5 + $0x6c] sm:$0xf0]  ;;  %v8044_v41 = vld [vmem:[%s13505_s5 + $0x68] sm:$0xf]  ;;  %528 = vmatpush.bf16.msra.mxu2 %v8037_v39 }
  0xbb   :  { %13553 = vst [vmem:[#allocation7_spill] sm:$0xff] %v9459_v42  ;;  %258 = vadd.xlane.f32.xlu1 %v9459_v42 }
  0xbe   :  { %v230_v44 = vpop.f32.mrf.mxu0 }
  0xbf   :  { %v231_v45 = vadd.f32 %v230_v44, %v97_v43  ;;  %v249_v46 = vpop.f32.mrf.mxu1  ;;  %v8668_v43 = vld [vmem:[%s13505_s5 + $0x70] sm:$0xf0]  ;;  %v8041_v44 = vor.u32 %v8666_v38, %v8038_v40 }
  0xc1   :  { %v9465_v47 = vadd.f32 %v249_v46, %v231_v45  ;;  %v8045_v45 = vor.u32 %v8668_v43, %v8044_v41  ;;  %547 = vmatpush.bf16.msra.mxu3 %v8041_v44  ;;  %v8024_v46 = vld [vmem:[%s13505_s5 + $0x48] sm:$0xf] }
  0xc2   :  { %v8025_v50 = vor.u32 %v8664_v48, %v8024_v46 }
  0xc3   :  { %13554 = vst [vmem:[#allocation8_spill] sm:$0xff] %v9465_v47  ;;  %260 = vadd.xlane.f32.xlu1 %v9465_v47  ;;  %566 = vmatpush.bf16.msrb.mxu0 %v8045_v45 }
  0xc4   :  { %529 = vmatpush.bf16.msra.mxu2 %v8025_v50 }
 0x11e   :  { %v255_v55 = vpop.xlane.xlu0 %254 }
 0x11f   :  { %v269_v56 = vmul.f32 %v9468_v54, %v255_v55  ;;  %v8029_v55 = vor.u32 %v8663_v49, %v8026_v51 }
 0x121   :  { %v9472_v57 = vsub.f32 %v9447_v32, %v269_v56  ;;  %v8033_v56 = vor.u32 %v8665_v53, %v8032_v52  ;;  %548 = vmatpush.bf16.msra.mxu3 %v8029_v55  ;;  %v9031_v55 = vld [vmem:[%s13503_s3] ss:$0 sm:$0xff] }
 0x123   :  { %v277_v58 = vmul.f32 %v9472_v57, %v9472_v57  ;;  %567 = vmatpush.bf16.msrb.mxu0 %v8033_v56 }
 0x125   :  { %281 = vadd.xlane.f32.xlu2 %v277_v58  ;;  %v8012_v58 = vld [vmem:[%s13505_s5 + $0x30] sm:$0xf] }
 0x126   :  { %v257_v59 = vpop.xlane.xlu0 %256 }
 0x127   :  { %v270_v60 = vmul.f32 %v9468_v54, %v257_v59  ;;  %v8661_v59 = vld [vmem:[%s13505_s5 + $0x38] sm:$0xf0] }
 0x129   :  { %v9478_v61 = vsub.f32 %v9453_v37, %v270_v60  ;;  %v8660_v60 = vld [vmem:[%s13505_s5 + $0x34] sm:$0xf] }
 0x12b   :  { %v278_v62 = vmul.f32 %v9478_v61, %v9478_v61 }
 0x12d   :  { %283 = vadd.xlane.f32.xlu2 %v278_v62  ;;  %v8013_v62 = vor.u32 %v8661_v59, %v8012_v58 }
 0x12e   :  { %v259_v63 = vpop.xlane.xlu1 %258 }
 0x12f   :  { %v271_v0 = vmul.f32 %v9468_v54, %v259_v63  ;;  %v8014_v63 = vld [vmem:[%s13505_s5 + $0x3c] sm:$0xf0]  ;;  %530 = vmatpush.bf16.msra.mxu2 %v8013_v62 }
 0x131   :  { %v9484_v1 = vsub.f32 %v9459_v42, %v271_v0  ;;  %v8020_v0 = vld [vmem:[%s13505_s5 + $0x38] sm:$0xf] }
 0x133   :  { %v279_v2 = vmul.f32 %v9484_v1, %v9484_v1 }
 0x135   :  { %285 = vadd.xlane.f32.xlu0 %v279_v2  ;;  %v8662_v2 = vld [vmem:[%s13505_s5 + $0x40] sm:$0xf0] }
 0x136   :  { %v261_v3 = vpop.xlane.xlu1 %260 }
 0x137   :  { %v272_v4 = vmul.f32 %v9468_v54, %v261_v3  ;;  %v8017_v3 = vor.u32 %v8660_v60, %v8014_v63 }
 0x139   :  { %v9490_v5 = vsub.f32 %v9465_v47, %v272_v4  ;;  %v8021_v4 = vor.u32 %v8662_v2, %v8020_v0  ;;  %549 = vmatpush.bf16.msra.mxu3 %v8017_v3  ;;  %v9032_v0 = vld [vmem:[%s13504_s4] ss:$0 sm:$0xff] }
 0x13b   :  { %v280_v6 = vmul.f32 %v9490_v5, %v9490_v5  ;;  %568 = vmatpush.bf16.msrb.mxu0 %v8021_v4 }
 0x13d   :  { %287 = vadd.xlane.f32.xlu1 %v280_v6  ;;  %v8000_v6 = vld [vmem:[%s13505_s5 + $0x18] sm:$0xf]  ;;  %550 = vmatpush.bf16.msra.mxu3 %v8005_v13 }
 0x13e   :  { %v8001_v9 = vor.u32 %v8658_v7, %v8000_v6 }
 0x13f   :  { %569 = vmatpush.bf16.msrb.mxu0 %v8009_v14 }
 0x140   :  { %531 = vmatpush.bf16.msra.mxu2 %v8001_v9 }
 0x141   :  { %551 = vmatpush.bf16.msra.mxu3 %v7993_v25 }
 0x143   :  { %570 = vmatpush.bf16.msrb.mxu0 %v7997_v26 }
 0x144   :  { %532 = vmatpush.bf16.msra.mxu2 %v7989_v20 }
 0x198   :  { %v282_v15 = vpop.xlane.xlu2 %281 }
 0x199   :  { %v289_v16 = vmul.f32 %v282_v15, %v9468_v54 }
 0x19b   :  { %v293_v24 = vadd.f32 1e-06, %v289_v16 }
 0x19d   :  { %9047 = vrsqrt.f32 %v293_v24  ;;  %vm303_vm2 = vweird.f32 %v293_v24 }
 0x1a0   :  { %v284_v27 = vpop.xlane.xlu2 %283 }
 0x1a1   :  { %v290_v28 = vmul.f32 %v284_v27, %v9468_v54 }
 0x1a3   :  { %v9048_v29 = vpop.eup %9047  ;;  %v294_v30 = vadd.f32 1e-06, %v290_v28 }
 0x1a4   :  { %v298_v31 = vmul.f32 %v9048_v29, %v293_v24  ;;  %vm304_vm1 = vweird.f32 %v9048_v29 }
 0x1a5   :  { %9049 = vrsqrt.f32 %v294_v30  ;;  %vm305_vm3 = vmor %vm303_vm2, %vm304_vm1  ;;  %vm313_vm5 = vweird.f32 %v294_v30 }
 0x1a6   :  { %v299_v33 = vmul.f32 %v9048_v29, %v298_v31 }
 0x1a8   :  { %v300_v34 = vmul.f32 0.5, %v299_v33  ;;  %v286_v35 = vpop.xlane.xlu0 %285 }
 0x1a9   :  { %v291_v36 = vmul.f32 %v286_v35, %v9468_v54 }
 0x1aa   :  { %v301_v38 = vsub.f32 1.5, %v300_v34 }
 0x1ab   :  { %v9050_v39 = vpop.eup %9049  ;;  %v295_v40 = vadd.f32 1e-06, %v291_v36 }
 0x1ac   :  { %v302_v41 = vmul.f32 %v9048_v29, %v301_v38  ;;  %v308_v43 = vmul.f32 %v9050_v39, %v294_v30  ;;  %vm314_vm4 = vweird.f32 %v9050_v39 }
 0x1ad   :  { %9051 = vrsqrt.f32 %v295_v40  ;;  %vm315_vm6 = vmor %vm313_vm5, %vm314_vm4  ;;  %vm323_vm8 = vweird.f32 %v295_v40 }
 0x1ae   :  { %v309_v44 = vmul.f32 %v9050_v39, %v308_v43  ;;  %v306_v45 = vsel %vm305_vm3, %v9048_v29, %v302_v41 }
 0x1af   :  { %v337_v53 = vmul.f32 %v306_v45, %v9472_v57 }
 0x1b0   :  { %v310_v46 = vmul.f32 0.5, %v309_v44  ;;  %v288_v48 = vpop.xlane.xlu1 %287 }
 0x1b1   :  { %v292_v49 = vmul.f32 %v288_v48, %v9468_v54  ;;  %v344_v63 = vmul.f32 %v9031_v55, %v337_v53 }
 0x1b2   :  { %v311_v50 = vsub.f32 1.5, %v310_v46 }
 0x1b3   :  { %v9052_v51 = vpop.eup %9051  ;;  %v296_v52 = vadd.f32 1e-06, %v292_v49  ;;  %v351_v6 = vadd.f32 %v9032_v0, %v344_v63 }
 0x1b4   :  { %v312_v56 = vmul.f32 %v9050_v39, %v311_v50  ;;  %v318_v58 = vmul.f32 %v9052_v51, %v295_v40  ;;  %vm324_vm7 = vweird.f32 %v9052_v51 }
 0x1b5   :  { %9053 = vrsqrt.f32 %v296_v52  ;;  %vm325_vm9 = vmor %vm323_vm8, %vm324_vm7  ;;  %vm333_vm11 = vweird.f32 %v296_v52 }
 0x1b6   :  { %v316_v59 = vsel %vm315_vm6, %v9050_v39, %v312_v56  ;;  %v319_v60 = vmul.f32 %v9052_v51, %v318_v58 }
 0x1b7   :  { %v338_v62 = vmul.f32 %v316_v59, %v9478_v61 }
 0x1b8   :  { %v320_v2 = vmul.f32 0.5, %v319_v60 }
 0x1b9   :  { %v345_v57 = vmul.f32 %v9031_v55, %v338_v62  ;;  %v9277_v62 = vmov 1983009808  }
 0x1ba   :  { %v321_v3 = vsub.f32 1.5, %v320_v2  ;;  %v628_v63 = vunpack.c.l.s4 %v9277_v62 }
 0x1bb   :  { %v9054_v4 = vpop.eup %9053  ;;  %v352_v7 = vadd.f32 %v9032_v0, %v345_v57 }
 0x1bc   :  { %v322_v8 = vmul.f32 %v9052_v51, %v321_v3  ;;  %v328_v9 = vmul.f32 %v9054_v4, %v296_v52  ;;  %vm334_vm10 = vweird.f32 %v9054_v4 }
 0x1bd   :  { %v355_v10 = vpack.c.bf16 %v352_v7, %v351_v6  ;;  %vm335_vm12 = vmor %vm333_vm11, %vm334_vm10  ;;  %v9699_v7 = vunpack.c.0.s8 %v628_v63 }
 0x1be   :  { %v329_v11 = vmul.f32 %v9054_v4, %v328_v9  ;;  %v326_v61 = vsel %vm325_vm9, %v9052_v51, %v322_v8 }
 0x1bf   :  { %533 = vmatmul.bf16.vlgmr.msra.gmra.mxu2 %v355_v10  ;;  %552 = vmatmul.bf16.vlgmr.msra.gmra.mxu3 %v355_v10  ;;  %v339_v14 = vmul.f32 %v326_v61, %v9484_v1  ;;  %v389_v1 = vld [vmem:[%s13506_s6] sm:$0x7] }
 0x1c0   :  { %v330_v12 = vmul.f32 0.5, %v329_v11  ;;  %571 = vmatmul.bf16.vlgmr.msrb.gmra.mxu0 %v355_v10  ;;  %v392_v27 = vperm.slane %v389_v1, 1  ;;  %v9657_v31 = vperm.slane %v389_v1, 2  ;;  %v391_v36 = vperm.slane %v389_v1, 0 }
 0x1c1   :  { %v346_v18 = vmul.f32 %v9031_v55, %v339_v14 }
 0x1c2   :  { %v331_v13 = vsub.f32 1.5, %v330_v12  ;;  %13556 = vst [vmem:[#allocation10_spill] sm:$0xff] %v9657_v31 }
 0x1c3   :  { %v353_v20 = vadd.f32 %v9032_v0, %v346_v18 }
 0x1c4   :  { %v332_v15 = vmul.f32 %v9054_v4, %v331_v13 }
 0x1c6   :  { %v336_v16 = vsel %vm335_vm12, %v9054_v4, %v332_v15 }
 0x1c7   :  { %v340_v17 = vmul.f32 %v336_v16, %v9490_v5  ;;  %v9278_v16 = vmov 1934713408  }
 0x1c9   :  { %v347_v19 = vmul.f32 %v9031_v55, %v340_v17  ;;  %v652_v17 = vunpack.c.l.s4 %v9278_v16 }
 0x1cb   :  { %v354_v21 = vadd.f32 %v9032_v0, %v347_v19 }
 0x1cd   :  { %v356_v22 = vpack.c.bf16 %v354_v21, %v353_v20 }
 0x1cf   :  { %538 = vmatmul.bf16.gmra.mxu2 %v356_v22  ;;  %557 = vmatmul.bf16.gmra.mxu3 %v356_v22 }
 0x1d0   :  { %576 = vmatmul.bf16.gmra.mxu0 %v356_v22 }
 0x23d   :  { %v572_v23 = vpop.f32.mrf.mxu0 }
 0x23e   :  { %v9690_v55 = vadd.f32 %v572_v23, %v9657_v31 }
 0x242   :  { %v534_v24 = vpop.f32.mrf.mxu2  ;;  %v553_v25 = vpop.f32.mrf.mxu3 }
 0x243   :  { %v9655_v5 = vadd.f32 %v553_v25, %v392_v27  ;;  %v535_v40 = vadd.f32 %v534_v24, %v391_v36 }
 0x245   :  { %v574_v26 = vpop.f32.mrf.mxu0  ;;  %v1121_v6 = vrot.slane %v9655_v5, 4  ;;  %v625_v15 = vrot.slane %v535_v40, 4 }
 0x246   :  { %v9687_v53 = vadd.f32 %v574_v26, %v9657_v31 }
 0x248   :  { %v8851_v56 = vpack.i.bf16 %v9687_v53, %v9690_v55 }
 0x24a   :  { %v536_v28 = vpop.f32.mrf.mxu2  ;;  %v555_v29 = vpop.f32.mrf.mxu3 }
 0x24b   :  { %v556_v30 = vadd.f32 %v555_v29, %v392_v27  ;;  %v537_v38 = vadd.f32 %v536_v28, %v391_v36 }
 0x24d   :  { %v577_v33 = vpop.f32.mrf.mxu0  ;;  %v8801_v34 = vpack.i.bf16 %v556_v30, %v9655_v5  ;;  %v8811_v43 = vpack.i.bf16 %v537_v38, %v535_v40  ;;  %v1177_v4 = vrot.slane %v556_v30, 4  ;;  %v681_v14 = vrot.slane %v537_v38, 4 }
 0x24e   :  { %v9661_v35 = vadd.f32 %v577_v33, %v9657_v31 }
 0x24f   :  { %8802 = vrot.lane.b32.xlu1 %v8801_v34, %s9274_s29  ;;  %8797 = vrot.lane.b32.xlu0 %v8801_v34, %s9275_s0 }
 0x250   :  { %13557 = vst [vmem:[#allocation11_spill] sm:$0xff] %v9661_v35  ;;  %8792 = vrot.lane.b32.xlu2 %v8801_v34, %s9276_s18 }
 0x252   :  { %v558_v39 = vpop.f32.mrf.mxu3  ;;  %v539_v41 = vpop.f32.mrf.mxu2 }
 0x253   :  { %v9668_v45 = vadd.f32 %v558_v39, %v392_v27  ;;  %v9679_v51 = vadd.f32 %v539_v41, %v391_v36 }
 0x257   :  { %8812 = vrot.lane.b32.xlu0 %v8811_v43, %s9275_s0 }
 0x258   :  { %8807 = vrot.lane.b32.xlu2 %v8811_v43, %s9276_s18 }
 0x25a   :  { %v560_v44 = vpop.f32.mrf.mxu3  ;;  %v541_v49 = vpop.f32.mrf.mxu2 }
 0x25b   :  { %v9670_v46 = vadd.f32 %v560_v44, %v392_v27  ;;  %v9677_v50 = vadd.f32 %v541_v49, %v391_v36 }
 0x25d   :  { %v8826_v48 = vpack.i.bf16 %v9670_v46, %v9668_v45  ;;  %v8841_v52 = vpack.i.bf16 %v9677_v50, %v9679_v51  ;;  %v13561_v47 = vrot.slane %v9670_v46, 4 }
 0x25f   :  { %8827 = vrot.lane.b32.xlu0 %v8826_v48, %s9276_s18  ;;  %8822 = vrot.lane.b32.xlu1 %v8826_v48, %s9274_s29 }
 0x260   :  { %8817 = vrot.lane.b32.xlu2 %v8811_v43, %s9274_s29 }
 0x267   :  { %8842 = vrot.lane.b32.xlu0 %v8841_v52, %s9276_s18  ;;  %8837 = vrot.lane.b32.xlu1 %v8841_v52, %s9274_s29 }
 0x268   :  { %8832 = vrot.lane.b32.xlu2 %v8826_v48, %s9275_s0 }
 0x26f   :  { %8852 = vrot.lane.b32.xlu0 %v8851_v56, %s9274_s29  ;;  %8862 = vrot.lane.b32.xlu1 %v8851_v56, %s9275_s0 }
 0x270   :  { %8847 = vrot.lane.b32.xlu2 %v8841_v52, %s9275_s0 }
 0x278   :  { %8857 = vrot.lane.b32.xlu2 %v8851_v56, %s9276_s18 }
 0x2aa   :  { %v8793_v58 = vpop.permute.xlu2 %8792 }
 0x2ab   :  { %v8795_v59 = vunpack.i.h.bf16 %v8793_v58  ;;  %v8794_v0 = vunpack.i.l.bf16 %v8793_v58 }
 0x2ad   :  { %v1175_v2 = vrot.slane %v8795_v59, 4  ;;  %v1119_v8 = vrot.slane %v8794_v0, 4  ;;  %v1178_v10 = vsel %vm623_vm13, %v8795_v59, %v1177_v4  ;;  %v1122_v11 = vsel %vm623_vm13, %v8794_v0, %v1121_v6 }
 0x2ae   :  { %v9710_v19 = vperm.slane %v1178_v10, %v9699_v7  ;;  %v9715_v21 = vperm.slane %v1122_v11, %v9699_v7 }
 0x2af   :  { %v1176_v9 = vsel %vm623_vm13, %v1175_v2, %v556_v30  ;;  %v1120_v20 = vsel %vm623_vm13, %v1119_v8, %v9655_v5 }
 0x2b0   :  { %v9707_v18 = vperm.slane %v1176_v9, %v9699_v7  ;;  %v1126_v28 = vperm.slane %v1120_v20, %v9699_v7  ;;  %v1213_v34 = vrot.slane %v9710_v19, 4  ;;  %v1157_v36 = vrot.slane %v9715_v21, 4 }
 0x2b2   :  { %v8808_v60 = vpop.permute.xlu2 %8807  ;;  %v1201_v33 = vrot.slane %v9707_v18, 4 }
 0x2b3   :  { %v8810_v57 = vunpack.i.h.bf16 %v8808_v60  ;;  %v8809_v3 = vunpack.i.l.bf16 %v8808_v60  ;;  %v1145_v60 = vrot.slane %v1126_v28, 4 }
 0x2b5   :  { %v679_v61 = vrot.slane %v8810_v57, 4  ;;  %v622_v12 = vrot.slane %v8809_v3, 4  ;;  %v682_v26 = vsel %vm623_vm13, %v8810_v57, %v681_v14  ;;  %v626_v27 = vsel %vm623_vm13, %v8809_v3, %v625_v15 }
 0x2b6   :  { %v9743_v43 = vperm.slane %v626_v27, %v9699_v7 }
 0x2b7   :  { %v680_v25 = vsel %vm623_vm13, %v679_v61, %v537_v38  ;;  %v624_v1 = vsel %vm623_vm13, %v622_v12, %v535_v40  ;;  %v9731_v38 = vunpack.c.0.s8 %v652_v17  ;;  %v9737_v40 = vperm.slane %v682_v26, %v9699_v7 }
 0x2b8   :  { %v9734_v39 = vperm.slane %v680_v25, %v9699_v7  ;;  %v9740_v41 = vperm.slane %v624_v1, %v9699_v7  ;;  %v661_v10 = vrot.slane %v9743_v43, 4 }
 0x2b9   :  { %v717_v8 = vrot.slane %v9737_v40, 4 }
 0x2ba   :  { %v9704_v13 = vpop.permute.xlu2 %8817  ;;  %v705_v6 = vrot.slane %v9734_v39, 4  ;;  %v649_v9 = vrot.slane %v9740_v41, 4 }
 0x2bb   :  { %v8820_v62 = vunpack.i.h.bf16 %v9704_v13  ;;  %v8819_v63 = vunpack.i.l.bf16 %v9704_v13 }
 0x2bd   :  { %v693_v25 = vrot.slane %v8820_v62, 4  ;;  %v637_v26 = vrot.slane %v8819_v63, 4 }
 0x2c1   :  { %v8803_v44 = vpop.permute.xlu1 %8802  ;;  %v8798_v48 = vpop.permute.xlu0 %8797 }
 0x2c2   :  { %v8805_v49 = vunpack.i.h.bf16 %v8803_v44  ;;  %v8804_v52 = vunpack.i.l.bf16 %v8803_v44  ;;  %v9745_v56 = vpop.permute.xlu2 %8832  ;;  %v8800_v58 = vunpack.i.h.bf16 %v8798_v48  ;;  %v8799_v59 = vunpack.i.l.bf16 %v8798_v48 }
 0x2c3   :  { %v8835_v0 = vunpack.i.h.bf16 %v9745_v56  ;;  %v8834_v27 = vunpack.i.l.bf16 %v9745_v56  ;;  %v13559_v56 = vrot.slane %v9687_v53, 4 }
 0x2c4   :  { %v1189_v2 = vrot.slane %v8805_v49, 4  ;;  %v1133_v57 = vrot.slane %v8804_v52, 4  ;;  %v1187_v3 = vrot.slane %v8800_v58, 4  ;;  %v1131_v4 = vrot.slane %v8799_v59, 4 }
 0x2c5   :  { %v1299_v1 = vrot.slane %v8835_v0, 4 }
 0x2c6   :  { %v1188_v11 = vsel %vm623_vm13, %v1187_v3, %v8805_v49  ;;  %v1190_v61 = vsel %vm623_vm13, %v8800_v58, %v1189_v2  ;;  %v1132_v12 = vsel %vm623_vm13, %v1131_v4, %v8804_v52  ;;  %v1134_v14 = vsel %vm623_vm13, %v8799_v59, %v1133_v57 }
 0x2c7   :  { %v1194_v15 = vperm.slane %v1188_v11, %v9699_v7  ;;  %v1198_v16 = vperm.slane %v1190_v61, %v9699_v7  ;;  %v1138_v17 = vperm.slane %v1132_v12, %v9699_v7  ;;  %v1142_v20 = vperm.slane %v1134_v14, %v9699_v7 }
 0x2c9   :  { %v1199_v44 = vrot.slane %v1194_v15, 4  ;;  %v1202_v48 = vsel %vm623_vm13, %v1194_v15, %v1201_v33  ;;  %v1211_v49 = vrot.slane %v1198_v16, 4  ;;  %v1214_v52 = vsel %vm623_vm13, %v1198_v16, %v1213_v34 }
 0x2ca   :  { %v1210_v58 = vperm.slane %v1202_v48, %v9731_v38  ;;  %v1222_v59 = vperm.slane %v1214_v52, %v9731_v38  ;;  %v1143_v2 = vrot.slane %v1138_v17, 4  ;;  %v1146_v57 = vsel %vm623_vm13, %v1138_v17, %v1145_v60  ;;  %v9795_v16 = vpop.permute.xlu2 %8847  ;;  %v8813_v52 = vpop.permute.xlu0 %8812 }
 0x2cb   :  { %v1200_v3 = vsel %vm623_vm13, %v1199_v44, %v9707_v18  ;;  %v1212_v4 = vsel %vm623_vm13, %v1211_v49, %v9710_v19  ;;  %v1154_v11 = vperm.slane %v1146_v57, %v9731_v38  ;;  %v1155_v61 = vrot.slane %v1142_v20, 4 }
 0x2cc   :  { %v9780_v33 = vperm.slane %v1200_v3, %v9731_v38  ;;  %v9783_v34 = vperm.slane %v1212_v4, %v9731_v38  ;;  %v9785_v12 = vrot.slane %v1210_v58, 4  ;;  %v9787_v14 = vrot.slane %v1222_v59, 4 }
 0x2cd   :  { %v1144_v60 = vsel %vm623_vm13, %v1143_v2, %v1126_v28  ;;  %v1156_v18 = vsel %vm623_vm13, %v1155_v61, %v9715_v21  ;;  %v1158_v19 = vsel %vm623_vm13, %v1142_v20, %v1157_v36  ;;  %v9793_v15 = vrot.slane %v1154_v11, 4 }
 0x2ce   :  { %v9799_v17 = vrot.slane %v8834_v27, 4  ;;  %v9803_v44 = vsel %vm623_vm13, 0.0, %v9785_v12  ;;  %v1227_v48 = vrot.slane %v9783_v34, 4  ;;  %v9808_v28 = vsel %vm623_vm13, 0.0, %v9787_v14 }
 0x2cf   :  { %v9813_v20 = vperm.slane %v1144_v60, %v9731_v38  ;;  %v9816_v49 = vperm.slane %v1156_v18, %v9731_v38  ;;  %v1166_v59 = vperm.slane %v1158_v19, %v9731_v38  ;;  %v9822_v2 = vsel %vm623_vm13, 0.0, %v9793_v15 }
 0x2d0   :  { %v13520_v57 = vunpack.i.h.bf16 %v9795_v16  ;;  %v9826_v3 = vsel %vm623_vm13, 0.0, %v1227_v48  ;;  %v13521_v61 = vunpack.i.l.bf16 %v9795_v16  ;;  %v8815_v58 = vunpack.i.h.bf16 %v8813_v52 }
 0x2d1   :  { %v1171_v11 = vrot.slane %v9816_v49, 4  ;;  %v9831_v60 = vpop.permute.xlu1 %8822  ;;  %v9833_v18 = vrot.slane %v1166_v59, 4  ;;  %v8814_v36 = vunpack.i.l.bf16 %v8813_v52 }
 0x2d2   :  { %v9841_v48 = vrot.slane %v13520_v57, 4  ;;  %v9845_v4 = vrot.slane %v13521_v61, 4  ;;  %v8825_v5 = vunpack.i.h.bf16 %v9831_v60  ;;  %v691_v19 = vrot.slane %v8815_v58, 4 }
 0x2d3   :  { %v9837_v21 = vsel %vm623_vm13, 0.0, %v1171_v11  ;;  %v9850_v59 = vsel %vm623_vm13, 0.0, %v9833_v18  ;;  %v694_v52 = vsel %vm623_vm13, %v8815_v58, %v693_v25  ;;  %v635_v30 = vrot.slane %v8814_v36, 4 }
 0x2d4   :  { %v702_v24 = vperm.slane %v694_v52, %v9699_v7  ;;  %v638_v57 = vsel %vm623_vm13, %v8814_v36, %v637_v26  ;;  %v8824_v29 = vunpack.i.l.bf16 %v9831_v60  ;;  %v692_v61 = vsel %vm623_vm13, %v691_v19, %v8820_v62 }
 0x2d5   :  { %v636_v22 = vsel %vm623_vm13, %v635_v30, %v8819_v63  ;;  %v646_v23 = vperm.slane %v638_v57, %v9699_v7  ;;  %v1300_v25 = vsel %vm623_vm13, %v1299_v1, %v8825_v5  ;;  %v698_v58 = vperm.slane %v692_v61, %v9699_v7 }
 0x2d6   :  { %v715_v11 = vrot.slane %v702_v24, 4  ;;  %v718_v26 = vsel %vm623_vm13, %v702_v24, %v717_v8  ;;  %v642_v36 = vperm.slane %v636_v22, %v9699_v7  ;;  %v1301_v30 = vrot.slane %v8825_v5, 4 }
 0x2d7   :  { %v726_v60 = vperm.slane %v718_v26, %v9731_v38  ;;  %v659_v62 = vrot.slane %v646_v23, 4  ;;  %v662_v13 = vsel %vm623_vm13, %v646_v23, %v661_v10  ;;  %v703_v63 = vrot.slane %v698_v58, 4 }
 0x2d8   :  { %v706_v1 = vsel %vm623_vm13, %v698_v58, %v705_v6  ;;  %v716_v57 = vsel %vm623_vm13, %v715_v11, %v9737_v40  ;;  %v647_v61 = vrot.slane %v642_v36, 4  ;;  %v650_v19 = vsel %vm623_vm13, %v642_v36, %v649_v9 }
 0x2d9   :  { %v714_v24 = vperm.slane %v706_v1, %v9731_v38  ;;  %v722_v22 = vperm.slane %v716_v57, %v9731_v38  ;;  %v733_v8 = vrot.slane %v726_v60, 4  ;;  %v704_v23 = vsel %vm623_vm13, %v703_v63, %v9734_v39 }
 0x2da   :  { %v648_v5 = vsel %vm623_vm13, %v647_v61, %v9740_v41  ;;  %v658_v6 = vperm.slane %v650_v19, %v9731_v38  ;;  %v660_v40 = vsel %vm623_vm13, %v659_v62, %v9743_v43  ;;  %v9892_v10 = vperm.slane %v704_v23, %v9731_v38 }
 0x2db   :  { %v9894_v52 = vrot.slane %v714_v24, 4  ;;  %v731_v11 = vrot.slane %v722_v22, 4  ;;  %v734_v58 = vsel %vm623_vm13, 0.0, %v733_v8  ;;  %v912_v9 = vsel %vm623_vm13, %v733_v8, %v722_v22 }
 0x2dc   :  { %v917_v26 = vrot.slane %v734_v58, 4  ;;  %v9899_v39 = vperm.slane %v648_v5, %v9731_v38  ;;  %v666_v41 = vperm.slane %v660_v40, %v9731_v38  ;;  %v727_v36 = vrot.slane %v9892_v10, 4 }
 0x2dd   :  { %v9905_v43 = vsel %vm623_vm13, 0.0, %v9894_v52  ;;  %v732_v60 = vsel %vm623_vm13, 0.0, %v731_v11  ;;  %v9909_v62 = vperm.slane %v912_v9, %v9699_v7  ;;  %v670_v1 = vperm.slane %v662_v13, %v9731_v38  ;;  %v8858_v9 = vpop.permute.xlu2 %8857 }
 0x2de   :  { %v918_v63 = vsel %vm623_vm13, %v917_v26, %v732_v60  ;;  %v671_v57 = vrot.slane %v9899_v39, 4  ;;  %v1302_v61 = vsel %vm623_vm13, %v8835_v0, %v1301_v30  ;;  %v9918_v24 = vsel %vm623_vm13, 0.0, %v727_v36  ;;  %v8828_v60 = vpop.permute.xlu0 %8827 }
 0x2df   :  { %13558 = vst [vmem:[#allocation12_spill] sm:$0xff] %v9909_v62  ;;  %v9922_v8 = vperm.slane %v918_v63, %v9699_v7  ;;  %v9924_v19 = vrot.slane %v658_v6, 4  ;;  %v675_v5 = vrot.slane %v666_v41, 4  ;;  %v677_v13 = vrot.slane %v670_v1, 4 }
 0x2e0   :  { %v1306_v40 = vperm.slane %v1300_v25, %v9699_v7  ;;  %v1310_v0 = vperm.slane %v1302_v61, %v9699_v7  ;;  %v1244_v30 = vsel %vm623_vm13, %v9799_v17, %v8824_v29  ;;  %v1245_v58 = vrot.slane %v8824_v29, 4 }
 0x2e1   :  { %v9930_v11 = vsel %vm623_vm13, 0.0, %v9924_v19  ;;  %v9936_v6 = vsel %vm623_vm13, 0.0, %v671_v57  ;;  %v676_v26 = vsel %vm623_vm13, 0.0, %v675_v5  ;;  %v678_v36 = vsel %vm623_vm13, 0.0, %v677_v13 }
 0x2e2   :  { %v858_v25 = vsel %vm623_vm13, %v677_v13, %v666_v41  ;;  %v863_v61 = vrot.slane %v678_v36, 4  ;;  %v1311_v23 = vrot.slane %v1306_v40, 4  ;;  %v1246_v29 = vsel %vm623_vm13, %v8834_v27, %v1245_v58 }
 0x2e3   :  { %v9943_v1 = vperm.slane %v858_v25, %v9699_v7  ;;  %v9949_v17 = vperm.slane %v1244_v30, %v9699_v7  ;;  %v8860_v57 = vunpack.i.h.bf16 %v8858_v9  ;;  %v8859_v5 = vunpack.i.l.bf16 %v8858_v9 }
 0x2e4   :  { %v864_v22 = vsel %vm623_vm13, %v863_v61, %v676_v26  ;;  %v1323_v41 = vrot.slane %v1310_v0, 4  ;;  %v1254_v13 = vperm.slane %v1246_v29, %v9699_v7  ;;  %v8830_v63 = vunpack.i.h.bf16 %v8828_v60 }
 0x2e5   :  { %v9954_v25 = vperm.slane %v864_v22, %v9699_v7  ;;  %v1671_v54 = vrot.slane %v8860_v57, 4  ;;  %v1674_v27 = vsel %vm623_vm13, %v8860_v57, %v13559_v56  ;;  %v1255_v30 = vrot.slane %v9949_v17, 4 }
 0x2e6   :  { %v9962_v58 = vperm.slane %v1674_v27, %v9699_v7  ;;  %v1615_v9 = vrot.slane %v8859_v5, 4  ;;  %v13560_v26 = vrot.slane %v9690_v55, 4  ;;  %v1287_v36 = vrot.slane %v8830_v63, 4 }
 0x2e7   :  { %v1672_v22 = vsel %vm623_vm13, %v1671_v54, %v9687_v53  ;;  %v1290_v57 = vsel %vm623_vm13, %v8830_v63, %v13561_v47  ;;  %v1267_v56 = vrot.slane %v1254_v13, 4 }
 0x2e8   :  { %v1618_v61 = vsel %vm623_vm13, %v8859_v5, %v13560_v26  ;;  %v9976_v27 = vperm.slane %v1672_v22, %v9699_v7  ;;  %v1616_v42 = vsel %vm623_vm13, %v1615_v9, %v9690_v55  ;;  %v1298_v5 = vperm.slane %v1290_v57, %v9699_v7 }
 0x2e9   :  { %v9970_v29 = vperm.slane %v1618_v61, %v9699_v7  ;;  %v9983_v54 = vperm.slane %v1616_v42, %v9699_v7  ;;  %v1288_v53 = vsel %vm623_vm13, %v1287_v36, %v9670_v46  ;;  %v8829_v61 = vunpack.i.l.bf16 %v8828_v60 }
 0x2ea   :  { %v1294_v63 = vperm.slane %v1288_v53, %v9699_v7  ;;  %v1324_v22 = vsel %vm623_vm13, %v1323_v41, %v1298_v5  ;;  %v1325_v37 = vrot.slane %v1298_v5, 4  ;;  %v13562_v26 = vrot.slane %v9668_v45, 4 }
 0x2eb   :  { %v1330_v9 = vperm.slane %v1324_v22, %v9731_v38  ;;  %v1231_v57 = vrot.slane %v8829_v61, 4 }
 0x2ec   :  { %v1234_v42 = vsel %vm623_vm13, %v8829_v61, %v13562_v26  ;;  %v1312_v32 = vsel %vm623_vm13, %v1311_v23, %v1294_v63  ;;  %v1313_v46 = vrot.slane %v1294_v63, 4  ;;  %v1326_v60 = vsel %vm623_vm13, %v1310_v0, %v1325_v37 }
 0x2ed   :  { %v1242_v36 = vperm.slane %v1234_v42, %v9699_v7  ;;  %v1318_v53 = vperm.slane %v1312_v32, %v9731_v38  ;;  %v1334_v41 = vperm.slane %v1326_v60, %v9731_v38  ;;  %v1339_v5 = vrot.slane %v1330_v9, 4 }
 0x2ee   :  { %v1232_v22 = vsel %vm623_vm13, %v1231_v57, %v9668_v45  ;;  %v1314_v47 = vsel %vm623_vm13, %v1306_v40, %v1313_v46 }
 0x2ef   :  { %v1238_v55 = vperm.slane %v1232_v22, %v9699_v7  ;;  %v1268_v26 = vsel %vm623_vm13, %v1267_v56, %v1242_v36  ;;  %v1269_v23 = vrot.slane %v1242_v36, 4  ;;  %v1322_v37 = vperm.slane %v1314_v47, %v9731_v38  ;;  %v8838_v36 = vpop.permute.xlu1 %8837 }
 0x2f0   :  { %v1335_v0 = vrot.slane %v1318_v53, 4  ;;  %v1341_v63 = vrot.slane %v1334_v41, 4  ;;  %v1274_v45 = vperm.slane %v1268_v26, %v9731_v38  ;;  %v1340_v40 = vsel %vm623_vm13, 0.0, %v1339_v5  ;;  %v8843_v26 = vpop.permute.xlu0 %8842 }
 0x2f1   :  { %v1256_v32 = vsel %vm623_vm13, %v1255_v30, %v1238_v55  ;;  %v1257_v42 = vrot.slane %v1238_v55, 4  ;;  %v1270_v60 = vsel %vm623_vm13, %v1254_v13, %v1269_v23  ;;  %v1337_v57 = vrot.slane %v1322_v37, 4 }
 0x2f2   :  { %v1342_v46 = vsel %vm623_vm13, 0.0, %v1341_v63  ;;  %v1516_v56 = vsel %vm623_vm13, %v1341_v63, %v1330_v9  ;;  %v10014_v22 = vsel %vm623_vm13, 0.0, %v1335_v0  ;;  %v1262_v55 = vperm.slane %v1256_v32, %v9731_v38 }
 0x2f3   :  { %13563 = vst [vmem:[#allocation13_spill] sm:$0xff] %v10014_v22  ;;  %v1521_v47 = vrot.slane %v1342_v46, 4  ;;  %v1258_v30 = vsel %vm623_vm13, %v9949_v17, %v1257_v42  ;;  %v10020_v13 = vsel %vm623_vm13, 0.0, %v1337_v57  ;;  %v10023_v41 = vperm.slane %v1516_v56, %v9699_v7 }
 0x2f4   :  { %13564 = vst [vmem:[#allocation14_spill] sm:$0xff] %v10020_v13  ;;  %v1266_v5 = vperm.slane %v1258_v30, %v9731_v38  ;;  %v1278_v9 = vperm.slane %v1270_v60, %v9731_v38  ;;  %v10028_v23 = vsel %vm623_vm13, %v1337_v57, %v1318_v53  ;;  %v1279_v0 = vrot.slane %v1262_v55, 4 }
 0x2f5   :  { %13565 = vst [vmem:[#allocation15_spill] sm:$0xff] %v10023_v41  ;;  %v1522_v37 = vsel %vm623_vm13, %v1521_v47, %v1340_v40  ;;  %v1283_v17 = vrot.slane %v1274_v45, 4  ;;  %v8840_v46 = vunpack.i.h.bf16 %v8838_v36  ;;  %v8839_v60 = vunpack.i.l.bf16 %v8838_v36 }
 0x2f6   :  { %13566 = vst [vmem:[#allocation16_spill] sm:$0xff] %v10028_v23  ;;  %v1281_v32 = vrot.slane %v1266_v5, 4  ;;  %v1285_v42 = vrot.slane %v1278_v9, 4  ;;  %v10033_v56 = vperm.slane %v1522_v37, %v9699_v7  ;;  %v10036_v30 = vsel %vm623_vm13, 0.0, %v1279_v0 }
 0x2f7   :  { %v8845_v61 = vunpack.i.h.bf16 %v8843_v26  ;;  %v1284_v57 = vsel %vm623_vm13, 0.0, %v1283_v17  ;;  %v804_v0 = vsel %vm623_vm13, %v9841_v48, %v8840_v46  ;;  %v805_v36 = vrot.slane %v8840_v46, 4 }
 0x2f8   :  { %13567 = vst [vmem:[#allocation17_spill] sm:$0xff] %v10033_v56  ;;  %v10039_v53 = vsel %vm623_vm13, 0.0, %v1281_v32  ;;  %v1286_v40 = vsel %vm623_vm13, 0.0, %v1285_v42  ;;  %v10044_v47 = vsel %vm623_vm13, %v1281_v32, %v1262_v55  ;;  %v1462_v9 = vsel %vm623_vm13, %v1285_v42, %v1274_v45 }
 0x2f9   :  { %13568 = vst [vmem:[#allocation18_spill] sm:$0xff] %v10039_v53  ;;  %v1467_v37 = vrot.slane %v1286_v40, 4  ;;  %v810_v63 = vperm.slane %v804_v0, %v9699_v7  ;;  %v748_v35 = vsel %vm623_vm13, %v9845_v4, %v8839_v60  ;;  %v749_v17 = vrot.slane %v8839_v60, 4 }
 0x2fa   :  { %v754_v55 = vperm.slane %v748_v35, %v9699_v7  ;;  %v791_v32 = vrot.slane %v8845_v61, 4  ;;  %v13569_v5 = vrot.slane %v9677_v50, 4  ;;  %v10059_v42 = vperm.slane %v1462_v9, %v9699_v7 }
 0x2fb   :  { %v1468_v31 = vsel %vm623_vm13, %v1467_v37, %v1284_v57  ;;  %v13571_v48 = vunpack.i.h.bf16 %v9795_v16  ;;  %v815_v40 = vrot.slane %v810_v63, 4  ;;  %v13572_v4 = vunpack.i.l.bf16 %v9795_v16  ;;  %v10067_v57 = vpop.permute.xlu1 %8862 }
 0x2fc   :  { %v794_v45 = vsel %vm623_vm13, %v8845_v61, %v13569_v5  ;;  %13570 = vst [vmem:[#allocation19_spill] sm:$0xff] %v10059_v42  ;;  %v10070_v35 = vperm.slane %v1468_v31, %v9699_v7  ;;  %v792_v5 = vsel %vm623_vm13, %v791_v32, %v9677_v50  ;;  %v759_v9 = vrot.slane %v754_v55, 4 }
 0x2fd   :  { %v806_v46 = vsel %vm623_vm13, %v13571_v48, %v805_v36  ;;  %v750_v60 = vsel %vm623_vm13, %v13572_v4, %v749_v17  ;;  %v798_v0 = vperm.slane %v792_v5, %v9699_v7  ;;  %v802_v36 = vperm.slane %v794_v45, %v9699_v7  ;;  %v10078_v48 = vpop.permute.xlu0 %8852 }
 0x2fe   :  { %13573 = vst [vmem:[#allocation20_spill] sm:$0xff] %v10070_v35  ;;  %v814_v37 = vperm.slane %v806_v46, %v9699_v7  ;;  %v758_v61 = vperm.slane %v750_v60, %v9699_v7  ;;  %v8844_v16 = vunpack.i.l.bf16 %v8843_v26  ;;  %v8865_v31 = vunpack.i.h.bf16 %v10067_v57 }
 0x2ff   :  { %v816_v46 = vsel %vm623_vm13, %v815_v40, %v798_v0  ;;  %v817_v60 = vrot.slane %v798_v0, 4  ;;  %v829_v41 = vrot.slane %v802_v36, 4  ;;  %v13574_v45 = vrot.slane %v9679_v51, 4 }
 0x300   :  { %v827_v17 = vrot.slane %v814_v37, 4  ;;  %v771_v4 = vrot.slane %v758_v61, 4  ;;  %v735_v13 = vrot.slane %v8844_v16, 4  ;;  %v822_v50 = vperm.slane %v816_v46, %v9731_v38 }
 0x301   :  { %v738_v26 = vsel %vm623_vm13, %v8844_v16, %v13574_v45  ;;  %v8855_v5 = vunpack.i.h.bf16 %v10078_v48  ;;  %v818_v22 = vsel %vm623_vm13, %v810_v63, %v817_v60  ;;  %v830_v23 = vsel %vm623_vm13, %v814_v37, %v829_v41 }
 0x302   :  { %v828_v32 = vsel %vm623_vm13, %v827_v17, %v802_v36  ;;  %v736_v40 = vsel %vm623_vm13, %v735_v13, %v9679_v51  ;;  %v826_v0 = vperm.slane %v818_v22, %v9731_v38  ;;  %v838_v46 = vperm.slane %v830_v23, %v9731_v38 }
 0x303   :  { %v834_v56 = vperm.slane %v828_v32, %v9731_v38  ;;  %v839_v36 = vrot.slane %v822_v50, 4  ;;  %v742_v17 = vperm.slane %v736_v40, %v9699_v7  ;;  %v746_v16 = vperm.slane %v738_v26, %v9699_v7 }
 0x304   :  { %v1683_v45 = vrot.slane %v8865_v31, 4  ;;  %v13575_v63 = vunpack.i.l.bf16 %v10067_v57  ;;  %v841_v37 = vrot.slane %v826_v0, 4  ;;  %v845_v32 = vrot.slane %v838_v46, 4 }
 0x305   :  { %v843_v35 = vrot.slane %v834_v56, 4  ;;  %v840_v41 = vsel %vm623_vm13, 0.0, %v839_v36  ;;  %v760_v51 = vsel %vm623_vm13, %v759_v9, %v742_v17  ;;  %v761_v13 = vrot.slane %v742_v17, 4 }
 0x306   :  { %v10100_v60 = vrot.slane %v13575_v63, 4  ;;  %v766_v23 = vperm.slane %v760_v51, %v9731_v38  ;;  %v772_v40 = vsel %vm623_vm13, %v771_v4, %v746_v16  ;;  %v842_v26 = vsel %vm623_vm13, 0.0, %v841_v37 }
 0x307   :  { %v844_v22 = vsel %vm623_vm13, 0.0, %v843_v35  ;;  %v846_v42 = vsel %vm623_vm13, 0.0, %v845_v32  ;;  %v1009_v63 = vsel %vm623_vm13, %v841_v37, %v822_v50  ;;  %v1020_v62 = vsel %vm623_vm13, %v845_v32, %v834_v56 }
 0x308   :  { %v10112_v0 = vperm.slane %v1009_v63, %v9699_v7  ;;  %v1014_v46 = vrot.slane %v842_v26, 4  ;;  %v10115_v9 = vperm.slane %v1020_v62, %v9699_v7  ;;  %v1025_v35 = vrot.slane %v846_v42, 4 }
 0x309   :  { %v762_v36 = vsel %vm623_vm13, %v754_v55, %v761_v13  ;;  %v773_v17 = vrot.slane %v746_v16, 4  ;;  %v778_v4 = vperm.slane %v772_v40, %v9731_v38  ;;  %v783_v51 = vrot.slane %v766_v23, 4 }
 0x30a   :  { %v1015_v53 = vsel %vm623_vm13, %v1014_v46, %v840_v41  ;;  %v1026_v50 = vsel %vm623_vm13, %v1025_v35, %v844_v22  ;;  %v1033_v56 = vrot.slane %v10112_v0, 4  ;;  %v1684_v37 = vsel %vm623_vm13, %v1683_v45, %v8855_v5 }
 0x30b   :  { %v10124_v32 = vperm.slane %v1026_v50, %v9699_v7  ;;  %v1045_v62 = vrot.slane %v10115_v9, 4  ;;  %v770_v42 = vperm.slane %v762_v36, %v9731_v38  ;;  %v774_v55 = vsel %vm623_vm13, %v758_v61, %v773_v17 }
 0x30c   :  { %v10130_v16 = vperm.slane %v1015_v53, %v9699_v7  ;;  %v782_v41 = vperm.slane %v774_v55, %v9731_v38  ;;  %v787_v13 = vrot.slane %v778_v4, 4  ;;  %v1685_v22 = vrot.slane %v8855_v5, 4 }
 0x30d   :  { %v784_v45 = vsel %vm623_vm13, 0.0, %v783_v51  ;;  %v785_v26 = vrot.slane %v770_v42, 4  ;;  %v1690_v63 = vperm.slane %v1684_v37, %v9699_v7  ;;  %v8854_v61 = vunpack.i.l.bf16 %v10078_v48 }
 0x30e   :  { %v788_v46 = vsel %vm623_vm13, 0.0, %v787_v13  ;;  %v789_v35 = vrot.slane %v782_v41, 4  ;;  %v1686_v36 = vsel %vm623_vm13, %v8865_v31, %v1685_v22  ;;  %v13576_v48 = vrot.slane %v9976_v27, 4 }
 0x30f   :  { %v786_v53 = vsel %vm623_vm13, 0.0, %v785_v26  ;;  %v955_v17 = vsel %vm623_vm13, %v785_v26, %v766_v23  ;;  %v1694_v5 = vperm.slane %v1686_v36, %v9699_v7  ;;  %v1695_v50 = vrot.slane %v1690_v63, 4 }
 0x310   :  { %v790_v55 = vsel %vm623_vm13, 0.0, %v789_v35  ;;  %v10144_v51 = vperm.slane %v955_v17, %v9699_v7  ;;  %v960_v37 = vrot.slane %v786_v53, 4  ;;  %v966_v42 = vsel %vm623_vm13, %v789_v35, %v778_v4 }
 0x311   :  { %v971_v41 = vrot.slane %v790_v55, 4  ;;  %v1696_v31 = vsel %vm623_vm13, %v1695_v50, %v9976_v27  ;;  %v1698_v13 = vsel %vm623_vm13, %v1690_v63, %v13576_v48  ;;  %v13577_v23 = vrot.slane %v9813_v20, 4 }
 0x312   :  { %v961_v26 = vsel %vm623_vm13, %v960_v37, %v784_v45  ;;  %v10157_v36 = vperm.slane %v966_v42, %v9699_v7  ;;  %v1702_v53 = vperm.slane %v1696_v31, %v9731_v38  ;;  %v1706_v4 = vperm.slane %v1698_v13, %v9731_v38 }
 0x313   :  { %v1168_v22 = vsel %vm623_vm13, 0.0, %v13577_v23  ;;  %v10162_v35 = vperm.slane %v961_v26, %v9699_v7  ;;  %v972_v27 = vsel %vm623_vm13, %v971_v41, %v788_v46  ;;  %v979_v63 = vrot.slane %v10144_v51, 4 }
 0x314   :  { %v1707_v17 = vrot.slane %v1694_v5, 4  ;;  %v10167_v50 = vperm.slane %v972_v27, %v9699_v7  ;;  %v13578_v45 = vrot.slane %v9962_v58, 4  ;;  %v1719_v37 = vrot.slane %v1702_v53, 4 }
 0x315   :  { %v1721_v42 = vrot.slane %v1706_v4, 4  ;;  %v1628_v46 = vsel %vm623_vm13, %v10100_v60, %v8854_v61  ;;  %v1629_v41 = vrot.slane %v8854_v61, 4  ;;  %v991_v13 = vrot.slane %v10157_v36, 4 }
 0x316   :  { %v1710_v55 = vsel %vm623_vm13, %v1694_v5, %v13578_v45  ;;  %v1708_v31 = vsel %vm623_vm13, %v1707_v17, %v9962_v58  ;;  %v1720_v26 = vsel %vm623_vm13, 0.0, %v1719_v37  ;;  %v13579_v58 = vunpack.i.l.bf16 %v10067_v57 }
 0x317   :  { %v1718_v48 = vperm.slane %v1710_v55, %v9731_v38  ;;  %v1714_v23 = vperm.slane %v1708_v31, %v9731_v38  ;;  %v1722_v27 = vsel %vm623_vm13, 0.0, %v1721_v42  ;;  %v1893_v4 = vsel %vm623_vm13, %v1721_v42, %v1702_v53 }
 0x318   :  { %v1898_v45 = vrot.slane %v1722_v27, 4  ;;  %v1630_v17 = vsel %vm623_vm13, %v13579_v58, %v1629_v41  ;;  %v1634_v61 = vperm.slane %v1628_v46, %v9699_v7  ;;  %v10190_v37 = vperm.slane %v1893_v4, %v9699_v7 }
 0x319   :  { %v1725_v5 = vrot.slane %v1718_v48, 4  ;;  %v1723_v60 = vrot.slane %v1714_v23, 4  ;;  %v1638_v40 = vperm.slane %v1630_v17, %v9699_v7  ;;  %v13580_v27 = vrot.slane %v9780_v33, 4 }
 0x31a   :  { %v10193_v48 = vsel %vm623_vm13, %v1898_v45, %v1720_v26  ;;  %v1639_v41 = vrot.slane %v1634_v61, 4  ;;  %v13581_v58 = vrot.slane %v9983_v54, 4  ;;  %v13582_v4 = vrot.slane %v9970_v29, 4 }
 0x31b   :  { %v1726_v31 = vsel %vm623_vm13, 0.0, %v1725_v5  ;;  %v1904_v53 = vsel %vm623_vm13, %v1725_v5, %v1714_v23  ;;  %v1724_v57 = vsel %vm623_vm13, 0.0, %v1723_v60  ;;  %v1224_v46 = vsel %vm623_vm13, 0.0, %v13580_v27 }
 0x31c   :  { %v1909_v42 = vrot.slane %v1726_v31, 4  ;;  %v1642_v17 = vsel %vm623_vm13, %v1634_v61, %v13581_v58  ;;  %v1651_v55 = vrot.slane %v1638_v40, 4  ;;  %v1654_v26 = vsel %vm623_vm13, %v1638_v40, %v13582_v4 }
 0x31d   :  { %v1343_v23 = vsel %vm623_vm13, %v9793_v15, %v9813_v20  ;;  %v10210_v5 = vperm.slane %v1904_v53, %v9699_v7  ;;  %v1640_v45 = vsel %vm623_vm13, %v1639_v41, %v9983_v54  ;;  %v1650_v60 = vperm.slane %v1642_v17, %v9731_v38 }
 0x31e   :  { %v1662_v31 = vperm.slane %v1654_v26, %v9731_v38  ;;  %v1646_v61 = vperm.slane %v1640_v45, %v9731_v38  ;;  %v1652_v27 = vsel %vm623_vm13, %v1651_v55, %v9970_v29  ;;  %v1347_v40 = vperm.slane %v1343_v23, %v9699_v7 }
 0x31f   :  { %v13583_v58 = vrot.slane %v9822_v2, 4  ;;  %v10224_v20 = vsel %vm623_vm13, %v1909_v42, %v1724_v57  ;;  %v1658_v54 = vperm.slane %v1652_v27, %v9731_v38  ;;  %v1665_v53 = vrot.slane %v1650_v60, 4 }
 0x320   :  { %v1669_v41 = vrot.slane %v1662_v31, 4  ;;  %v1663_v17 = vrot.slane %v1646_v61, 4  ;;  %v1354_v29 = vsel %vm623_vm13, %v9833_v18, %v9816_v49  ;;  %v13584_v55 = vrot.slane %v9850_v59, 4 }
 0x321   :  { %v1349_v15 = vsel %vm623_vm13, %v13583_v58, %v1168_v22  ;;  %v1666_v22 = vsel %vm623_vm13, 0.0, %v1665_v53  ;;  %v1667_v57 = vrot.slane %v1658_v54, 4  ;;  %v1839_v26 = vsel %vm623_vm13, %v1665_v53, %v1646_v61 }
 0x322   :  { %v1353_v4 = vperm.slane %v1349_v15, %v9699_v7  ;;  %v1360_v2 = vsel %vm623_vm13, %v13584_v55, %v9837_v21  ;;  %v1670_v42 = vsel %vm623_vm13, 0.0, %v1669_v41  ;;  %v1664_v23 = vsel %vm623_vm13, 0.0, %v1663_v17 }
 0x323   :  { %v1844_v45 = vrot.slane %v1666_v22, 4  ;;  %v1850_v60 = vsel %vm623_vm13, %v1669_v41, %v1658_v54  ;;  %v1367_v31 = vrot.slane %v1347_v40, 4  ;;  %v1668_v49 = vsel %vm623_vm13, 0.0, %v1667_v57 }
 0x324   :  { %v10242_v18 = vperm.slane %v1839_v26, %v9699_v7  ;;  %v1855_v59 = vrot.slane %v1670_v42, 4  ;;  %v1358_v21 = vperm.slane %v1354_v29, %v9699_v7  ;;  %v10246_v27 = vperm.slane %v1850_v60, %v9699_v7 }
 0x325   :  { %v1364_v58 = vperm.slane %v1360_v2, %v9699_v7  ;;  %v1365_v61 = vrot.slane %v1353_v4, 4  ;;  %v1397_v15 = vsel %vm623_vm13, %v9785_v12, %v9780_v33  ;;  %v10253_v54 = vsel %vm623_vm13, %v1844_v45, %v1664_v23 }
 0x326   :  { %v1379_v53 = vrot.slane %v1358_v21, 4  ;;  %v1401_v41 = vperm.slane %v1397_v15, %v9699_v7  ;;  %v13585_v17 = vrot.slane %v9803_v44, 4  ;;  %v1408_v57 = vsel %vm623_vm13, %v9787_v14, %v9783_v34 }
 0x327   :  { %v1366_v55 = vsel %vm623_vm13, %v1365_v61, %v1347_v40  ;;  %v1377_v22 = vrot.slane %v1364_v58, 4  ;;  %v10265_v33 = vsel %vm623_vm13, %v1855_v59, %v1668_v49  ;;  %v1412_v42 = vperm.slane %v1408_v57, %v9699_v7 }
 0x328   :  { %v1403_v29 = vsel %vm623_vm13, %v13585_v17, %v1224_v46  ;;  %v1372_v12 = vperm.slane %v1366_v55, %v9731_v38  ;;  %v13586_v44 = vrot.slane %v9808_v28, 4  ;;  %v1421_v45 = vrot.slane %v1401_v41, 4 }
 0x329   :  { %v1407_v2 = vperm.slane %v1403_v29, %v9699_v7  ;;  %v1378_v40 = vsel %vm623_vm13, %v1377_v22, %v1358_v21  ;;  %v1433_v14 = vrot.slane %v1412_v42, 4  ;;  %v1368_v49 = vsel %vm623_vm13, %v1353_v4, %v1367_v31 }
 0x32a   :  { %v1414_v46 = vsel %vm623_vm13, %v13586_v44, %v9826_v3  ;;  %v1384_v34 = vperm.slane %v1378_v40, %v9731_v38  ;;  %v1391_v60 = vrot.slane %v1372_v12, 4  ;;  %v1376_v15 = vperm.slane %v1368_v49, %v9731_v38 }
 0x32b   :  { %v1418_v26 = vperm.slane %v1414_v46, %v9699_v7  ;;  %v1419_v23 = vrot.slane %v1407_v2, 4  ;;  %v1380_v28 = vsel %vm623_vm13, %v1364_v58, %v1379_v53  ;;  %v1422_v57 = vsel %vm623_vm13, %v1407_v2, %v1421_v45 }
 0x32c   :  { %v1389_v3 = vrot.slane %v1384_v34, 4  ;;  %v1392_v17 = vsel %vm623_vm13, %v1384_v34, %v1391_v60  ;;  %v1388_v29 = vperm.slane %v1380_v28, %v9731_v38  ;;  %v1430_v40 = vperm.slane %v1422_v57, %v9731_v38 }
 0x32d   :  { %v1420_v59 = vsel %vm623_vm13, %v1419_v23, %v1401_v41  ;;  %v1431_v61 = vrot.slane %v1418_v26, 4  ;;  %v1561_v22 = vpack.c.bf16 %v1392_v17, %v1392_v17  ;;  %v1434_v4 = vsel %vm623_vm13, %v1418_v26, %v1433_v14 }
 0x32e   :  { %v1426_v21 = vperm.slane %v1420_v59, %v9731_v38  ;;  %v1390_v31 = vsel %vm623_vm13, %v1389_v3, %v1372_v12  ;;  %v1393_v53 = vrot.slane %v1388_v29, 4  ;;  %v1442_v23 = vperm.slane %v1434_v4, %v9731_v38 }
 0x32f   :  { %v1432_v55 = vsel %vm623_vm13, %v1431_v61, %v1412_v42  ;;  %v1559_v44 = vpack.c.bf16 %v1390_v31, %v1390_v31  ;;  %v2109_v46 = vunpack.c.l.b16 %v1561_v22  ;;  %v1395_v45 = vrot.slane %v1376_v15, 4 }
 0x330   :  { %v1438_v41 = vperm.slane %v1432_v55, %v9731_v38  ;;  %v1445_v58 = vrot.slane %v1426_v21, 4  ;;  %v1394_v2 = vsel %vm623_vm13, %v1393_v53, %v1376_v15  ;;  %v1447_v12 = vrot.slane %v1442_v23, 4 }
 0x331   :  { %v2078_v26 = vunpack.c.l.b16 %v1559_v44  ;;  %v1563_v60 = vpack.c.bf16 %v1394_v2, %v1394_v2  ;;  %v1396_v59 = vsel %vm623_vm13, %v1388_v29, %v1395_v45  ;;  %v1449_v61 = vrot.slane %v1430_v40, 4 }
 0x332   :  { %v1443_v34 = vrot.slane %v1438_v41, 4  ;;  %v1446_v42 = vsel %vm623_vm13, %v1438_v41, %v1445_v58  ;;  %v847_v28 = vsel %vm623_vm13, %v9924_v19, %v9899_v39  ;;  %v1448_v55 = vsel %vm623_vm13, %v1447_v12, %v1430_v40 }
 0x333   :  { %v1562_v14 = vpack.c.bf16 %v1446_v42, %v1446_v42  ;;  %v2139_v22 = vunpack.c.l.b16 %v1563_v60  ;;  %v1564_v57 = vpack.c.bf16 %v1448_v55, %v1448_v55  ;;  %v1450_v15 = vsel %vm623_vm13, %v1442_v23, %v1449_v61 }
 0x334   :  { %v1444_v49 = vsel %vm623_vm13, %v1443_v34, %v1426_v21  ;;  %v1565_v4 = vpack.c.bf16 %v1396_v59, %v1396_v59  ;;  %v10300_v31 = vperm.slane %v847_v28, %v9699_v7  ;;  %v1566_v29 = vpack.c.bf16 %v1450_v15, %v1450_v15 }
 0x335   :  { %v1560_v3 = vpack.c.bf16 %v1444_v49, %v1444_v49  ;;  %v2110_v17 = vunpack.c.l.b16 %v1562_v14  ;;  %v13587_v58 = vrot.slane %v9930_v11, 4  ;;  %v2140_v19 = vunpack.c.l.b16 %v1564_v57  ;;  %v13589_v57 = vld [vmem:[#allocation18_spill] sm:$0xff] }
 0x336   :  { %v2169_v53 = vunpack.c.l.b16 %v1565_v4  ;;  %v871_v40 = vrot.slane %v10300_v31, 4  ;;  %v2170_v42 = vunpack.c.l.b16 %v1566_v29  ;;  %v881_v2 = vrot.slane %v9954_v25, 4 }
 0x337   :  { %v2079_v21 = vunpack.c.l.b16 %v1560_v3  ;;  %v2111_v41 = vpack.c.b16 %v2110_v17, %v2109_v46  ;;  %v853_v39 = vsel %vm623_vm13, %v13587_v58, %v9936_v6  ;;  %v2141_v46 = vpack.c.b16 %v2140_v19, %v2139_v22 }
 0x338   :  { %v10307_v44 = vperm.slane %v853_v39, %v9699_v7  ;;  %v901_v11 = vsel %vm623_vm13, %v9894_v52, %v9892_v10  ;;  %v13588_v6 = vrot.slane %v9905_v43, 4  ;;  %v2171_v12 = vpack.c.b16 %v2170_v42, %v2169_v53  ;;  %v13592_v39 = vld [vmem:[#allocation19_spill] sm:$0xff] }
 0x339   :  { %v2080_v23 = vpack.c.b16 %v2079_v21, %v2078_v26  ;;  %v2116_v34 = vsel %vm2081_vm14, %v2111_v41, 0  ;;  %v882_v60 = vsel %vm623_vm13, %v881_v2, %v9943_v1  ;;  %v10324_v49 = vperm.slane %v901_v11, %v9699_v7  ;;  %v13591_v21 = vld [vmem:[#allocation12_spill] sm:$0xff] }
 0x33a   :  { %2125 = vmatpush.bf16.xpose.msrb.mxu3 %v2116_v34  ;;  %v869_v45 = vrot.slane %v10307_v44, 4  ;;  %v907_v14 = vsel %vm623_vm13, %v13588_v6, %v9918_v24  ;;  %v2146_v59 = vsel %vm2081_vm14, %v2141_v46, 0  ;;  %v888_v52 = vperm.slane %v882_v60, %v9731_v38  ;;  %v13593_v46 = vld [vmem:[#allocation20_spill] sm:$0xff] }
 0x33b   :  { %v2086_v26 = vsel %vm2081_vm14, %v2080_v23, 0  ;;  %v10331_v43 = vperm.slane %v907_v14, %v9699_v7  ;;  %v2176_v24 = vsel %vm2081_vm14, %v2171_v12, 0  ;;  %v925_v28 = vrot.slane %v10324_v49, 4 }
 0x33c   :  { %2095 = vmatpush.bf16.xpose.msrb.mxu1 %v2086_v26  ;;  %v870_v10 = vsel %vm623_vm13, %v869_v45, %v10300_v31  ;;  %v935_v3 = vrot.slane %v9922_v8, 4  ;;  %v893_v17 = vrot.slane %v888_v52, 4  ;;  %v1455_v22 = vperm.slane %v10044_v47, %v9699_v7 }
 0x33d   :  { %v876_v61 = vperm.slane %v870_v10, %v9731_v38  ;;  %v923_v55 = vrot.slane %v10331_v43, 4  ;;  %v13590_v15 = vrot.slane %v13589_v57, 4  ;;  %v1487_v19 = vrot.slane %v13592_v39, 4  ;;  %v13594_v10 = vld [vmem:[#allocation16_spill] sm:$0xff] }
 0x33e   :  { %v936_v41 = vsel %vm623_vm13, %v935_v3, %v13591_v21  ;;  %v1475_v34 = vrot.slane %v1455_v22, 4  ;;  %v926_v31 = vsel %vm623_vm13, %v10331_v43, %v925_v28 }
 0x33f   :  { %v1457_v4 = vsel %vm623_vm13, %v13590_v15, %v10036_v30  ;;  %v895_v29 = vrot.slane %v876_v61, 4  ;;  %v894_v53 = vsel %vm623_vm13, %v893_v17, %v876_v61  ;;  %v924_v23 = vsel %vm623_vm13, %v923_v55, %v10324_v49  ;;  %v13595_v17 = vld [vmem:[#allocation13_spill] sm:$0xff]  ;;  %v13596_v55 = vld [vmem:[#allocation14_spill] sm:$0xff] }
 0x340   :  { %v1461_v58 = vperm.slane %v1457_v4, %v9699_v7  ;;  %v942_v47 = vperm.slane %v936_v41, %v9731_v38  ;;  %v930_v42 = vperm.slane %v924_v23, %v9731_v38  ;;  %v1063_v2 = vpack.c.bf16 %v894_v53, %v894_v53 }
 0x341   :  { %v896_v30 = vsel %vm623_vm13, %v888_v52, %v895_v29  ;;  %v1488_v45 = vsel %vm623_vm13, %v13593_v46, %v1487_v19  ;;  %v13597_v57 = vrot.slane %v13596_v55, 4  ;;  %v13601_v49 = vrot.slane %v13591_v21, 4 }
 0x342   :  { %2155 = vmatpush.bf16.xpose.msra.mxu3 %v2146_v59  ;;  %v947_v11 = vrot.slane %v942_v47, 4  ;;  %v1065_v6 = vpack.c.bf16 %v896_v30, %v896_v30  ;;  %v1476_v14 = vsel %vm623_vm13, %v1461_v58, %v1475_v34  ;;  %v1496_v26 = vperm.slane %v1488_v45, %v9731_v38  ;;  %v13598_v34 = vld [vmem:[#allocation15_spill] sm:$0xff] }
 0x343   :  { %v2073_v12 = vunpack.c.l.b16 %v1063_v2  ;;  %v949_v60 = vrot.slane %v930_v42, 4  ;;  %v1484_v59 = vperm.slane %v1476_v14, %v9731_v38  ;;  %v1511_v15 = vsel %vm623_vm13, %v13597_v57, %v13595_v17 }
 0x344   :  { %2185 = vmatpush.bf16.xpose.msra.mxu1 %v2176_v24  ;;  %v1509_v24 = vperm.slane %v13594_v10, %v9699_v7  ;;  %v948_v61 = vsel %vm623_vm13, %v947_v11, %v930_v42  ;;  %v2104_v3 = vunpack.c.l.b16 %v1065_v6  ;;  %v1501_v52 = vrot.slane %v1496_v26, 4 }
 0x345   :  { %v1064_v4 = vpack.c.bf16 %v948_v61, %v948_v61  ;;  %v950_v41 = vsel %vm623_vm13, %v942_v47, %v949_v60  ;;  %v1515_v29 = vperm.slane %v1511_v15, %v9699_v7  ;;  %v1541_v2 = vrot.slane %v13598_v34, 4  ;;  %v13599_v61 = vld [vmem:[#allocation17_spill] sm:$0xff] }
 0x346   :  { %v1529_v19 = vrot.slane %v1509_v24, 4  ;;  %v1066_v53 = vpack.c.bf16 %v950_v41, %v950_v41  ;;  %v1502_v23 = vsel %vm623_vm13, %v1501_v52, %v1484_v59  ;;  %v1473_v30 = vrot.slane %v1461_v58, 4 }
 0x347   :  { %v2074_v42 = vunpack.c.l.b16 %v1064_v4  ;;  %v1571_v11 = vpack.c.bf16 %v1502_v23, %v1502_v23  ;;  %v1485_v6 = vrot.slane %v13593_v46, 4  ;;  %v1542_v47 = vsel %vm623_vm13, %v13599_v61, %v1541_v2 }
 0x348   :  { %v1530_v45 = vsel %vm623_vm13, %v1515_v29, %v1529_v19  ;;  %v2105_v14 = vunpack.c.l.b16 %v1066_v53  ;;  %v1474_v60 = vsel %vm623_vm13, %v1473_v30, %v1455_v22  ;;  %v1550_v52 = vperm.slane %v1542_v47, %v9731_v38 }
 0x349   :  { %v1538_v10 = vperm.slane %v1530_v45, %v9731_v38  ;;  %v2075_v17 = vpack.c.b16 %v2074_v42, %v2073_v12  ;;  %v2259_v55 = vunpack.c.l.b16 %v1571_v11  ;;  %v1480_v58 = vperm.slane %v1474_v60, %v9731_v38 }
 0x34a   :  { %v2106_v57 = vpack.c.b16 %v2105_v14, %v2104_v3  ;;  %v1486_v15 = vsel %vm623_vm13, %v1485_v6, %v13592_v39  ;;  %v1527_v4 = vrot.slane %v1515_v29, 4  ;;  %v1539_v46 = vrot.slane %v13599_v61, 4 }
 0x34b   :  { %8082 = vmatmul.msk.bf16.vlgmr.msrb.gmra.mxu1 %vm2081_vm14, %v2075_v17  ;;  %v1555_v41 = vrot.slane %v1550_v52, 4  ;;  %v1492_v19 = vperm.slane %v1486_v15, %v9731_v38  ;;  %v1499_v53 = vrot.slane %v1480_v58, 4  ;;  %v1503_v22 = vrot.slane %v1484_v59, 4 }
 0x34c   :  { %8083 = vmatmul.msk.bf16.vlgmr.msrb.gmra.mxu3 %vm2081_vm14, %v2106_v57  ;;  %v1528_v12 = vsel %vm623_vm13, %v1527_v4, %v1509_v24  ;;  %v1540_v3 = vsel %vm623_vm13, %v1539_v46, %v13598_v34  ;;  %v1557_v23 = vrot.slane %v1538_v10, 4  ;;  %v980_v39 = vsel %vm623_vm13, %v10162_v35, %v979_v63 }
 0x34d   :  { %v1556_v29 = vsel %vm623_vm13, %v1555_v41, %v1538_v10  ;;  %v1497_v2 = vrot.slane %v1492_v19, 4  ;;  %v1534_v30 = vperm.slane %v1528_v12, %v9731_v38  ;;  %v1546_v59 = vperm.slane %v1540_v3, %v9731_v38 }
 0x34e   :  { %v1572_v42 = vpack.c.bf16 %v1556_v29, %v1556_v29  ;;  %v1504_v45 = vsel %vm623_vm13, %v1496_v26, %v1503_v22  ;;  %v1558_v24 = vsel %vm623_vm13, %v1550_v52, %v1557_v23  ;;  %v1500_v34 = vsel %vm623_vm13, %v1492_v19, %v1499_v53 }
 0x34f   :  { %v1498_v11 = vsel %vm623_vm13, %v1497_v2, %v1480_v58  ;;  %v1551_v6 = vrot.slane %v1546_v59, 4  ;;  %v1553_v14 = vrot.slane %v1534_v30, 4  ;;  %v1573_v61 = vpack.c.bf16 %v1504_v45, %v1504_v45 }
 0x350   :  { %v2260_v63 = vunpack.c.l.b16 %v1572_v42  ;;  %v1567_v47 = vpack.c.bf16 %v1498_v11, %v1498_v11  ;;  %v1574_v10 = vpack.c.bf16 %v1558_v24, %v1558_v24  ;;  %v1569_v60 = vpack.c.bf16 %v1500_v34, %v1500_v34 }
 0x351   :  { %v1552_v17 = vsel %vm623_vm13, %v1551_v6, %v1534_v30  ;;  %v2289_v57 = vunpack.c.l.b16 %v1573_v61  ;;  %v1554_v15 = vsel %vm623_vm13, %v1546_v59, %v1553_v14  ;;  %v10401_v26 = vperm.slane %v980_v39, %v9731_v38 }
 0x352   :  { %v2261_v52 = vpack.c.b16 %v2260_v63, %v2259_v55  ;;  %v1568_v4 = vpack.c.bf16 %v1552_v17, %v1552_v17  ;;  %v2199_v46 = vunpack.c.l.b16 %v1567_v47  ;;  %v2290_v41 = vunpack.c.l.b16 %v1574_v10 }
 0x353   :  { %v1570_v58 = vpack.c.bf16 %v1554_v15, %v1554_v15  ;;  %v2229_v19 = vunpack.c.l.b16 %v1569_v60  ;;  %v992_v53 = vsel %vm623_vm13, %v10167_v50, %v991_v13  ;;  %v1034_v22 = vsel %vm623_vm13, %v10130_v16, %v1033_v56 }
 0x354   :  { %v2266_v12 = vsel %vm2081_vm14, %v2261_v52, 0  ;;  %v2200_v3 = vunpack.c.l.b16 %v1568_v4  ;;  %v2291_v23 = vpack.c.b16 %v2290_v41, %v2289_v57  ;;  %v10413_v55 = vperm.slane %v992_v53, %v9731_v38 }
 0x355   :  { %2275 = vmatpush.bf16.xpose.msra.mxu0 %v2266_v12  ;;  %v2230_v39 = vunpack.c.l.b16 %v1570_v58  ;;  %v10416_v29 = vperm.slane %v1034_v22, %v9731_v38  ;;  %v1046_v13 = vsel %vm623_vm13, %v10124_v32, %v1045_v62  ;;  %v872_v56 = vsel %vm623_vm13, %v10307_v44, %v871_v40 }
 0x356   :  { %v2201_v2 = vpack.c.b16 %v2200_v3, %v2199_v46  ;;  %v2296_v30 = vsel %vm2081_vm14, %v2291_v23, 0  ;;  %v1005_v59 = vrot.slane %v10413_v55, 4  ;;  %v10429_v42 = vperm.slane %v1046_v13, %v9731_v38 }
 0x357   :  { %2305 = vmatpush.bf16.xpose.msrb.mxu1 %v2296_v30  ;;  %v2231_v45 = vpack.c.b16 %v2230_v39, %v2229_v19  ;;  %v880_v24 = vperm.slane %v872_v56, %v9731_v38  ;;  %v13600_v34 = vrot.slane %v9943_v1, 4  ;;  %v938_v43 = vsel %vm623_vm13, %v9922_v8, %v13601_v49 }
 0x358   :  { %v2206_v44 = vsel %vm2081_vm14, %v2201_v2, 0  ;;  %v1006_v40 = vsel %vm623_vm13, %v1005_v59, %v10401_v26  ;;  %v1059_v11 = vrot.slane %v10429_v42, 4  ;;  %v946_v63 = vperm.slane %v938_v43, %v9731_v38 }
 0x359   :  { %v884_v62 = vsel %vm623_vm13, %v9954_v25, %v13600_v34  ;;  %2215 = vmatpush.bf16.xpose.msrb.mxu2 %v2206_v44  ;;  %v2236_v1 = vsel %vm2081_vm14, %v2231_v45, 0  ;;  %v1075_v14 = vpack.c.bf16 %v1006_v40, %v1006_v40  ;;  %v934_v25 = vperm.slane %v926_v31, %v9731_v38 }
 0x35a   :  { %v892_v6 = vperm.slane %v884_v62, %v9731_v38  ;;  %2245 = vmatpush.bf16.xpose.msrb.mxu3 %v2236_v1  ;;  %v1060_v28 = vsel %vm623_vm13, %v1059_v11, %v10416_v29  ;;  %v899_v47 = vrot.slane %v880_v24, 4  ;;  %v977_v57 = vrot.slane %v10162_v35, 4 }
 0x35b   :  { %v1076_v10 = vpack.c.bf16 %v1060_v28, %v1060_v28  ;;  %v2254_v60 = vunpack.c.l.b16 %v1075_v14  ;;  %v953_v17 = vrot.slane %v934_v25, 4  ;;  %v951_v52 = vrot.slane %v946_v63, 4 }
 0x35c   :  { %v897_v61 = vrot.slane %v892_v6, 4  ;;  %v900_v21 = vsel %vm623_vm13, %v892_v6, %v899_v47  ;;  %v13602_v8 = vrot.slane %v10167_v50, 4  ;;  %v978_v35 = vsel %vm623_vm13, %v977_v57, %v10144_v51 }
 0x35d   :  { %v2255_v46 = vunpack.c.l.b16 %v1076_v10  ;;  %v954_v58 = vsel %vm623_vm13, %v946_v63, %v953_v17  ;;  %v1069_v19 = vpack.c.bf16 %v900_v21, %v900_v21  ;;  %v952_v53 = vsel %vm623_vm13, %v951_v52, %v934_v25 }
 0x35e   :  { %v898_v15 = vsel %vm623_vm13, %v897_v61, %v880_v24  ;;  %v990_v4 = vsel %vm623_vm13, %v13602_v8, %v10157_v36  ;;  %v1070_v22 = vpack.c.bf16 %v954_v58, %v954_v58  ;;  %v1068_v23 = vpack.c.bf16 %v952_v53, %v952_v53 }
 0x35f   :  { %v1067_v41 = vpack.c.bf16 %v898_v15, %v898_v15  ;;  %v10466_v12 = vperm.slane %v990_v4, %v9731_v38  ;;  %v2256_v3 = vpack.c.b16 %v2255_v46, %v2254_v60  ;;  %v2164_v50 = vunpack.c.l.b16 %v1069_v19 }
 0x360   :  { %v2165_v13 = vunpack.c.l.b16 %v1070_v22  ;;  %v10469_v36 = vperm.slane %v978_v35, %v9731_v38  ;;  %v1031_v2 = vrot.slane %v10130_v16, 4  ;;  %v2135_v30 = vunpack.c.l.b16 %v1068_v23 }
 0x361   :  { %v2134_v39 = vunpack.c.l.b16 %v1067_v41  ;;  %v1001_v56 = vrot.slane %v10466_v12, 4  ;;  %8088 = vmatmul.msk.bf16.vlgmr.msra.gmra.mxu0 %vm2081_vm14, %v2256_v3  ;;  %v13603_v51 = vrot.slane %v10124_v32, 4  ;;  %v1849_v45 = vperm.slane %v10253_v54, %v9699_v7 }
 0x362   :  { %v1860_v24 = vperm.slane %v10265_v33, %v9699_v7  ;;  %v2166_v34 = vpack.c.b16 %v2165_v13, %v2164_v50  ;;  %v1003_v16 = vrot.slane %v10469_v36, 4  ;;  %v1032_v31 = vsel %vm623_vm13, %v1031_v2, %v10112_v0 }
 0x363   :  { %v1044_v59 = vsel %vm623_vm13, %v13603_v51, %v10115_v9  ;;  %v1002_v62 = vsel %vm623_vm13, %v1001_v56, %v10469_v36  ;;  %v2136_v44 = vpack.c.b16 %v2135_v30, %v2134_v39  ;;  %v10488_v32 = vperm.slane %v1032_v31, %v9731_v38 }
 0x364   :  { %v1050_v9 = vperm.slane %v1044_v59, %v9731_v38  ;;  %v1071_v40 = vpack.c.bf16 %v1002_v62, %v1002_v62  ;;  %8085 = vmatmul.msk.bf16.vlgmr.msra.gmra.mxu1 %vm2081_vm14, %v2166_v34  ;;  %v1863_v54 = vrot.slane %v10242_v18, 4  ;;  %v1875_v33 = vrot.slane %v10246_v27, 4 }
 0x365   :  { %v1903_v11 = vperm.slane %v10193_v48, %v9699_v7  ;;  %v1914_v6 = vperm.slane %v10224_v20, %v9699_v7  ;;  %8084 = vmatmul.msk.bf16.vlgmr.msra.gmra.mxu3 %vm2081_vm14, %v2136_v44  ;;  %v1057_v1 = vrot.slane %v10488_v32, 4  ;;  %v1917_v25 = vrot.slane %v10190_v37, 4 }
 0x366   :  { %v1055_v0 = vrot.slane %v1050_v9, 4  ;;  %v2194_v14 = vunpack.c.l.b16 %v1071_v40  ;;  %v1864_v49 = vsel %vm623_vm13, %v1849_v45, %v1863_v54  ;;  %v1876_v43 = vsel %vm623_vm13, %v1860_v24, %v1875_v33 }
 0x367   :  { %v1929_v28 = vrot.slane %v10210_v5, 4  ;;  %v1861_v61 = vrot.slane %v1849_v45, 4  ;;  %v1872_v20 = vperm.slane %v1864_v49, %v9731_v38  ;;  %v1884_v63 = vperm.slane %v1876_v43, %v9731_v38 }
 0x368   :  { %v1056_v48 = vsel %vm623_vm13, %v1055_v0, %v10488_v32  ;;  %v1918_v47 = vsel %vm623_vm13, %v1903_v11, %v1917_v25  ;;  %v1873_v41 = vrot.slane %v1860_v24, 4  ;;  %v1915_v58 = vrot.slane %v1903_v11, 4 }
 0x369   :  { %v1072_v10 = vpack.c.bf16 %v1056_v48, %v1056_v48  ;;  %v1926_v60 = vperm.slane %v1918_v47, %v9731_v38  ;;  %v1930_v17 = vsel %vm623_vm13, %v1914_v6, %v1929_v28  ;;  %v1862_v57 = vsel %vm623_vm13, %v1861_v61, %v10242_v18 }
 0x36a   :  { %v1889_v15 = vrot.slane %v1884_v63, 4  ;;  %v1938_v52 = vperm.slane %v1930_v17, %v9731_v38  ;;  %v1891_v21 = vrot.slane %v1872_v20, 4  ;;  %v1868_v8 = vperm.slane %v1862_v57, %v9731_v38 }
 0x36b   :  { %v2195_v4 = vunpack.c.l.b16 %v1072_v10  ;;  %v1945_v46 = vrot.slane %v1926_v60, 4  ;;  %v1927_v35 = vrot.slane %v1914_v6, 4  ;;  %v1874_v36 = vsel %vm623_vm13, %v1873_v41, %v10246_v27 }
 0x36c   :  { %v1890_v19 = vsel %vm623_vm13, %v1889_v15, %v1872_v20  ;;  %v1943_v53 = vrot.slane %v1938_v52, 4  ;;  %v1892_v22 = vsel %vm623_vm13, %v1884_v63, %v1891_v21  ;;  %v1916_v56 = vsel %vm623_vm13, %v1915_v58, %v10190_v37 }
 0x36d   :  { %v2196_v3 = vpack.c.b16 %v2195_v4, %v2194_v14  ;;  %v2059_v23 = vpack.c.bf16 %v1890_v19, %v1890_v19  ;;  %v1946_v18 = vsel %vm623_vm13, %v1938_v52, %v1945_v46  ;;  %v2061_v39 = vpack.c.bf16 %v1892_v22, %v1892_v22 }
 0x36e   :  { %v1944_v50 = vsel %vm623_vm13, %v1943_v53, %v1926_v60  ;;  %v2062_v13 = vpack.c.bf16 %v1946_v18, %v1946_v18  ;;  %v1880_v59 = vperm.slane %v1874_v36, %v9731_v38  ;;  %v1922_v24 = vperm.slane %v1916_v56, %v9731_v38  ;;  %v579_v53 = vpop.f32.mrf.mxu0 }
 0x36f   :  { %8086 = vmatmul.msk.bf16.vlgmr.msrb.gmra.mxu2 %vm2081_vm14, %v2196_v3  ;;  %v2060_v2 = vpack.c.bf16 %v1944_v50, %v1944_v50  ;;  %v2776_v30 = vunpack.c.l.b16 %v2059_v23  ;;  %v2804_v51 = vunpack.c.l.b16 %v2061_v39  ;;  %v1928_v34 = vsel %vm623_vm13, %v1927_v35, %v10210_v5 }
 0x370   :  { %v2805_v45 = vunpack.c.l.b16 %v2062_v13  ;;  %v1887_v62 = vrot.slane %v1868_v8, 4  ;;  %v1885_v44 = vrot.slane %v1880_v59, 4  ;;  %v1934_v27 = vperm.slane %v1928_v34, %v9731_v38 }
 0x371   :  { %v2777_v31 = vunpack.c.l.b16 %v2060_v2  ;;  %v1004_v37 = vsel %vm623_vm13, %v10466_v12, %v1003_v16  ;;  %v1941_v54 = vrot.slane %v1922_v24, 4  ;;  %v1058_v33 = vsel %vm623_vm13, %v1050_v9, %v1057_v1 }
 0x372   :  { %v2806_v32 = vpack.c.b16 %v2805_v45, %v2804_v51  ;;  %v1888_v40 = vsel %vm623_vm13, %v1880_v59, %v1887_v62  ;;  %v1886_v6 = vsel %vm623_vm13, %v1885_v44, %v1868_v8  ;;  %v1939_v0 = vrot.slane %v1934_v27, 4 }
 0x373   :  { %v2778_v11 = vpack.c.b16 %v2777_v31, %v2776_v30  ;;  %v2057_v14 = vpack.c.bf16 %v1888_v40, %v1888_v40  ;;  %v2055_v5 = vpack.c.bf16 %v1886_v6, %v1886_v6  ;;  %v1942_v25 = vsel %vm623_vm13, %v1934_v27, %v1941_v54 }
 0x374   :  { %2818 = vmatpush.bf16.msra.mxu1 %v2806_v32  ;;  %v1073_v49 = vpack.c.bf16 %v1004_v37, %v1004_v37  ;;  %v1074_v43 = vpack.c.bf16 %v1058_v33, %v1058_v33  ;;  %v1940_v12 = vsel %vm623_vm13, %v1939_v0, %v1922_v24  ;;  %v2058_v16 = vpack.c.bf16 %v1942_v25, %v1942_v25  ;;  %v13605_v0 = vld [vmem:[#allocation11_spill] sm:$0xff] }
 0x375   :  { %2790 = vmatpush.bf16.msrb.mxu0 %v2778_v11  ;;  %v2748_v28 = vunpack.c.l.b16 %v2057_v14  ;;  %v1007_v61 = vrot.slane %v10401_v26, 4  ;;  %v2056_v48 = vpack.c.bf16 %v1940_v12, %v1940_v12  ;;  %v2720_v9 = vunpack.c.l.b16 %v2055_v5  ;;  %v13604_v11 = vld [vmem:[#allocation10_spill] sm:$0xff] }
 0x376   :  { %v2224_v1 = vunpack.c.l.b16 %v1073_v49  ;;  %v2225_v20 = vunpack.c.l.b16 %v1074_v43  ;;  %v2749_v63 = vunpack.c.l.b16 %v2058_v16  ;;  %v1061_v10 = vrot.slane %v10416_v29, 4 }
 0x377   :  { %v1008_v47 = vsel %vm623_vm13, %v10413_v55, %v1007_v61  ;;  %v2721_v60 = vunpack.c.l.b16 %v2056_v48  ;;  %v10600_v6 = vadd.f32 %v579_v53, %v13604_v11 }
 0x378   :  { %v2226_v17 = vpack.c.b16 %v2225_v20, %v2224_v1  ;;  %v1077_v57 = vpack.c.bf16 %v1008_v47, %v1008_v47  ;;  %v2750_v15 = vpack.c.b16 %v2749_v63, %v2748_v28  ;;  %v1062_v52 = vsel %vm623_vm13, %v10429_v42, %v1061_v10 }
 0x379   :  { %v2722_v21 = vpack.c.b16 %v2721_v60, %v2720_v9  ;;  %v1078_v26 = vpack.c.bf16 %v1062_v52, %v1062_v52  ;;  %v8866_v14 = vpack.i.bf16 %v10600_v6, %v13605_v0 }
 0x37a   :  { %8087 = vmatmul.msk.bf16.vlgmr.msrb.gmra.mxu3 %vm2081_vm14, %v2226_v17  ;;  %v2284_v8 = vunpack.c.l.b16 %v1077_v57 }
 0x37b   :  { %2762 = vmatpush.bf16.msra.mxu3 %v2750_v15  ;;  %2734 = vmatpush.bf16.msra.mxu2 %v2722_v21  ;;  %v2285_v4 = vunpack.c.l.b16 %v1078_v26 }
 0x37d   :  { %v2286_v46 = vpack.c.b16 %v2285_v4, %v2284_v8 }
 0x37f   :  { %8089 = vmatmul.msk.bf16.vlgmr.msrb.gmra.mxu1 %vm2081_vm14, %v2286_v46 }
 0x3c8   :  { %v2097_v55 = vpop.f32.mrf.mxu1 }
 0x3c9   :  { %v2313_v29 = vsel %vm2312_vm15, %v2097_v55, -inf }
 0x3ca   :  { %2314 = vmax.xlane.f32.xlu1 %v2313_v29 }
 0x3cf   :  { %v2127_v41 = vpop.f32.mrf.mxu3 }
 0x3d0   :  { %v2319_v58 = vsel %vm2312_vm15, %v2127_v41, -inf  ;;  %v2099_v42 = vpop.f32.mrf.mxu1 }
 0x3d1   :  { %2320 = vmax.xlane.f32.xlu2 %v2319_v58  ;;  %v2316_v19 = vsel %vm2312_vm15, %v2099_v42, -inf }
 0x3d2   :  { %2317 = vmax.xlane.f32.xlu0 %v2316_v19 }
 0x3d7   :  { %v10547_v22 = vpop.f32.mrf.mxu3 }
 0x3d8   :  { %v2322_v18 = vsel %vm2312_vm15, %v10547_v22, -inf }
 0x3de   :  { %v10549_v35 = vpop.f32.mrf.mxu0 }
 0x3df   :  { %v2349_v3 = vsel %vm2312_vm15, %v10549_v35, -inf }
 0x3e0   :  { %2350 = vmax.xlane.f32.xlu1 %v2349_v3 }
 0x3e1   :  { %v10559_v50 = vpop.f32.mrf.mxu1 }
 0x3e2   :  { %v2331_v56 = vsel %vm2312_vm15, %v10559_v50, -inf }
 0x3e6   :  { %v10553_v23 = vpop.f32.mrf.mxu0 }
 0x3e7   :  { %v2352_v39 = vsel %vm2312_vm15, %v10553_v23, -inf }
 0x3e8   :  { %v10561_v13 = vpop.f32.mrf.mxu3  ;;  %2323 = vmax.xlane.f32.xlu1 %v2322_v18  ;;  %2353 = vmax.xlane.f32.xlu0 %v2352_v39 }
 0x3e9   :  { %v2325_v36 = vsel %vm2312_vm15, %v10561_v13, -inf  ;;  %v10571_v51 = vpop.f32.mrf.mxu1 }
 0x3ea   :  { %v2334_v45 = vsel %vm2312_vm15, %v10571_v51, -inf }
 0x3f0   :  { %2326 = vmax.xlane.f32.xlu0 %v2325_v36  ;;  %2332 = vmax.xlane.f32.xlu1 %v2331_v56  ;;  %v10573_v59 = vpop.f32.mrf.mxu3 }
 0x3f1   :  { %v2328_v24 = vsel %vm2312_vm15, %v10573_v59, -inf }
 0x3f2   :  { %v10567_v2 = vpop.f32.mrf.mxu2 }
 0x3f3   :  { %v2337_v30 = vsel %vm2312_vm15, %v10567_v2, -inf }
 0x3f4   :  { %2338 = vmax.xlane.f32.xlu2 %v2337_v30 }
 0x3f8   :  { %2335 = vmax.xlane.f32.xlu0 %v2334_v45 }
 0x3fa   :  { %v10579_v34 = vpop.f32.mrf.mxu2 }
 0x3fb   :  { %v2340_v62 = vsel %vm2312_vm15, %v10579_v34, -inf }
 0x3fc   :  { %2329 = vmax.xlane.f32.xlu2 %v2328_v24  ;;  %2341 = vmax.xlane.f32.xlu1 %v2340_v62  ;;  %v10583_v31 = vpop.f32.mrf.mxu1 }
 0x3fd   :  { %v10585_v44 = vpop.f32.mrf.mxu3  ;;  %v2355_v37 = vsel %vm2312_vm15, %v10583_v31, -inf }
 0x3fe   :  { %v2343_v27 = vsel %vm2312_vm15, %v10585_v44, -inf }
 0x400   :  { %2344 = vmax.xlane.f32.xlu0 %v2343_v27 }
 0x404   :  { %2356 = vmax.xlane.f32.xlu2 %v2355_v37  ;;  %v10591_v32 = vpop.f32.mrf.mxu1 }
 0x405   :  { %v10593_v40 = vpop.f32.mrf.mxu3  ;;  %v2358_v54 = vsel %vm2312_vm15, %v10591_v32, -inf }
 0x406   :  { %2359 = vmax.xlane.f32.xlu1 %v2358_v54  ;;  %v2346_v33 = vsel %vm2312_vm15, %v10593_v40, -inf }
 0x40c   :  { %2347 = vmax.xlane.f32.xlu2 %v2346_v33 }
 0x414   :  { %8867 = vrot.lane.b32.xlu0 %v8866_v14, %s9274_s29 }
 0x41f   :  { %8872 = vrot.lane.b32.xlu1 %v8866_v14, %s9276_s18 }
 0x424   :  { %8877 = vrot.lane.b32.xlu2 %v8866_v14, %s9275_s0 }
 0x43d   :  { %v2315_v5 = vpop.xlane.xlu1 %2314 }
 0x43e   :  { %v2361_v25 = vsub.f32 %v2097_v55, %v2315_v5 }
 0x440   :  { %v2377_v49 = vmul.f32 1.442695, %v2361_v25 }
 0x442   :  { %9055 = vpow2.f32 %v2377_v49 }
 0x444   :  { %v2321_v43 = vpop.xlane.xlu2 %2320 }
 0x445   :  { %v2363_v12 = vsub.f32 %v2127_v41, %v2321_v43  ;;  %v2318_v16 = vpop.xlane.xlu0 %2317 }
 0x446   :  { %v2362_v28 = vsub.f32 %v2099_v42, %v2318_v16 }
 0x447   :  { %v2381_v61 = vmul.f32 1.442695, %v2363_v12 }
 0x448   :  { %v10607_v48 = vpop.eup %9055  ;;  %v2379_v9 = vmul.f32 1.442695, %v2362_v28 }
 0x449   :  { %9057 = vpow2.f32 %v2381_v61  ;;  %v2409_v1 = vsel %vm2312_vm15, %v10607_v48, 0.0 }
 0x44a   :  { %9059 = vpow2.f32 %v2379_v9  ;;  %2410 = vadd.xlane.f32.xlu0 %v2409_v1 }
 0x44f   :  { %v10611_v20 = vpop.eup %9057 }
 0x450   :  { %v10613_v63 = vpop.eup %9059  ;;  %v2415_v47 = vsel %vm2312_vm15, %v10611_v20, 0.0 }
 0x451   :  { %2416 = vadd.xlane.f32.xlu1 %v2415_v47  ;;  %v2412_v10 = vsel %vm2312_vm15, %v10613_v63, 0.0 }
 0x452   :  { %2413 = vadd.xlane.f32.xlu2 %v2412_v10 }
 0x453   :  { %v2351_v60 = vpop.xlane.xlu1 %2350 }
 0x454   :  { %v2373_v17 = vsub.f32 %v10549_v35, %v2351_v60 }
 0x456   :  { %v2401_v57 = vmul.f32 1.442695, %v2373_v17 }
 0x458   :  { %9061 = vpow2.f32 %v2401_v57 }
 0x45b   :  { %v2324_v15 = vpop.xlane.xlu1 %2323  ;;  %v10620_v52 = vpop.xlane.xlu0 %2353 }
 0x45c   :  { %v2364_v21 = vsub.f32 %v10547_v22, %v2324_v15 }
 0x45e   :  { %v10623_v26 = vpop.eup %9061  ;;  %v2383_v8 = vmul.f32 1.442695, %v2364_v21 }
 0x45f   :  { %v2445_v4 = vsel %vm2312_vm15, %v10623_v26, 0.0 }
 0x460   :  { %9063 = vpow2.f32 %v2383_v8  ;;  %2446 = vadd.xlane.f32.xlu1 %v2445_v4 }
 0x463   :  { %v2327_v46 = vpop.xlane.xlu0 %2326  ;;  %v2333_v55 = vpop.xlane.xlu1 %2332 }
 0x464   :  { %v2365_v29 = vsub.f32 %v10561_v13, %v2327_v46  ;;  %v2367_v41 = vsub.f32 %v10559_v50, %v2333_v55 }
 0x466   :  { %v10629_v58 = vpop.eup %9063  ;;  %v2385_v19 = vmul.f32 1.442695, %v2365_v29  ;;  %v2389_v53 = vmul.f32 1.442695, %v2367_v41 }
 0x467   :  { %v2339_v42 = vpop.xlane.xlu2 %2338  ;;  %v2418_v35 = vsel %vm2312_vm15, %v10629_v58, 0.0 }
 0x468   :  { %v2369_v22 = vsub.f32 %v10567_v2, %v2339_v42  ;;  %9065 = vpow2.f32 %v2385_v19  ;;  %2419 = vadd.xlane.f32.xlu0 %v2418_v35 }
 0x469   :  { %9067 = vpow2.f32 %v2389_v53 }
 0x46a   :  { %v2393_v3 = vmul.f32 1.442695, %v2369_v22 }
 0x46b   :  { %v2336_v18 = vpop.xlane.xlu0 %2335 }
 0x46c   :  { %9069 = vpow2.f32 %v2393_v3  ;;  %v2368_v39 = vsub.f32 %v10571_v51, %v2336_v18 }
 0x46e   :  { %v10635_v13 = vpop.eup %9065  ;;  %v2391_v56 = vmul.f32 1.442695, %v2368_v39 }
 0x46f   :  { %v2330_v50 = vpop.xlane.xlu2 %2329  ;;  %v2342_v36 = vpop.xlane.xlu1 %2341  ;;  %v2421_v24 = vsel %vm2312_vm15, %v10635_v13, 0.0 }
 0x470   :  { %v10637_v30 = vpop.eup %9067  ;;  %v2366_v2 = vsub.f32 %v10573_v59, %v2330_v50  ;;  %v2370_v45 = vsub.f32 %v10579_v34, %v2342_v36  ;;  %9071 = vpow2.f32 %v2391_v56  ;;  %2422 = vadd.xlane.f32.xlu2 %v2421_v24  ;;  %v1785_v24 = vrot.slane %v10600_v6, 4 }
 0x471   :  { %v2427_v62 = vsel %vm2312_vm15, %v10637_v30, 0.0 }
 0x472   :  { %v10645_v51 = vpop.eup %9069  ;;  %v2387_v27 = vmul.f32 1.442695, %v2366_v2  ;;  %v2395_v37 = vmul.f32 1.442695, %v2370_v45  ;;  %2428 = vadd.xlane.f32.xlu1 %v2427_v62  ;;  %v1729_v45 = vrot.slane %v13605_v0, 4 }
 0x473   :  { %v2433_v54 = vsel %vm2312_vm15, %v10645_v51, 0.0  ;;  %v2345_v59 = vpop.xlane.xlu0 %2344 }
 0x474   :  { %9073 = vpow2.f32 %v2387_v27  ;;  %2434 = vadd.xlane.f32.xlu0 %v2433_v54  ;;  %v2371_v34 = vsub.f32 %v10585_v44, %v2345_v59 }
 0x475   :  { %9075 = vpow2.f32 %v2395_v37 }
 0x476   :  { %v10650_v33 = vpop.eup %9071  ;;  %v2397_v14 = vmul.f32 1.442695, %v2371_v34 }
 0x477   :  { %v2357_v11 = vpop.xlane.xlu2 %2356  ;;  %v2430_v25 = vsel %vm2312_vm15, %v10650_v33, 0.0 }
 0x478   :  { %v2375_v5 = vsub.f32 %v10583_v31, %v2357_v11  ;;  %9077 = vpow2.f32 %v2397_v14  ;;  %2431 = vadd.xlane.f32.xlu2 %v2430_v25 }
 0x479   :  { %v2360_v12 = vpop.xlane.xlu1 %2359 }
 0x47a   :  { %v10655_v49 = vpop.eup %9073  ;;  %v2405_v43 = vmul.f32 1.442695, %v2375_v5  ;;  %v2376_v28 = vsub.f32 %v10591_v32, %v2360_v12  ;;  %v2374_v32 = vsub.f32 %v10553_v23, %v10620_v52 }
 0x47b   :  { %v10657_v16 = vpop.eup %9075  ;;  %v2424_v44 = vsel %vm2312_vm15, %v10655_v49, 0.0 }
 0x47c   :  { %2425 = vadd.xlane.f32.xlu0 %v2424_v44  ;;  %v2436_v31 = vsel %vm2312_vm15, %v10657_v16, 0.0  ;;  %v2407_v61 = vmul.f32 1.442695, %v2376_v28  ;;  %9079 = vpow2.f32 %v2405_v43  ;;  %v2403_v15 = vmul.f32 1.442695, %v2374_v32 }
 0x47d   :  { %2437 = vadd.xlane.f32.xlu1 %v2436_v31 }
 0x47e   :  { %v10664_v9 = vpop.eup %9077  ;;  %9081 = vpow2.f32 %v2407_v61 }
 0x47f   :  { %v2348_v1 = vpop.xlane.xlu2 %2347  ;;  %v2439_v10 = vsel %vm2312_vm15, %v10664_v9, 0.0 }
 0x480   :  { %v2372_v47 = vsub.f32 %v10593_v40, %v2348_v1  ;;  %2440 = vadd.xlane.f32.xlu2 %v2439_v10 }
 0x482   :  { %v2399_v60 = vmul.f32 1.442695, %v2372_v47  ;;  %v10671_v17 = vpop.eup %9079 }
 0x483   :  { %v2451_v55 = vsel %vm2312_vm15, %v10671_v17, 0.0 }
 0x484   :  { %9083 = vpow2.f32 %v2399_v60  ;;  %v10673_v57 = vpop.eup %9081 }
 0x485   :  { %v2454_v21 = vsel %vm2312_vm15, %v10673_v57, 0.0  ;;  %9085 = vpow2.f32 %v2403_v15 }
 0x486   :  { %2455 = vadd.xlane.f32.xlu1 %v2454_v21  ;;  %v8868_v40 = vpop.permute.xlu0 %8867 }
 0x487   :  { %v8878_v8 = vpop.permute.xlu2 %8877  ;;  %v8870_v4 = vunpack.i.h.bf16 %v8868_v40  ;;  %v8869_v46 = vunpack.i.l.bf16 %v8868_v40 }
 0x488   :  { %2452 = vadd.xlane.f32.xlu2 %v2451_v55  ;;  %v8880_v52 = vunpack.i.h.bf16 %v8878_v8  ;;  %v8879_v29 = vunpack.i.l.bf16 %v8878_v8 }
 0x489   :  { %v1797_v41 = vrot.slane %v8870_v4, 4  ;;  %v1741_v42 = vrot.slane %v8869_v46, 4 }
 0x48a   :  { %v10679_v23 = vpop.eup %9083  ;;  %v1795_v35 = vrot.slane %v8880_v52, 4  ;;  %v1739_v3 = vrot.slane %v8879_v29, 4 }
 0x48b   :  { %v2442_v19 = vsel %vm2312_vm15, %v10679_v23, 0.0  ;;  %v1742_v53 = vsel %vm623_vm13, %v8879_v29, %v1741_v42  ;;  %v1798_v22 = vsel %vm623_vm13, %v8880_v52, %v1797_v41  ;;  %v10685_v18 = vpop.eup %9085 }
 0x48c   :  { %2443 = vadd.xlane.f32.xlu0 %v2442_v19  ;;  %v1740_v39 = vsel %vm623_vm13, %v1739_v3, %v8869_v46  ;;  %v1750_v50 = vperm.slane %v1742_v53, %v9699_v7  ;;  %v1796_v36 = vsel %vm623_vm13, %v1795_v35, %v8870_v4  ;;  %v1806_v56 = vperm.slane %v1798_v22, %v9699_v7 }
 0x48d   :  { %v2448_v2 = vsel %vm2312_vm15, %v10685_v18, 0.0  ;;  %v1746_v27 = vperm.slane %v1740_v39, %v9699_v7  ;;  %v1802_v37 = vperm.slane %v1796_v36, %v9699_v7 }
 0x48e   :  { %v1763_v34 = vrot.slane %v1750_v50, 4  ;;  %v1819_v11 = vrot.slane %v1806_v56, 4 }
 0x48f   :  { %v1751_v44 = vrot.slane %v1746_v27, 4  ;;  %v1807_v31 = vrot.slane %v1802_v37, 4 }
 0x491   :  { %v8873_v62 = vpop.permute.xlu1 %8872 }
 0x492   :  { %v8875_v54 = vunpack.i.h.bf16 %v8873_v62  ;;  %v8874_v59 = vunpack.i.l.bf16 %v8873_v62 }
 0x494   :  { %2449 = vadd.xlane.f32.xlu0 %v2448_v2  ;;  %v1783_v14 = vrot.slane %v8875_v54, 4  ;;  %v1786_v5 = vsel %vm623_vm13, %v8875_v54, %v1785_v24  ;;  %v1727_v25 = vrot.slane %v8874_v59, 4  ;;  %v1730_v43 = vsel %vm623_vm13, %v8874_v59, %v1729_v45 }
 0x495   :  { %v1794_v12 = vperm.slane %v1786_v5, %v9699_v7  ;;  %v1738_v28 = vperm.slane %v1730_v43, %v9699_v7 }
 0x496   :  { %v1784_v61 = vsel %vm623_vm13, %v1783_v14, %v10600_v6  ;;  %v1728_v1 = vsel %vm623_vm13, %v1727_v25, %v13605_v0 }
 0x497   :  { %v1790_v47 = vperm.slane %v1784_v61, %v9699_v7  ;;  %v1820_v10 = vsel %vm623_vm13, %v1819_v11, %v1794_v12  ;;  %v1821_v32 = vrot.slane %v1794_v12, 4  ;;  %v1734_v60 = vperm.slane %v1728_v1, %v9699_v7 }
 0x498   :  { %v1826_v15 = vperm.slane %v1820_v10, %v9731_v38  ;;  %v1764_v21 = vsel %vm623_vm13, %v1763_v34, %v1738_v28  ;;  %v1765_v8 = vrot.slane %v1738_v28, 4 }
 0x499   :  { %v1808_v40 = vsel %vm623_vm13, %v1807_v31, %v1790_v47  ;;  %v1809_v4 = vrot.slane %v1790_v47, 4  ;;  %v1822_v6 = vsel %vm623_vm13, %v1806_v56, %v1821_v32  ;;  %v1752_v46 = vsel %vm623_vm13, %v1751_v44, %v1734_v60 }
 0x49a   :  { %v1814_v0 = vperm.slane %v1808_v40, %v9731_v38  ;;  %v1830_v55 = vperm.slane %v1822_v6, %v9731_v38  ;;  %v1835_v52 = vrot.slane %v1826_v15, 4  ;;  %v1753_v29 = vrot.slane %v1734_v60, 4 }
 0x49b   :  { %v1810_v41 = vsel %vm623_vm13, %v1802_v37, %v1809_v4  ;;  %v1758_v42 = vperm.slane %v1752_v46, %v9731_v38  ;;  %v1766_v19 = vsel %vm623_vm13, %v1750_v50, %v1765_v8  ;;  %v1770_v53 = vperm.slane %v1764_v21, %v9731_v38 }
 0x49c   :  { %v1818_v22 = vperm.slane %v1810_v41, %v9731_v38  ;;  %v1831_v35 = vrot.slane %v1814_v0, 4  ;;  %v1836_v3 = vsel %vm623_vm13, 0.0, %v1835_v52  ;;  %v1837_v39 = vrot.slane %v1830_v55, 4 }
 0x49d   :  { %v1754_v36 = vsel %vm623_vm13, %v1746_v27, %v1753_v29  ;;  %v1774_v56 = vperm.slane %v1766_v19, %v9731_v38  ;;  %v1775_v2 = vrot.slane %v1758_v42, 4  ;;  %v1779_v45 = vrot.slane %v1770_v53, 4 }
 0x49e   :  { %v1832_v24 = vsel %vm623_vm13, 0.0, %v1831_v35  ;;  %v1833_v62 = vrot.slane %v1818_v22, 4  ;;  %v1838_v37 = vsel %vm623_vm13, 0.0, %v1837_v39  ;;  %v2012_v50 = vsel %vm623_vm13, %v1837_v39, %v1826_v15 }
 0x49f   :  { %v2016_v54 = vperm.slane %v2012_v50, %v9699_v7  ;;  %v2017_v59 = vrot.slane %v1838_v37, 4  ;;  %v1762_v34 = vperm.slane %v1754_v36, %v9731_v38  ;;  %v1776_v11 = vsel %vm623_vm13, 0.0, %v1775_v2 }
 0x4a0   :  { %v1834_v27 = vsel %vm623_vm13, 0.0, %v1833_v62  ;;  %v2001_v14 = vsel %vm623_vm13, %v1833_v62, %v1814_v0  ;;  %v1780_v5 = vsel %vm623_vm13, 0.0, %v1779_v45  ;;  %v1781_v25 = vrot.slane %v1774_v56, 4 }
 0x4a1   :  { %v2005_v43 = vperm.slane %v2001_v14, %v9699_v7  ;;  %v2006_v12 = vrot.slane %v1834_v27, 4  ;;  %v2018_v28 = vsel %vm623_vm13, %v2017_v59, %v1836_v3  ;;  %v2037_v44 = vrot.slane %v2016_v54, 4 }
 0x4a2   :  { %v2022_v31 = vperm.slane %v2018_v28, %v9699_v7  ;;  %v1777_v61 = vrot.slane %v1762_v34, 4  ;;  %v1782_v1 = vsel %vm623_vm13, 0.0, %v1781_v25  ;;  %v1958_v47 = vsel %vm623_vm13, %v1781_v25, %v1770_v53 }
 0x4a3   :  { %v2007_v10 = vsel %vm623_vm13, %v2006_v12, %v1832_v24  ;;  %v1962_v32 = vperm.slane %v1958_v47, %v9699_v7  ;;  %v1963_v60 = vrot.slane %v1782_v1, 4  ;;  %v2025_v15 = vrot.slane %v2005_v43, 4 }
 0x4a4   :  { %v2035_v21 = vrot.slane %v2022_v31, 4  ;;  %v1778_v8 = vsel %vm623_vm13, 0.0, %v1777_v61  ;;  %v1947_v40 = vsel %vm623_vm13, %v1777_v61, %v1758_v42  ;;  %v2011_v4 = vperm.slane %v2007_v10, %v9699_v7 }
 0x4a5   :  { %v1951_v6 = vperm.slane %v1947_v40, %v9699_v7  ;;  %v1952_v46 = vrot.slane %v1778_v8, 4  ;;  %v1964_v0 = vsel %vm623_vm13, %v1963_v60, %v1780_v5  ;;  %v1983_v55 = vrot.slane %v1962_v32, 4 }
 0x4a6   :  { %v1968_v52 = vperm.slane %v1964_v0, %v9699_v7  ;;  %v2026_v29 = vsel %vm623_vm13, %v2011_v4, %v2025_v15  ;;  %v2038_v41 = vsel %vm623_vm13, %v2022_v31, %v2037_v44  ;;  %v2023_v19 = vrot.slane %v2011_v4, 4 }
 0x4a7   :  { %v1953_v53 = vsel %vm623_vm13, %v1952_v46, %v1776_v11  ;;  %v1971_v22 = vrot.slane %v1951_v6, 4  ;;  %v2034_v42 = vperm.slane %v2026_v29, %v9731_v38  ;;  %v2046_v35 = vperm.slane %v2038_v41, %v9731_v38 }
 0x4a8   :  { %v1981_v3 = vrot.slane %v1968_v52, 4  ;;  %v1957_v39 = vperm.slane %v1953_v53, %v9699_v7  ;;  %v1984_v36 = vsel %vm623_vm13, %v1968_v52, %v1983_v55  ;;  %v2024_v56 = vsel %vm623_vm13, %v2023_v19, %v2005_v43 }
 0x4a9   :  { %v1992_v2 = vperm.slane %v1984_v36, %v9731_v38  ;;  %v2051_v45 = vrot.slane %v2046_v35, 4  ;;  %v2030_v24 = vperm.slane %v2024_v56, %v9731_v38  ;;  %v2036_v62 = vsel %vm623_vm13, %v2035_v21, %v2016_v54 }
 0x4aa   :  { %v1972_v37 = vsel %vm623_vm13, %v1957_v39, %v1971_v22  ;;  %v1969_v50 = vrot.slane %v1957_v39, 4  ;;  %v1982_v59 = vsel %vm623_vm13, %v1981_v3, %v1962_v32  ;;  %v2042_v34 = vperm.slane %v2036_v62, %v9731_v38 }
 0x4ab   :  { %v1980_v11 = vperm.slane %v1972_v37, %v9731_v38  ;;  %v1997_v27 = vrot.slane %v1992_v2, 4  ;;  %v2052_v14 = vsel %vm623_vm13, %v2051_v45, %v2034_v42  ;;  %v1988_v5 = vperm.slane %v1982_v59, %v9731_v38 }
 0x4ac   :  { %v2068_v25 = vpack.c.bf16 %v2052_v14, %v2052_v14  ;;  %v1970_v43 = vsel %vm623_vm13, %v1969_v50, %v1951_v6  ;;  %v2047_v12 = vrot.slane %v2042_v34, 4  ;;  %v2053_v28 = vrot.slane %v2034_v42, 4 }
 0x4ad   :  { %v1998_v54 = vsel %vm623_vm13, %v1997_v27, %v1980_v11  ;;  %v1976_v44 = vperm.slane %v1970_v43, %v9731_v38  ;;  %v1993_v31 = vrot.slane %v1988_v5, 4  ;;  %v1999_v61 = vrot.slane %v1980_v11, 4 }
 0x4ae   :  { %v2067_v1 = vpack.c.bf16 %v1998_v54, %v1998_v54  ;;  %v2889_v47 = vunpack.c.l.b16 %v2068_v25  ;;  %v2048_v10 = vsel %vm623_vm13, %v2047_v12, %v2030_v24  ;;  %v2054_v32 = vsel %vm623_vm13, %v2046_v35, %v2053_v28 }
 0x4af   :  { %v1994_v60 = vsel %vm623_vm13, %v1993_v31, %v1976_v44  ;;  %v2064_v15 = vpack.c.bf16 %v2048_v10, %v2048_v10  ;;  %v2000_v21 = vsel %vm623_vm13, %v1992_v2, %v1999_v61  ;;  %v2070_v8 = vpack.c.bf16 %v2054_v32, %v2054_v32 }
 0x4b0   :  { %v2888_v40 = vunpack.c.l.b16 %v2067_v1  ;;  %v2063_v4 = vpack.c.bf16 %v1994_v60, %v1994_v60  ;;  %v2069_v6 = vpack.c.bf16 %v2000_v21, %v2000_v21  ;;  %v1995_v46 = vrot.slane %v1976_v44, 4 }
 0x4b1   :  { %v2833_v0 = vunpack.c.l.b16 %v2064_v15  ;;  %v2917_v55 = vunpack.c.l.b16 %v2070_v8  ;;  %v2049_v52 = vrot.slane %v2030_v24, 4 }
 0x4b2   :  { %v2890_v29 = vpack.c.b16 %v2889_v47, %v2888_v40  ;;  %v2832_v41 = vunpack.c.l.b16 %v2063_v4  ;;  %v2916_v19 = vunpack.c.l.b16 %v2069_v6  ;;  %v1996_v53 = vsel %vm623_vm13, %v1988_v5, %v1995_v46 }
 0x4b3   :  { %v2050_v22 = vsel %vm623_vm13, %v2042_v34, %v2049_v52  ;;  %v2065_v42 = vpack.c.bf16 %v1996_v53, %v1996_v53 }
 0x4b4   :  { %2902 = vmatpush.bf16.msra.mxu0 %v2890_v29  ;;  %v2834_v35 = vpack.c.b16 %v2833_v0, %v2832_v41  ;;  %v2918_v3 = vpack.c.b16 %v2917_v55, %v2916_v19  ;;  %v2066_v39 = vpack.c.bf16 %v2050_v22, %v2050_v22 }
 0x4b5   :  { %v2860_v36 = vunpack.c.l.b16 %v2065_v42 }
 0x4b6   :  { %2846 = vmatpush.bf16.msrb.mxu2 %v2834_v35  ;;  %2930 = vmatpush.bf16.msrb.mxu1 %v2918_v3  ;;  %v2861_v56 = vunpack.c.l.b16 %v2066_v39 }
 0x4b8   :  { %v2862_v2 = vpack.c.b16 %v2861_v56, %v2860_v36 }
 0x4ba   :  { %2874 = vmatpush.bf16.msrb.mxu3 %v2862_v2 }
 0x4bd   :  { %v2411_v45 = vpop.xlane.xlu0 %2410 }
 0x4be   :  { %9087 = vrcp.f32 %v2411_v45  ;;  %v2468_v11 = vand.u32 2147483648, %v2411_v45  ;;  %vm2462_vm1 = vweird.f32 %v2411_v45  ;;  %v2466_v5 = vand.u32 2147483647, %v2411_v45 }
 0x4c0   :  { %v2469_v54 = vor.u32 1.1754944e-38, %v2468_v11  ;;  %vm2467_vm3 = vcmp.eq.f32.partialorder %v2466_v5, 8.507059e+37 }
 0x4c4   :  { %v9088_v24 = vpop.eup %9087  ;;  %v2417_v62 = vpop.xlane.xlu1 %2416 }
 0x4c5   :  { %v2458_v37 = vmul.f32 %v9088_v24, %v2411_v45  ;;  %9089 = vrcp.f32 %v2417_v62  ;;  %v2414_v50 = vpop.xlane.xlu2 %2413  ;;  %vm2463_vm0 = vweird.f32 %v9088_v24  ;;  %v2498_v55 = vand.u32 2147483648, %v2417_v62 }
 0x4c6   :  { %9091 = vrcp.f32 %v2414_v50  ;;  %vm2464_vm2 = vmor %vm2462_vm1, %vm2463_vm0  ;;  %v2483_v1 = vand.u32 2147483648, %v2414_v50  ;;  %v2481_v10 = vand.u32 2147483647, %v2414_v50  ;;  %vm2477_vm5 = vweird.f32 %v2414_v50 }
 0x4c7   :  { %v2459_v59 = vsub.f32 1.0, %v2458_v37  ;;  %vm2492_vm9 = vweird.f32 %v2417_v62  ;;  %v2496_v52 = vand.u32 2147483647, %v2417_v62  ;;  %v2499_v35 = vor.u32 1.1754944e-38, %v2498_v55 }
 0x4c8   :  { %v2484_v8 = vor.u32 1.1754944e-38, %v2483_v1  ;;  %vm2482_vm7 = vcmp.eq.f32.partialorder %v2481_v10, 8.507059e+37 }
 0x4c9   :  { %v2460_v34 = vmul.f32 %v9088_v24, %v2459_v59  ;;  %vm2497_vm11 = vcmp.eq.f32.partialorder %v2496_v52, 8.507059e+37 }
 0x4cb   :  { %v9090_v27 = vpop.eup %9089  ;;  %v2461_v14 = vadd.f32 %v9088_v24, %v2460_v34 }
 0x4cc   :  { %v9092_v25 = vpop.eup %9091  ;;  %v2488_v43 = vmul.f32 %v9090_v27, %v2417_v62  ;;  %vm2493_vm8 = vweird.f32 %v9090_v27 }
 0x4cd   :  { %v2465_v12 = vsel %vm2464_vm2, %v9088_v24, %v2461_v14  ;;  %v2473_v28 = vmul.f32 %v9092_v25, %v2414_v50  ;;  %vm2478_vm4 = vweird.f32 %v9092_v25  ;;  %vm2494_vm10 = vmor %vm2492_vm9, %vm2493_vm8 }
 0x4ce   :  { %v2489_v44 = vsub.f32 1.0, %v2488_v43  ;;  %v2470_v61 = vsel %vm2467_vm3, %v2469_v54, %v2465_v12  ;;  %vm2479_vm6 = vmor %vm2477_vm5, %vm2478_vm4 }
 0x4cf   :  { %v2474_v31 = vsub.f32 1.0, %v2473_v28  ;;  %v2471_v32 = vmul.f32 %v10607_v48, %v2470_v61 }
 0x4d0   :  { %v2490_v60 = vmul.f32 %v9090_v27, %v2489_v44 }
 0x4d1   :  { %v2475_v47 = vmul.f32 %v9092_v25, %v2474_v31  ;;  %v2697_v6 = vpack.c.bf16 %v2471_v32, %v2471_v32 }
 0x4d2   :  { %v2491_v46 = vadd.f32 %v9090_v27, %v2490_v60 }
 0x4d3   :  { %v2476_v15 = vadd.f32 %v9092_v25, %v2475_v47  ;;  %v2447_v21 = vpop.xlane.xlu1 %2446  ;;  %v2715_v41 = vunpack.c.l.b16 %v2697_v6 }
 0x4d4   :  { %9093 = vrcp.f32 %v2447_v21  ;;  %v2495_v19 = vsel %vm2494_vm10, %v9090_v27, %v2491_v46  ;;  %v2646_v37 = vand.u32 2147483647, %v2447_v21  ;;  %v2648_v34 = vand.u32 2147483648, %v2447_v21 }
 0x4d5   :  { %v2480_v40 = vsel %vm2479_vm6, %v9092_v25, %v2476_v15  ;;  %v2500_v36 = vsel %vm2497_vm11, %v2499_v35, %v2495_v19  ;;  %vm2642_vm0 = vweird.f32 %v2447_v21 }
 0x4d6   :  { %v2485_v4 = vsel %vm2482_vm7, %v2484_v8, %v2480_v40  ;;  %v2501_v56 = vmul.f32 %v10611_v20, %v2500_v36  ;;  %vm2647_vm2 = vcmp.eq.f32.partialorder %v2646_v37, 8.507059e+37  ;;  %v2649_v54 = vor.u32 1.1754944e-38, %v2648_v34 }
 0x4d7   :  { %v2486_v0 = vmul.f32 %v10613_v63, %v2485_v4 }
 0x4d8   :  { %v2699_v59 = vpack.c.bf16 %v2501_v56, %v2501_v56 }
 0x4d9   :  { %v2698_v29 = vpack.c.bf16 %v2486_v0, %v2486_v0 }
 0x4da   :  { %v9094_v48 = vpop.eup %9093  ;;  %v10791_v28 = vunpack.c.l.b16 %v2699_v59 }
 0x4db   :  { %v2716_v53 = vunpack.c.l.b16 %v2698_v29  ;;  %v2638_v22 = vmul.f32 %v9094_v48, %v2447_v21  ;;  %v2420_v42 = vpop.xlane.xlu0 %2419  ;;  %vm2643_vm12 = vweird.f32 %v9094_v48 }
 0x4dc   :  { %9095 = vrcp.f32 %v2420_v42  ;;  %v2511_v27 = vand.u32 2147483647, %v2420_v42  ;;  %v2513_v14 = vand.u32 2147483648, %v2420_v42  ;;  %vm10783_vm1 = vmor %vm2642_vm0, %vm2643_vm12  ;;  %vm2507_vm3 = vweird.f32 %v2420_v42 }
 0x4dd   :  { %v2639_v3 = vsub.f32 1.0, %v2638_v22  ;;  %v2717_v39 = vpack.c.b16 %v2716_v53, %v2715_v41 }
 0x4de   :  { %vm10793_vm5 = vcmp.eq.f32.partialorder %v2511_v27, 8.507059e+37  ;;  %v2514_v1 = vor.u32 1.1754944e-38, %v2513_v14 }
 0x4df   :  { %8090 = vmatmul.msk.bf16.vlgmr.msra.gmra.mxu2 %vm2312_vm15, %v2717_v39  ;;  %v2640_v63 = vmul.f32 %v9094_v48, %v2639_v3 }
 0x4e1   :  { %v2641_v62 = vadd.f32 %v9094_v48, %v2640_v63 }
 0x4e2   :  { %v9096_v2 = vpop.eup %9095 }
 0x4e3   :  { %v2503_v45 = vmul.f32 %v9096_v2, %v2420_v42  ;;  %v10775_v24 = vpop.xlane.xlu2 %2422  ;;  %v2645_v43 = vsel %vm10783_vm1, %v9094_v48, %v2641_v62  ;;  %vm2508_vm4 = vweird.f32 %v9096_v2 }
 0x4e4   :  { %9097 = vrcp.f32 %v10775_v24  ;;  %v2526_v12 = vand.u32 2147483647, %v10775_v24  ;;  %v10797_v10 = vsel %vm2647_vm2, %v2649_v54, %v2645_v43  ;;  %vm2522_vm6 = vweird.f32 %v10775_v24  ;;  %vm10812_vm9 = vmor %vm2507_vm3, %vm2508_vm4 }
 0x4e5   :  { %v10778_v50 = vpop.xlane.xlu1 %2428  ;;  %v2504_v11 = vsub.f32 1.0, %v2503_v45  ;;  %v2528_v60 = vand.u32 2147483648, %v10775_v24 }
 0x4e6   :  { %9099 = vrcp.f32 %v10778_v50  ;;  %vm10804_vm7 = vcmp.eq.f32.partialorder %v2526_v12, 8.507059e+37  ;;  %vm2552_vm8 = vweird.f32 %v10778_v50  ;;  %v2556_v46 = vand.u32 2147483647, %v10778_v50 }
 0x4e7   :  { %v10781_v20 = vpop.xlane.xlu0 %2434  ;;  %v2505_v25 = vmul.f32 %v9096_v2, %v2504_v11  ;;  %v2558_v0 = vand.u32 2147483648, %v10778_v50  ;;  %v2529_v42 = vor.u32 1.1754944e-38, %v2528_v60 }
 0x4e8   :  { %9101 = vrcp.f32 %v10781_v20  ;;  %vm2582_vm10 = vweird.f32 %v10781_v20  ;;  %v2586_v29 = vand.u32 2147483647, %v10781_v20  ;;  %v2588_v19 = vand.u32 2147483648, %v10781_v20 }
 0x4e9   :  { %v2506_v31 = vadd.f32 %v9096_v2, %v2505_v25  ;;  %vm10831_vm0 = vcmp.eq.f32.partialorder %v2556_v46, 8.507059e+37  ;;  %v2559_v56 = vor.u32 1.1754944e-38, %v2558_v0 }
 0x4ea   :  { %v9098_v44 = vpop.eup %9097  ;;  %vm10835_vm2 = vcmp.eq.f32.partialorder %v2586_v29, 8.507059e+37  ;;  %v2589_v59 = vor.u32 1.1754944e-38, %v2588_v19 }
 0x4eb   :  { %v2518_v32 = vmul.f32 %v9098_v44, %v10775_v24  ;;  %v10802_v15 = vpop.xlane.xlu2 %2431  ;;  %v2510_v55 = vsel %vm10812_vm9, %v9096_v2, %v2506_v31  ;;  %vm2523_vm11 = vweird.f32 %v9098_v44 }
 0x4ec   :  { %v9100_v47 = vpop.eup %9099  ;;  %9103 = vrcp.f32 %v10802_v15  ;;  %v2515_v39 = vsel %vm10793_vm5, %v2514_v1, %v2510_v55  ;;  %vm2524_vm3 = vmor %vm2522_vm6, %vm2523_vm11  ;;  %vm2567_vm5 = vweird.f32 %v10802_v15  ;;  %v2573_v12 = vand.u32 2147483648, %v10802_v15 }
 0x4ed   :  { %v2548_v8 = vmul.f32 %v9100_v47, %v10778_v50  ;;  %v2519_v6 = vsub.f32 1.0, %v2518_v32  ;;  %vm2553_vm12 = vweird.f32 %v9100_v47  ;;  %v2516_v27 = vmul.f32 %v10629_v58, %v2515_v39 }
 0x4ee   :  { %v9102_v40 = vpop.eup %9101  ;;  %vm2554_vm4 = vmor %vm2552_vm8, %vm2553_vm12  ;;  %v2571_v50 = vand.u32 2147483647, %v10802_v15 }
 0x4ef   :  { %v2578_v52 = vmul.f32 %v9102_v40, %v10781_v20  ;;  %v2549_v48 = vsub.f32 1.0, %v2548_v8  ;;  %v10823_v41 = vpop.xlane.xlu0 %2425  ;;  %v2520_v53 = vmul.f32 %v9098_v44, %v2519_v6  ;;  %vm2583_vm1 = vweird.f32 %v9102_v40 }
 0x4f0   :  { %9105 = vrcp.f32 %v10823_v41  ;;  %v10827_v3 = vpop.xlane.xlu1 %2437  ;;  %vm2584_vm6 = vmor %vm2582_vm10, %vm2583_vm1  ;;  %v2541_v31 = vand.u32 2147483647, %v10823_v41  ;;  %v2543_v1 = vand.u32 2147483648, %v10823_v41  ;;  %v2700_v32 = vpack.c.bf16 %v2516_v27, %v2516_v27 }
 0x4f1   :  { %v2579_v22 = vsub.f32 1.0, %v2578_v52  ;;  %v2550_v35 = vmul.f32 %v9100_v47, %v2549_v48  ;;  %v2521_v36 = vadd.f32 %v9098_v44, %v2520_v53  ;;  %9107 = vrcp.f32 %v10827_v3 }
 0x4f2   :  { %v9104_v2 = vpop.eup %9103  ;;  %vm2537_vm8 = vweird.f32 %v10823_v41  ;;  %vm10866_vm9 = vcmp.eq.f32.partialorder %v2571_v50, 8.507059e+37  ;;  %vm10877_vm12 = vcmp.eq.f32.partialorder %v2541_v31, 8.507059e+37  ;;  %v2544_v52 = vor.u32 1.1754944e-38, %v2543_v1 }
 0x4f3   :  { %v2580_v45 = vmul.f32 %v9102_v40, %v2579_v22  ;;  %v2551_v37 = vadd.f32 %v9100_v47, %v2550_v35  ;;  %v2525_v34 = vsel %vm2524_vm3, %v9098_v44, %v2521_v36  ;;  %v2563_v11 = vmul.f32 %v9104_v2, %v10802_v15  ;;  %v10858_v61 = vpop.xlane.xlu2 %2440 }
 0x4f4   :  { %v2530_v24 = vsel %vm10804_vm7, %v2529_v42, %v2525_v34  ;;  %vm2568_vm7 = vweird.f32 %v9104_v2  ;;  %9109 = vrcp.f32 %v10858_v61  ;;  %v2574_v48 = vor.u32 1.1754944e-38, %v2573_v12 }
 0x4f5   :  { %v2581_v14 = vadd.f32 %v9102_v40, %v2580_v45  ;;  %v2555_v5 = vsel %vm2554_vm4, %v9100_v47, %v2551_v37  ;;  %v2564_v43 = vsub.f32 1.0, %v2563_v11  ;;  %v2531_v60 = vmul.f32 %v10635_v13, %v2530_v24  ;;  %vm2569_vm11 = vmor %vm2567_vm5, %vm2568_vm7 }
 0x4f6   :  { %v9106_v25 = vpop.eup %9105  ;;  %v2560_v58 = vsel %vm10831_vm0, %v2559_v56, %v2555_v5  ;;  %v2603_v35 = vand.u32 2147483648, %v10827_v3  ;;  %v2744_v45 = vunpack.c.l.b16 %v2700_v32  ;;  %vm2612_vm5 = vweird.f32 %v10858_v61 }
 0x4f7   :  { %v2585_v54 = vsel %vm2584_vm6, %v9102_v40, %v2581_v14  ;;  %v2533_v44 = vmul.f32 %v9106_v25, %v10823_v41  ;;  %v2565_v47 = vmul.f32 %v9104_v2, %v2564_v43  ;;  %v9108_v8 = vpop.eup %9107  ;;  %v2561_v40 = vmul.f32 %v10637_v30, %v2560_v58 }
 0x4f8   :  { %v2590_v20 = vsel %vm10835_vm2, %v2589_v59, %v2585_v54  ;;  %vm2538_vm10 = vweird.f32 %v9106_v25  ;;  %v2593_v13 = vmul.f32 %v9108_v8, %v10827_v3  ;;  %v2701_v19 = vpack.c.bf16 %v2531_v60, %v2531_v60 }
 0x4f9   :  { %v2534_v21 = vsub.f32 1.0, %v2533_v44  ;;  %v2566_v4 = vadd.f32 %v9104_v2, %v2565_v47  ;;  %v2591_v46 = vmul.f32 %v10645_v51, %v2590_v20  ;;  %v10875_v55 = vpop.xlane.xlu1 %2455  ;;  %v2601_v51 = vand.u32 2147483647, %v10827_v3  ;;  %vm2539_vm0 = vmor %vm2537_vm8, %vm2538_vm10 }
 0x4fa   :  { %v2594_v22 = vsub.f32 1.0, %v2593_v13  ;;  %v2703_v42 = vpack.c.bf16 %v2561_v40, %v2561_v40  ;;  %9111 = vrcp.f32 %v10875_v55  ;;  %vm2598_vm1 = vweird.f32 %v9108_v8 }
 0x4fb   :  { %v2535_v0 = vmul.f32 %v9106_v25, %v2534_v21  ;;  %v2570_v29 = vsel %vm2569_vm11, %v9104_v2, %v2566_v4  ;;  %v2705_v39 = vpack.c.bf16 %v2591_v46, %v2591_v46  ;;  %v9110_v2 = vpop.eup %9109  ;;  %v2616_v41 = vand.u32 2147483647, %v10858_v61 }
 0x4fc   :  { %v2575_v15 = vsel %vm10866_vm9, %v2574_v48, %v2570_v29  ;;  %v2595_v63 = vmul.f32 %v9108_v8, %v2594_v22  ;;  %vm2597_vm2 = vweird.f32 %v10827_v3  ;;  %v10897_v11 = vunpack.c.l.b16 %v2701_v19 }
 0x4fd   :  { %v2536_v53 = vadd.f32 %v9106_v25, %v2535_v0  ;;  %v2576_v59 = vmul.f32 %v10650_v33, %v2575_v15  ;;  %vm2599_vm3 = vmor %vm2597_vm2, %vm2598_vm1  ;;  %vm2602_vm4 = vcmp.eq.f32.partialorder %v2601_v51, 8.507059e+37  ;;  %v2604_v27 = vor.u32 1.1754944e-38, %v2603_v35 }
 0x4fe   :  { %v2596_v34 = vadd.f32 %v9108_v8, %v2595_v63  ;;  %v2608_v14 = vmul.f32 %v9110_v2, %v10858_v61  ;;  %v10900_v5 = vunpack.c.l.b16 %v2705_v39  ;;  %vm10909_vm6 = vcmp.eq.f32.partialorder %v2616_v41, 8.507059e+37 }
 0x4ff   :  { %v2540_v36 = vsel %vm2539_vm0, %v9106_v25, %v2536_v53  ;;  %v10888_v56 = vpop.xlane.xlu0 %2443  ;;  %v10902_v25 = vunpack.c.l.b16 %v2703_v42  ;;  %v2704_v54 = vpack.c.bf16 %v2576_v59, %v2576_v59  ;;  %v2618_v44 = vand.u32 2147483648, %v10858_v61 }
 0x500   :  { %v2545_v62 = vsel %vm10877_vm12, %v2544_v52, %v2540_v36  ;;  %9113 = vrcp.f32 %v10888_v56  ;;  %v2600_v24 = vsel %vm2599_vm3, %v9108_v8, %v2596_v34  ;;  %v10907_v33 = vpop.eup %9111  ;;  %v2609_v50 = vsub.f32 1.0, %v2608_v14 }
 0x501   :  { %v2546_v37 = vmul.f32 %v10655_v49, %v2545_v62  ;;  %v10905_v49 = vpop.xlane.xlu2 %2452  ;;  %v2605_v3 = vsel %vm2602_vm4, %v2604_v27, %v2600_v24  ;;  %v2683_v31 = vmul.f32 %v10907_v33, %v10875_v55  ;;  %vm2613_vm7 = vweird.f32 %v9110_v2 }
 0x502   :  { %v2606_v58 = vmul.f32 %v10657_v16, %v2605_v3  ;;  %v2610_v1 = vmul.f32 %v9110_v2, %v2609_v50  ;;  %v2745_v47 = vpack.c.b16 %v2744_v45, %v10791_v28  ;;  %9115 = vrcp.f32 %v10905_v49  ;;  %vm2614_vm8 = vmor %vm2612_vm5, %vm2613_vm7 }
 0x503   :  { %v2702_v43 = vpack.c.bf16 %v2546_v37, %v2546_v37  ;;  %v2631_v60 = vand.u32 2147483647, %v10888_v56  ;;  %v2684_v21 = vsub.f32 1.0, %v2683_v31  ;;  %v2691_v8 = vand.u32 2147483647, %v10875_v55 }
 0x504   :  { %v2706_v4 = vpack.c.bf16 %v2606_v58, %v2606_v58  ;;  %v2611_v6 = vadd.f32 %v9110_v2, %v2610_v1  ;;  %8091 = vmatmul.msk.bf16.vlgmr.msra.gmra.mxu3 %vm2312_vm15, %v2745_v47  ;;  %v2633_v28 = vand.u32 2147483648, %v10888_v56  ;;  %v2619_v0 = vor.u32 1.1754944e-38, %v2618_v44 }
 0x505   :  { %v2772_v40 = vunpack.c.l.b16 %v2702_v43  ;;  %v2685_v13 = vmul.f32 %v10907_v33, %v2684_v21  ;;  %v2800_v30 = vunpack.c.l.b16 %v2704_v54  ;;  %vm2688_vm9 = vweird.f32 %v10907_v33 }
 0x506   :  { %v9114_v20 = vpop.eup %9113  ;;  %v2615_v52 = vsel %vm2614_vm8, %v9110_v2, %v2611_v6  ;;  %v2693_v29 = vand.u32 2147483648, %v10875_v55  ;;  %v2828_v51 = vunpack.c.l.b16 %v2706_v4  ;;  %vm2687_vm11 = vweird.f32 %v10875_v55 }
 0x507   :  { %v2623_v32 = vmul.f32 %v9114_v20, %v10888_v56  ;;  %v10922_v16 = vpop.xlane.xlu0 %2449  ;;  %vm2628_vm10 = vweird.f32 %v9114_v20  ;;  %v2620_v19 = vsel %vm10909_vm6, %v2619_v0, %v2615_v52  ;;  %v2686_v53 = vadd.f32 %v10907_v33, %v2685_v13  ;;  %vm10940_vm1 = vmor %vm2687_vm11, %vm2688_vm9 }
 0x508   :  { %9117 = vrcp.f32 %v10922_v16  ;;  %v9116_v22 = vpop.eup %9115  ;;  %v2621_v61 = vmul.f32 %v10664_v9, %v2620_v19  ;;  %v2773_v42 = vpack.c.b16 %v2772_v40, %v10897_v11  ;;  %vm2627_vm12 = vweird.f32 %v10888_v56 }
 0x509   :  { %v2624_v46 = vsub.f32 1.0, %v2623_v32  ;;  %vm2632_vm0 = vcmp.eq.f32.partialorder %v2631_v60, 8.507059e+37  ;;  %v2668_v39 = vmul.f32 %v9116_v22, %v10905_v49  ;;  %vm2629_vm2 = vmor %vm2627_vm12, %vm2628_vm10  ;;  %v2634_v63 = vor.u32 1.1754944e-38, %v2633_v28 }
 0x50a   :  { %v2690_v9 = vsel %vm10940_vm1, %v10907_v33, %v2686_v53  ;;  %vm2692_vm3 = vcmp.eq.f32.partialorder %v2691_v8, 8.507059e+37  ;;  %8092 = vmatmul.msk.bf16.vlgmr.msrb.gmra.mxu0 %vm2312_vm15, %v2773_v42  ;;  %v2801_v55 = vpack.c.b16 %v2800_v30, %v10902_v25  ;;  %v2707_v2 = vpack.c.bf16 %v2621_v61, %v2621_v61 }
 0x50b   :  { %v2625_v48 = vmul.f32 %v9114_v20, %v2624_v46  ;;  %v2694_v45 = vor.u32 1.1754944e-38, %v2693_v29  ;;  %v2661_v37 = vand.u32 2147483647, %v10922_v16  ;;  %v2669_v59 = vsub.f32 1.0, %v2668_v39 }
 0x50c   :  { %8093 = vmatmul.msk.bf16.vlgmr.msra.gmra.mxu1 %vm2312_vm15, %v2801_v55  ;;  %v2829_v34 = vpack.c.b16 %v2828_v51, %v10900_v5  ;;  %v2678_v24 = vand.u32 2147483648, %v10905_v49  ;;  %v2663_v25 = vand.u32 2147483648, %v10922_v16  ;;  %vm2673_vm4 = vweird.f32 %v9116_v22 }
 0x50d   :  { %v2626_v15 = vadd.f32 %v9114_v20, %v2625_v48  ;;  %v2695_v27 = vsel %vm2692_vm3, %v2694_v45, %v2690_v9  ;;  %v2670_v33 = vmul.f32 %v9116_v22, %v2669_v59  ;;  %v2676_v43 = vand.u32 2147483647, %v10905_v49 }
 0x50e   :  { %v9118_v36 = vpop.eup %9117  ;;  %8094 = vmatmul.msk.bf16.vlgmr.msrb.gmra.mxu2 %vm2312_vm15, %v2829_v34  ;;  %v2855_v50 = vunpack.c.l.b16 %v2707_v2  ;;  %v2651_v5 = vmul.f32 %v10623_v26, %v10797_v10  ;;  %vm2672_vm6 = vweird.f32 %v10905_v49  ;;  %vm2657_vm7 = vweird.f32 %v10922_v16 }
 0x50f   :  { %v2630_v56 = vsel %vm2629_vm2, %v9114_v20, %v2626_v15  ;;  %v2653_v62 = vmul.f32 %v9118_v36, %v10922_v16  ;;  %vm2658_vm5 = vweird.f32 %v9118_v36  ;;  %v2671_v54 = vadd.f32 %v9116_v22, %v2670_v33  ;;  %vm2674_vm8 = vmor %vm2672_vm6, %vm2673_vm4 }
 0x510   :  { %v2635_v41 = vsel %vm2632_vm0, %v2634_v63, %v2630_v56  ;;  %v2679_v31 = vor.u32 1.1754944e-38, %v2678_v24  ;;  %vm2659_vm9 = vmor %vm2657_vm7, %vm2658_vm5  ;;  %v2664_v20 = vor.u32 1.1754944e-38, %v2663_v25  ;;  %vm2677_vm10 = vcmp.eq.f32.partialorder %v2676_v43, 8.507059e+37 }
 0x511   :  { %v2636_v11 = vmul.f32 %v10679_v23, %v2635_v41  ;;  %v2654_v14 = vsub.f32 1.0, %v2653_v62  ;;  %v2696_v23 = vmul.f32 %v10673_v57, %v2695_v27  ;;  %v2675_v1 = vsel %vm2674_vm8, %v9116_v22, %v2671_v54 }
 0x512   :  { %vm2662_vm11 = vcmp.eq.f32.partialorder %v2661_v37, 8.507059e+37  ;;  %v2680_v32 = vsel %vm2677_vm10, %v2679_v31, %v2675_v1  ;;  %v2709_v21 = vpack.c.bf16 %v2651_v5, %v2651_v5  ;;  %vm3429_vm12 = vcmask 523264  }
 0x513   :  { %v2708_v3 = vpack.c.bf16 %v2636_v11, %v2636_v11  ;;  %v2655_v12 = vmul.f32 %v9118_v36, %v2654_v14  ;;  %v2712_v26 = vpack.c.bf16 %v2696_v23, %v2696_v23  ;;  %v2681_v57 = vmul.f32 %v10671_v17, %v2680_v32 }
 0x514   :  { %v2883_v6 = vunpack.c.l.b16 %v2709_v21  ;;  %vm3434_vm0 = vcmask 785408  }
 0x515   :  { %v2856_v58 = vunpack.c.l.b16 %v2708_v3  ;;  %v2656_v44 = vadd.f32 %v9118_v36, %v2655_v12  ;;  %v2711_v8 = vpack.c.bf16 %v2681_v57, %v2681_v57  ;;  %v2912_v40 = vunpack.c.l.b16 %v2712_v26 }
 0x517   :  { %v2660_v47 = vsel %vm2659_vm9, %v9118_v36, %v2656_v44  ;;  %v2857_v60 = vpack.c.b16 %v2856_v58, %v2855_v50  ;;  %v2911_v4 = vunpack.c.l.b16 %v2711_v8 }
 0x518   :  { %v2665_v10 = vsel %vm2662_vm11, %v2664_v20, %v2660_v47 }
 0x519   :  { %v2666_v49 = vmul.f32 %v10685_v18, %v2665_v10  ;;  %8095 = vmatmul.msk.bf16.vlgmr.msrb.gmra.mxu3 %vm2312_vm15, %v2857_v60  ;;  %v2913_v28 = vpack.c.b16 %v2912_v40, %v2911_v4 }
 0x51b   :  { %v2710_v16 = vpack.c.bf16 %v2666_v49, %v2666_v49 }
 0x51c   :  { %8097 = vmatmul.msk.bf16.vlgmr.msrb.gmra.mxu1 %vm2312_vm15, %v2913_v28 }
 0x51d   :  { %v2884_v46 = vunpack.c.l.b16 %v2710_v16 }
 0x51f   :  { %v2885_v0 = vpack.c.b16 %v2884_v46, %v2883_v6 }
 0x521   :  { %8096 = vmatmul.msk.bf16.vlgmr.msra.gmra.mxu0 %vm2312_vm15, %v2885_v0 }
 0x562   :  { %v2736_v13 = vpop.f32.mrf.mxu2 }
 0x563   :  { %v2939_v30 = vrot.slane %v2736_v13, 4 }
 0x56a   :  { %v2738_v19 = vpop.f32.mrf.mxu2 }
 0x56b   :  { %v2995_v14 = vrot.slane %v2738_v19, 4 }
 0x587   :  { %v2764_v17 = vpop.f32.mrf.mxu3  ;;  %v2792_v52 = vpop.f32.mrf.mxu0 }
 0x588   :  { %v2951_v29 = vrot.slane %v2764_v17, 4  ;;  %v2937_v18 = vrot.slane %v2792_v52, 4  ;;  %v2940_v48 = vsel %vm623_vm13, %v2792_v52, %v2939_v30 }
 0x589   :  { %v2948_v53 = vperm.slane %v2940_v48, %v9699_v7  ;;  %v2820_v22 = vpop.f32.mrf.mxu1 }
 0x58a   :  { %v2938_v51 = vsel %vm623_vm13, %v2937_v18, %v2736_v13  ;;  %v2949_v61 = vrot.slane %v2820_v22, 4  ;;  %v2952_v42 = vsel %vm623_vm13, %v2820_v22, %v2951_v29 }
 0x58b   :  { %v2944_v15 = vperm.slane %v2938_v51, %v9699_v7  ;;  %v2975_v35 = vrot.slane %v2948_v53, 4  ;;  %v2960_v39 = vperm.slane %v2952_v42, %v9699_v7 }
 0x58c   :  { %v2950_v36 = vsel %vm623_vm13, %v2949_v61, %v2764_v17 }
 0x58d   :  { %v2963_v63 = vrot.slane %v2944_v15, 4  ;;  %v2956_v9 = vperm.slane %v2950_v36, %v9699_v7  ;;  %v2973_v55 = vrot.slane %v2960_v39, 4  ;;  %v2976_v56 = vsel %vm623_vm13, %v2960_v39, %v2975_v35 }
 0x58e   :  { %v2984_v2 = vperm.slane %v2976_v56, %v9731_v38 }
 0x58f   :  { %v2961_v45 = vrot.slane %v2956_v9, 4  ;;  %v2964_v62 = vsel %vm623_vm13, %v2956_v9, %v2963_v63  ;;  %v2974_v41 = vsel %vm623_vm13, %v2973_v55, %v2948_v53  ;;  %v2794_v37 = vpop.f32.mrf.mxu0  ;;  %v2766_v59 = vpop.f32.mrf.mxu3 }
 0x590   :  { %v2972_v34 = vperm.slane %v2964_v62, %v9731_v38  ;;  %v2980_v11 = vperm.slane %v2974_v41, %v9731_v38  ;;  %v2991_v27 = vrot.slane %v2984_v2, 4  ;;  %v2993_v33 = vrot.slane %v2794_v37, 4 }
 0x591   :  { %v2962_v24 = vsel %vm623_vm13, %v2961_v45, %v2944_v15  ;;  %v2848_v25 = vpop.f32.mrf.mxu2  ;;  %v2822_v43 = vpop.f32.mrf.mxu1  ;;  %v2996_v44 = vsel %vm623_vm13, %v2794_v37, %v2995_v14  ;;  %v3007_v31 = vrot.slane %v2766_v59, 4 }
 0x592   :  { %v2968_v3 = vperm.slane %v2962_v24, %v9731_v38  ;;  %v2987_v50 = vrot.slane %v2972_v34, 4  ;;  %v2989_v12 = vrot.slane %v2980_v11, 4  ;;  %v2992_v5 = vsel %vm623_vm13, 0.0, %v2991_v27 }
 0x593   :  { %v3172_v23 = vsel %vm623_vm13, %v2991_v27, %v2980_v11  ;;  %v3177_v54 = vrot.slane %v2992_v5, 4  ;;  %v2994_v58 = vsel %vm623_vm13, %v2993_v33, %v2738_v19  ;;  %v3004_v21 = vperm.slane %v2996_v44, %v9699_v7 }
 0x594   :  { %v2985_v20 = vrot.slane %v2968_v3, 4  ;;  %v2988_v1 = vsel %vm623_vm13, 0.0, %v2987_v50  ;;  %v2990_v47 = vsel %vm623_vm13, 0.0, %v2989_v12  ;;  %v10992_v60 = vperm.slane %v3172_v23, %v9699_v7 }
 0x595   :  { %v3166_v32 = vrot.slane %v2988_v1, 4  ;;  %v3178_v26 = vsel %vm623_vm13, %v3177_v54, %v2990_v47  ;;  %v3000_v10 = vperm.slane %v2994_v58, %v9699_v7  ;;  %v3161_v57 = vsel %vm623_vm13, %v2987_v50, %v2968_v3 }
 0x596   :  { %v3005_v49 = vrot.slane %v2822_v43, 4  ;;  %v3008_v8 = vsel %vm623_vm13, %v2822_v43, %v3007_v31  ;;  %v3051_v16 = vrot.slane %v2848_v25, 4  ;;  %v2986_v6 = vsel %vm623_vm13, 0.0, %v2985_v20 }
 0x597   :  { %v3019_v40 = vrot.slane %v3000_v10, 4  ;;  %v3016_v4 = vperm.slane %v3008_v8, %v9699_v7  ;;  %v11002_v46 = vperm.slane %v3178_v26, %v9699_v7  ;;  %v3031_v28 = vrot.slane %v3004_v21, 4 }
 0x598   :  { %v3006_v0 = vsel %vm623_vm13, %v3005_v49, %v2766_v59  ;;  %v3167_v30 = vsel %vm623_vm13, %v3166_v32, %v2986_v6  ;;  %v3197_v17 = vrot.slane %v10992_v60, 4  ;;  %v11009_v48 = vperm.slane %v3161_v57, %v9699_v7 }
 0x599   :  { %v3012_v52 = vperm.slane %v3006_v0, %v9699_v7  ;;  %v3029_v29 = vrot.slane %v3016_v4, 4  ;;  %v2932_v18 = vpop.f32.mrf.mxu1  ;;  %v3032_v19 = vsel %vm623_vm13, %v3016_v4, %v3031_v28  ;;  %v2850_v53 = vpop.f32.mrf.mxu2  ;;  %v11013_v42 = vperm.slane %v3167_v30, %v9699_v7 }
 0x59a   :  { %v3061_v61 = vrot.slane %v2932_v18, 4  ;;  %v3040_v36 = vperm.slane %v3032_v19, %v9731_v38  ;;  %v3107_v62 = vrot.slane %v2850_v53, 4  ;;  %v3185_v5 = vrot.slane %v11009_v48, 4 }
 0x59b   :  { %v3017_v15 = vrot.slane %v3012_v52, 4  ;;  %v3020_v35 = vsel %vm623_vm13, %v3012_v52, %v3019_v40  ;;  %v3030_v39 = vsel %vm623_vm13, %v3029_v29, %v3004_v21 }
 0x59c   :  { %v2876_v13 = vpop.f32.mrf.mxu3  ;;  %v3028_v63 = vperm.slane %v3020_v35, %v9731_v38  ;;  %v3036_v9 = vperm.slane %v3030_v39, %v9731_v38  ;;  %v3047_v45 = vrot.slane %v3040_v36, 4 }
 0x59d   :  { %v3063_v22 = vrot.slane %v2876_v13, 4  ;;  %v3018_v2 = vsel %vm623_vm13, %v3017_v15, %v3000_v10  ;;  %v3062_v33 = vsel %vm623_vm13, %v3061_v61, %v2876_v13 }
 0x59e   :  { %v2904_v51 = vpop.f32.mrf.mxu0  ;;  %v11024_v37 = vperm.slane %v3018_v2, %v9731_v38  ;;  %v3043_v59 = vrot.slane %v3028_v63, 4  ;;  %v3045_v34 = vrot.slane %v3036_v9, 4  ;;  %v3048_v27 = vsel %vm623_vm13, 0.0, %v3047_v45 }
 0x59f   :  { %v3049_v55 = vrot.slane %v2904_v51, 4  ;;  %v3052_v56 = vsel %vm623_vm13, %v2904_v51, %v3051_v16  ;;  %v3226_v14 = vsel %vm623_vm13, %v3047_v45, %v3036_v9  ;;  %v3231_v54 = vrot.slane %v3048_v27, 4 }
 0x5a0   :  { %v3060_v41 = vperm.slane %v3052_v56, %v9699_v7  ;;  %v3041_v43 = vrot.slane %v11024_v37, 4  ;;  %v11033_v3 = vsel %vm623_vm13, 0.0, %v3043_v59  ;;  %v3046_v23 = vsel %vm623_vm13, 0.0, %v3045_v34 }
 0x5a1   :  { %v3050_v11 = vsel %vm623_vm13, %v3049_v55, %v2848_v25  ;;  %v11039_v25 = vsel %vm623_vm13, %v3043_v59, %v11024_v37  ;;  %v2934_v44 = vpop.f32.mrf.mxu1  ;;  %v3220_v31 = vrot.slane %v11033_v3, 4  ;;  %v11043_v20 = vperm.slane %v3226_v14, %v9699_v7 }
 0x5a2   :  { %v3056_v24 = vperm.slane %v3050_v11, %v9699_v7  ;;  %v3087_v50 = vrot.slane %v3060_v41, 4  ;;  %v3064_v1 = vsel %vm623_vm13, %v2932_v18, %v3063_v22  ;;  %v3068_v47 = vperm.slane %v3062_v33, %v9699_v7 }
 0x5a3   :  { %v3072_v26 = vperm.slane %v3064_v1, %v9699_v7  ;;  %v3117_v21 = vrot.slane %v2934_v44, 4  ;;  %v3232_v49 = vsel %vm623_vm13, %v3231_v54, %v3046_v23  ;;  %v3251_v18 = vrot.slane %v11043_v20, 4 }
 0x5a4   :  { %v2878_v12 = vpop.f32.mrf.mxu3  ;;  %v3075_v58 = vrot.slane %v3056_v24, 4  ;;  %v3073_v8 = vrot.slane %v3068_v47, 4  ;;  %v11064_v61 = vperm.slane %v3232_v49, %v9699_v7  ;;  %v3198_v14 = vsel %vm623_vm13, %v11002_v46, %v3197_v17 }
 0x5a5   :  { %v3119_v10 = vrot.slane %v2878_v12, 4  ;;  %v3085_v6 = vrot.slane %v3072_v26, 4  ;;  %v3088_v28 = vsel %vm623_vm13, %v3072_v26, %v3087_v50  ;;  %v3118_v35 = vsel %vm623_vm13, %v3117_v21, %v2878_v12 }
 0x5a6   :  { %v2906_v32 = vpop.f32.mrf.mxu0  ;;  %v3076_v16 = vsel %vm623_vm13, %v3068_v47, %v3075_v58  ;;  %v3074_v13 = vsel %vm623_vm13, %v3073_v8, %v3056_v24  ;;  %v3096_v30 = vperm.slane %v3088_v28, %v9731_v38  ;;  %v3124_v37 = vperm.slane %v3118_v35, %v9699_v7 }
 0x5a7   :  { %v3105_v57 = vrot.slane %v2906_v32, 4  ;;  %v3108_v40 = vsel %vm623_vm13, %v2906_v32, %v3107_v62  ;;  %v3084_v4 = vperm.slane %v3076_v16, %v9731_v38  ;;  %v11060_v19 = vperm.slane %v3074_v13, %v9731_v38 }
 0x5a8   :  { %v3116_v29 = vperm.slane %v3108_v40, %v9699_v7  ;;  %v3086_v22 = vsel %vm623_vm13, %v3085_v6, %v3060_v41  ;;  %v3103_v15 = vrot.slane %v3096_v30, 4  ;;  %v3120_v9 = vsel %vm623_vm13, %v2934_v44, %v3119_v10 }
 0x5a9   :  { %v3106_v0 = vsel %vm623_vm13, %v3105_v57, %v2850_v53  ;;  %v3099_v51 = vrot.slane %v3084_v4, 4  ;;  %v3092_v53 = vperm.slane %v3086_v22, %v9731_v38  ;;  %v3097_v55 = vrot.slane %v11060_v19, 4 }
 0x5aa   :  { %v3112_v52 = vperm.slane %v3106_v0, %v9699_v7  ;;  %v3143_v63 = vrot.slane %v3116_v29, 4  ;;  %v3104_v2 = vsel %vm623_vm13, 0.0, %v3103_v15  ;;  %v3128_v59 = vperm.slane %v3120_v9, %v9699_v7 }
 0x5ab   :  { %v11069_v39 = vsel %vm623_vm13, 0.0, %v3099_v51  ;;  %v3101_v56 = vrot.slane %v3092_v53, 4  ;;  %v3280_v45 = vsel %vm623_vm13, %v3103_v15, %v3092_v53  ;;  %v3285_v41 = vrot.slane %v3104_v2, 4 }
 0x5ac   :  { %v3131_v36 = vrot.slane %v3112_v52, 4  ;;  %v11076_v62 = vperm.slane %v3280_v45, %v9699_v7  ;;  %v11083_v11 = vsel %vm623_vm13, %v3099_v51, %v11060_v19  ;;  %v3274_v27 = vrot.slane %v11069_v39, 4 }
 0x5ad   :  { %v3102_v34 = vsel %vm623_vm13, 0.0, %v3101_v56  ;;  %v3129_v24 = vrot.slane %v3124_v37, 4  ;;  %v3042_v50 = vsel %vm623_vm13, 0.0, %v3041_v43  ;;  %v3186_v12 = vsel %vm623_vm13, %v11013_v42, %v3185_v5 }
 0x5ae   :  { %v3132_v33 = vsel %vm623_vm13, %v3124_v37, %v3131_v36  ;;  %v3286_v23 = vsel %vm623_vm13, %v3285_v41, %v3102_v34  ;;  %v3141_v58 = vrot.slane %v3128_v59, 4  ;;  %v3144_v44 = vsel %vm623_vm13, %v3128_v59, %v3143_v63 }
 0x5af   :  { %v3140_v54 = vperm.slane %v3132_v33, %v9731_v38  ;;  %v3305_v1 = vrot.slane %v11076_v62, 4  ;;  %v3130_v47 = vsel %vm623_vm13, %v3129_v24, %v3112_v52  ;;  %v3152_v17 = vperm.slane %v3144_v44, %v9731_v38 }
 0x5b0   :  { %v3206_v32 = vperm.slane %v3198_v14, %v9731_v38  ;;  %v3136_v43 = vperm.slane %v3130_v47, %v9731_v38  ;;  %v3142_v26 = vsel %vm623_vm13, %v3141_v58, %v3116_v29  ;;  %v3219_v10 = vperm.slane %v11039_v25, %v9699_v7 }
 0x5b1   :  { %v3155_v5 = vrot.slane %v3140_v54, 4  ;;  %v3148_v57 = vperm.slane %v3142_v26, %v9731_v38  ;;  %v3159_v21 = vrot.slane %v3152_v17, 4  ;;  %v3194_v49 = vperm.slane %v3186_v12, %v9731_v38 }
 0x5b2   :  { %v3221_v8 = vsel %vm623_vm13, %v3220_v31, %v3042_v50  ;;  %v11111_v16 = vperm.slane %v3286_v23, %v9699_v7  ;;  %v3153_v40 = vrot.slane %v3136_v43, 4  ;;  %v3211_v4 = vrot.slane %v3206_v32, 4 }
 0x5b3   :  { %v3225_v6 = vperm.slane %v3221_v8, %v9699_v7  ;;  %v3156_v28 = vsel %vm623_vm13, 0.0, %v3155_v5  ;;  %v3157_v0 = vrot.slane %v3148_v57, 4  ;;  %v3160_v25 = vsel %vm623_vm13, 0.0, %v3159_v21 }
 0x5b4   :  { %v3334_v13 = vsel %vm623_vm13, %v3159_v21, %v3148_v57  ;;  %v3323_v30 = vsel %vm623_vm13, %v3155_v5, %v3136_v43  ;;  %v3339_v31 = vrot.slane %v3160_v25, 4  ;;  %v3239_v52 = vrot.slane %v3219_v10, 4 }
 0x5b5   :  { %v11119_v3 = vperm.slane %v3334_v13, %v9699_v7  ;;  %v3158_v29 = vsel %vm623_vm13, 0.0, %v3157_v0  ;;  %v3252_v22 = vsel %vm623_vm13, %v11064_v61, %v3251_v18  ;;  %v3213_v51 = vrot.slane %v3194_v49, 4 }
 0x5b6   :  { %v3183_v53 = vrot.slane %v11013_v42, 4  ;;  %v3328_v15 = vrot.slane %v3156_v28, 4  ;;  %v3340_v35 = vsel %vm623_vm13, %v3339_v31, %v3158_v29  ;;  %v3240_v36 = vsel %vm623_vm13, %v3225_v6, %v3239_v52 }
 0x5b7   :  { %v3260_v63 = vperm.slane %v3252_v22, %v9731_v38  ;;  %v3359_v9 = vrot.slane %v11119_v3, 4  ;;  %v3212_v56 = vsel %vm623_vm13, %v3211_v4, %v3194_v49  ;;  %v3248_v2 = vperm.slane %v3240_v36, %v9731_v38 }
 0x5b8   :  { %v3184_v45 = vsel %vm623_vm13, %v3183_v53, %v11009_v48  ;;  %v3195_v42 = vrot.slane %v11002_v46, 4  ;;  %v3237_v37 = vrot.slane %v3225_v6, 4  ;;  %v3344_v59 = vperm.slane %v3340_v35, %v9699_v7 }
 0x5b9   :  { %v3265_v18 = vrot.slane %v3260_v63, 4  ;;  %v11134_v41 = vperm.slane %v3184_v45, %v9731_v38  ;;  %v3214_v34 = vsel %vm623_vm13, %v3206_v32, %v3213_v51  ;;  %v3267_v14 = vrot.slane %v3248_v2, 4 }
 0x5ba   :  { %v3249_v24 = vrot.slane %v11064_v61, 4  ;;  %v3196_v50 = vsel %vm623_vm13, %v3195_v42, %v10992_v60  ;;  %v3238_v48 = vsel %vm623_vm13, %v3237_v37, %v3219_v10  ;;  %v3098_v12 = vsel %vm623_vm13, 0.0, %v3097_v55 }
 0x5bb   :  { %v3266_v33 = vsel %vm623_vm13, %v3265_v18, %v3248_v2  ;;  %v3268_v23 = vsel %vm623_vm13, %v3260_v63, %v3267_v14  ;;  %v3209_v54 = vrot.slane %v11134_v41, 4  ;;  %v3244_v58 = vperm.slane %v3238_v48, %v9731_v38 }
 0x5bc   :  { %v8886_v46 = vpack.i.bf16 %v3266_v33, %v3212_v56  ;;  %v8891_v44 = vpack.i.bf16 %v3268_v23, %v3214_v34  ;;  %v3250_v61 = vsel %vm623_vm13, %v3249_v24, %v11043_v20  ;;  %v3273_v60 = vperm.slane %v11083_v11, %v9699_v7 }
 0x5bd   :  { %v3275_v19 = vsel %vm623_vm13, %v3274_v27, %v3098_v12  ;;  %v3202_v55 = vperm.slane %v3196_v50, %v9731_v38  ;;  %v3256_v47 = vperm.slane %v3250_v61, %v9731_v38  ;;  %v3263_v17 = vrot.slane %v3244_v58, 4  ;;  %v8682_v61 = vld [vmem:[%s13507_s7 + $0x20] sm:$0xff] }
 0x5be   :  { %8887 = vrot.lane.b32.xlu2 %v8886_v46, %s9276_s18  ;;  %v3154_v32 = vsel %vm623_vm13, 0.0, %v3153_v40  ;;  %8892 = vrot.lane.b32.xlu1 %v8891_v44, %s9274_s29  ;;  %v3279_v20 = vperm.slane %v3275_v19, %v9699_v7  ;;  %v3293_v43 = vrot.slane %v3273_v60, 4  ;;  %v3306_v39 = vsel %vm623_vm13, %v11111_v16, %v3305_v1  ;;  %v8683_v44 = vld [vmem:[%s13507_s7 + $0x28] sm:$0xff]  ;;  %v8680_v19 = vld [vmem:[%s13507_s7 + $0x10] sm:$0xff] }
 0x5bf   :  { %v3327_v11 = vperm.slane %v3323_v30, %v9699_v7  ;;  %v3210_v27 = vsel %vm623_vm13, %v3202_v55, %v3209_v54  ;;  %v3264_v26 = vsel %vm623_vm13, %v3256_v47, %v3263_v17  ;;  %v3314_v5 = vperm.slane %v3306_v39, %v9731_v38  ;;  %v8685_v54 = vld [vmem:[%s13507_s7 + $0x38] sm:$0xff] }
 0x5c0   :  { %v3329_v10 = vsel %vm623_vm13, %v3328_v15, %v3154_v32  ;;  %v8881_v57 = vpack.i.bf16 %v3264_v26, %v3210_v27  ;;  %v3294_v21 = vsel %vm623_vm13, %v3279_v20, %v3293_v43  ;;  %v3360_v1 = vsel %vm623_vm13, %v3344_v59, %v3359_v9  ;;  %3509 = vmatpush.bf16.msra.mxu2 %v8685_v54 }
 0x5c1   :  { %v3333_v49 = vperm.slane %v3329_v10, %v9699_v7  ;;  %v3347_v8 = vrot.slane %v3327_v11, 4  ;;  %v3302_v40 = vperm.slane %v3294_v21, %v9731_v38  ;;  %v3319_v4 = vrot.slane %v3314_v5, 4 }
 0x5c2   :  { %v3291_v6 = vrot.slane %v3279_v20, 4  ;;  %8882 = vrot.lane.b32.xlu0 %v8881_v57, %s9275_s0  ;;  %v3368_v0 = vperm.slane %v3360_v1, %v9731_v38  ;;  %v3303_v25 = vrot.slane %v11111_v16, 4  ;;  %v3207_v30 = vrot.slane %v3202_v55, 4  ;;  %v8679_v55 = vld [vmem:[%s13507_s7 + $0x8] sm:$0xff] }
 0x5c3   :  { %v3348_v28 = vsel %vm623_vm13, %v3333_v49, %v3347_v8  ;;  %v3345_v13 = vrot.slane %v3333_v49, 4  ;;  %v3357_v29 = vrot.slane %v3344_v59, 4  ;;  %v3261_v35 = vrot.slane %v3256_v47, 4  ;;  %v8678_v47 = vld [vmem:[%s13507_s7] sm:$0xff] }
 0x5c4   :  { %v3356_v31 = vperm.slane %v3348_v28, %v9731_v38  ;;  %v3292_v52 = vsel %vm623_vm13, %v3291_v6, %v3273_v60  ;;  %v3373_v22 = vrot.slane %v3368_v0, 4  ;;  %v3304_v53 = vsel %vm623_vm13, %v3303_v25, %v11076_v62  ;;  %v8681_v60 = vld [vmem:[%s13507_s7 + $0x18] sm:$0xff] }
 0x5c5   :  { %v3298_v51 = vperm.slane %v3292_v52, %v9731_v38  ;;  %v3346_v15 = vsel %vm623_vm13, %v3345_v13, %v3327_v11  ;;  %v3310_v36 = vperm.slane %v3304_v53, %v9731_v38  ;;  %v3358_v63 = vsel %vm623_vm13, %v3357_v29, %v11119_v3 }
 0x5c6   :  { %v3352_v16 = vperm.slane %v3346_v15, %v9731_v38  ;;  %v3320_v9 = vsel %vm623_vm13, %v3319_v4, %v3302_v40  ;;  %v3374_v56 = vsel %vm623_vm13, %v3373_v22, %v3356_v31  ;;  %v3364_v45 = vperm.slane %v3358_v63, %v9731_v38 }
 0x5c7   :  { %v3317_v2 = vrot.slane %v3298_v51, 4  ;;  %v8901_v18 = vpack.i.bf16 %v3374_v56, %v3320_v9  ;;  %v3315_v42 = vrot.slane %v3310_v36, 4  ;;  %v3208_v59 = vsel %vm623_vm13, %v3207_v30, %v11134_v41  ;;  %v13626_v56 = vld [vmem:[#allocation5_spill] sm:$0xff] }
 0x5c8   :  { %v3371_v62 = vrot.slane %v3352_v16, 4  ;;  %v3369_v37 = vrot.slane %v3364_v45, 4  ;;  %v3262_v14 = vsel %vm623_vm13, %v3261_v35, %v3244_v58  ;;  %v3375_v48 = vrot.slane %v3356_v31, 4  ;;  %v8684_v58 = vld [vmem:[%s13507_s7 + $0x30] sm:$0xff] }
 0x5c9   :  { %8902 = vrot.lane.b32.xlu2 %v8901_v18, %s9276_s18  ;;  %v3318_v34 = vsel %vm623_vm13, %v3310_v36, %v3317_v2  ;;  %v3316_v24 = vsel %vm623_vm13, %v3315_v42, %v3298_v51  ;;  %v3321_v12 = vrot.slane %v3302_v40, 4  ;;  %3510 = vmatpush.bf16.msra.mxu2 %v8684_v58  ;;  %v13627_v42 = vld [vmem:[#allocation6_spill] sm:$0xff] }
 0x5ca   :  { %v3372_v3 = vsel %vm623_vm13, %v3364_v45, %v3371_v62  ;;  %v3370_v50 = vsel %vm623_vm13, %v3369_v37, %v3352_v16  ;;  %v3376_v46 = vsel %vm623_vm13, %v3368_v0, %v3375_v48  ;;  %v9033_v16 = vld [vmem:[%s13508_s8] ss:$0 sm:$0xff] }
 0x5cb   :  { %v8896_v33 = vpack.i.bf16 %v3372_v3, %v3318_v34  ;;  %v3322_v41 = vsel %vm623_vm13, %v3314_v5, %v3321_v12  ;;  %v13628_v34 = vld [vmem:[#allocation7_spill] sm:$0xff]  ;;  %v13630_v12 = vld [vmem:[#allocation9_spill] sm:$0xff] }
 0x5cc   :  { %v8906_v23 = vpack.i.bf16 %v3376_v46, %v3322_v41 }
 0x5cd   :  { %8897 = vrot.lane.b32.xlu0 %v8896_v33, %s9275_s0  ;;  %3511 = vmatpush.bf16.msra.mxu2 %v8683_v44  ;;  %v13629_v33 = vld [vmem:[#allocation8_spill] sm:$0xff] }
 0x5d1   :  { %3512 = vmatpush.bf16.msra.mxu2 %v8682_v61 }
 0x5d5   :  { %8907 = vrot.lane.b32.xlu0 %v8906_v23, %s9274_s29  ;;  %3513 = vmatpush.bf16.msra.mxu2 %v8681_v60 }
 0x5d9   :  { %3514 = vmatpush.bf16.msra.mxu2 %v8680_v19 }
 0x5dd   :  { %3515 = vmatpush.bf16.msra.mxu2 %v8679_v55 }
 0x5e1   :  { %3516 = vmatpush.bf16.msra.mxu2 %v8678_v47 }
 0x618   :  { %v8888_v17 = vpop.permute.xlu2 %8887 }
 0x619   :  { %v8890_v11 = vunpack.i.h.bf16 %v8888_v17  ;;  %v8889_v27 = vunpack.i.l.bf16 %v8888_v17 }
 0x623   :  { %v8903_v0 = vpop.permute.xlu2 %8902 }
 0x624   :  { %v8905_v30 = vunpack.i.h.bf16 %v8903_v0  ;;  %v8904_v31 = vunpack.i.l.bf16 %v8903_v0 }
 0x630   :  { %v8893_v32 = vpop.permute.xlu1 %8892 }
 0x631   :  { %v8895_v26 = vunpack.i.h.bf16 %v8893_v32  ;;  %v8894_v5 = vunpack.i.l.bf16 %v8893_v32 }
 0x634   :  { %v8883_v20 = vpop.permute.xlu0 %8882 }
 0x635   :  { %v8885_v43 = vunpack.i.h.bf16 %v8883_v20  ;;  %v8884_v39 = vunpack.i.l.bf16 %v8883_v20 }
 0x637   :  { %v3425_v10 = vsel %vm2081_vm14, %v3208_v59, %v8884_v39  ;;  %v3426_v57 = vsel %vm2081_vm14, %v3262_v14, %v8885_v43  ;;  %v8188_v39 = vld [vmem:[%s13511_s11 + $0x70] sm:$0xf] }
 0x638   :  { %v3430_v21 = vsel %vm3429_vm12, %v3425_v10, %v8889_v27  ;;  %v3431_v49 = vsel %vm3429_vm12, %v3426_v57, %v8890_v11  ;;  %v8701_v11 = vld [vmem:[%s13511_s11 + $0x74] sm:$0xf0]  ;;  %v8700_v27 = vld [vmem:[%s13511_s11 + $0x74] sm:$0xf]  ;;  %v8180_v57 = vld [vmem:[%s13511_s11 + $0x60] sm:$0xf] }
 0x639   :  { %v3435_v8 = vsel %vm3434_vm0, %v3430_v21, %v8894_v5  ;;  %v3436_v40 = vsel %vm3434_vm0, %v3431_v49, %v8895_v26  ;;  %v8189_v26 = vor.u32 %v8701_v11, %v8188_v39  ;;  %v8190_v5 = vld [vmem:[%s13511_s11 + $0x78] sm:$0xf0]  ;;  %v8699_v21 = vld [vmem:[%s13511_s11 + $0x64] sm:$0xf0]  ;;  %v8698_v49 = vld [vmem:[%s13511_s11 + $0x64] sm:$0xf] }
 0x63a   :  { %v3439_v4 = vpack.c.bf16 %v3436_v40, %v3435_v8  ;;  %v8193_v10 = vor.u32 %v8700_v27, %v8190_v5  ;;  %v8181_v8 = vor.u32 %v8699_v21, %v8180_v57  ;;  %v8182_v40 = vld [vmem:[%s13511_s11 + $0x68] sm:$0xf0]  ;;  %v8132_v39 = vld [vmem:[%s13511_s11] sm:$0xf]  ;;  %v8687_v11 = vld [vmem:[%s13511_s11 + $0x4] sm:$0xf0] }
 0x63b   :  { %3732 = vmatpush.bf16.msra.mxu3 %v8189_v26  ;;  %v8686_v26 = vld [vmem:[%s13511_s11 + $0x4] sm:$0xf]  ;;  %v8134_v5 = vld [vmem:[%s13511_s11 + $0x8] sm:$0xf0] }
 0x63c   :  { %3517 = vmatmul.bf16.vlgmr.msra.gmra.mxu2 %v3439_v4  ;;  %3751 = vmatpush.bf16.msrb.mxu0 %v8193_v10  ;;  %v8185_v4 = vor.u32 %v8698_v49, %v8182_v40  ;;  %v8133_v49 = vor.u32 %v8687_v11, %v8132_v39  ;;  %v8708_v11 = vld [vmem:[%s13513_s13 + $0x30] sm:$0xff] }
 0x63f   :  { %v8898_v1 = vpop.permute.xlu0 %8897  ;;  %3733 = vmatpush.bf16.msra.mxu3 %v8181_v8 }
 0x640   :  { %v8900_v6 = vunpack.i.h.bf16 %v8898_v1  ;;  %v8899_v28 = vunpack.i.l.bf16 %v8898_v1  ;;  %v8172_v1 = vld [vmem:[%s13511_s11 + $0x50] sm:$0xf]  ;;  %3752 = vmatpush.bf16.msrb.mxu0 %v8185_v4  ;;  %v8137_v4 = vor.u32 %v8686_v26, %v8134_v5  ;;  %v8714_v26 = vld [vmem:[%s13513_s13 + $0x60] sm:$0xff] }
 0x642   :  { %v3427_v25 = vsel %vm2081_vm14, %v3316_v24, %v8899_v28  ;;  %v3428_v13 = vsel %vm2081_vm14, %v3370_v50, %v8900_v6  ;;  %v8697_v6 = vld [vmem:[%s13511_s11 + $0x54] sm:$0xf0]  ;;  %v8696_v28 = vld [vmem:[%s13511_s11 + $0x54] sm:$0xf] }
 0x643   :  { %v3432_v51 = vsel %vm3429_vm12, %v3427_v25, %v8904_v31  ;;  %v3433_v53 = vsel %vm3429_vm12, %v3428_v13, %v8905_v30  ;;  %v8173_v25 = vor.u32 %v8697_v6, %v8172_v1  ;;  %v8174_v13 = vld [vmem:[%s13511_s11 + $0x58] sm:$0xf0]  ;;  %v8164_v30 = vld [vmem:[%s13511_s11 + $0x40] sm:$0xf]  ;;  %v8695_v31 = vld [vmem:[%s13511_s11 + $0x44] sm:$0xf0] }
 0x645   :  { %3734 = vmatpush.bf16.msra.mxu3 %v8173_v25 }
 0x647   :  { %v8908_v52 = vpop.permute.xlu0 %8907 }
 0x648   :  { %v8910_v29 = vunpack.i.h.bf16 %v8908_v52  ;;  %v8909_v22 = vunpack.i.l.bf16 %v8908_v52 }
 0x64a   :  { %v3437_v15 = vsel %vm3434_vm0, %v3432_v51, %v8909_v22  ;;  %v3438_v35 = vsel %vm3434_vm0, %v3433_v53, %v8910_v29  ;;  %v8177_v29 = vor.u32 %v8696_v28, %v8174_v13  ;;  %v8694_v22 = vld [vmem:[%s13511_s11 + $0x44] sm:$0xf]  ;;  %v8166_v51 = vld [vmem:[%s13511_s11 + $0x48] sm:$0xf0] }
 0x64b   :  { %v3440_v36 = vpack.c.bf16 %v3438_v35, %v3437_v15  ;;  %v8165_v15 = vor.u32 %v8695_v31, %v8164_v30  ;;  %v8169_v35 = vor.u32 %v8694_v22, %v8166_v51 }
 0x64c   :  { %3753 = vmatpush.bf16.msrb.mxu0 %v8177_v29  ;;  %v9034_v29 = vld [vmem:[%s13509_s9] ss:$0 sm:$0xff] }
 0x64d   :  { %3522 = vmatmul.bf16.gmra.mxu2 %v3440_v36  ;;  %v8156_v36 = vld [vmem:[%s13511_s11 + $0x30] sm:$0xf]  ;;  %3735 = vmatpush.bf16.msra.mxu3 %v8165_v15 }
 0x650   :  { %3754 = vmatpush.bf16.msrb.mxu0 %v8169_v35 }
 0x6bf   :  { %v3518_v63 = vpop.f32.mrf.mxu2 }
 0x6c0   :  { %v3519_v9 = vadd.f32 %v9033_v16, %v3518_v63  ;;  %v8692_v63 = vld [vmem:[%s13511_s11 + $0x34] sm:$0xf] }
 0x6c2   :  { %v11245_v2 = vadd.f32 %v3519_v9, %v13626_v56  ;;  %v8158_v9 = vld [vmem:[%s13511_s11 + $0x38] sm:$0xf0] }
 0x6c4   :  { %3534 = vadd.xlane.f32.xlu1 %v11245_v2 }
 0x6c7   :  { %v3520_v45 = vpop.f32.mrf.mxu2 }
 0x6c8   :  { %v3521_v18 = vadd.f32 %v9033_v16, %v3520_v45 }
 0x6ca   :  { %v11249_v62 = vadd.f32 %v3521_v18, %v13627_v42  ;;  %v8161_v18 = vor.u32 %v8692_v63, %v8158_v9  ;;  %v8148_v42 = vld [vmem:[%s13511_s11 + $0x20] sm:$0xf] }
 0x6cc   :  { %3536 = vadd.xlane.f32.xlu2 %v11249_v62  ;;  %3755 = vmatpush.bf16.msrb.mxu0 %v8161_v18 }
 0x6d0   :  { %v3523_v37 = vpop.f32.mrf.mxu2 }
 0x6d1   :  { %v3524_v59 = vadd.f32 %v9033_v16, %v3523_v37  ;;  %v8691_v37 = vld [vmem:[%s13511_s11 + $0x24] sm:$0xf0] }
 0x6d3   :  { %v11253_v3 = vadd.f32 %v3524_v59, %v13628_v34  ;;  %v8690_v34 = vld [vmem:[%s13511_s11 + $0x24] sm:$0xf] }
 0x6d5   :  { %3538 = vadd.xlane.f32.xlu0 %v11253_v3 }
 0x6d8   :  { %v3525_v14 = vpop.f32.mrf.mxu2 }
 0x6d9   :  { %v3526_v24 = vadd.f32 %v9033_v16, %v3525_v14  ;;  %v8693_v16 = vld [vmem:[%s13511_s11 + $0x34] sm:$0xf0]  ;;  %v8150_v14 = vld [vmem:[%s13511_s11 + $0x28] sm:$0xf0] }
 0x6da   :  { %v8157_v56 = vor.u32 %v8693_v16, %v8156_v36  ;;  %v9035_v16 = vld [vmem:[%s13510_s10] ss:$0 sm:$0xff] }
 0x6db   :  { %v11257_v50 = vadd.f32 %v3526_v24, %v13629_v33 }
 0x6dc   :  { %3736 = vmatpush.bf16.msra.mxu3 %v8157_v56 }
 0x6dd   :  { %3540 = vadd.xlane.f32.xlu1 %v11257_v50 }
 0x737   :  { %v3535_v48 = vpop.xlane.xlu1 %3534 }
 0x738   :  { %v3542_v46 = vmul.f32 %v3535_v48, %v13630_v12  ;;  %v8149_v48 = vor.u32 %v8691_v37, %v8148_v42 }
 0x73a   :  { %v11262_v41 = vsub.f32 %v11245_v2, %v3542_v46  ;;  %3737 = vmatpush.bf16.msra.mxu3 %v8149_v48 }
 0x73c   :  { %v3550_v23 = vmul.f32 %v11262_v41, %v11262_v41 }
 0x73e   :  { %3554 = vadd.xlane.f32.xlu2 %v3550_v23  ;;  %v8153_v23 = vor.u32 %v8690_v34, %v8150_v14 }
 0x73f   :  { %v3537_v54 = vpop.xlane.xlu2 %3536 }
 0x740   :  { %v3543_v58 = vmul.f32 %v3537_v54, %v13630_v12  ;;  %v8140_v54 = vld [vmem:[%s13511_s11 + $0x10] sm:$0xf]  ;;  %3756 = vmatpush.bf16.msrb.mxu0 %v8153_v23 }
 0x742   :  { %v11268_v44 = vsub.f32 %v11249_v62, %v3543_v58  ;;  %v8689_v58 = vld [vmem:[%s13511_s11 + $0x14] sm:$0xf0] }
 0x744   :  { %v3551_v61 = vmul.f32 %v11268_v44, %v11268_v44 }
 0x746   :  { %3556 = vadd.xlane.f32.xlu0 %v3551_v61  ;;  %v8688_v61 = vld [vmem:[%s13511_s11 + $0x14] sm:$0xf] }
 0x748   :  { %v3539_v60 = vpop.xlane.xlu0 %3538 }
 0x749   :  { %v3544_v19 = vmul.f32 %v3539_v60, %v13630_v12  ;;  %v8142_v60 = vld [vmem:[%s13511_s11 + $0x18] sm:$0xf0] }
 0x74b   :  { %v11274_v55 = vsub.f32 %v11253_v3, %v3544_v19 }
 0x74d   :  { %v3552_v47 = vmul.f32 %v11274_v55, %v11274_v55 }
 0x74f   :  { %3558 = vadd.xlane.f32.xlu1 %v3552_v47  ;;  %v8141_v47 = vor.u32 %v8689_v58, %v8140_v54 }
 0x750   :  { %v3541_v17 = vpop.xlane.xlu1 %3540 }
 0x751   :  { %v3545_v32 = vmul.f32 %v3541_v17, %v13630_v12  ;;  %3738 = vmatpush.bf16.msra.mxu3 %v8141_v47  ;;  %v8717_v47 = vld [vmem:[%s13513_s13 + $0x78] sm:$0xff] }
 0x752   :  { %3997 = vmatpush.bf16.msrb.mxu2 %v8717_v47 }
 0x753   :  { %v11280_v20 = vsub.f32 %v11257_v50, %v3545_v32 }
 0x755   :  { %v3553_v43 = vmul.f32 %v11280_v20, %v11280_v20  ;;  %3739 = vmatpush.bf16.msra.mxu3 %v8133_v49 }
 0x757   :  { %3560 = vadd.xlane.f32.xlu2 %v3553_v43  ;;  %v8145_v43 = vor.u32 %v8688_v61, %v8142_v60 }
 0x759   :  { %3757 = vmatpush.bf16.msrb.mxu0 %v8145_v43  ;;  %v8715_v43 = vld [vmem:[%s13513_s13 + $0x68] sm:$0xff] }
 0x75d   :  { %3758 = vmatpush.bf16.msrb.mxu0 %v8137_v4 }
 0x7b1   :  { %v3555_v0 = vpop.xlane.xlu2 %3554 }
 0x7b2   :  { %v3562_v52 = vmul.f32 %v3555_v0, %v13630_v12 }
 0x7b4   :  { %v3566_v53 = vadd.f32 1e-06, %v3562_v52 }
 0x7b6   :  { %9119 = vrsqrt.f32 %v3566_v53  ;;  %vm3576_vm2 = vweird.f32 %v3566_v53 }
 0x7b9   :  { %v3557_v45 = vpop.xlane.xlu0 %3556 }
 0x7ba   :  { %v3563_v59 = vmul.f32 %v3557_v45, %v13630_v12 }
 0x7bc   :  { %v9120_v24 = vpop.eup %9119  ;;  %v3567_v33 = vadd.f32 1e-06, %v3563_v59 }
 0x7bd   :  { %v3571_v46 = vmul.f32 %v9120_v24, %v3566_v53  ;;  %vm3577_vm1 = vweird.f32 %v9120_v24 }
 0x7be   :  { %9121 = vrsqrt.f32 %v3567_v33  ;;  %vm3578_vm3 = vmor %vm3576_vm2, %vm3577_vm1  ;;  %vm3586_vm5 = vweird.f32 %v3567_v33 }
 0x7bf   :  { %v3572_v19 = vmul.f32 %v9120_v24, %v3571_v46 }
 0x7c1   :  { %v3573_v17 = vmul.f32 0.5, %v3572_v19 }
 0x7c2   :  { %v3559_v32 = vpop.xlane.xlu1 %3558 }
 0x7c3   :  { %v3564_v27 = vmul.f32 %v3559_v32, %v13630_v12  ;;  %v3574_v10 = vsub.f32 1.5, %v3573_v17  ;;  %v8709_v17 = vld [vmem:[%s13513_s13 + $0x38] sm:$0xff] }
 0x7c4   :  { %v9122_v57 = vpop.eup %9121  ;;  %3978 = vmatpush.bf16.msra.mxu1 %v8709_v17 }
 0x7c5   :  { %v3568_v21 = vadd.f32 1e-06, %v3564_v27  ;;  %v3575_v8 = vmul.f32 %v9120_v24, %v3574_v10  ;;  %v3581_v40 = vmul.f32 %v9122_v57, %v3567_v33  ;;  %vm3587_vm4 = vweird.f32 %v9122_v57 }
 0x7c6   :  { %vm3588_vm6 = vmor %vm3586_vm5, %vm3587_vm4 }
 0x7c7   :  { %9123 = vrsqrt.f32 %v3568_v21  ;;  %v3582_v1 = vmul.f32 %v9122_v57, %v3581_v40  ;;  %v3579_v6 = vsel %vm3578_vm3, %v9120_v24, %v3575_v8  ;;  %vm3596_vm8 = vweird.f32 %v3568_v21  ;;  %v8713_v8 = vld [vmem:[%s13513_s13 + $0x58] sm:$0xff]  ;;  %v8706_v40 = vld [vmem:[%s13513_s13 + $0x20] sm:$0xff] }
 0x7c8   :  { %v3610_v31 = vmul.f32 %v3579_v6, %v11262_v41  ;;  %3979 = vmatpush.bf16.msra.mxu1 %v8708_v11 }
 0x7c9   :  { %v3583_v28 = vmul.f32 0.5, %v3582_v1 }
 0x7ca   :  { %v3561_v0 = vpop.xlane.xlu2 %3560  ;;  %v3617_v36 = vmul.f32 %v9034_v29, %v3610_v31 }
 0x7cb   :  { %v3565_v25 = vmul.f32 %v3561_v0, %v13630_v12  ;;  %v3584_v13 = vsub.f32 1.5, %v3583_v28  ;;  %v8712_v28 = vld [vmem:[%s13513_s13 + $0x50] sm:$0xff] }
 0x7cc   :  { %v3624_v45 = vadd.f32 %v9035_v16, %v3617_v36 }
 0x7cd   :  { %v9124_v30 = vpop.eup %9123  ;;  %v3569_v52 = vadd.f32 1e-06, %v3565_v25  ;;  %v3585_v22 = vmul.f32 %v9122_v57, %v3584_v13 }
 0x7ce   :  { %v3591_v51 = vmul.f32 %v9124_v30, %v3568_v21  ;;  %vm3597_vm7 = vweird.f32 %v9124_v30 }
 0x7cf   :  { %9125 = vrsqrt.f32 %v3569_v52  ;;  %v3589_v53 = vsel %vm3588_vm6, %v9122_v57, %v3585_v22  ;;  %vm3598_vm9 = vmor %vm3596_vm8, %vm3597_vm7  ;;  %vm3606_vm11 = vweird.f32 %v3569_v52  ;;  %v8707_v57 = vld [vmem:[%s13513_s13 + $0x28] sm:$0xff] }
 0x7d0   :  { %v3592_v15 = vmul.f32 %v9124_v30, %v3591_v51  ;;  %v3611_v35 = vmul.f32 %v3589_v53, %v11268_v44  ;;  %3980 = vmatpush.bf16.msra.mxu1 %v8707_v57  ;;  %v8711_v22 = vld [vmem:[%s13513_s13 + $0x48] sm:$0xff] }
 0x7d2   :  { %v3593_v41 = vmul.f32 0.5, %v3592_v15  ;;  %v3618_v63 = vmul.f32 %v9034_v29, %v3611_v35  ;;  %v8704_v35 = vld [vmem:[%s13513_s13 + $0x10] sm:$0xff] }
 0x7d4   :  { %v3594_v9 = vsub.f32 1.5, %v3593_v41  ;;  %v3625_v18 = vadd.f32 %v9035_v16, %v3618_v63  ;;  %3981 = vmatpush.bf16.msra.mxu1 %v8706_v40 }
 0x7d5   :  { %v9126_v56 = vpop.eup %9125 }
 0x7d6   :  { %v3595_v42 = vmul.f32 %v9124_v30, %v3594_v9  ;;  %v3601_v37 = vmul.f32 %v9126_v56, %v3569_v52  ;;  %v3628_v59 = vpack.c.bf16 %v3625_v18, %v3624_v45  ;;  %vm3607_vm10 = vweird.f32 %v9126_v56  ;;  %v8710_v9 = vld [vmem:[%s13513_s13 + $0x40] sm:$0xff] }
 0x7d7   :  { %vm3608_vm1 = vmor %vm3606_vm11, %vm3607_vm10 }
 0x7d8   :  { %v3602_v34 = vmul.f32 %v9126_v56, %v3601_v37  ;;  %3740 = vmatmul.bf16.vlgmr.msra.gmra.mxu3 %v3628_v59  ;;  %3759 = vmatmul.bf16.vlgmr.msrb.gmra.mxu0 %v3628_v59  ;;  %v3599_v14 = vsel %vm3598_vm9, %v9124_v30, %v3595_v42  ;;  %v8705_v30 = vld [vmem:[%s13513_s13 + $0x18] sm:$0xff]  ;;  %v8703_v37 = vld [vmem:[%s13513_s13 + $0x8] sm:$0xff] }
 0x7d9   :  { %v3612_v33 = vmul.f32 %v3599_v14, %v11274_v55  ;;  %v3646_v55 = vld [vmem:[%s13512_s12] sm:$0x3]  ;;  %3982 = vmatpush.bf16.msra.mxu1 %v8705_v30 }
 0x7da   :  { %v3603_v44 = vmul.f32 0.5, %v3602_v34  ;;  %v11406_v32 = vperm.slane %v3646_v55, 1  ;;  %v11422_v10 = vperm.slane %v3646_v55, 0 }
 0x7db   :  { %v3619_v54 = vmul.f32 %v9034_v29, %v3612_v33 }
 0x7dc   :  { %v3604_v24 = vsub.f32 1.5, %v3603_v44 }
 0x7dd   :  { %v3626_v61 = vadd.f32 %v9035_v16, %v3619_v54  ;;  %3983 = vmatpush.bf16.msra.mxu1 %v8704_v35 }
 0x7de   :  { %v3605_v48 = vmul.f32 %v9126_v56, %v3604_v24 }
 0x7e0   :  { %v3609_v46 = vsel %vm3608_vm1, %v9126_v56, %v3605_v48 }
 0x7e1   :  { %v3613_v23 = vmul.f32 %v3609_v46, %v11280_v20  ;;  %v8716_v20 = vld [vmem:[%s13513_s13 + $0x70] sm:$0xff]  ;;  %3984 = vmatpush.bf16.msra.mxu1 %v8703_v37  ;;  %v8702_v46 = vld [vmem:[%s13513_s13] sm:$0xff] }
 0x7e2   :  { %3998 = vmatpush.bf16.msrb.mxu2 %v8716_v20 }
 0x7e3   :  { %v3620_v58 = vmul.f32 %v9034_v29, %v3613_v23 }
 0x7e5   :  { %v3627_v60 = vadd.f32 %v9035_v16, %v3620_v58  ;;  %3985 = vmatpush.bf16.msra.mxu1 %v8702_v46 }
 0x7e6   :  { %3999 = vmatpush.bf16.msrb.mxu2 %v8715_v43 }
 0x7e7   :  { %v3629_v19 = vpack.c.bf16 %v3627_v60, %v3626_v61 }
 0x7e9   :  { %3745 = vmatmul.bf16.gmra.mxu3 %v3629_v19  ;;  %3764 = vmatmul.bf16.gmra.mxu0 %v3629_v19 }
 0x7ea   :  { %4000 = vmatpush.bf16.msrb.mxu2 %v8714_v26 }
 0x7ee   :  { %4001 = vmatpush.bf16.msrb.mxu2 %v8713_v8 }
 0x7f2   :  { %4002 = vmatpush.bf16.msrb.mxu2 %v8712_v28 }
 0x7f6   :  { %4003 = vmatpush.bf16.msrb.mxu2 %v8711_v22 }
 0x7fa   :  { %4004 = vmatpush.bf16.msrb.mxu2 %v8710_v9 }
 0x855   :  { %v3760_v39 = vpop.f32.mrf.mxu0 }
 0x856   :  { %v11415_v27 = vadd.f32 %v3760_v39, %v11406_v32 }
 0x858   :  { %v3771_v5 = vmul.f32 %v11415_v27, %v11415_v27 }
 0x85a   :  { %v3779_v21 = vmul.f32 %v3771_v5, %v11415_v27 }
 0x85b   :  { %v3741_v49 = vpop.f32.mrf.mxu3 }
 0x85c   :  { %v3787_v4 = vmul.f32 0.044715, %v3779_v21  ;;  %v11435_v1 = vadd.f32 %v3741_v49, %v11422_v10 }
 0x85d   :  { %v3762_v6 = vpop.f32.mrf.mxu0 }
 0x85e   :  { %v3795_v0 = vadd.f32 %v3787_v4, %v11415_v27  ;;  %v3770_v25 = vmul.f32 %v11435_v1, %v11435_v1  ;;  %v11444_v13 = vadd.f32 %v3762_v6, %v11406_v32 }
 0x860   :  { %v3803_v31 = vmul.f32 0.7978846, %v3795_v0  ;;  %v3778_v52 = vmul.f32 %v3770_v25, %v11435_v1  ;;  %v3773_v29 = vmul.f32 %v11444_v13, %v11444_v13 }
 0x862   :  { %v3786_v51 = vmul.f32 0.044715, %v3778_v52  ;;  %v3781_v53 = vmul.f32 %v3773_v29, %v11444_v13  ;;  %9127 = vtanh.f32 %v3803_v31 }
 0x863   :  { %v3743_v15 = vpop.f32.mrf.mxu3 }
 0x864   :  { %v3794_v36 = vadd.f32 %v3786_v51, %v11435_v1  ;;  %v3789_v16 = vmul.f32 0.044715, %v3781_v53  ;;  %v11461_v41 = vadd.f32 %v3743_v15, %v11422_v10 }
 0x866   :  { %v3765_v63 = vpop.f32.mrf.mxu0  ;;  %v3802_v56 = vmul.f32 0.7978846, %v3794_v36  ;;  %v3797_v45 = vadd.f32 %v3789_v16, %v11444_v13  ;;  %v3772_v18 = vmul.f32 %v11461_v41, %v11461_v41 }
 0x867   :  { %v11470_v42 = vadd.f32 %v3765_v63, %v11406_v32 }
 0x868   :  { %v3805_v59 = vmul.f32 0.7978846, %v3797_v45  ;;  %v3780_v34 = vmul.f32 %v3772_v18, %v11461_v41  ;;  %9129 = vtanh.f32 %v3802_v56  ;;  %v9128_v14 = vpop.eup %9127 }
 0x869   :  { %v3775_v44 = vmul.f32 %v11470_v42, %v11470_v42  ;;  %v3819_v61 = vadd.f32 1.0, %v9128_v14 }
 0x86a   :  { %9131 = vtanh.f32 %v3805_v59  ;;  %v3788_v24 = vmul.f32 0.044715, %v3780_v34 }
 0x86b   :  { %v3783_v33 = vmul.f32 %v3775_v44, %v11470_v42  ;;  %v3827_v5 = vmul.f32 0.5, %v3819_v61 }
 0x86c   :  { %v3746_v48 = vpop.f32.mrf.mxu3  ;;  %v3796_v23 = vadd.f32 %v3788_v24, %v11461_v41 }
 0x86d   :  { %v3791_v54 = vmul.f32 0.044715, %v3783_v33  ;;  %v11484_v58 = vadd.f32 %v3746_v48, %v11422_v10  ;;  %v3835_v0 = vmul.f32 %v3827_v5, %v11415_v27 }
 0x86e   :  { %v3767_v60 = vpop.f32.mrf.mxu0  ;;  %v3804_v19 = vmul.f32 0.7978846, %v3796_v23  ;;  %v9130_v17 = vpop.eup %9129 }
 0x86f   :  { %v3799_v47 = vadd.f32 %v3791_v54, %v11470_v42  ;;  %v3774_v55 = vmul.f32 %v11484_v58, %v11484_v58  ;;  %v3768_v20 = vadd.f32 %v3767_v60, %v11406_v32  ;;  %v3818_v8 = vadd.f32 1.0, %v9130_v17 }
 0x870   :  { %v9132_v43 = vpop.eup %9131  ;;  %9133 = vtanh.f32 %v3804_v19  ;;  %v9036_v19 = vld [vmem:[%s13514_s14] ss:$0 sm:$0xff] }
 0x871   :  { %v3782_v39 = vmul.f32 %v3774_v55, %v11484_v58  ;;  %v3777_v11 = vmul.f32 %v3768_v20, %v3768_v20  ;;  %v3807_v26 = vmul.f32 0.7978846, %v3799_v47  ;;  %v3821_v57 = vadd.f32 1.0, %v9132_v43 }
 0x872   :  { %v3826_v22 = vmul.f32 0.5, %v3818_v8 }
 0x873   :  { %v3790_v21 = vmul.f32 0.044715, %v3782_v39  ;;  %v3785_v49 = vmul.f32 %v3777_v11, %v3768_v20  ;;  %v3829_v40 = vmul.f32 0.5, %v3821_v57  ;;  %9135 = vtanh.f32 %v3807_v26 }
 0x874   :  { %v3748_v4 = vpop.f32.mrf.mxu3 }
 0x875   :  { %v3798_v6 = vadd.f32 %v3790_v21, %v11484_v58  ;;  %v3793_v28 = vmul.f32 0.044715, %v3785_v49  ;;  %v3749_v32 = vadd.f32 %v3748_v4, %v11422_v10  ;;  %v3837_v25 = vmul.f32 %v3829_v40, %v11444_v13 }
 0x876   :  { %v9134_v30 = vpop.eup %9133  ;;  %v3834_v10 = vmul.f32 %v3826_v22, %v11435_v1 }
 0x877   :  { %v3801_v31 = vadd.f32 %v3793_v28, %v3768_v20  ;;  %v3776_v52 = vmul.f32 %v3749_v32, %v3749_v32  ;;  %v3806_v29 = vmul.f32 0.7978846, %v3798_v6  ;;  %v3820_v51 = vadd.f32 1.0, %v9134_v30 }
 0x878   :  { %v3843_v53 = vpack.c.bf16 %v3837_v25, %v3835_v0 }
 0x879   :  { %v3784_v15 = vmul.f32 %v3776_v52, %v3749_v32  ;;  %v3809_v35 = vmul.f32 0.7978846, %v3801_v31  ;;  %v3828_v36 = vmul.f32 0.5, %v3820_v51  ;;  %9137 = vtanh.f32 %v3806_v29  ;;  %v9136_v16 = vpop.eup %9135 }
 0x87a   :  { %4005 = vmatmul.bf16.vlgmr.msrb.gmra.mxu2 %v3843_v53  ;;  %v3823_v56 = vadd.f32 1.0, %v9136_v16  ;;  %v8379_v16 = vld [vmem:[%s13505_s5 + $0x168] sm:$0xf] }
 0x87b   :  { %v3792_v63 = vmul.f32 0.044715, %v3784_v15  ;;  %9139 = vtanh.f32 %v3809_v35  ;;  %v3836_v27 = vmul.f32 %v3828_v36, %v11461_v41 }
 0x87c   :  { %v3831_v34 = vmul.f32 0.5, %v3823_v56  ;;  %v8741_v56 = vld [vmem:[%s13505_s5 + $0x178] sm:$0xf0] }
 0x87d   :  { %v3800_v13 = vadd.f32 %v3792_v63, %v3749_v32  ;;  %v3842_v9 = vpack.c.bf16 %v3836_v27, %v3834_v10  ;;  %v8740_v63 = vld [vmem:[%s13505_s5 + $0x170] sm:$0xf0]  ;;  %v8739_v10 = vld [vmem:[%s13505_s5 + $0x16c] sm:$0xf] }
 0x87e   :  { %v3839_v24 = vmul.f32 %v3831_v34, %v11470_v42  ;;  %v8380_v27 = vor.u32 %v8740_v63, %v8379_v16  ;;  %v8736_v34 = vld [vmem:[%s13505_s5 + $0x154] sm:$0xf]  ;;  %v8321_v16 = vld [vmem:[%s13505_s5 + $0xfc] sm:$0xf0]  ;;  %v8327_v63 = vld [vmem:[%s13505_s5 + $0xf8] sm:$0xf] }
 0x87f   :  { %v3808_v45 = vmul.f32 0.7978846, %v3800_v13  ;;  %v9138_v18 = vpop.eup %9137  ;;  %3986 = vmatmul.bf16.vlgmr.msra.gmra.mxu1 %v3842_v9  ;;  %v8381_v13 = vld [vmem:[%s13505_s5 + $0x174] sm:$0xf0]  ;;  %v8387_v9 = vld [vmem:[%s13505_s5 + $0x170] sm:$0xf] }
 0x880   :  { %v3822_v14 = vadd.f32 1.0, %v9138_v18  ;;  %v8388_v18 = vor.u32 %v8741_v56, %v8387_v9  ;;  %4290 = vmatpush.bf16.msrb.mxu3 %v8380_v27 }
 0x881   :  { %v9140_v37 = vpop.eup %9139  ;;  %9141 = vtanh.f32 %v3808_v45  ;;  %v8384_v45 = vor.u32 %v8739_v10, %v8381_v13  ;;  %v8726_v10 = vld [vmem:[%s13505_s5 + $0x100] sm:$0xf0] }
 0x882   :  { %v3825_v59 = vadd.f32 1.0, %v9140_v37  ;;  %v3830_v23 = vmul.f32 0.5, %v3822_v14  ;;  %4328 = vmatpush.bf16.msrb.mxu1 %v8388_v18  ;;  %v8367_v37 = vld [vmem:[%s13505_s5 + $0x150] sm:$0xf]  ;;  %v8369_v14 = vld [vmem:[%s13505_s5 + $0x15c] sm:$0xf0]  ;;  %v8328_v18 = vor.u32 %v8726_v10, %v8327_v63 }
 0x883   :  { %4309 = vmatpush.bf16.msra.mxu0 %v8384_v45 }
 0x884   :  { %v3833_v44 = vmul.f32 0.5, %v3825_v59  ;;  %v3838_v54 = vmul.f32 %v3830_v23, %v11484_v58  ;;  %v8737_v59 = vld [vmem:[%s13505_s5 + $0x158] sm:$0xf0]  ;;  %v8734_v23 = vld [vmem:[%s13505_s5 + $0x140] sm:$0xf0] }
 0x886   :  { %v3841_v33 = vmul.f32 %v3833_v44, %v3768_v20  ;;  %v8368_v44 = vor.u32 %v8737_v59, %v8367_v37  ;;  %v8307_v59 = vld [vmem:[%s13505_s5 + $0xd8] sm:$0xf] }
 0x887   :  { %v9142_v48 = vpop.eup %9141 }
 0x888   :  { %v3845_v46 = vpack.c.bf16 %v3841_v33, %v3839_v24  ;;  %v3824_v1 = vadd.f32 1.0, %v9142_v48  ;;  %v8375_v24 = vld [vmem:[%s13505_s5 + $0x158] sm:$0xf]  ;;  %v8738_v33 = vld [vmem:[%s13505_s5 + $0x160] sm:$0xf0]  ;;  %v8372_v48 = vor.u32 %v8736_v34, %v8369_v14  ;;  %4291 = vmatpush.bf16.msrb.mxu3 %v8368_v44 }
 0x889   :  { %v8722_v34 = vld [vmem:[%s13505_s5 + $0xe0] sm:$0xf0]  ;;  %v8721_v44 = vld [vmem:[%s13505_s5 + $0xdc] sm:$0xf] }
 0x88a   :  { %4010 = vmatmul.bf16.gmra.mxu2 %v3845_v46  ;;  %v3832_v41 = vmul.f32 0.5, %v3824_v1  ;;  %v8376_v46 = vor.u32 %v8738_v33, %v8375_v24  ;;  %v8355_v1 = vld [vmem:[%s13505_s5 + $0x138] sm:$0xf]  ;;  %4310 = vmatpush.bf16.msra.mxu0 %v8372_v48  ;;  %v8308_v33 = vor.u32 %v8722_v34, %v8307_v59  ;;  %v8309_v48 = vld [vmem:[%s13505_s5 + $0xe4] sm:$0xf0] }
 0x88c   :  { %v3840_v61 = vmul.f32 %v3832_v41, %v3749_v32  ;;  %v8733_v41 = vld [vmem:[%s13505_s5 + $0x13c] sm:$0xf]  ;;  %4329 = vmatpush.bf16.msrb.mxu1 %v8376_v46  ;;  %v8315_v46 = vld [vmem:[%s13505_s5 + $0xe0] sm:$0xf] }
 0x88e   :  { %v3844_v60 = vpack.c.bf16 %v3840_v61, %v3838_v54  ;;  %v8356_v61 = vor.u32 %v8734_v23, %v8355_v1  ;;  %v8312_v23 = vor.u32 %v8721_v44, %v8309_v48 }
 0x890   :  { %3991 = vmatmul.bf16.gmra.mxu1 %v3844_v60  ;;  %v8357_v60 = vld [vmem:[%s13505_s5 + $0x144] sm:$0xf0]  ;;  %4292 = vmatpush.bf16.msrb.mxu3 %v8356_v61  ;;  %v8719_v61 = vld [vmem:[%s13505_s5 + $0xc8] sm:$0xf0] }
 0x8fc   :  { %v3987_v47 = vpop.f32.mrf.mxu1 }
 0x8fd   :  { %v4006_v55 = vpop.f32.mrf.mxu2  ;;  %v3988_v17 = vadd.f32 %v9036_v19, %v3987_v47  ;;  %v8735_v47 = vld [vmem:[%s13505_s5 + $0x148] sm:$0xf0] }
 0x8ff   :  { %v4007_v42 = vadd.f32 %v4006_v55, %v3988_v17  ;;  %v8360_v17 = vor.u32 %v8733_v41, %v8357_v60  ;;  %v8723_v41 = vld [vmem:[%s13505_s5 + $0xe8] sm:$0xf0] }
 0x901   :  { %v11503_v20 = vadd.f32 %v4007_v42, %v11245_v2  ;;  %4311 = vmatpush.bf16.msra.mxu0 %v8360_v17 }
 0x903   :  { %13631 = vst [vmem:[#allocation18_spill] sm:$0xff] %v11503_v20  ;;  %4024 = vadd.xlane.f32.xlu0 %v11503_v20 }
 0x904   :  { %v3989_v43 = vpop.f32.mrf.mxu1 }
 0x905   :  { %v4008_v39 = vpop.f32.mrf.mxu2  ;;  %v3990_v11 = vadd.f32 %v9036_v19, %v3989_v43  ;;  %v8343_v43 = vld [vmem:[%s13505_s5 + $0x120] sm:$0xf] }
 0x907   :  { %v4009_v58 = vadd.f32 %v4008_v39, %v3990_v11  ;;  %v8731_v39 = vld [vmem:[%s13505_s5 + $0x128] sm:$0xf0]  ;;  %v8730_v11 = vld [vmem:[%s13505_s5 + $0x124] sm:$0xf] }
 0x909   :  { %v11507_v26 = vadd.f32 %v4009_v58, %v11249_v62  ;;  %v8345_v58 = vld [vmem:[%s13505_s5 + $0x12c] sm:$0xf0] }
 0x90b   :  { %13632 = vst [vmem:[#allocation12_spill] sm:$0xff] %v11507_v26  ;;  %4026 = vadd.xlane.f32.xlu1 %v11507_v26 }
 0x90d   :  { %v3992_v5 = vpop.f32.mrf.mxu1  ;;  %v4011_v57 = vpop.f32.mrf.mxu2 }
 0x90e   :  { %v3993_v21 = vadd.f32 %v9036_v19, %v3992_v5  ;;  %v8351_v5 = vld [vmem:[%s13505_s5 + $0x128] sm:$0xf] }
 0x910   :  { %v4012_v49 = vadd.f32 %v4011_v57, %v3993_v21  ;;  %v8732_v57 = vld [vmem:[%s13505_s5 + $0x130] sm:$0xf0] }
 0x912   :  { %v11511_v8 = vadd.f32 %v4012_v49, %v11253_v3  ;;  %v8344_v49 = vor.u32 %v8731_v39, %v8343_v43 }
 0x914   :  { %13633 = vst [vmem:[#allocation19_spill] sm:$0xff] %v11511_v8  ;;  %4028 = vadd.xlane.f32.xlu2 %v11511_v8  ;;  %4293 = vmatpush.bf16.msrb.mxu3 %v8344_v49 }
 0x915   :  { %v3994_v2 = vpop.f32.mrf.mxu1  ;;  %v4013_v4 = vpop.f32.mrf.mxu2 }
 0x916   :  { %v3995_v40 = vadd.f32 %v9036_v19, %v3994_v2  ;;  %v8363_v19 = vld [vmem:[%s13505_s5 + $0x140] sm:$0xf]  ;;  %v8348_v2 = vor.u32 %v8730_v11, %v8345_v58  ;;  %v8303_v11 = vld [vmem:[%s13505_s5 + $0xc8] sm:$0xf]  ;;  %v8720_v58 = vld [vmem:[%s13505_s5 + $0xd0] sm:$0xf0] }
 0x917   :  { %v8364_v42 = vor.u32 %v8735_v47, %v8363_v19  ;;  %v8316_v19 = vor.u32 %v8723_v41, %v8315_v46  ;;  %v8718_v47 = vld [vmem:[%s13505_s5 + $0xc4] sm:$0xf]  ;;  %v8304_v49 = vor.u32 %v8720_v58, %v8303_v11 }
 0x918   :  { %v4014_v6 = vadd.f32 %v4013_v4, %v3995_v40  ;;  %v8352_v40 = vor.u32 %v8732_v57, %v8351_v5  ;;  %v8331_v4 = vld [vmem:[%s13505_s5 + $0x108] sm:$0xf]  ;;  %4312 = vmatpush.bf16.msra.mxu0 %v8348_v2 }
 0x919   :  { %4330 = vmatpush.bf16.msrb.mxu1 %v8364_v42 }
 0x91a   :  { %v11515_v28 = vadd.f32 %v4014_v6, %v11257_v50  ;;  %v8728_v6 = vld [vmem:[%s13505_s5 + $0x110] sm:$0xf0] }
 0x91c   :  { %13634 = vst [vmem:[#allocation20_spill] sm:$0xff] %v11515_v28  ;;  %4030 = vadd.xlane.f32.xlu0 %v11515_v28 }
 0x91d   :  { %4331 = vmatpush.bf16.msrb.mxu1 %v8352_v40 }
 0x976   :  { %v4025_v62 = vpop.xlane.xlu0 %4024 }
 0x977   :  { %v4032_v32 = vmul.f32 %v4025_v62, %v13630_v12  ;;  %v8727_v62 = vld [vmem:[%s13505_s5 + $0x10c] sm:$0xf] }
 0x979   :  { %v11520_v0 = vsub.f32 %v11503_v20, %v4032_v32 }
 0x97b   :  { %v4040_v3 = vmul.f32 %v11520_v0, %v11520_v0 }
 0x97d   :  { %4044 = vadd.xlane.f32.xlu1 %v4040_v3  ;;  %v8332_v3 = vor.u32 %v8728_v6, %v8331_v4 }
 0x97e   :  { %v4027_v25 = vpop.xlane.xlu1 %4026 }
 0x97f   :  { %v4033_v30 = vmul.f32 %v4027_v25, %v13630_v12  ;;  %v8333_v25 = vld [vmem:[%s13505_s5 + $0x114] sm:$0xf0]  ;;  %4294 = vmatpush.bf16.msrb.mxu3 %v8332_v3 }
 0x981   :  { %v11526_v31 = vsub.f32 %v11507_v26, %v4033_v30  ;;  %v8339_v30 = vld [vmem:[%s13505_s5 + $0x110] sm:$0xf] }
 0x983   :  { %v4041_v50 = vmul.f32 %v11526_v31, %v11526_v31 }
 0x985   :  { %4046 = vadd.xlane.f32.xlu2 %v4041_v50  ;;  %v8729_v50 = vld [vmem:[%s13505_s5 + $0x118] sm:$0xf0] }
 0x987   :  { %v4029_v52 = vpop.xlane.xlu2 %4028 }
 0x988   :  { %v4034_v29 = vmul.f32 %v4029_v52, %v13630_v12 }
 0x98a   :  { %v11532_v22 = vsub.f32 %v11511_v8, %v4034_v29  ;;  %v8336_v29 = vor.u32 %v8727_v62, %v8333_v25 }
 0x98c   :  { %v4042_v51 = vmul.f32 %v11532_v22, %v11532_v22  ;;  %4313 = vmatpush.bf16.msra.mxu0 %v8336_v29 }
 0x98e   :  { %4048 = vadd.xlane.f32.xlu0 %v4042_v51  ;;  %v8340_v51 = vor.u32 %v8729_v50, %v8339_v30 }
 0x98f   :  { %v4031_v53 = vpop.xlane.xlu0 %4030 }
 0x990   :  { %v4035_v15 = vmul.f32 %v4031_v53, %v13630_v12  ;;  %v8319_v53 = vld [vmem:[%s13505_s5 + $0xf0] sm:$0xf]  ;;  %4332 = vmatpush.bf16.msrb.mxu1 %v8340_v51 }
 0x992   :  { %v11538_v35 = vsub.f32 %v11515_v28, %v4035_v15  ;;  %v8725_v15 = vld [vmem:[%s13505_s5 + $0xf8] sm:$0xf0] }
 0x993   :  { %v8320_v9 = vor.u32 %v8725_v15, %v8319_v53 }
 0x994   :  { %v4043_v36 = vmul.f32 %v11538_v35, %v11538_v35  ;;  %4333 = vmatpush.bf16.msrb.mxu1 %v8328_v18 }
 0x995   :  { %4295 = vmatpush.bf16.msrb.mxu3 %v8320_v9 }
 0x996   :  { %4050 = vadd.xlane.f32.xlu1 %v4043_v36  ;;  %v8724_v36 = vld [vmem:[%s13505_s5 + $0xf4] sm:$0xf] }
 0x997   :  { %v8324_v45 = vor.u32 %v8724_v36, %v8321_v16 }
 0x998   :  { %4334 = vmatpush.bf16.msrb.mxu1 %v8316_v19 }
 0x999   :  { %4314 = vmatpush.bf16.msra.mxu0 %v8324_v45  ;;  %4296 = vmatpush.bf16.msrb.mxu3 %v8308_v33 }
 0x99c   :  { %4335 = vmatpush.bf16.msrb.mxu1 %v8304_v49 }
 0x99d   :  { %4315 = vmatpush.bf16.msra.mxu0 %v8312_v23 }
 0x9f0   :  { %v4045_v54 = vpop.xlane.xlu1 %4044 }
 0x9f1   :  { %v4052_v55 = vmul.f32 %v4045_v54, %v13630_v12  ;;  %v8295_v54 = vld [vmem:[%s13505_s5 + $0xc0] sm:$0xf] }
 0x9f2   :  { %v8296_v43 = vor.u32 %v8719_v61, %v8295_v54 }
 0x9f3   :  { %v11615_v21 = vadd.f32 1e-06, %v4052_v55  ;;  %v8297_v55 = vld [vmem:[%s13505_s5 + $0xcc] sm:$0xf0] }
 0x9f4   :  { %v8300_v39 = vor.u32 %v8718_v47, %v8297_v55  ;;  %4297 = vmatpush.bf16.msrb.mxu3 %v8296_v43 }
 0x9f5   :  { %9143 = vrsqrt.f32 %v11615_v21  ;;  %vm4066_vm3 = vweird.f32 %v11615_v21 }
 0x9f6   :  { %4316 = vmatpush.bf16.msra.mxu0 %v8300_v39 }
 0x9f8   :  { %v4047_v32 = vpop.xlane.xlu2 %4046 }
 0x9f9   :  { %v4053_v52 = vmul.f32 %v4047_v32, %v13630_v12 }
 0x9fb   :  { %v9144_v27 = vpop.eup %9143  ;;  %v11655_v13 = vadd.f32 1e-06, %v4053_v52 }
 0x9fc   :  { %v4061_v56 = vmul.f32 %v9144_v27, %v11615_v21  ;;  %vm4067_vm2 = vweird.f32 %v9144_v27  ;;  %v9037_v21 = vld [vmem:[%s13503_s3 + $0x1] ss:$0 sm:$0xff] }
 0x9fd   :  { %9145 = vrsqrt.f32 %v11655_v13  ;;  %vm4068_vm4 = vmor %vm4066_vm3, %vm4067_vm2  ;;  %vm4076_vm6 = vweird.f32 %v11655_v13 }
 0x9fe   :  { %v4062_v37 = vmul.f32 %v9144_v27, %v4061_v56 }
 0xa00   :  { %v4063_v14 = vmul.f32 0.5, %v4062_v37 }
 0xa01   :  { %v4049_v24 = vpop.xlane.xlu0 %4048 }
 0xa02   :  { %v4054_v1 = vmul.f32 %v4049_v24, %v13630_v12  ;;  %v4064_v60 = vsub.f32 1.5, %v4063_v14 }
 0xa03   :  { %v9146_v17 = vpop.eup %9145 }
 0xa04   :  { %v4058_v42 = vadd.f32 1e-06, %v4054_v1  ;;  %v4065_v5 = vmul.f32 %v9144_v27, %v4064_v60  ;;  %v4071_v57 = vmul.f32 %v9146_v17, %v11655_v13  ;;  %vm4077_vm5 = vweird.f32 %v9146_v17 }
 0xa05   :  { %vm4078_vm7 = vmor %vm4076_vm6, %vm4077_vm5 }
 0xa06   :  { %9147 = vrsqrt.f32 %v4058_v42  ;;  %v4072_v2 = vmul.f32 %v9146_v17, %v4071_v57  ;;  %v4069_v40 = vsel %vm4068_vm4, %v9144_v27, %v4065_v5  ;;  %vm4086_vm9 = vweird.f32 %v4058_v42 }
 0xa07   :  { %v4100_v25 = vmul.f32 %v4069_v40, %v11520_v0  ;;  %v9038_v0 = vld [vmem:[%s13504_s4 + $0x1] ss:$0 sm:$0xff] }
 0xa08   :  { %v4073_v4 = vmul.f32 0.5, %v4072_v2 }
 0xa09   :  { %v4051_v6 = vpop.xlane.xlu1 %4050  ;;  %v4107_v15 = vmul.f32 %v9037_v21, %v4100_v25 }
 0xa0a   :  { %v4055_v62 = vmul.f32 %v4051_v6, %v13630_v12  ;;  %v4074_v32 = vsub.f32 1.5, %v4073_v4 }
 0xa0b   :  { %v4114_v27 = vadd.f32 %v9038_v0, %v4107_v15 }
 0xa0c   :  { %v9148_v3 = vpop.eup %9147  ;;  %v4059_v30 = vadd.f32 1e-06, %v4055_v62  ;;  %v4075_v50 = vmul.f32 %v9146_v17, %v4074_v32 }
 0xa0d   :  { %v4081_v52 = vmul.f32 %v9148_v3, %v4058_v42  ;;  %vm4087_vm8 = vweird.f32 %v9148_v3 }
 0xa0e   :  { %9149 = vrsqrt.f32 %v4059_v30  ;;  %v4079_v29 = vsel %vm4078_vm7, %v9146_v17, %v4075_v50  ;;  %vm4088_vm10 = vmor %vm4086_vm9, %vm4087_vm8  ;;  %vm4096_vm1 = vweird.f32 %v4059_v30 }
 0xa0f   :  { %v4082_v51 = vmul.f32 %v9148_v3, %v4081_v52  ;;  %v4101_v53 = vmul.f32 %v4079_v29, %v11526_v31 }
 0xa11   :  { %v4083_v36 = vmul.f32 0.5, %v4082_v51  ;;  %v4108_v16 = vmul.f32 %v9037_v21, %v4101_v53 }
 0xa13   :  { %v4084_v63 = vsub.f32 1.5, %v4083_v36  ;;  %v4115_v9 = vadd.f32 %v9038_v0, %v4108_v16 }
 0xa14   :  { %v9150_v10 = vpop.eup %9149 }
 0xa15   :  { %v4085_v56 = vmul.f32 %v9148_v3, %v4084_v63  ;;  %v4091_v13 = vmul.f32 %v9150_v10, %v4059_v30  ;;  %v4118_v45 = vpack.c.bf16 %v4115_v9, %v4114_v27  ;;  %vm4097_vm11 = vweird.f32 %v9150_v10 }
 0xa16   :  { %vm4098_vm2 = vmor %vm4096_vm1, %vm4097_vm11 }
 0xa17   :  { %v4092_v18 = vmul.f32 %v9150_v10, %v4091_v13  ;;  %4298 = vmatmul.bf16.vlgmr.msrb.gmra.mxu3 %v4118_v45  ;;  %4317 = vmatmul.bf16.vlgmr.msra.gmra.mxu0 %v4118_v45  ;;  %v4089_v31 = vsel %vm4088_vm10, %v9148_v3, %v4085_v56 }
 0xa18   :  { %4336 = vmatmul.bf16.vlgmr.msrb.gmra.mxu1 %v4118_v45  ;;  %v4102_v34 = vmul.f32 %v4089_v31, %v11532_v22  ;;  %v8292_v22 = vld [vmem:[%s13506_s6 + $0x3] sm:$0x7] }
 0xa19   :  { %v4093_v37 = vmul.f32 0.5, %v4092_v18  ;;  %v4157_v61 = vperm.slane %v8292_v22, 1  ;;  %v4156_v42 = vperm.slane %v8292_v22, 0  ;;  %v11722_v11 = vperm.slane %v8292_v22, 2 }
 0xa1a   :  { %v4109_v33 = vmul.f32 %v9037_v21, %v4102_v34 }
 0xa1b   :  { %v4094_v59 = vsub.f32 1.5, %v4093_v37 }
 0xa1c   :  { %v4116_v46 = vadd.f32 %v9038_v0, %v4109_v33 }
 0xa1d   :  { %v4095_v44 = vmul.f32 %v9150_v10, %v4094_v59 }
 0xa1f   :  { %v4099_v14 = vsel %vm4098_vm2, %v9150_v10, %v4095_v44 }
 0xa20   :  { %v4103_v24 = vmul.f32 %v4099_v14, %v11538_v35 }
 0xa22   :  { %v4110_v48 = vmul.f32 %v9037_v21, %v4103_v24 }
 0xa24   :  { %v4117_v1 = vadd.f32 %v9038_v0, %v4110_v48 }
 0xa26   :  { %v4119_v23 = vpack.c.bf16 %v4117_v1, %v4116_v46 }
 0xa28   :  { %4303 = vmatmul.bf16.gmra.mxu3 %v4119_v23  ;;  %4322 = vmatmul.bf16.gmra.mxu0 %v4119_v23 }
 0xa29   :  { %4341 = vmatmul.bf16.gmra.mxu1 %v4119_v23 }
 0xa94   :  { %v4318_v41 = vpop.f32.mrf.mxu0 }
 0xa95   :  { %v4337_v54 = vpop.f32.mrf.mxu1  ;;  %v11713_v47 = vadd.f32 %v4318_v41, %v4157_v61 }
 0xa96   :  { %v11751_v52 = vadd.f32 %v4337_v54, %v11722_v11 }
 0xa97   :  { %v4885_v33 = vrot.slane %v11713_v47, 4 }
 0xa98   :  { %v5381_v48 = vrot.slane %v11751_v52, 4 }
 0xa9a   :  { %v4299_v60 = vpop.f32.mrf.mxu3 }
 0xa9b   :  { %v4300_v5 = vadd.f32 %v4299_v60, %v4156_v42 }
 0xa9c   :  { %v4320_v19 = vpop.f32.mrf.mxu0 }
 0xa9d   :  { %v11715_v35 = vadd.f32 %v4320_v19, %v4157_v61  ;;  %v4339_v55 = vpop.f32.mrf.mxu1  ;;  %v4389_v10 = vrot.slane %v4300_v5, 4 }
 0xa9e   :  { %v11748_v50 = vadd.f32 %v4339_v55, %v11722_v11 }
 0xa9f   :  { %v8916_v17 = vpack.i.bf16 %v11715_v35, %v11713_v47  ;;  %v4941_v46 = vrot.slane %v11715_v35, 4 }
 0xaa0   :  { %v8971_v29 = vpack.i.bf16 %v11748_v50, %v11751_v52  ;;  %v5437_v1 = vrot.slane %v11748_v50, 4 }
 0xaa1   :  { %8917 = vrot.lane.b32.xlu0 %v8916_v17, %s9276_s18  ;;  %8912 = vrot.lane.b32.xlu2 %v8916_v17, %s9274_s29 }
 0xaa2   :  { %8922 = vrot.lane.b32.xlu1 %v8916_v17, %s9275_s0  ;;  %v4301_v43 = vpop.f32.mrf.mxu3 }
 0xaa3   :  { %v4302_v39 = vadd.f32 %v4301_v43, %v4156_v42 }
 0xaa5   :  { %v4323_v58 = vpop.f32.mrf.mxu0  ;;  %v8931_v2 = vpack.i.bf16 %v4302_v39, %v4300_v5  ;;  %v4445_v63 = vrot.slane %v4302_v39, 4 }
 0xaa6   :  { %v4342_v57 = vpop.f32.mrf.mxu1  ;;  %v11729_v6 = vadd.f32 %v4323_v58, %v4157_v61 }
 0xaa7   :  { %v11725_v49 = vadd.f32 %v4342_v57, %v11722_v11 }
 0xaa8   :  { %v4997_v41 = vrot.slane %v11729_v6, 4 }
 0xaa9   :  { %8932 = vrot.lane.b32.xlu2 %v8931_v2, %s9276_s18  ;;  %8927 = vrot.lane.b32.xlu0 %v8931_v2, %s9274_s29 }
 0xaab   :  { %v4304_v40 = vpop.f32.mrf.mxu3 }
 0xaac   :  { %v11740_v30 = vadd.f32 %v4304_v40, %v4156_v42 }
 0xaad   :  { %v4325_v4 = vpop.f32.mrf.mxu0 }
 0xaae   :  { %v11731_v62 = vadd.f32 %v4325_v4, %v4157_v61 }
 0xab0   :  { %v8946_v32 = vpack.i.bf16 %v11731_v62, %v11729_v6  ;;  %v5053_v23 = vrot.slane %v11731_v62, 4 }
 0xab1   :  { %8937 = vrot.lane.b32.xlu0 %v8931_v2, %s9275_s0 }
 0xab2   :  { %8947 = vrot.lane.b32.xlu1 %v8946_v32, %s9276_s18  ;;  %8942 = vrot.lane.b32.xlu2 %v8946_v32, %s9274_s29 }
 0xab3   :  { %v4306_v3 = vpop.f32.mrf.mxu3 }
 0xab4   :  { %v11738_v25 = vadd.f32 %v4306_v3, %v4156_v42 }
 0xab6   :  { %v8961_v21 = vpack.i.bf16 %v11738_v25, %v11740_v30 }
 0xab9   :  { %8952 = vrot.lane.b32.xlu0 %v8946_v32, %s9275_s0 }
 0xaba   :  { %8962 = vrot.lane.b32.xlu1 %v8961_v21, %s9276_s18  ;;  %8957 = vrot.lane.b32.xlu2 %v8961_v21, %s9274_s29 }
 0xac1   :  { %8967 = vrot.lane.b32.xlu0 %v8961_v21, %s9275_s0 }
 0xac2   :  { %8972 = vrot.lane.b32.xlu1 %v8971_v29, %s9274_s29  ;;  %8977 = vrot.lane.b32.xlu2 %v8971_v29, %s9276_s18 }
 0xac9   :  { %8982 = vrot.lane.b32.xlu0 %v8971_v29, %s9275_s0 }
 0xafb   :  { %v8913_v51 = vpop.permute.xlu2 %8912 }
 0xafc   :  { %v8915_v18 = vunpack.i.h.bf16 %v8913_v51  ;;  %v8914_v31 = vunpack.i.l.bf16 %v8913_v51 }
 0xafe   :  { %v4953_v54 = vrot.slane %v8915_v18, 4  ;;  %v4897_v22 = vrot.slane %v8914_v31, 4 }
 0xb03   :  { %v8933_v53 = vpop.permute.xlu2 %8932 }
 0xb04   :  { %v8935_v15 = vunpack.i.h.bf16 %v8933_v53  ;;  %v8934_v0 = vunpack.i.l.bf16 %v8933_v53 }
 0xb06   :  { %v4443_v36 = vrot.slane %v8935_v15, 4  ;;  %v4387_v16 = vrot.slane %v8934_v0, 4  ;;  %v4446_v9 = vsel %vm623_vm13, %v8935_v15, %v4445_v63  ;;  %v4390_v13 = vsel %vm623_vm13, %v8934_v0, %v4389_v10 }
 0xb07   :  { %v11769_v59 = vperm.slane %v4446_v9, %v9699_v7  ;;  %v11775_v44 = vperm.slane %v4390_v13, %v9699_v7 }
 0xb08   :  { %v4444_v27 = vsel %vm623_vm13, %v4443_v36, %v4302_v39  ;;  %v4388_v56 = vsel %vm623_vm13, %v4387_v16, %v4300_v5 }
 0xb09   :  { %v11766_v37 = vperm.slane %v4444_v27, %v9699_v7  ;;  %v11772_v34 = vperm.slane %v4388_v56, %v9699_v7  ;;  %v4481_v55 = vrot.slane %v11769_v59, 4  ;;  %v4425_v42 = vrot.slane %v11775_v44, 4 }
 0xb0b   :  { %v4469_v19 = vrot.slane %v11766_v37, 4  ;;  %v4413_v17 = vrot.slane %v11772_v34, 4 }
 0xb0c   :  { %v11763_v45 = vpop.permute.xlu2 %8942 }
 0xb0d   :  { %v13541_v14 = vunpack.i.h.bf16 %v11763_v45  ;;  %v13540_v24 = vunpack.i.l.bf16 %v11763_v45 }
 0xb0f   :  { %v11793_v39 = vrot.slane %v13541_v14, 4  ;;  %v11797_v58 = vrot.slane %v13540_v24, 4 }
 0xb13   :  { %v8918_v43 = vpop.permute.xlu0 %8917 }
 0xb14   :  { %v8923_v5 = vpop.permute.xlu1 %8922  ;;  %v8920_v57 = vunpack.i.h.bf16 %v8918_v43  ;;  %v8919_v2 = vunpack.i.l.bf16 %v8918_v43  ;;  %v11799_v40 = vpop.permute.xlu2 %8957 }
 0xb15   :  { %v8925_v4 = vunpack.i.h.bf16 %v8923_v5  ;;  %v8924_v32 = vunpack.i.l.bf16 %v8923_v5  ;;  %v13539_v3 = vunpack.i.h.bf16 %v11799_v40  ;;  %v13538_v21 = vunpack.i.l.bf16 %v11799_v40 }
 0xb16   :  { %v4939_v29 = vrot.slane %v8920_v57, 4  ;;  %v4942_v51 = vsel %vm623_vm13, %v8920_v57, %v4941_v46  ;;  %v4883_v53 = vrot.slane %v8919_v2, 4  ;;  %v4886_v15 = vsel %vm623_vm13, %v8919_v2, %v4885_v33 }
 0xb17   :  { %v4951_v0 = vrot.slane %v8925_v4, 4  ;;  %v4954_v36 = vsel %vm623_vm13, %v8925_v4, %v4953_v54  ;;  %v4895_v16 = vrot.slane %v8924_v32, 4  ;;  %v4898_v63 = vsel %vm623_vm13, %v8924_v32, %v4897_v22 }
 0xb18   :  { %v4962_v10 = vperm.slane %v4954_v36, %v9699_v7  ;;  %v4906_v27 = vperm.slane %v4898_v63, %v9699_v7  ;;  %v4940_v9 = vsel %vm623_vm13, %v4939_v29, %v11715_v35  ;;  %v4950_v56 = vperm.slane %v4942_v51, %v9699_v7 }
 0xb19   :  { %v4952_v13 = vsel %vm623_vm13, %v4951_v0, %v8915_v18  ;;  %v4896_v46 = vsel %vm623_vm13, %v4895_v16, %v8914_v31  ;;  %v4946_v33 = vperm.slane %v4940_v9, %v9699_v7  ;;  %v4884_v54 = vsel %vm623_vm13, %v4883_v53, %v11713_v47 }
 0xb1a   :  { %v4958_v22 = vperm.slane %v4952_v13, %v9699_v7  ;;  %v4975_v43 = vrot.slane %v4962_v10, 4  ;;  %v4902_v5 = vperm.slane %v4896_v46, %v9699_v7  ;;  %v4919_v57 = vrot.slane %v4906_v27, 4 }
 0xb1b   :  { %v4965_v2 = vrot.slane %v4946_v33, 4  ;;  %v4977_v4 = vrot.slane %v4950_v56, 4  ;;  %v4890_v35 = vperm.slane %v4884_v54, %v9699_v7  ;;  %v4894_v32 = vperm.slane %v4886_v15, %v9699_v7  ;;  %v11821_v18 = vpop.permute.xlu0 %8927 }
 0xb1c   :  { %v4963_v31 = vrot.slane %v4958_v22, 4  ;;  %v4907_v29 = vrot.slane %v4902_v5, 4  ;;  %v4976_v51 = vsel %vm623_vm13, %v4975_v43, %v4950_v56  ;;  %v11826_v47 = vrot.slane %v13539_v3, 4 }
 0xb1d   :  { %v4966_v53 = vsel %vm623_vm13, %v4958_v22, %v4965_v2  ;;  %v4978_v0 = vsel %vm623_vm13, %v4962_v10, %v4977_v4  ;;  %v4982_v36 = vperm.slane %v4976_v51, %v9731_v38  ;;  %v4909_v16 = vrot.slane %v4890_v35, 4 }
 0xb1e   :  { %v4964_v63 = vsel %vm623_vm13, %v4963_v31, %v4946_v33  ;;  %v4974_v15 = vperm.slane %v4966_v53, %v9731_v38  ;;  %v4986_v9 = vperm.slane %v4978_v0, %v9731_v38  ;;  %v4908_v13 = vsel %vm623_vm13, %v4907_v29, %v4890_v35 }
 0xb1f   :  { %v4970_v56 = vperm.slane %v4964_v63, %v9731_v38  ;;  %v4991_v46 = vrot.slane %v4982_v36, 4  ;;  %v4910_v54 = vsel %vm623_vm13, %v4902_v5, %v4909_v16  ;;  %v4914_v22 = vperm.slane %v4908_v13, %v9731_v38 }
 0xb20   :  { %v4989_v43 = vrot.slane %v4974_v15, 4  ;;  %v4993_v10 = vrot.slane %v4986_v9, 4  ;;  %v4918_v2 = vperm.slane %v4910_v54, %v9731_v38  ;;  %v4920_v4 = vsel %vm623_vm13, %v4919_v57, %v4894_v32 }
 0xb21   :  { %v4987_v33 = vrot.slane %v4970_v56, 4  ;;  %v4992_v31 = vsel %vm623_vm13, 0.0, %v4991_v46  ;;  %v4921_v51 = vrot.slane %v4894_v32, 4  ;;  %v4926_v53 = vperm.slane %v4920_v4, %v9731_v38 }
 0xb22   :  { %v11843_v35 = vsel %vm623_vm13, 0.0, %v4989_v43  ;;  %v4994_v29 = vsel %vm623_vm13, 0.0, %v4993_v10  ;;  %v11847_v5 = vsel %vm623_vm13, %v4989_v43, %v4970_v56  ;;  %v5172_v0 = vsel %vm623_vm13, %v4993_v10, %v4982_v36  ;;  %v8978_v10 = vpop.permute.xlu2 %8977 }
 0xb23   :  { %v11851_v16 = vsel %vm623_vm13, 0.0, %v4987_v33  ;;  %v11855_v63 = vperm.slane %v5172_v0, %v9699_v7  ;;  %v5177_v32 = vrot.slane %v4994_v29, 4  ;;  %v4922_v15 = vsel %vm623_vm13, %v4906_v27, %v4921_v51  ;;  %v8938_v4 = vpop.permute.xlu0 %8937 }
 0xb24   :  { %v4931_v9 = vrot.slane %v4914_v22, 4  ;;  %v4933_v13 = vrot.slane %v4918_v2, 4  ;;  %v4935_v46 = vrot.slane %v4926_v53, 4  ;;  %v4930_v56 = vperm.slane %v4922_v15, %v9731_v38  ;;  %v11875_v51 = vpop.permute.xlu1 %8947 }
 0xb25   :  { %v5178_v54 = vsel %vm623_vm13, %v5177_v32, %v4992_v31  ;;  %v11862_v36 = vrot.slane %v13538_v21, 4  ;;  %v8930_v43 = vunpack.i.h.bf16 %v11821_v18  ;;  %v8980_v57 = vunpack.i.h.bf16 %v8978_v10 }
 0xb26   :  { %v11866_v33 = vperm.slane %v5178_v54, %v9699_v7  ;;  %v11869_v27 = vsel %vm623_vm13, 0.0, %v4931_v9  ;;  %v11872_v2 = vsel %vm623_vm13, 0.0, %v4933_v13  ;;  %v4936_v31 = vsel %vm623_vm13, 0.0, %v4935_v46 }
 0xb27   :  { %v4937_v29 = vrot.slane %v4930_v56, 4  ;;  %v11878_v0 = vsel %vm623_vm13, %v4933_v13, %v4914_v22  ;;  %v4457_v15 = vrot.slane %v8930_v43, 4  ;;  %v8929_v54 = vunpack.i.l.bf16 %v11821_v18 }
 0xb28   :  { %v8979_v21 = vunpack.i.l.bf16 %v8978_v10  ;;  %v8940_v9 = vunpack.i.h.bf16 %v8938_v4  ;;  %v8939_v61 = vunpack.i.l.bf16 %v8938_v4  ;;  %v8950_v46 = vunpack.i.h.bf16 %v11875_v51 }
 0xb29   :  { %v4938_v3 = vsel %vm623_vm13, 0.0, %v4937_v29  ;;  %v5118_v60 = vsel %vm623_vm13, %v4937_v29, %v4926_v53  ;;  %v4401_v13 = vrot.slane %v8929_v54, 4  ;;  %v5435_v24 = vrot.slane %v8980_v57, 4 }
 0xb2a   :  { %v11886_v56 = vperm.slane %v5118_v60, %v9699_v7  ;;  %v5123_v22 = vrot.slane %v4938_v3, 4  ;;  %v5438_v18 = vsel %vm623_vm13, %v8980_v57, %v5437_v1  ;;  %v5379_v32 = vrot.slane %v8979_v21, 4 }
 0xb2b   :  { %v5382_v10 = vsel %vm623_vm13, %v8979_v21, %v5381_v48  ;;  %v4455_v14 = vrot.slane %v8940_v9, 4  ;;  %v5436_v4 = vsel %vm623_vm13, %v5435_v24, %v11748_v50  ;;  %v11898_v60 = vperm.slane %v5438_v18, %v9699_v7 }
 0xb2c   :  { %v5124_v53 = vsel %vm623_vm13, %v5123_v22, %v4936_v31  ;;  %v11901_v3 = vperm.slane %v5382_v10, %v9699_v7  ;;  %v11907_v1 = vperm.slane %v5436_v4, %v9699_v7  ;;  %v5380_v48 = vsel %vm623_vm13, %v5379_v32, %v11751_v52 }
 0xb2d   :  { %v11904_v29 = vperm.slane %v5124_v53, %v9699_v7  ;;  %v4399_v21 = vrot.slane %v8939_v61, 4  ;;  %v11913_v50 = vperm.slane %v5380_v48, %v9699_v7  ;;  %v4402_v31 = vsel %vm623_vm13, %v8939_v61, %v4401_v13 }
 0xb2e   :  { %v4410_v10 = vperm.slane %v4402_v31, %v9699_v7  ;;  %v4456_v53 = vsel %vm623_vm13, %v4455_v14, %v8930_v43  ;;  %v4458_v4 = vsel %vm623_vm13, %v8940_v9, %v4457_v15 }
 0xb2f   :  { %v4400_v18 = vsel %vm623_vm13, %v4399_v21, %v8929_v54  ;;  %v4462_v48 = vperm.slane %v4456_v53, %v9699_v7  ;;  %v4466_v13 = vperm.slane %v4458_v4, %v9699_v7  ;;  %v5051_v54 = vrot.slane %v8950_v46, 4 }
 0xb30   :  { %v4406_v32 = vperm.slane %v4400_v18, %v9699_v7  ;;  %v4423_v57 = vrot.slane %v4410_v10, 4  ;;  %v4426_v61 = vsel %vm623_vm13, %v4410_v10, %v4425_v42 }
 0xb31   :  { %v4434_v43 = vperm.slane %v4426_v61, %v9731_v38  ;;  %v4467_v15 = vrot.slane %v4462_v48, 4  ;;  %v4470_v42 = vsel %vm623_vm13, %v4462_v48, %v4469_v19  ;;  %v4479_v18 = vrot.slane %v4466_v13, 4 }
 0xb32   :  { %v4411_v21 = vrot.slane %v4406_v32, 4  ;;  %v4414_v14 = vsel %vm623_vm13, %v4406_v32, %v4413_v17  ;;  %v4424_v31 = vsel %vm623_vm13, %v4423_v57, %v11775_v44  ;;  %v4478_v44 = vperm.slane %v4470_v42, %v9731_v38 }
 0xb33   :  { %v4422_v9 = vperm.slane %v4414_v14, %v9731_v38  ;;  %v4430_v53 = vperm.slane %v4424_v31, %v9731_v38  ;;  %v4441_v4 = vrot.slane %v4434_v43, 4  ;;  %v4468_v17 = vsel %vm623_vm13, %v4467_v15, %v11766_v37 }
 0xb34   :  { %v4412_v10 = vsel %vm623_vm13, %v4411_v21, %v11772_v34  ;;  %v4474_v14 = vperm.slane %v4468_v17, %v9731_v38  ;;  %v4480_v48 = vsel %vm623_vm13, %v4479_v18, %v11769_v59  ;;  %v4482_v34 = vsel %vm623_vm13, %v4466_v13, %v4481_v55 }
 0xb35   :  { %v4418_v32 = vperm.slane %v4412_v10, %v9731_v38  ;;  %v4437_v61 = vrot.slane %v4422_v9, 4  ;;  %v4439_v57 = vrot.slane %v4430_v53, 4  ;;  %v4442_v19 = vsel %vm623_vm13, 0.0, %v4441_v4 }
 0xb36   :  { %v4486_v43 = vperm.slane %v4480_v48, %v9731_v38  ;;  %v4490_v15 = vperm.slane %v4482_v34, %v9731_v38  ;;  %v4491_v31 = vrot.slane %v4474_v14, 4  ;;  %v4493_v42 = vrot.slane %v4478_v44, 4 }
 0xb37   :  { %v4435_v21 = vrot.slane %v4418_v32, 4  ;;  %v4438_v37 = vsel %vm623_vm13, 0.0, %v4437_v61  ;;  %v4440_v9 = vsel %vm623_vm13, 0.0, %v4439_v57  ;;  %v4611_v10 = vsel %vm623_vm13, %v4437_v61, %v4418_v32 }
 0xb38   :  { %v4495_v18 = vrot.slane %v4486_v43, 4  ;;  %v4497_v24 = vrot.slane %v4490_v15, 4  ;;  %v11962_v59 = vperm.slane %v4611_v10, %v9699_v7  ;;  %v4492_v55 = vsel %vm623_vm13, 0.0, %v4491_v31 }
 0xb39   :  { %v4436_v17 = vsel %vm623_vm13, 0.0, %v4435_v21  ;;  %v4494_v13 = vsel %vm623_vm13, 0.0, %v4493_v42  ;;  %v4616_v48 = vrot.slane %v4438_v37, 4  ;;  %v4622_v34 = vsel %vm623_vm13, %v4441_v4, %v4430_v53 }
 0xb3a   :  { %v4496_v57 = vsel %vm623_vm13, 0.0, %v4495_v18  ;;  %v4498_v44 = vsel %vm623_vm13, 0.0, %v4497_v24  ;;  %v11970_v32 = vperm.slane %v4622_v34, %v9699_v7  ;;  %v4627_v61 = vrot.slane %v4442_v19, 4  ;;  %v8953_v34 = vpop.permute.xlu0 %8952 }
 0xb3b   :  { %v4617_v21 = vsel %vm623_vm13, %v4616_v48, %v4436_v17  ;;  %v4665_v10 = vsel %vm623_vm13, %v4493_v42, %v4474_v14  ;;  %v4670_v31 = vrot.slane %v4494_v13, 4  ;;  %v4676_v17 = vsel %vm623_vm13, %v4497_v24, %v4486_v43 }
 0xb3c   :  { %v11976_v52 = vperm.slane %v4617_v21, %v9699_v7  ;;  %v4628_v53 = vsel %vm623_vm13, %v4627_v61, %v4440_v9  ;;  %v11981_v37 = vperm.slane %v4665_v10, %v9699_v7  ;;  %v4681_v48 = vrot.slane %v4498_v44, 4  ;;  %v11997_v61 = vpop.permute.xlu1 %8962 }
 0xb3d   :  { %v11984_v18 = vperm.slane %v4628_v53, %v9699_v7  ;;  %v4671_v19 = vsel %vm623_vm13, %v4670_v31, %v4492_v55  ;;  %v11992_v42 = vperm.slane %v4676_v17, %v9699_v7  ;;  %v5052_v13 = vsel %vm623_vm13, %v5051_v54, %v11731_v62 }
 0xb3e   :  { %v11989_v14 = vperm.slane %v4671_v19, %v9699_v7  ;;  %v4682_v55 = vsel %vm623_vm13, %v4681_v48, %v4496_v57  ;;  %v5054_v24 = vsel %vm623_vm13, %v8950_v46, %v5053_v23  ;;  %v5058_v43 = vperm.slane %v5052_v13, %v9699_v7 }
 0xb3f   :  { %v12008_v44 = vperm.slane %v4682_v55, %v9699_v7  ;;  %v5062_v10 = vperm.slane %v5054_v24, %v9699_v7  ;;  %v8949_v31 = vunpack.i.l.bf16 %v11875_v51  ;;  %v8955_v19 = vunpack.i.h.bf16 %v8953_v34 }
 0xb40   :  { %v5077_v53 = vrot.slane %v5058_v43, 4  ;;  %v8954_v57 = vunpack.i.l.bf16 %v8953_v34  ;;  %v8965_v62 = vunpack.i.h.bf16 %v11997_v61 }
 0xb41   :  { %v5089_v48 = vrot.slane %v5062_v10, 4  ;;  %v4995_v23 = vrot.slane %v8949_v31, 4  ;;  %v4998_v46 = vsel %vm623_vm13, %v8949_v31, %v4997_v41  ;;  %v5063_v55 = vrot.slane %v8955_v19, 4 }
 0xb42   :  { %v5006_v13 = vperm.slane %v4998_v46, %v9699_v7  ;;  %v5066_v24 = vsel %vm623_vm13, %v8955_v19, %v11793_v39  ;;  %v5007_v51 = vrot.slane %v8954_v57, 4  ;;  %v5010_v17 = vsel %vm623_vm13, %v8954_v57, %v11797_v58 }
 0xb43   :  { %v4996_v34 = vsel %vm623_vm13, %v4995_v23, %v11729_v6  ;;  %v5074_v21 = vperm.slane %v5066_v24, %v9699_v7  ;;  %v4555_v54 = vrot.slane %v8965_v62, 4  ;;  %v13635_v41 = vunpack.i.h.bf16 %v11763_v45 }
 0xb44   :  { %v5002_v9 = vperm.slane %v4996_v34, %v9699_v7  ;;  %v5033_v22 = vrot.slane %v5006_v13, 4  ;;  %v13636_v46 = vunpack.i.l.bf16 %v11763_v45  ;;  %v5018_v34 = vperm.slane %v5010_v17, %v9699_v7 }
 0xb45   :  { %v5064_v31 = vsel %vm623_vm13, %v5063_v55, %v13635_v41  ;;  %v5087_v6 = vrot.slane %v5074_v21, 4  ;;  %v5090_v23 = vsel %vm623_vm13, %v5074_v21, %v5089_v48  ;;  %v4556_v4 = vsel %vm623_vm13, %v4555_v54, %v11738_v25 }
 0xb46   :  { %v5008_v39 = vsel %vm623_vm13, %v5007_v51, %v13636_v46  ;;  %v5070_v19 = vperm.slane %v5064_v31, %v9699_v7  ;;  %v5021_v58 = vrot.slane %v5002_v9, 4  ;;  %v5098_v57 = vperm.slane %v5090_v23, %v9731_v38 }
 0xb47   :  { %v5014_v24 = vperm.slane %v5008_v39, %v9699_v7  ;;  %v5088_v51 = vsel %vm623_vm13, %v5087_v6, %v5062_v10  ;;  %v5031_v54 = vrot.slane %v5018_v34, 4 }
 0xb48   :  { %v5075_v55 = vrot.slane %v5070_v19, 4  ;;  %v5078_v45 = vsel %vm623_vm13, %v5070_v19, %v5077_v53  ;;  %v5094_v21 = vperm.slane %v5088_v51, %v9731_v38  ;;  %v5105_v48 = vrot.slane %v5098_v57, 4 }
 0xb49   :  { %v5019_v41 = vrot.slane %v5014_v24, 4  ;;  %v5086_v31 = vperm.slane %v5078_v45, %v9731_v38  ;;  %v5022_v46 = vsel %vm623_vm13, %v5014_v24, %v5021_v58  ;;  %v5032_v24 = vsel %vm623_vm13, %v5031_v54, %v5006_v13 }
 0xb4a   :  { %v5076_v39 = vsel %vm623_vm13, %v5075_v55, %v5058_v43  ;;  %v5030_v23 = vperm.slane %v5022_v46, %v9731_v38  ;;  %v5103_v19 = vrot.slane %v5094_v21, 4  ;;  %v5106_v10 = vsel %vm623_vm13, 0.0, %v5105_v48 }
 0xb4b   :  { %v5020_v17 = vsel %vm623_vm13, %v5019_v41, %v5002_v9  ;;  %v5082_v15 = vperm.slane %v5076_v39, %v9731_v38  ;;  %v5101_v53 = vrot.slane %v5086_v31, 4  ;;  %v5280_v6 = vsel %vm623_vm13, %v5105_v48, %v5094_v21 }
 0xb4c   :  { %v5285_v45 = vrot.slane %v5106_v10, 4  ;;  %v5026_v57 = vperm.slane %v5020_v17, %v9731_v38  ;;  %v5104_v9 = vsel %vm623_vm13, 0.0, %v5103_v19  ;;  %v12062_v41 = vperm.slane %v5280_v6, %v9699_v7 }
 0xb4d   :  { %v5099_v58 = vrot.slane %v5082_v15, 4  ;;  %v12054_v43 = vsel %vm623_vm13, 0.0, %v5101_v53  ;;  %v12058_v55 = vsel %vm623_vm13, %v5101_v53, %v5082_v15  ;;  %v5034_v21 = vsel %vm623_vm13, %v5018_v34, %v5033_v22 }
 0xb4e   :  { %v12065_v31 = vsel %vm623_vm13, %v5285_v45, %v5104_v9  ;;  %v5038_v48 = vperm.slane %v5032_v24, %v9731_v38  ;;  %v5042_v46 = vperm.slane %v5034_v21, %v9731_v38  ;;  %v5043_v39 = vrot.slane %v5026_v57, 4 }
 0xb4f   :  { %v12069_v13 = vsel %vm623_vm13, 0.0, %v5099_v58  ;;  %v5045_v15 = vrot.slane %v5030_v23, 4  ;;  %v13637_v17 = vrot.slane %v11738_v25, 4  ;;  %v4562_v53 = vperm.slane %v4556_v4, %v9699_v7 }
 0xb50   :  { %v8964_v19 = vunpack.i.l.bf16 %v11997_v61  ;;  %v12079_v10 = vsel %vm623_vm13, 0.0, %v5043_v39  ;;  %v5047_v22 = vrot.slane %v5038_v48, 4  ;;  %v5049_v34 = vrot.slane %v5042_v46, 4 }
 0xb51   :  { %v4558_v54 = vsel %vm623_vm13, %v8965_v62, %v13637_v17  ;;  %v12083_v45 = vsel %vm623_vm13, 0.0, %v5045_v15  ;;  %v12086_v23 = vsel %vm623_vm13, %v5045_v15, %v5026_v57  ;;  %v4581_v25 = vrot.slane %v4562_v53, 4  ;;  %v8968_v62 = vpop.permute.xlu0 %8967 }
 0xb52   :  { %v4566_v6 = vperm.slane %v4558_v54, %v9699_v7  ;;  %v4499_v24 = vrot.slane %v8964_v19, 4  ;;  %v5048_v4 = vsel %vm623_vm13, 0.0, %v5047_v22  ;;  %v5050_v61 = vsel %vm623_vm13, 0.0, %v5049_v34 }
 0xb53   :  { %v5226_v9 = vsel %vm623_vm13, %v5049_v34, %v5038_v48  ;;  %v5231_v46 = vrot.slane %v5050_v61, 4  ;;  %v13638_v15 = vrot.slane %v11740_v30, 4  ;;  %v8970_v22 = vunpack.i.h.bf16 %v8968_v62 }
 0xb54   :  { %v12093_v21 = vperm.slane %v5226_v9, %v9699_v7  ;;  %v4593_v39 = vrot.slane %v4566_v6, 4  ;;  %v4500_v57 = vsel %vm623_vm13, %v4499_v24, %v11740_v30  ;;  %v8969_v51 = vunpack.i.l.bf16 %v8968_v62 }
 0xb55   :  { %v4502_v17 = vsel %vm623_vm13, %v8964_v19, %v13638_v15  ;;  %v4506_v54 = vperm.slane %v4500_v57, %v9699_v7  ;;  %v12102_v58 = vsel %vm623_vm13, %v5231_v46, %v5048_v4  ;;  %v12107_v34 = vperm.slane %v11878_v0, %v9699_v7 }
 0xb56   :  { %v4510_v48 = vperm.slane %v4502_v17, %v9699_v7  ;;  %v13639_v24 = vrot.slane %v11872_v2, 4  ;;  %v4567_v19 = vrot.slane %v8970_v22, 4  ;;  %v4570_v9 = vsel %vm623_vm13, %v8970_v22, %v11826_v47 }
 0xb57   :  { %v4525_v61 = vrot.slane %v4506_v54, 4  ;;  %v4511_v62 = vrot.slane %v8969_v51, 4  ;;  %v4578_v4 = vperm.slane %v4570_v9, %v9699_v7  ;;  %v4514_v46 = vsel %vm623_vm13, %v8969_v51, %v11862_v36 }
 0xb58   :  { %v5113_v30 = vsel %vm623_vm13, %v13639_v24, %v11869_v27  ;;  %v4537_v57 = vrot.slane %v4510_v48, 4  ;;  %v13640_v15 = vunpack.i.h.bf16 %v11799_v40  ;;  %v13641_v27 = vunpack.i.l.bf16 %v11799_v40 }
 0xb59   :  { %v12119_v0 = vperm.slane %v5113_v30, %v9699_v7  ;;  %v4522_v47 = vperm.slane %v4514_v46, %v9699_v7  ;;  %v5131_v22 = vrot.slane %v12107_v34, 4  ;;  %v4591_v9 = vrot.slane %v4578_v4, 4 }
 0xb5a   :  { %v4568_v2 = vsel %vm623_vm13, %v4567_v19, %v13640_v15  ;;  %v4512_v17 = vsel %vm623_vm13, %v4511_v62, %v13641_v27  ;;  %v4594_v36 = vsel %vm623_vm13, %v4578_v4, %v4593_v39 }
 0xb5b   :  { %v4574_v24 = vperm.slane %v4568_v2, %v9699_v7  ;;  %v4518_v51 = vperm.slane %v4512_v17, %v9699_v7  ;;  %v4602_v30 = vperm.slane %v4594_v36, %v9731_v38  ;;  %v4535_v12 = vrot.slane %v4522_v47, 4 }
 0xb5c   :  { %v4538_v19 = vsel %vm623_vm13, %v4522_v47, %v4537_v57  ;;  %v5132_v40 = vsel %vm623_vm13, %v12119_v0, %v5131_v22  ;;  %v4592_v15 = vsel %vm623_vm13, %v4591_v9, %v4566_v6 }
 0xb5d   :  { %v4579_v62 = vrot.slane %v4574_v24, 4  ;;  %v4582_v46 = vsel %vm623_vm13, %v4574_v24, %v4581_v25  ;;  %v4523_v27 = vrot.slane %v4518_v51, 4  ;;  %v4598_v39 = vperm.slane %v4592_v15, %v9731_v38 }
 0xb5e   :  { %v4590_v2 = vperm.slane %v4582_v46, %v9731_v38  ;;  %v4609_v4 = vrot.slane %v4602_v30, 4  ;;  %v4526_v17 = vsel %vm623_vm13, %v4518_v51, %v4525_v61  ;;  %v4536_v22 = vsel %vm623_vm13, %v4535_v12, %v4510_v48 }
 0xb5f   :  { %v4580_v36 = vsel %vm623_vm13, %v4579_v62, %v4562_v53  ;;  %v4524_v57 = vsel %vm623_vm13, %v4523_v27, %v4506_v54  ;;  %v4534_v47 = vperm.slane %v4526_v17, %v9731_v38  ;;  %v4607_v6 = vrot.slane %v4598_v39, 4 }
 0xb60   :  { %v4586_v25 = vperm.slane %v4580_v36, %v9731_v38  ;;  %v4605_v24 = vrot.slane %v4590_v2, 4  ;;  %v4610_v9 = vsel %vm623_vm13, 0.0, %v4609_v4  ;;  %v4784_v46 = vsel %vm623_vm13, %v4609_v4, %v4598_v39 }
 0xb61   :  { %v4789_v15 = vrot.slane %v4610_v9, 4  ;;  %v4530_v30 = vperm.slane %v4524_v57, %v9731_v38  ;;  %v4542_v61 = vperm.slane %v4536_v22, %v9731_v38  ;;  %v4608_v51 = vsel %vm623_vm13, 0.0, %v4607_v6 }
 0xb62   :  { %v4603_v53 = vrot.slane %v4586_v25, 4  ;;  %v4606_v54 = vsel %vm623_vm13, 0.0, %v4605_v24  ;;  %v4773_v12 = vsel %vm623_vm13, %v4605_v24, %v4586_v25  ;;  %v12157_v27 = vperm.slane %v4784_v46, %v9699_v7 }
 0xb63   :  { %v12154_v48 = vperm.slane %v4773_v12, %v9699_v7  ;;  %v4778_v62 = vrot.slane %v4606_v54, 4  ;;  %v4790_v2 = vsel %vm623_vm13, %v4789_v15, %v4608_v51  ;;  %v4546_v17 = vperm.slane %v4538_v19, %v9731_v38 }
 0xb64   :  { %v4604_v39 = vsel %vm623_vm13, 0.0, %v4603_v53  ;;  %v12162_v4 = vperm.slane %v4790_v2, %v9699_v7  ;;  %v4547_v36 = vrot.slane %v4530_v30, 4  ;;  %v4809_v25 = vrot.slane %v12157_v27, 4 }
 0xb65   :  { %v4779_v57 = vsel %vm623_vm13, %v4778_v62, %v4604_v39  ;;  %v4549_v24 = vrot.slane %v4534_v47, 4  ;;  %v4551_v15 = vrot.slane %v4542_v61, 4  ;;  %v4553_v54 = vrot.slane %v4546_v17, 4 }
 0xb66   :  { %v12169_v6 = vperm.slane %v4779_v57, %v9699_v7  ;;  %v4548_v46 = vsel %vm623_vm13, 0.0, %v4547_v36  ;;  %v4810_v53 = vsel %vm623_vm13, %v12162_v4, %v4809_v25  ;;  %v5140_v57 = vperm.slane %v5132_v40, %v9731_v38 }
 0xb67   :  { %v4550_v19 = vsel %vm623_vm13, 0.0, %v4549_v24  ;;  %v4719_v51 = vsel %vm623_vm13, %v4549_v24, %v4530_v30  ;;  %v12178_v12 = vperm.slane %v4810_v53, %v9731_v38  ;;  %v4552_v47 = vsel %vm623_vm13, 0.0, %v4551_v15 }
 0xb68   :  { %v12182_v62 = vperm.slane %v4719_v51, %v9699_v7  ;;  %v4724_v2 = vrot.slane %v4550_v19, 4  ;;  %v4554_v39 = vsel %vm623_vm13, 0.0, %v4553_v54  ;;  %v4730_v36 = vsel %vm623_vm13, %v4553_v54, %v4542_v61 }
 0xb69   :  { %v5143_v25 = vrot.slane %v11886_v56, 4  ;;  %v12190_v30 = vperm.slane %v4730_v36, %v9699_v7  ;;  %v4735_v24 = vrot.slane %v4554_v39, 4  ;;  %v5165_v61 = vperm.slane %v11847_v5, %v9699_v7 }
 0xb6a   :  { %v4725_v17 = vsel %vm623_vm13, %v4724_v2, %v4548_v46  ;;  %v13642_v40 = vrot.slane %v11843_v35, 4  ;;  %v5129_v5 = vrot.slane %v12119_v0, 4  ;;  %v5141_v35 = vrot.slane %v11904_v29, 4 }
 0xb6b   :  { %v12194_v53 = vperm.slane %v4725_v17, %v9699_v7  ;;  %v5144_v19 = vsel %vm623_vm13, %v11904_v29, %v5143_v25  ;;  %v4736_v54 = vsel %vm623_vm13, %v4735_v24, %v4552_v47  ;;  %v4755_v51 = vrot.slane %v12190_v30, 4 }
 0xb6c   :  { %v5167_v46 = vsel %vm623_vm13, %v13642_v40, %v11851_v16  ;;  %v5152_v2 = vperm.slane %v5144_v19, %v9731_v38  ;;  %v12209_v36 = vperm.slane %v4736_v54, %v9699_v7  ;;  %v5185_v25 = vrot.slane %v5165_v61, 4 }
 0xb6d   :  { %v5171_v39 = vperm.slane %v5167_v46, %v9699_v7  ;;  %v5197_v17 = vrot.slane %v11855_v63, 4  ;;  %v5195_v47 = vrot.slane %v11866_v33, 4  ;;  %v5130_v24 = vsel %vm623_vm13, %v5129_v5, %v12107_v34 }
 0xb6e   :  { %v5157_v9 = vrot.slane %v5152_v2, 4  ;;  %v4756_v19 = vsel %vm623_vm13, %v12209_v36, %v4755_v51  ;;  %v5142_v51 = vsel %vm623_vm13, %v5141_v35, %v11886_v56 }
 0xb6f   :  { %v5183_v16 = vrot.slane %v5171_v39, 4  ;;  %v5186_v40 = vsel %vm623_vm13, %v5171_v39, %v5185_v25  ;;  %v5198_v46 = vsel %vm623_vm13, %v11866_v33, %v5197_v17  ;;  %v12222_v54 = vperm.slane %v4756_v19, %v9731_v38 }
 0xb70   :  { %v5158_v0 = vsel %vm623_vm13, %v5157_v9, %v5140_v57  ;;  %v5194_v29 = vperm.slane %v5186_v40, %v9731_v38  ;;  %v5206_v22 = vperm.slane %v5198_v46, %v9731_v38  ;;  %v5136_v33 = vperm.slane %v5130_v24, %v9731_v38 }
 0xb71   :  { %v5327_v15 = vpack.c.bf16 %v5158_v0, %v5158_v0  ;;  %v5184_v39 = vsel %vm623_vm13, %v5183_v16, %v5165_v61  ;;  %v5148_v17 = vperm.slane %v5142_v51, %v9731_v38  ;;  %v5196_v40 = vsel %vm623_vm13, %v5195_v47, %v11855_v63 }
 0xb72   :  { %v5211_v25 = vrot.slane %v5206_v22, 4  ;;  %v5190_v9 = vperm.slane %v5184_v39, %v9731_v38  ;;  %v5159_v46 = vrot.slane %v5140_v57, 4  ;;  %v5213_v0 = vrot.slane %v5194_v29, 4 }
 0xb73   :  { %v5902_v19 = vunpack.c.l.b16 %v5327_v15  ;;  %v5153_v5 = vrot.slane %v5148_v17, 4  ;;  %v5202_v56 = vperm.slane %v5196_v40, %v9731_v38  ;;  %v5155_v35 = vrot.slane %v5136_v33, 4 }
 0xb74   :  { %v5212_v34 = vsel %vm623_vm13, %v5211_v25, %v5194_v29  ;;  %v5160_v16 = vsel %vm623_vm13, %v5152_v2, %v5159_v46  ;;  %v5214_v24 = vsel %vm623_vm13, %v5206_v22, %v5213_v0  ;;  %v5209_v51 = vrot.slane %v5190_v9, 4  ;;  %v8973_v25 = vpop.permute.xlu1 %8972  ;;  %v8983_v46 = vpop.permute.xlu0 %8982 }
 0xb75   :  { %v5328_v61 = vpack.c.bf16 %v5212_v34, %v5212_v34  ;;  %v5154_v39 = vsel %vm623_vm13, %v5153_v5, %v5136_v33  ;;  %v5207_v15 = vrot.slane %v5202_v56, 4  ;;  %v5329_v28 = vpack.c.bf16 %v5160_v16, %v5160_v16 }
 0xb76   :  { %v5330_v8 = vpack.c.bf16 %v5214_v24, %v5214_v24  ;;  %v5323_v57 = vpack.c.bf16 %v5154_v39, %v5154_v39  ;;  %v5156_v47 = vsel %vm623_vm13, %v5148_v17, %v5155_v35  ;;  %v5210_v29 = vsel %vm623_vm13, %v5202_v56, %v5209_v51 }
 0xb77   :  { %v5903_v63 = vunpack.c.l.b16 %v5328_v61  ;;  %v5208_v40 = vsel %vm623_vm13, %v5207_v15, %v5190_v9  ;;  %v5932_v34 = vunpack.c.l.b16 %v5329_v28  ;;  %v5325_v2 = vpack.c.bf16 %v5156_v47, %v5156_v47 }
 0xb78   :  { %v5933_v26 = vunpack.c.l.b16 %v5330_v8  ;;  %v5324_v0 = vpack.c.bf16 %v5208_v40, %v5208_v40  ;;  %v5842_v20 = vunpack.c.l.b16 %v5323_v57  ;;  %v5326_v33 = vpack.c.bf16 %v5210_v29, %v5210_v29 }
 0xb79   :  { %v5904_v22 = vpack.c.b16 %v5903_v63, %v5902_v19  ;;  %v5872_v16 = vunpack.c.l.b16 %v5325_v2  ;;  %v8975_v24 = vunpack.i.h.bf16 %v8973_v25  ;;  %v8974_v61 = vunpack.i.l.bf16 %v8973_v25 }
 0xb7a   :  { %v5934_v5 = vpack.c.b16 %v5933_v26, %v5932_v34  ;;  %v5843_v17 = vunpack.c.l.b16 %v5324_v0  ;;  %v5873_v35 = vunpack.c.l.b16 %v5326_v33  ;;  %v8985_v56 = vunpack.i.h.bf16 %v8983_v46 }
 0xb7b   :  { %v5909_v39 = vsel %vm2081_vm14, %v5904_v22, 0  ;;  %v5449_v28 = vrot.slane %v8975_v24, 4  ;;  %v5393_v8 = vrot.slane %v8974_v61, 4  ;;  %v8984_v51 = vunpack.i.l.bf16 %v8983_v46 }
 0xb7c   :  { %5918 = vmatpush.bf16.xpose.msrb.mxu0 %v5909_v39  ;;  %v5939_v9 = vsel %vm2081_vm14, %v5934_v5, 0  ;;  %v5844_v15 = vpack.c.b16 %v5843_v17, %v5842_v20  ;;  %v5874_v19 = vpack.c.b16 %v5873_v35, %v5872_v16  ;;  %v5447_v63 = vrot.slane %v8985_v56, 4 }
 0xb7d   :  { %5948 = vmatpush.bf16.xpose.msra.mxu1 %v5939_v9  ;;  %v13643_v26 = vrot.slane %v11962_v59, 4  ;;  %v5450_v47 = vsel %vm623_vm13, %v8985_v56, %v5449_v28  ;;  %v5391_v29 = vrot.slane %v8984_v51, 4  ;;  %v5394_v25 = vsel %vm623_vm13, %v8984_v51, %v5393_v8 }
 0xb7e   :  { %v5849_v34 = vsel %vm2081_vm14, %v5844_v15, 0  ;;  %v5879_v20 = vsel %vm2081_vm14, %v5874_v19, 0  ;;  %v5448_v2 = vsel %vm623_vm13, %v5447_v63, %v8975_v24  ;;  %v5458_v46 = vperm.slane %v5450_v47, %v9699_v7 }
 0xb7f   :  { %v4636_v57 = vsel %vm623_vm13, %v11976_v52, %v13643_v26  ;;  %5858 = vmatpush.bf16.xpose.msra.mxu2 %v5849_v34  ;;  %5888 = vmatpush.bf16.xpose.msra.mxu3 %v5879_v20  ;;  %v5454_v22 = vperm.slane %v5448_v2, %v9699_v7  ;;  %v5392_v0 = vsel %vm623_vm13, %v5391_v29, %v8974_v61  ;;  %v4633_v5 = vrot.slane %v11976_v52, 4 }
 0xb80   :  { %v12254_v40 = vperm.slane %v4636_v57, %v9731_v38  ;;  %v5402_v33 = vperm.slane %v5394_v25, %v9699_v7  ;;  %v5471_v16 = vrot.slane %v5458_v46, 4  ;;  %v13644_v39 = vrot.slane %v11898_v60, 4 }
 0xb81   :  { %v5398_v35 = vperm.slane %v5392_v0, %v9699_v7  ;;  %v13645_v24 = vrot.slane %v11970_v32, 4  ;;  %v5459_v9 = vrot.slane %v5454_v22, 4  ;;  %v13646_v28 = vrot.slane %v11907_v1, 4 }
 0xb82   :  { %v5474_v17 = vsel %vm623_vm13, %v5458_v46, %v13644_v39  ;;  %v5415_v51 = vrot.slane %v5402_v33, 4  ;;  %v5472_v19 = vsel %vm623_vm13, %v5471_v16, %v11898_v60  ;;  %v13647_v26 = vrot.slane %v11913_v50, 4 }
 0xb83   :  { %v4648_v56 = vsel %vm623_vm13, %v11984_v18, %v13645_v24  ;;  %v5462_v61 = vsel %vm623_vm13, %v5454_v22, %v13646_v28  ;;  %v5482_v8 = vperm.slane %v5474_v17, %v9731_v38  ;;  %v5403_v63 = vrot.slane %v5398_v35, 4 }
 0xb84   :  { %v5470_v15 = vperm.slane %v5462_v61, %v9731_v38  ;;  %v5406_v57 = vsel %vm623_vm13, %v5398_v35, %v13647_v26  ;;  %v5460_v47 = vsel %vm623_vm13, %v5459_v9, %v11907_v1  ;;  %v5478_v29 = vperm.slane %v5472_v19, %v9731_v38 }
 0xb85   :  { %v5489_v25 = vrot.slane %v5482_v8, 4  ;;  %v5414_v34 = vperm.slane %v5406_v57, %v9731_v38  ;;  %v5466_v20 = vperm.slane %v5460_v47, %v9731_v38  ;;  %v5404_v46 = vsel %vm623_vm13, %v5403_v63, %v11913_v50 }
 0xb86   :  { %v5485_v2 = vrot.slane %v5470_v15, 4  ;;  %v5416_v60 = vsel %vm623_vm13, %v5415_v51, %v11901_v3  ;;  %v5487_v22 = vrot.slane %v5478_v29, 4  ;;  %v5410_v1 = vperm.slane %v5404_v46, %v9731_v38 }
 0xb87   :  { %v5490_v0 = vsel %vm623_vm13, 0.0, %v5489_v25  ;;  %v5668_v16 = vsel %vm623_vm13, %v5489_v25, %v5478_v29  ;;  %v5483_v39 = vrot.slane %v5466_v20, 4  ;;  %v13648_v15 = vrot.slane %v11901_v3, 4 }
 0xb88   :  { %v12295_v17 = vsel %vm623_vm13, 0.0, %v5485_v2  ;;  %v5657_v35 = vsel %vm623_vm13, %v5485_v2, %v5466_v20  ;;  %v12299_v24 = vperm.slane %v5668_v16, %v9699_v7  ;;  %v5488_v50 = vsel %vm623_vm13, 0.0, %v5487_v22 }
 0xb89   :  { %v12303_v9 = vperm.slane %v5657_v35, %v9699_v7  ;;  %v5662_v28 = vrot.slane %v12295_v17, 4  ;;  %v5673_v61 = vrot.slane %v5490_v0, 4  ;;  %v12307_v8 = vsel %vm623_vm13, 0.0, %v5483_v39 }
 0xb8a   :  { %v5418_v19 = vsel %vm623_vm13, %v5402_v33, %v13648_v15  ;;  %v5422_v63 = vperm.slane %v5416_v60, %v9731_v38  ;;  %v5427_v47 = vrot.slane %v5410_v1, 4  ;;  %v5429_v29 = vrot.slane %v5414_v34, 4 }
 0xb8b   :  { %v5674_v26 = vsel %vm623_vm13, %v5673_v61, %v5488_v50  ;;  %v5426_v57 = vperm.slane %v5418_v19, %v9731_v38  ;;  %v4656_v2 = vperm.slane %v4648_v56, %v9731_v38  ;;  %v13649_v46 = vrot.slane %v11981_v37, 4 }
 0xb8c   :  { %v12317_v25 = vperm.slane %v5674_v26, %v9699_v7  ;;  %v5431_v20 = vrot.slane %v5422_v63, 4  ;;  %v12325_v33 = vsel %vm623_vm13, 0.0, %v5427_v47  ;;  %v12328_v60 = vsel %vm623_vm13, 0.0, %v5429_v29 }
 0xb8d   :  { %v4690_v3 = vsel %vm623_vm13, %v11989_v14, %v13649_v46  ;;  %v5433_v22 = vrot.slane %v5426_v57, 4  ;;  %v5603_v34 = vsel %vm623_vm13, %v5429_v29, %v5410_v1  ;;  %v5608_v56 = vrot.slane %v12328_v60, 4 }
 0xb8e   :  { %v5432_v0 = vsel %vm623_vm13, 0.0, %v5431_v20  ;;  %v12333_v16 = vperm.slane %v5603_v34, %v9699_v7  ;;  %v4661_v39 = vrot.slane %v4656_v2, 4  ;;  %v4698_v61 = vperm.slane %v4690_v3, %v9731_v38 }
 0xb8f   :  { %v5434_v35 = vsel %vm623_vm13, 0.0, %v5433_v22  ;;  %v5614_v50 = vsel %vm623_vm13, %v5433_v22, %v5422_v63  ;;  %v13650_v15 = vrot.slane %v11992_v42, 4  ;;  %v4634_v63 = vsel %vm623_vm13, %v4633_v5, %v11962_v59 }
 0xb90   :  { %v12344_v1 = vperm.slane %v5614_v50, %v9699_v7  ;;  %v5619_v26 = vrot.slane %v5434_v35, 4  ;;  %v4662_v57 = vsel %vm623_vm13, %v4661_v39, %v12254_v40  ;;  %v13651_v20 = vrot.slane %v11984_v18, 4 }
 0xb91   :  { %v4702_v19 = vsel %vm623_vm13, %v12008_v44, %v13650_v15  ;;  %v4831_v29 = vpack.c.bf16 %v4662_v57, %v4662_v57  ;;  %v4687_v3 = vrot.slane %v11989_v14, 4  ;;  %v4640_v35 = vperm.slane %v4634_v63, %v9731_v38 }
 0xb92   :  { %v4710_v47 = vperm.slane %v4702_v19, %v9731_v38  ;;  %v4646_v46 = vsel %vm623_vm13, %v13651_v20, %v11970_v32  ;;  %v5620_v22 = vsel %vm623_vm13, %v5619_v26, %v5432_v0  ;;  %v5639_v34 = vrot.slane %v12344_v1, 4 }
 0xb93   :  { %v12362_v50 = vperm.slane %v5620_v22, %v9699_v7  ;;  %v5897_v52 = vunpack.c.l.b16 %v4831_v29  ;;  %v4652_v59 = vperm.slane %v4646_v46, %v9731_v38  ;;  %v4688_v18 = vsel %vm623_vm13, %v4687_v3, %v11981_v37 }
 0xb94   :  { %v4715_v39 = vrot.slane %v4710_v47, 4  ;;  %v4694_v14 = vperm.slane %v4688_v18, %v9731_v38  ;;  %v13652_v5 = vrot.slane %v12008_v44, 4  ;;  %v4663_v15 = vrot.slane %v12254_v40, 4 }
 0xb95   :  { %v4657_v26 = vrot.slane %v4652_v59, 4  ;;  %v4717_v29 = vrot.slane %v4698_v61, 4  ;;  %v4659_v20 = vrot.slane %v4640_v35, 4  ;;  %v5219_v46 = vperm.slane %v12086_v23, %v9699_v7 }
 0xb96   :  { %v4716_v32 = vsel %vm623_vm13, %v4715_v39, %v4698_v61  ;;  %v4700_v0 = vsel %vm623_vm13, %v13652_v5, %v11992_v42  ;;  %v4664_v63 = vsel %vm623_vm13, %v4656_v2, %v4663_v15  ;;  %v4713_v37 = vrot.slane %v4694_v14, 4 }
 0xb97   :  { %v4832_v19 = vpack.c.bf16 %v4716_v32, %v4716_v32  ;;  %v4706_v57 = vperm.slane %v4700_v0, %v9731_v38  ;;  %v4658_v22 = vsel %vm623_vm13, %v4657_v26, %v4640_v35  ;;  %v4718_v42 = vsel %vm623_vm13, %v4710_v47, %v4717_v29 }
 0xb98   :  { %v4827_v39 = vpack.c.bf16 %v4658_v22, %v4658_v22  ;;  %v4833_v40 = vpack.c.bf16 %v4664_v63, %v4664_v63  ;;  %v4834_v18 = vpack.c.bf16 %v4718_v42, %v4718_v42  ;;  %v4660_v32 = vsel %vm623_vm13, %v4652_v59, %v4659_v20 }
 0xb99   :  { %v5898_v3 = vunpack.c.l.b16 %v4832_v19  ;;  %v4711_v44 = vrot.slane %v4706_v57, 4  ;;  %v4714_v2 = vsel %vm623_vm13, %v4706_v57, %v4713_v37  ;;  %v4829_v0 = vpack.c.bf16 %v4660_v32, %v4660_v32 }
 0xb9a   :  { %v5837_v51 = vunpack.c.l.b16 %v4827_v39  ;;  %v5927_v23 = vunpack.c.l.b16 %v4833_v40  ;;  %v5928_v19 = vunpack.c.l.b16 %v4834_v18  ;;  %v4830_v35 = vpack.c.bf16 %v4714_v2, %v4714_v2 }
 0xb9b   :  { %v5899_v5 = vpack.c.b16 %v5898_v3, %v5897_v52  ;;  %v4712_v61 = vsel %vm623_vm13, %v4711_v44, %v4694_v14  ;;  %v5867_v26 = vunpack.c.l.b16 %v4829_v0  ;;  %v13653_v47 = vrot.slane %v12083_v45, 4 }
 0xb9c   :  { %v4828_v15 = vpack.c.bf16 %v4712_v61, %v4712_v61  ;;  %v5236_v52 = vperm.slane %v12102_v58, %v9699_v7  ;;  %v5929_v14 = vpack.c.b16 %v5928_v19, %v5927_v23  ;;  %v5239_v63 = vrot.slane %v5219_v46, 4 }
 0xb9d   :  { %8391 = vmatmul.msk.bf16.vlgmr.msrb.gmra.mxu0 %vm2081_vm14, %v5899_v5  ;;  %v5221_v29 = vsel %vm623_vm13, %v13653_v47, %v12079_v10  ;;  %v5868_v20 = vunpack.c.l.b16 %v4830_v35  ;;  %v5251_v37 = vrot.slane %v12093_v21, 4  ;;  %v5273_v3 = vperm.slane %v12058_v55, %v9699_v7 }
 0xb9e   :  { %v5838_v59 = vunpack.c.l.b16 %v4828_v15  ;;  %v5225_v57 = vperm.slane %v5221_v29, %v9699_v7  ;;  %v13654_v22 = vrot.slane %v12054_v43, 4  ;;  %8392 = vmatmul.msk.bf16.vlgmr.msra.gmra.mxu1 %vm2081_vm14, %v5929_v14  ;;  %v5290_v42 = vperm.slane %v12065_v31, %v9699_v7 }
 0xb9f   :  { %v5869_v39 = vpack.c.b16 %v5868_v20, %v5867_v26  ;;  %v5252_v55 = vsel %vm623_vm13, %v5236_v52, %v5251_v37  ;;  %v5293_v18 = vrot.slane %v5273_v3, 4  ;;  %v5249_v32 = vrot.slane %v5236_v52, 4 }
 0xba0   :  { %v5275_v45 = vsel %vm623_vm13, %v13654_v22, %v12069_v13  ;;  %v5839_v10 = vpack.c.b16 %v5838_v59, %v5837_v51  ;;  %v5240_v58 = vsel %vm623_vm13, %v5225_v57, %v5239_v63  ;;  %v5260_v43 = vperm.slane %v5252_v55, %v9731_v38 }
 0xba1   :  { %v5279_v44 = vperm.slane %v5275_v45, %v9699_v7  ;;  %v5248_v40 = vperm.slane %v5240_v58, %v9731_v38  ;;  %v5305_v13 = vrot.slane %v12062_v41, 4  ;;  %v5237_v51 = vrot.slane %v5225_v57, 4  ;;  %8390 = vmatmul.msk.bf16.vlgmr.msra.gmra.mxu3 %vm2081_vm14, %v5869_v39 }
 0xba2   :  { %8389 = vmatmul.msk.bf16.vlgmr.msra.gmra.mxu2 %vm2081_vm14, %v5839_v10  ;;  %v5303_v31 = vrot.slane %v5290_v42, 4  ;;  %v5265_v0 = vrot.slane %v5260_v43, 4  ;;  %v5250_v47 = vsel %vm623_vm13, %v5249_v32, %v12093_v21 }
 0xba3   :  { %v5294_v5 = vsel %vm623_vm13, %v5279_v44, %v5293_v18  ;;  %v5291_v61 = vrot.slane %v5279_v44, 4  ;;  %v5267_v2 = vrot.slane %v5248_v40, 4  ;;  %v5306_v23 = vsel %vm623_vm13, %v5290_v42, %v5305_v13 }
 0xba4   :  { %v5302_v15 = vperm.slane %v5294_v5, %v9731_v38  ;;  %v5238_v19 = vsel %vm623_vm13, %v5237_v51, %v5219_v46  ;;  %v5314_v35 = vperm.slane %v5306_v23, %v9731_v38  ;;  %v5266_v52 = vsel %vm623_vm13, %v5265_v0, %v5248_v40 }
 0xba5   :  { %v5244_v26 = vperm.slane %v5238_v19, %v9731_v38  ;;  %v5292_v29 = vsel %vm623_vm13, %v5291_v61, %v5273_v3  ;;  %v5256_v59 = vperm.slane %v5250_v47, %v9731_v38  ;;  %v5304_v57 = vsel %vm623_vm13, %v5303_v31, %v12062_v41 }
 0xba6   :  { %v5298_v14 = vperm.slane %v5292_v29, %v9731_v38  ;;  %v5319_v63 = vrot.slane %v5314_v35, 4  ;;  %v5335_v46 = vpack.c.bf16 %v5266_v52, %v5266_v52  ;;  %v5310_v20 = vperm.slane %v5304_v57, %v9731_v38 }
 0xba7   :  { %v5268_v37 = vsel %vm623_vm13, %v5260_v43, %v5267_v2  ;;  %v5261_v22 = vrot.slane %v5256_v59, 4  ;;  %v5321_v45 = vrot.slane %v5302_v15, 4  ;;  %v5263_v10 = vrot.slane %v5244_v26, 4 }
 0xba8   :  { %v5337_v21 = vpack.c.bf16 %v5268_v37, %v5268_v37  ;;  %v5320_v3 = vsel %vm623_vm13, %v5319_v63, %v5302_v15  ;;  %v6022_v58 = vunpack.c.l.b16 %v5335_v46  ;;  %v5315_v44 = vrot.slane %v5310_v20, 4 }
 0xba9   :  { %v5317_v42 = vrot.slane %v5298_v14, 4  ;;  %v5336_v39 = vpack.c.bf16 %v5320_v3, %v5320_v3  ;;  %v5262_v40 = vsel %vm623_vm13, %v5261_v22, %v5244_v26  ;;  %v5322_v41 = vsel %vm623_vm13, %v5314_v35, %v5321_v45 }
 0xbaa   :  { %v6052_v55 = vunpack.c.l.b16 %v5337_v21  ;;  %v5316_v18 = vsel %vm623_vm13, %v5315_v44, %v5298_v14  ;;  %v5331_v13 = vpack.c.bf16 %v5262_v40, %v5262_v40  ;;  %v5338_v51 = vpack.c.bf16 %v5322_v41, %v5322_v41 }
 0xbab   :  { %v5264_v43 = vsel %vm623_vm13, %v5256_v59, %v5263_v10  ;;  %v6023_v32 = vunpack.c.l.b16 %v5336_v39  ;;  %v5332_v5 = vpack.c.bf16 %v5316_v18, %v5316_v18  ;;  %v5318_v61 = vsel %vm623_vm13, %v5310_v20, %v5317_v42 }
 0xbac   :  { %v5333_v31 = vpack.c.bf16 %v5264_v43, %v5264_v43  ;;  %v5962_v2 = vunpack.c.l.b16 %v5331_v13  ;;  %v6053_v0 = vunpack.c.l.b16 %v5338_v51  ;;  %v5334_v15 = vpack.c.bf16 %v5318_v61, %v5318_v61 }
 0xbad   :  { %v13655_v23 = vrot.slane %v12182_v62, 4  ;;  %v6024_v35 = vpack.c.b16 %v6023_v32, %v6022_v58  ;;  %v5963_v26 = vunpack.c.l.b16 %v5332_v5  ;;  %v4769_v14 = vrot.slane %v12222_v54, 4 }
 0xbae   :  { %v5992_v47 = vunpack.c.l.b16 %v5333_v31  ;;  %v6054_v52 = vpack.c.b16 %v6053_v0, %v6052_v55  ;;  %v5993_v59 = vunpack.c.l.b16 %v5334_v15  ;;  %v13656_v57 = vrot.slane %v12154_v48, 4 }
 0xbaf   :  { %v4744_v19 = vsel %vm623_vm13, %v12194_v53, %v13655_v23  ;;  %v6029_v46 = vsel %vm2081_vm14, %v6024_v35, 0  ;;  %v5964_v20 = vpack.c.b16 %v5963_v26, %v5962_v2  ;;  %v4823_v22 = vrot.slane %v12178_v12, 4 }
 0xbb0   :  { %v4752_v29 = vperm.slane %v4744_v19, %v9731_v38  ;;  %v4798_v63 = vsel %vm623_vm13, %v12169_v6, %v13656_v57  ;;  %6038 = vmatpush.bf16.xpose.msra.mxu0 %v6029_v46  ;;  %v6059_v45 = vsel %vm2081_vm14, %v6054_v52, 0  ;;  %v5994_v21 = vpack.c.b16 %v5993_v59, %v5992_v47 }
 0xbb1   :  { %v4806_v37 = vperm.slane %v4798_v63, %v9731_v38  ;;  %v4741_v3 = vrot.slane %v12194_v53, 4  ;;  %v5969_v58 = vsel %vm2081_vm14, %v5964_v20, 0  ;;  %6068 = vmatpush.bf16.xpose.msrb.mxu1 %v6059_v45  ;;  %v13657_v39 = vrot.slane %v12209_v36, 4 }
 0xbb2   :  { %v4770_v10 = vsel %vm623_vm13, %v4769_v14, %v4752_v29  ;;  %5978 = vmatpush.bf16.xpose.msrb.mxu2 %v5969_v58  ;;  %v5999_v41 = vsel %vm2081_vm14, %v5994_v21, 0  ;;  %v4795_v43 = vrot.slane %v12169_v6, 4  ;;  %v13658_v36 = vrot.slane %v12162_v4, 4 }
 0xbb3   :  { %v4824_v44 = vsel %vm623_vm13, %v4823_v22, %v4806_v37  ;;  %v4839_v42 = vpack.c.bf16 %v4770_v10, %v4770_v10  ;;  %v4754_v40 = vsel %vm623_vm13, %v13657_v39, %v12190_v30  ;;  %v4742_v18 = vsel %vm623_vm13, %v4741_v3, %v12182_v62  ;;  %6008 = vmatpush.bf16.xpose.msrb.mxu3 %v5999_v41 }
 0xbb4   :  { %v4840_v55 = vpack.c.bf16 %v4824_v44, %v4824_v44  ;;  %v4760_v53 = vperm.slane %v4754_v40, %v9731_v38  ;;  %v4748_v51 = vperm.slane %v4742_v18, %v9731_v38  ;;  %v4808_v30 = vsel %vm623_vm13, %v13658_v36, %v12157_v27 }
 0xbb5   :  { %v6017_v13 = vunpack.c.l.b16 %v4839_v42  ;;  %v4814_v61 = vperm.slane %v4808_v30, %v9731_v38  ;;  %v4771_v31 = vrot.slane %v4752_v29, 4  ;;  %v4796_v62 = vsel %vm623_vm13, %v4795_v43, %v12154_v48 }
 0xbb6   :  { %v6018_v32 = vunpack.c.l.b16 %v4840_v55  ;;  %v4765_v5 = vrot.slane %v4760_v53, 4  ;;  %v4767_v2 = vrot.slane %v4748_v51, 4  ;;  %v4825_v0 = vrot.slane %v4806_v37, 4 }
 0xbb7   :  { %v5609_v6 = vsel %vm623_vm13, %v5608_v56, %v12325_v33  ;;  %v4802_v27 = vperm.slane %v4796_v62, %v9731_v38  ;;  %v4819_v23 = vrot.slane %v4814_v61, 4  ;;  %v4772_v35 = vsel %vm623_vm13, %v12222_v54, %v4771_v31 }
 0xbb8   :  { %v6019_v15 = vpack.c.b16 %v6018_v32, %v6017_v13  ;;  %v4766_v4 = vsel %vm623_vm13, %v4765_v5, %v4748_v51  ;;  %v4826_v26 = vsel %vm623_vm13, %v12178_v12, %v4825_v0  ;;  %v4768_v48 = vsel %vm623_vm13, %v4760_v53, %v4767_v2 }
 0xbb9   :  { %v4835_v19 = vpack.c.bf16 %v4766_v4, %v4766_v4  ;;  %v4820_v60 = vsel %vm623_vm13, %v4819_v23, %v4802_v27  ;;  %v4821_v33 = vrot.slane %v4802_v27, 4  ;;  %v4841_v56 = vpack.c.bf16 %v4772_v35, %v4772_v35 }
 0xbba   :  { %8395 = vmatmul.msk.bf16.vlgmr.msra.gmra.mxu0 %vm2081_vm14, %v6019_v15  ;;  %v4842_v47 = vpack.c.bf16 %v4826_v26, %v4826_v26  ;;  %v4836_v29 = vpack.c.bf16 %v4820_v60, %v4820_v60  ;;  %v4837_v59 = vpack.c.bf16 %v4768_v48, %v4768_v48  ;;  %v5613_v14 = vperm.slane %v5609_v6, %v9699_v7 }
 0xbbb   :  { %v5957_v52 = vunpack.c.l.b16 %v4835_v19  ;;  %v6047_v57 = vunpack.c.l.b16 %v4841_v56  ;;  %v4822_v54 = vsel %vm623_vm13, %v4814_v61, %v4821_v33  ;;  %v5627_v12 = vrot.slane %v12333_v16, 4 }
 0xbbc   :  { %v6048_v63 = vunpack.c.l.b16 %v4842_v47  ;;  %v5958_v46 = vunpack.c.l.b16 %v4836_v29  ;;  %v4838_v20 = vpack.c.bf16 %v4822_v54, %v4822_v54  ;;  %v5987_v37 = vunpack.c.l.b16 %v4837_v59 }
 0xbbd   :  { %v5640_v22 = vsel %vm623_vm13, %v12362_v50, %v5639_v34  ;;  %v5628_v21 = vsel %vm623_vm13, %v5613_v14, %v5627_v12  ;;  %v5663_v3 = vsel %vm623_vm13, %v5662_v28, %v12307_v8  ;;  %v5681_v34 = vrot.slane %v12303_v9, 4 }
 0xbbe   :  { %v6049_v45 = vpack.c.b16 %v6048_v63, %v6047_v57  ;;  %v5648_v10 = vperm.slane %v5640_v22, %v9731_v38  ;;  %v5959_v58 = vpack.c.b16 %v5958_v46, %v5957_v52  ;;  %v5988_v44 = vunpack.c.l.b16 %v4838_v20 }
 0xbbf   :  { %v5636_v42 = vperm.slane %v5628_v21, %v9731_v38  ;;  %v5667_v39 = vperm.slane %v5663_v3, %v9699_v7  ;;  %v13659_v41 = vrot.slane %v12299_v24, 4  ;;  %v5625_v18 = vrot.slane %v5613_v14, 4  ;;  %v4344_v3 = vpop.f32.mrf.mxu1 }
 0xbc0   :  { %8396 = vmatmul.msk.bf16.vlgmr.msrb.gmra.mxu1 %vm2081_vm14, %v6049_v45  ;;  %v5653_v40 = vrot.slane %v5648_v10, 4  ;;  %8393 = vmatmul.msk.bf16.vlgmr.msrb.gmra.mxu2 %vm2081_vm14, %v5959_v58  ;;  %v5989_v17 = vpack.c.b16 %v5988_v44, %v5987_v37  ;;  %v5637_v8 = vrot.slane %v12362_v50, 4  ;;  %v5691_v36 = vrot.slane %v12317_v25, 4 }
 0xbc1   :  { %v5694_v55 = vsel %vm623_vm13, %v12317_v25, %v13659_v41  ;;  %v5679_v53 = vrot.slane %v5667_v39, 4  ;;  %v5682_v51 = vsel %vm623_vm13, %v5667_v39, %v5681_v34  ;;  %v5626_v43 = vsel %vm623_vm13, %v5625_v18, %v12333_v16 }
 0xbc2   :  { %v5702_v28 = vperm.slane %v5694_v55, %v9731_v38  ;;  %v5654_v13 = vsel %vm623_vm13, %v5653_v40, %v5636_v42  ;;  %8394 = vmatmul.msk.bf16.vlgmr.msrb.gmra.mxu3 %vm2081_vm14, %v5989_v17  ;;  %v5690_v30 = vperm.slane %v5682_v51, %v9731_v38  ;;  %v5632_v61 = vperm.slane %v5626_v43, %v9731_v38 }
 0xbc3   :  { %v5823_v5 = vpack.c.bf16 %v5654_v13, %v5654_v13  ;;  %v5638_v50 = vsel %vm623_vm13, %v5637_v8, %v12344_v1  ;;  %v5680_v31 = vsel %vm623_vm13, %v5679_v53, %v12303_v9  ;;  %v5692_v2 = vsel %vm623_vm13, %v5691_v36, %v12299_v24 }
 0xbc4   :  { %v5707_v32 = vrot.slane %v5702_v28, 4  ;;  %v5655_v16 = vrot.slane %v5636_v42, 4  ;;  %v5644_v0 = vperm.slane %v5638_v50, %v9731_v38  ;;  %v5686_v6 = vperm.slane %v5680_v31, %v9731_v38 }
 0xbc5   :  { %v6538_v62 = vunpack.c.l.b16 %v5823_v5  ;;  %v5698_v4 = vperm.slane %v5692_v2, %v9731_v38  ;;  %v5709_v1 = vrot.slane %v5690_v30, 4  ;;  %v5651_v9 = vrot.slane %v5632_v61, 4 }
 0xbc6   :  { %v5708_v25 = vsel %vm623_vm13, %v5707_v32, %v5690_v30  ;;  %v5656_v27 = vsel %vm623_vm13, %v5648_v10, %v5655_v16  ;;  %v5649_v23 = vrot.slane %v5644_v0, 4  ;;  %v5705_v35 = vrot.slane %v5686_v6, 4 }
 0xbc7   :  { %v5824_v15 = vpack.c.bf16 %v5708_v25, %v5708_v25  ;;  %v5825_v19 = vpack.c.bf16 %v5656_v27, %v5656_v27  ;;  %v5703_v24 = vrot.slane %v5698_v4, 4  ;;  %v5710_v48 = vsel %vm623_vm13, %v5702_v28, %v5709_v1 }
 0xbc8   :  { %v5650_v60 = vsel %vm623_vm13, %v5649_v23, %v5632_v61  ;;  %v5826_v33 = vpack.c.bf16 %v5710_v48, %v5710_v48  ;;  %v5652_v47 = vsel %vm623_vm13, %v5644_v0, %v5651_v9  ;;  %v5706_v14 = vsel %vm623_vm13, %v5698_v4, %v5705_v35 }
 0xbc9   :  { %v6539_v26 = vunpack.c.l.b16 %v5824_v15  ;;  %v6566_v56 = vunpack.c.l.b16 %v5825_v19  ;;  %v5704_v52 = vsel %vm623_vm13, %v5703_v24, %v5686_v6  ;;  %v5819_v59 = vpack.c.bf16 %v5650_v60, %v5650_v60 }
 0xbca   :  { %v5820_v57 = vpack.c.bf16 %v5704_v52, %v5704_v52  ;;  %v6567_v63 = vunpack.c.l.b16 %v5826_v33  ;;  %v5821_v54 = vpack.c.bf16 %v5652_v47, %v5652_v47  ;;  %v5822_v12 = vpack.c.bf16 %v5706_v14, %v5706_v14 }
 0xbcb   :  { %v6540_v29 = vpack.c.b16 %v6539_v26, %v6538_v62  ;;  %v6482_v46 = vunpack.c.l.b16 %v5819_v59  ;;  %v12580_v1 = vadd.f32 %v4344_v3, %v11722_v11 }
 0xbcc   :  { %v6483_v20 = vunpack.c.l.b16 %v5820_v57  ;;  %v6568_v37 = vpack.c.b16 %v6567_v63, %v6566_v56  ;;  %v6510_v22 = vunpack.c.l.b16 %v5821_v54  ;;  %v6511_v45 = vunpack.c.l.b16 %v5822_v12 }
 0xbcd   :  { %6552 = vmatpush.bf16.msrb.mxu0 %v6540_v29  ;;  %v12584_v23 = vpack.i.bf16 %v12580_v1, %v11725_v49 }
 0xbce   :  { %v6484_v21 = vpack.c.b16 %v6483_v20, %v6482_v46  ;;  %6580 = vmatpush.bf16.msra.mxu1 %v6568_v37  ;;  %v6512_v10 = vpack.c.b16 %v6511_v45, %v6510_v22 }
 0xbd0   :  { %6496 = vmatpush.bf16.msra.mxu2 %v6484_v21  ;;  %6524 = vmatpush.bf16.msra.mxu3 %v6512_v10 }
 0xc1a   :  { %v5920_v58 = vpop.f32.mrf.mxu0 }
 0xc1b   :  { %v6087_v44 = vsel %vm2312_vm15, %v5920_v58, -inf  ;;  %v5950_v42 = vpop.f32.mrf.mxu1 }
 0xc1c   :  { %6088 = vmax.xlane.f32.xlu1 %v6087_v44  ;;  %v6093_v39 = vsel %vm2312_vm15, %v5950_v42, -inf }
 0xc1d   :  { %6094 = vmax.xlane.f32.xlu0 %v6093_v39 }
 0xc22   :  { %v12535_v28 = vpop.f32.mrf.mxu0 }
 0xc23   :  { %v5952_v34 = vpop.f32.mrf.mxu1  ;;  %v6090_v53 = vsel %vm2312_vm15, %v12535_v28, -inf }
 0xc24   :  { %v12529_v41 = vpop.f32.mrf.mxu3  ;;  %v6096_v18 = vsel %vm2312_vm15, %v5952_v34, -inf }
 0xc25   :  { %v5860_v40 = vpop.f32.mrf.mxu2  ;;  %6097 = vmax.xlane.f32.xlu1 %v6096_v18  ;;  %v6081_v17 = vsel %vm2312_vm15, %v12529_v41, -inf }
 0xc26   :  { %v6075_v55 = vsel %vm2312_vm15, %v5860_v40, -inf  ;;  %6082 = vmax.xlane.f32.xlu0 %v6081_v17 }
 0xc27   :  { %6076 = vmax.xlane.f32.xlu2 %v6075_v55 }
 0xc2c   :  { %v12543_v51 = vpop.f32.mrf.mxu3 }
 0xc2d   :  { %v12537_v8 = vpop.f32.mrf.mxu2  ;;  %v6084_v36 = vsel %vm2312_vm15, %v12543_v51, -inf }
 0xc2e   :  { %v6078_v13 = vsel %vm2312_vm15, %v12537_v8, -inf }
 0xc2f   :  { %6091 = vmax.xlane.f32.xlu2 %v6090_v53  ;;  %6079 = vmax.xlane.f32.xlu1 %v6078_v13 }
 0xc37   :  { %v12545_v43 = vpop.f32.mrf.mxu0  ;;  %6085 = vmax.xlane.f32.xlu2 %v6084_v36 }
 0xc38   :  { %v6111_v30 = vsel %vm2312_vm15, %v12545_v43, -inf }
 0xc39   :  { %6112 = vmax.xlane.f32.xlu0 %v6111_v30 }
 0xc3d   :  { %v12551_v32 = vpop.f32.mrf.mxu1 }
 0xc3e   :  { %v6117_v61 = vsel %vm2312_vm15, %v12551_v32, -inf }
 0xc3f   :  { %v12553_v5 = vpop.f32.mrf.mxu0  ;;  %6118 = vmax.xlane.f32.xlu2 %v6117_v61 }
 0xc40   :  { %v6114_v50 = vsel %vm2312_vm15, %v12553_v5, -inf }
 0xc41   :  { %6115 = vmax.xlane.f32.xlu1 %v6114_v50 }
 0xc43   :  { %v12559_v31 = vpop.f32.mrf.mxu2 }
 0xc44   :  { %v6099_v62 = vsel %vm2312_vm15, %v12559_v31, -inf }
 0xc45   :  { %v12561_v2 = vpop.f32.mrf.mxu1  ;;  %v12563_v16 = vpop.f32.mrf.mxu3 }
 0xc46   :  { %v6120_v25 = vsel %vm2312_vm15, %v12561_v2, -inf  ;;  %v6105_v0 = vsel %vm2312_vm15, %v12563_v16, -inf }
 0xc47   :  { %6121 = vmax.xlane.f32.xlu0 %v6120_v25  ;;  %6100 = vmax.xlane.f32.xlu2 %v6099_v62 }
 0xc49   :  { %6106 = vmax.xlane.f32.xlu1 %v6105_v0 }
 0xc4b   :  { %v12571_v6 = vpop.f32.mrf.mxu2 }
 0xc4c   :  { %v6102_v4 = vsel %vm2312_vm15, %v12571_v6, -inf }
 0xc4d   :  { %v12573_v15 = vpop.f32.mrf.mxu3 }
 0xc4e   :  { %v6108_v27 = vsel %vm2312_vm15, %v12573_v15, -inf }
 0xc4f   :  { %6103 = vmax.xlane.f32.xlu0 %v6102_v4  ;;  %6109 = vmax.xlane.f32.xlu2 %v6108_v27 }
 0xc67   :  { %8987 = vrot.lane.b32.xlu2 %v12584_v23, %s9274_s29 }
 0xc8f   :  { %v6089_v19 = vpop.xlane.xlu1 %6088 }
 0xc90   :  { %v6127_v9 = vsub.f32 %v5920_v58, %v6089_v19  ;;  %v6095_v26 = vpop.xlane.xlu0 %6094 }
 0xc91   :  { %v6129_v24 = vsub.f32 %v5950_v42, %v6095_v26 }
 0xc92   :  { %v6147_v35 = vmul.f32 1.442695, %v6127_v9 }
 0xc93   :  { %v6151_v48 = vmul.f32 1.442695, %v6129_v24 }
 0xc94   :  { %9151 = vpow2.f32 %v6147_v35 }
 0xc95   :  { %9153 = vpow2.f32 %v6151_v48 }
 0xc98   :  { %v6098_v11 = vpop.xlane.xlu1 %6097 }
 0xc99   :  { %v6130_v47 = vsub.f32 %v5952_v34, %v6098_v11  ;;  %v6083_v63 = vpop.xlane.xlu0 %6082 }
 0xc9a   :  { %v12588_v60 = vpop.eup %9151  ;;  %v6077_v33 = vpop.xlane.xlu2 %6076  ;;  %v6125_v22 = vsub.f32 %v12529_v41, %v6083_v63 }
 0xc9b   :  { %v6123_v56 = vsub.f32 %v5860_v40, %v6077_v33  ;;  %v6183_v29 = vsel %vm2312_vm15, %v12588_v60, 0.0  ;;  %v12592_v52 = vpop.eup %9153  ;;  %v6153_v14 = vmul.f32 1.442695, %v6130_v47 }
 0xc9c   :  { %6184 = vadd.xlane.f32.xlu0 %v6183_v29  ;;  %v6189_v57 = vsel %vm2312_vm15, %v12592_v52, 0.0  ;;  %v6143_v44 = vmul.f32 1.442695, %v6125_v22 }
 0xc9d   :  { %v6139_v59 = vmul.f32 1.442695, %v6123_v56  ;;  %6190 = vadd.xlane.f32.xlu1 %v6189_v57 }
 0xc9f   :  { %9155 = vpow2.f32 %v6139_v59 }
 0xca0   :  { %9157 = vpow2.f32 %v6153_v14 }
 0xca2   :  { %v6092_v54 = vpop.xlane.xlu2 %6091  ;;  %v6080_v12 = vpop.xlane.xlu1 %6079 }
 0xca3   :  { %v6128_v46 = vsub.f32 %v12535_v28, %v6092_v54  ;;  %v6124_v20 = vsub.f32 %v12537_v8, %v6080_v12 }
 0xca5   :  { %v12598_v37 = vpop.eup %9155  ;;  %v6149_v45 = vmul.f32 1.442695, %v6128_v46  ;;  %v6141_v21 = vmul.f32 1.442695, %v6124_v20 }
 0xca6   :  { %v12601_v10 = vpop.eup %9157  ;;  %v6171_v3 = vsel %vm2312_vm15, %v12598_v37, 0.0 }
 0xca7   :  { %9159 = vpow2.f32 %v6149_v45  ;;  %6172 = vadd.xlane.f32.xlu1 %v6171_v3  ;;  %v6192_v58 = vsel %vm2312_vm15, %v12601_v10, 0.0 }
 0xca8   :  { %9161 = vpow2.f32 %v6141_v21  ;;  %6193 = vadd.xlane.f32.xlu0 %v6192_v58 }
 0xca9   :  { %9163 = vpow2.f32 %v6143_v44 }
 0xcaa   :  { %v6086_v42 = vpop.xlane.xlu2 %6085 }
 0xcab   :  { %v6126_v39 = vsub.f32 %v12543_v51, %v6086_v42 }
 0xcac   :  { %v6113_v19 = vpop.xlane.xlu0 %6112 }
 0xcad   :  { %v12608_v40 = vpop.eup %9159  ;;  %v6145_v34 = vmul.f32 1.442695, %v6126_v39  ;;  %v6135_v24 = vsub.f32 %v12545_v43, %v6113_v19 }
 0xcae   :  { %v12610_v41 = vpop.eup %9161  ;;  %v6186_v55 = vsel %vm2312_vm15, %v12608_v40, 0.0 }
 0xcaf   :  { %9165 = vpow2.f32 %v6145_v34  ;;  %6187 = vadd.xlane.f32.xlu2 %v6186_v55  ;;  %v6174_v18 = vsel %vm2312_vm15, %v12610_v41, 0.0  ;;  %v12616_v28 = vpop.eup %9163  ;;  %v6163_v48 = vmul.f32 1.442695, %v6135_v24 }
 0xcb0   :  { %6175 = vadd.xlane.f32.xlu0 %v6174_v18  ;;  %v6177_v13 = vsel %vm2312_vm15, %v12616_v28, 0.0 }
 0xcb2   :  { %v6119_v17 = vpop.xlane.xlu2 %6118 }
 0xcb3   :  { %v6137_v62 = vsub.f32 %v12551_v32, %v6119_v17 }
 0xcb4   :  { %v6116_v26 = vpop.xlane.xlu1 %6115 }
 0xcb5   :  { %v12618_v8 = vpop.eup %9165  ;;  %v6167_v27 = vmul.f32 1.442695, %v6137_v62  ;;  %v6136_v63 = vsub.f32 %v12553_v5, %v6116_v26 }
 0xcb6   :  { %v6180_v53 = vsel %vm2312_vm15, %v12618_v8, 0.0 }
 0xcb7   :  { %6181 = vadd.xlane.f32.xlu1 %v6180_v53  ;;  %6178 = vadd.xlane.f32.xlu2 %v6177_v13 }
 0xcba   :  { %v6101_v51 = vpop.xlane.xlu2 %6100  ;;  %v6122_v35 = vpop.xlane.xlu0 %6121 }
 0xcbb   :  { %v6131_v36 = vsub.f32 %v12559_v31, %v6101_v51  ;;  %v6138_v59 = vsub.f32 %v12561_v2, %v6122_v35 }
 0xcbc   :  { %v6107_v56 = vpop.xlane.xlu1 %6106 }
 0xcbd   :  { %v6155_v30 = vmul.f32 1.442695, %v6131_v36  ;;  %v6133_v47 = vsub.f32 %v12563_v16, %v6107_v56  ;;  %v6169_v43 = vmul.f32 1.442695, %v6138_v59 }
 0xcbf   :  { %9167 = vpow2.f32 %v6155_v30  ;;  %v6159_v14 = vmul.f32 1.442695, %v6133_v47 }
 0xcc2   :  { %v6110_v61 = vpop.xlane.xlu2 %6109  ;;  %v6104_v33 = vpop.xlane.xlu0 %6103 }
 0xcc3   :  { %v6134_v50 = vsub.f32 %v12573_v15, %v6110_v61  ;;  %v6132_v11 = vsub.f32 %v12571_v6, %v6104_v33  ;;  %v6165_v6 = vmul.f32 1.442695, %v6136_v63 }
 0xcc4   :  { %8997 = vrot.lane.b32.xlu0 %v12584_v23, %s9275_s0 }
 0xcc5   :  { %v12628_v25 = vpop.eup %9167  ;;  %v6161_v0 = vmul.f32 1.442695, %v6134_v50  ;;  %v6157_v29 = vmul.f32 1.442695, %v6132_v11 }
 0xcc6   :  { %v6195_v4 = vsel %vm2312_vm15, %v12628_v25, 0.0 }
 0xcc7   :  { %9169 = vpow2.f32 %v6161_v0  ;;  %6196 = vadd.xlane.f32.xlu2 %v6195_v4 }
 0xcc8   :  { %9171 = vpow2.f32 %v6167_v27 }
 0xcc9   :  { %9173 = vpow2.f32 %v6163_v48 }
 0xcca   :  { %9175 = vpow2.f32 %v6157_v29  ;;  %v12668_v39 = vpop.permute.xlu2 %8987 }
 0xccb   :  { %9177 = vpow2.f32 %v6159_v14 }
 0xccc   :  { %9179 = vpow2.f32 %v6169_v43 }
 0xccd   :  { %v12633_v31 = vpop.eup %9169  ;;  %9181 = vpow2.f32 %v6165_v6 }
 0xcce   :  { %v6204_v15 = vsel %vm2312_vm15, %v12633_v31, 0.0  ;;  %v12639_v9 = vpop.eup %9171 }
 0xccf   :  { %6205 = vadd.xlane.f32.xlu2 %v6204_v15  ;;  %v6213_v32 = vsel %vm2312_vm15, %v12639_v9, 0.0 }
 0xcd0   :  { %8992 = vrot.lane.b32.xlu1 %v12584_v23, %s9276_s18  ;;  %v12646_v23 = vpop.eup %9173 }
 0xcd1   :  { %v6207_v57 = vsel %vm2312_vm15, %v12646_v23, 0.0  ;;  %v12652_v54 = vpop.eup %9175 }
 0xcd2   :  { %v6198_v16 = vsel %vm2312_vm15, %v12652_v54, 0.0  ;;  %v12656_v12 = vpop.eup %9177 }
 0xcd3   :  { %v6201_v2 = vsel %vm2312_vm15, %v12656_v12, 0.0  ;;  %v12660_v46 = vpop.eup %9179 }
 0xcd4   :  { %v6216_v5 = vsel %vm2312_vm15, %v12660_v46, 0.0  ;;  %v12664_v20 = vpop.eup %9181 }
 0xcd5   :  { %v6210_v22 = vsel %vm2312_vm15, %v12664_v20, 0.0 }
 0xcd7   :  { %6214 = vadd.xlane.f32.xlu2 %v6213_v32 }
 0xcee   :  { %6208 = vadd.xlane.f32.xlu0 %v6207_v57 }
 0xcf6   :  { %6199 = vadd.xlane.f32.xlu0 %v6198_v16 }
 0xcfa   :  { %6202 = vadd.xlane.f32.xlu1 %v6201_v2  ;;  %v8989_v2 = vunpack.i.l.bf16 %v12668_v39 }
 0xcfe   :  { %6217 = vadd.xlane.f32.xlu0 %v6216_v5 }
 0xd02   :  { %6211 = vadd.xlane.f32.xlu1 %v6210_v22 }
 0xd0f   :  { %v6185_v45 = vpop.xlane.xlu0 %6184 }
 0xd10   :  { %9183 = vrcp.f32 %v6185_v45  ;;  %v6191_v21 = vpop.xlane.xlu1 %6190  ;;  %v6290_v51 = vand.u32 2147483648, %v6185_v45  ;;  %vm6284_vm5 = vweird.f32 %v6185_v45  ;;  %v6288_v30 = vand.u32 2147483647, %v6185_v45 }
 0xd11   :  { %9185 = vrcp.f32 %v6191_v21  ;;  %v6320_v61 = vand.u32 2147483648, %v6191_v21  ;;  %vm6314_vm7 = vweird.f32 %v6191_v21  ;;  %v6318_v0 = vand.u32 2147483647, %v6191_v21 }
 0xd12   :  { %v6291_v15 = vor.u32 1.1754944e-38, %v6290_v51  ;;  %vm6289_vm9 = vcmp.eq.f32.partialorder %v6288_v30, 8.507059e+37 }
 0xd13   :  { %v6321_v24 = vor.u32 1.1754944e-38, %v6320_v61  ;;  %vm6319_vm10 = vcmp.eq.f32.partialorder %v6318_v0, 8.507059e+37 }
 0xd16   :  { %v9184_v3 = vpop.eup %9183 }
 0xd17   :  { %v6280_v58 = vmul.f32 %v9184_v3, %v6185_v45  ;;  %v9186_v44 = vpop.eup %9185  ;;  %vm6285_vm3 = vweird.f32 %v9184_v3 }
 0xd18   :  { %v6310_v34 = vmul.f32 %v9186_v44, %v6191_v21  ;;  %vm6315_vm4 = vweird.f32 %v9186_v44  ;;  %vm12673_vm6 = vmor %vm6284_vm5, %vm6285_vm3 }
 0xd19   :  { %v6281_v42 = vsub.f32 1.0, %v6280_v58  ;;  %vm6316_vm8 = vmor %vm6314_vm7, %vm6315_vm4 }
 0xd1a   :  { %v12670_v55 = vpop.xlane.xlu1 %6172  ;;  %v6311_v53 = vsub.f32 1.0, %v6310_v34 }
 0xd1b   :  { %v6282_v18 = vmul.f32 %v9184_v3, %v6281_v42  ;;  %9187 = vrcp.f32 %v12670_v55  ;;  %v6194_v17 = vpop.xlane.xlu0 %6193  ;;  %v6228_v29 = vand.u32 2147483647, %v12670_v55  ;;  %v6230_v57 = vand.u32 2147483648, %v12670_v55 }
 0xd1c   :  { %9189 = vrcp.f32 %v6194_v17  ;;  %v6312_v36 = vmul.f32 %v9186_v44, %v6311_v53  ;;  %v6335_v43 = vand.u32 2147483648, %v6194_v17  ;;  %v6333_v16 = vand.u32 2147483647, %v6194_v17 }
 0xd1d   :  { %v6283_v13 = vadd.f32 %v9184_v3, %v6282_v18  ;;  %vm6329_vm2 = vweird.f32 %v6194_v17  ;;  %vm6224_vm3 = vweird.f32 %v12670_v55  ;;  %vm12698_vm4 = vcmp.eq.f32.partialorder %v6228_v29, 8.507059e+37 }
 0xd1e   :  { %v6313_v62 = vadd.f32 %v9186_v44, %v6312_v36  ;;  %v6336_v58 = vor.u32 1.1754944e-38, %v6335_v43 }
 0xd1f   :  { %v6287_v27 = vsel %vm12673_vm6, %v9184_v3, %v6283_v13  ;;  %vm6334_vm6 = vcmp.eq.f32.partialorder %v6333_v16, 8.507059e+37 }
 0xd20   :  { %v6317_v32 = vsel %vm6316_vm8, %v9186_v44, %v6313_v62  ;;  %v6292_v11 = vsel %vm6289_vm9, %v6291_v15, %v6287_v27 }
 0xd21   :  { %v12677_v4 = vpop.eup %9187  ;;  %v6322_v47 = vsel %vm6319_vm10, %v6321_v24, %v6317_v32  ;;  %v6293_v63 = vmul.f32 %v12588_v60, %v6292_v11  ;;  %v6231_v60 = vor.u32 1.1754944e-38, %v6230_v57 }
 0xd22   :  { %v9190_v19 = vpop.eup %9189  ;;  %v6220_v35 = vmul.f32 %v12677_v4, %v12670_v55  ;;  %v12683_v26 = vpop.xlane.xlu2 %6187  ;;  %v6323_v5 = vmul.f32 %v12592_v52, %v6322_v47  ;;  %vm6225_vm1 = vweird.f32 %v12677_v4 }
 0xd23   :  { %v6325_v48 = vmul.f32 %v9190_v19, %v6194_v17  ;;  %v12685_v33 = vpop.xlane.xlu0 %6175  ;;  %9191 = vrcp.f32 %v12683_v26  ;;  %vm6330_vm11 = vweird.f32 %v9190_v19  ;;  %v6463_v42 = vpack.c.bf16 %v6293_v63, %v6293_v63  ;;  %vm12709_vm7 = vmor %vm6224_vm3, %vm6225_vm1 }
 0xd24   :  { %v6221_v56 = vsub.f32 1.0, %v6220_v35  ;;  %9193 = vrcp.f32 %v12685_v33  ;;  %vm6331_vm5 = vmor %vm6329_vm2, %vm6330_vm11  ;;  %v6465_v53 = vpack.c.bf16 %v6323_v5, %v6323_v5  ;;  %vm6299_vm8 = vweird.f32 %v12683_v26 }
 0xd25   :  { %v6326_v59 = vsub.f32 1.0, %v6325_v48  ;;  %v6303_v50 = vand.u32 2147483647, %v12683_v26  ;;  %v6305_v62 = vand.u32 2147483648, %v12683_v26  ;;  %v6243_v0 = vand.u32 2147483647, %v12685_v33 }
 0xd26   :  { %v6222_v14 = vmul.f32 %v12677_v4, %v6221_v56  ;;  %v12724_v32 = vunpack.c.l.b16 %v6463_v42  ;;  %v6245_v35 = vand.u32 2147483648, %v12685_v33  ;;  %vm6239_vm2 = vweird.f32 %v12685_v33 }
 0xd27   :  { %v6327_v6 = vmul.f32 %v9190_v19, %v6326_v59  ;;  %vm6304_vm1 = vcmp.eq.f32.partialorder %v6303_v50, 8.507059e+37  ;;  %v6306_v47 = vor.u32 1.1754944e-38, %v6305_v62  ;;  %vm12732_vm3 = vcmp.eq.f32.partialorder %v6243_v0, 8.507059e+37 }
 0xd28   :  { %v6223_v22 = vadd.f32 %v12677_v4, %v6222_v14 }
 0xd29   :  { %v6328_v45 = vadd.f32 %v9190_v19, %v6327_v6  ;;  %v9192_v21 = vpop.eup %9191 }
 0xd2a   :  { %v12702_v44 = vpop.xlane.xlu1 %6181  ;;  %v6295_v34 = vmul.f32 %v9192_v21, %v12683_v26  ;;  %v12705_v18 = vpop.xlane.xlu2 %6178  ;;  %v6227_v51 = vsel %vm12709_vm7, %v12677_v4, %v6223_v22  ;;  %vm6300_vm9 = vweird.f32 %v9192_v21  ;;  %v6561_v4 = vunpack.c.l.b16 %v6465_v53 }
 0xd2b   :  { %v6332_v52 = vsel %vm6331_vm5, %v9190_v19, %v6328_v45  ;;  %v9194_v17 = vpop.eup %9193  ;;  %9195 = vrcp.f32 %v12702_v44  ;;  %vm6301_vm11 = vmor %vm6299_vm8, %vm6300_vm9  ;;  %v6246_v26 = vor.u32 1.1754944e-38, %v6245_v35  ;;  %vm6269_vm5 = vweird.f32 %v12702_v44 }
 0xd2c   :  { %v6337_v13 = vsel %vm6334_vm6, %v6336_v58, %v6332_v52  ;;  %v6296_v30 = vsub.f32 1.0, %v6295_v34  ;;  %v6235_v61 = vmul.f32 %v9194_v17, %v12685_v33  ;;  %9197 = vrcp.f32 %v12705_v18 }
 0xd2d   :  { %v6338_v36 = vmul.f32 %v12601_v10, %v6337_v13  ;;  %v6232_v10 = vsel %vm12698_vm4, %v6231_v60, %v6227_v51  ;;  %vm6240_vm10 = vweird.f32 %v9194_v17  ;;  %v6273_v3 = vand.u32 2147483647, %v12702_v44 }
 0xd2e   :  { %v6297_v19 = vmul.f32 %v9192_v21, %v6296_v30  ;;  %v6236_v15 = vsub.f32 1.0, %v6235_v61  ;;  %v6233_v6 = vmul.f32 %v12598_v37, %v6232_v10  ;;  %vm6241_vm4 = vmor %vm6239_vm2, %vm6240_vm10  ;;  %v6275_v37 = vand.u32 2147483648, %v12702_v44 }
 0xd2f   :  { %v6466_v27 = vpack.c.bf16 %v6338_v36, %v6338_v36  ;;  %v6260_v53 = vand.u32 2147483648, %v12705_v18  ;;  %vm6254_vm9 = vweird.f32 %v12705_v18  ;;  %vm6274_vm10 = vcmp.eq.f32.partialorder %v6273_v3, 8.507059e+37 }
 0xd30   :  { %v6298_v48 = vadd.f32 %v9192_v21, %v6297_v19  ;;  %v6237_v11 = vmul.f32 %v9194_v17, %v6236_v15  ;;  %v6459_v34 = vpack.c.bf16 %v6233_v6, %v6233_v6  ;;  %v6276_v30 = vor.u32 1.1754944e-38, %v6275_v37 }
 0xd31   :  { %v6562_v24 = vunpack.c.l.b16 %v6466_v27  ;;  %v9196_v56 = vpop.eup %9195  ;;  %v8990_v27 = vunpack.i.h.bf16 %v12668_v39  ;;  %v6261_v15 = vor.u32 1.1754944e-38, %v6260_v53 }
 0xd32   :  { %v6302_v14 = vsel %vm6301_vm11, %v9192_v21, %v6298_v48  ;;  %v6238_v57 = vadd.f32 %v9194_v17, %v6237_v11  ;;  %v6265_v43 = vmul.f32 %v9196_v56, %v12702_v44  ;;  %v9198_v63 = vpop.eup %9197  ;;  %vm6270_vm6 = vweird.f32 %v9196_v56 }
 0xd33   :  { %v6563_v59 = vpack.c.b16 %v6562_v24, %v6561_v4  ;;  %v6307_v16 = vsel %vm6304_vm1, %v6306_v47, %v6302_v14  ;;  %v6250_v45 = vmul.f32 %v9198_v63, %v12705_v18  ;;  %vm6255_vm7 = vweird.f32 %v9198_v63  ;;  %vm6271_vm8 = vmor %vm6269_vm5, %vm6270_vm6 }
 0xd34   :  { %v6308_v5 = vmul.f32 %v12608_v40, %v6307_v16  ;;  %v6242_v33 = vsel %vm6241_vm4, %v9194_v17, %v6238_v57  ;;  %v6266_v22 = vsub.f32 1.0, %v6265_v43  ;;  %v6258_v17 = vand.u32 2147483647, %v12705_v18  ;;  %vm6256_vm11 = vmor %vm6254_vm9, %vm6255_vm7 }
 0xd35   :  { %8400 = vmatmul.msk.bf16.vlgmr.msra.gmra.mxu1 %vm2312_vm15, %v6563_v59  ;;  %v6247_v21 = vsel %vm12732_vm3, %v6246_v26, %v6242_v33  ;;  %v6251_v52 = vsub.f32 1.0, %v6250_v45  ;;  %v5505_v18 = vrot.slane %v8989_v2, 4  ;;  %v6477_v11 = vunpack.c.l.b16 %v6459_v34 }
 0xd36   :  { %v6464_v60 = vpack.c.bf16 %v6308_v5, %v6308_v5  ;;  %v6248_v58 = vmul.f32 %v12610_v41, %v6247_v21  ;;  %v6267_v42 = vmul.f32 %v9196_v56, %v6266_v22  ;;  %v8998_v40 = vpop.permute.xlu0 %8997  ;;  %vm6259_vm1 = vcmp.eq.f32.partialorder %v6258_v17, 8.507059e+37 }
 0xd37   :  { %v6252_v36 = vmul.f32 %v9198_v63, %v6251_v52  ;;  %v9000_v41 = vunpack.i.h.bf16 %v8998_v40  ;;  %v8999_v61 = vunpack.i.l.bf16 %v8998_v40  ;;  %v5561_v57 = vrot.slane %v8990_v27, 4 }
 0xd38   :  { %v6534_v55 = vunpack.c.l.b16 %v6464_v60  ;;  %v6460_v13 = vpack.c.bf16 %v6248_v58, %v6248_v58  ;;  %v6268_v51 = vadd.f32 %v9196_v56, %v6267_v42  ;;  %v5493_v33 = vrot.slane %v11725_v49, 4 }
 0xd39   :  { %v6253_v0 = vadd.f32 %v9198_v63, %v6252_v36  ;;  %v5559_v35 = vrot.slane %v9000_v41, 4  ;;  %v5503_v24 = vrot.slane %v8999_v61, 4  ;;  %v5506_v29 = vsel %vm623_vm13, %v8999_v61, %v5505_v18 }
 0xd3a   :  { %v6535_v50 = vpack.c.b16 %v6534_v55, %v12724_v32  ;;  %v6272_v62 = vsel %vm6271_vm8, %v9196_v56, %v6268_v51  ;;  %v6478_v4 = vunpack.c.l.b16 %v6460_v13  ;;  %v12760_v48 = vpop.xlane.xlu2 %6196  ;;  %v5514_v26 = vperm.slane %v5506_v29, %v9699_v7 }
 0xd3b   :  { %v6277_v19 = vsel %vm6274_vm10, %v6276_v30, %v6272_v62  ;;  %v6257_v10 = vsel %vm6256_vm11, %v9198_v63, %v6253_v0  ;;  %9199 = vrcp.f32 %v12760_v48  ;;  %v5560_v43 = vsel %vm623_vm13, %v5559_v35, %v8990_v27 }
 0xd3c   :  { %v6278_v44 = vmul.f32 %v12618_v8, %v6277_v19  ;;  %8399 = vmatmul.msk.bf16.vlgmr.msrb.gmra.mxu0 %vm2312_vm15, %v6535_v50  ;;  %v6262_v32 = vsel %vm6259_vm1, %v6261_v15, %v6257_v10  ;;  %v6479_v14 = vpack.c.b16 %v6478_v4, %v6477_v11  ;;  %v5504_v63 = vsel %vm623_vm13, %v5503_v24, %v8989_v2 }
 0xd3d   :  { %v6263_v47 = vmul.f32 %v12616_v28, %v6262_v32  ;;  %v5549_v22 = vrot.slane %v12580_v1, 4  ;;  %v5562_v21 = vsel %vm623_vm13, %v9000_v41, %v5561_v57  ;;  %v5510_v3 = vperm.slane %v5504_v63, %v9699_v7 }
 0xd3e   :  { %v6462_v56 = vpack.c.bf16 %v6278_v44, %v6278_v44  ;;  %8397 = vmatmul.msk.bf16.vlgmr.msra.gmra.mxu2 %vm2312_vm15, %v6479_v14  ;;  %v5566_v2 = vperm.slane %v5560_v43, %v9699_v7  ;;  %v5527_v52 = vrot.slane %v5514_v26, 4  ;;  %v5570_v53 = vperm.slane %v5562_v21, %v9699_v7 }
 0xd3f   :  { %v6461_v8 = vpack.c.bf16 %v6263_v47, %v6263_v47  ;;  %v5515_v51 = vrot.slane %v5510_v3, 4  ;;  %vm6344_vm3 = vweird.f32 %v12760_v48 }
 0xd40   :  { %v6506_v59 = vunpack.c.l.b16 %v6462_v56  ;;  %v5571_v41 = vrot.slane %v5566_v2, 4  ;;  %v5583_v15 = vrot.slane %v5570_v53, 4 }
 0xd41   :  { %v6505_v16 = vunpack.c.l.b16 %v6461_v8  ;;  %v12778_v42 = vpop.eup %9199 }
 0xd42   :  { %v8993_v6 = vpop.permute.xlu1 %8992  ;;  %v12798_v10 = vpop.xlane.xlu2 %6205  ;;  %vm6345_vm2 = vweird.f32 %v12778_v42 }
 0xd43   :  { %v8995_v28 = vunpack.i.h.bf16 %v8993_v6  ;;  %v8994_v5 = vunpack.i.l.bf16 %v8993_v6  ;;  %v6507_v45 = vpack.c.b16 %v6506_v59, %v6505_v16  ;;  %9201 = vrcp.f32 %v12798_v10  ;;  %vm12868_vm4 = vmor %vm6344_vm3, %vm6345_vm2 }
 0xd44   :  { %vm6389_vm6 = vweird.f32 %v12798_v10 }
 0xd45   :  { %v5547_v39 = vrot.slane %v8995_v28, 4  ;;  %v5550_v37 = vsel %vm623_vm13, %v8995_v28, %v5549_v22  ;;  %v5491_v60 = vrot.slane %v8994_v5, 4  ;;  %v5494_v58 = vsel %vm623_vm13, %v8994_v5, %v5493_v33  ;;  %8398 = vmatmul.msk.bf16.vlgmr.msra.gmra.mxu3 %vm2312_vm15, %v6507_v45 }
 0xd46   :  { %v5558_v34 = vperm.slane %v5550_v37, %v9699_v7  ;;  %v5502_v17 = vperm.slane %v5494_v58, %v9699_v7 }
 0xd47   :  { %v5548_v40 = vsel %vm623_vm13, %v5547_v39, %v12580_v1  ;;  %v5492_v13 = vsel %vm623_vm13, %v5491_v60, %v11725_v49  ;;  %v6340_v1 = vmul.f32 %v12778_v42, %v12760_v48 }
 0xd48   :  { %v5554_v55 = vperm.slane %v5548_v40, %v9699_v7  ;;  %v5498_v36 = vperm.slane %v5492_v13, %v9699_v7  ;;  %v5528_v30 = vsel %vm623_vm13, %v5527_v52, %v5502_v17  ;;  %v5529_v50 = vrot.slane %v5502_v17, 4 }
 0xd49   :  { %v5585_v62 = vrot.slane %v5558_v34, 4  ;;  %v5534_v19 = vperm.slane %v5528_v30, %v9731_v38  ;;  %v6341_v11 = vsub.f32 1.0, %v6340_v1  ;;  %v5584_v59 = vsel %vm623_vm13, %v5583_v15, %v5558_v34 }
 0xd4a   :  { %v5573_v61 = vrot.slane %v5554_v55, 4  ;;  %v5516_v0 = vsel %vm623_vm13, %v5515_v51, %v5498_v36  ;;  %v5517_v27 = vrot.slane %v5498_v36, 4  ;;  %v5530_v49 = vsel %vm623_vm13, %v5514_v26, %v5529_v50  ;;  %v12826_v51 = vpop.xlane.xlu2 %6214  ;;  %v12828_v36 = vpop.eup %9201 }
 0xd4b   :  { %v5572_v4 = vsel %vm623_vm13, %v5571_v41, %v5554_v55  ;;  %v5522_v32 = vperm.slane %v5516_v0, %v9731_v38  ;;  %v5538_v35 = vperm.slane %v5530_v49, %v9731_v38  ;;  %v5543_v47 = vrot.slane %v5534_v19, 4 }
 0xd4c   :  { %v5574_v44 = vsel %vm623_vm13, %v5566_v2, %v5573_v61  ;;  %v5518_v18 = vsel %vm623_vm13, %v5510_v3, %v5517_v27  ;;  %v5586_v8 = vsel %vm623_vm13, %v5570_v53, %v5585_v62  ;;  %v5578_v57 = vperm.slane %v5572_v4, %v9731_v38 }
 0xd4d   :  { %v5582_v24 = vperm.slane %v5574_v44, %v9731_v38  ;;  %v5526_v56 = vperm.slane %v5518_v18, %v9731_v38  ;;  %v5545_v29 = vrot.slane %v5538_v35, 4  ;;  %v5590_v43 = vperm.slane %v5584_v59, %v9731_v38 }
 0xd4e   :  { %v5594_v63 = vperm.slane %v5586_v8, %v9731_v38  ;;  %v5539_v6 = vrot.slane %v5522_v32, 4  ;;  %v6342_v22 = vmul.f32 %v12778_v42, %v6341_v11  ;;  %v5544_v45 = vsel %vm623_vm13, 0.0, %v5543_v47 }
 0xd4f   :  { %v5541_v14 = vrot.slane %v5526_v56, 4  ;;  %v5597_v16 = vrot.slane %v5582_v24, 4  ;;  %v5546_v28 = vsel %vm623_vm13, 0.0, %v5545_v29  ;;  %v5599_v3 = vrot.slane %v5590_v43, 4 }
 0xd50   :  { %v5601_v5 = vrot.slane %v5594_v63, 4  ;;  %v5595_v39 = vrot.slane %v5578_v57, 4  ;;  %v5722_v60 = vsel %vm623_vm13, %v5545_v29, %v5534_v19  ;;  %v5540_v58 = vsel %vm623_vm13, 0.0, %v5539_v6 }
 0xd51   :  { %v5542_v26 = vsel %vm623_vm13, 0.0, %v5541_v14  ;;  %v5711_v33 = vsel %vm623_vm13, %v5541_v14, %v5522_v32  ;;  %v5598_v21 = vsel %vm623_vm13, 0.0, %v5597_v16  ;;  %v5726_v40 = vperm.slane %v5722_v60, %v9699_v7 }
 0xd52   :  { %v5602_v2 = vsel %vm623_vm13, 0.0, %v5601_v5  ;;  %v5716_v37 = vrot.slane %v5542_v26, 4  ;;  %v12821_v52 = vperm.slane %v5711_v33, %v9699_v7  ;;  %v5727_v34 = vrot.slane %v5546_v28, 4 }
 0xd53   :  { %v5765_v17 = vsel %vm623_vm13, %v5597_v16, %v5578_v57  ;;  %v5770_v53 = vrot.slane %v5598_v21, 4  ;;  %v5776_v55 = vsel %vm623_vm13, %v5601_v5, %v5590_v43  ;;  %v5781_v13 = vrot.slane %v5602_v2, 4 }
 0xd54   :  { %v5600_v30 = vsel %vm623_vm13, 0.0, %v5599_v3  ;;  %v5728_v41 = vsel %vm623_vm13, %v5727_v34, %v5544_v45  ;;  %v5747_v1 = vrot.slane %v5726_v40, 4  ;;  %v12833_v61 = vperm.slane %v5776_v55, %v9699_v7 }
 0xd55   :  { %v5596_v50 = vsel %vm623_vm13, 0.0, %v5595_v39  ;;  %v5717_v62 = vsel %vm623_vm13, %v5716_v37, %v5540_v58  ;;  %v5732_v0 = vperm.slane %v5728_v41, %v9699_v7  ;;  %v5782_v27 = vsel %vm623_vm13, %v5781_v13, %v5600_v30 }
 0xd56   :  { %v5769_v19 = vperm.slane %v5765_v17, %v9699_v7  ;;  %v5786_v15 = vperm.slane %v5782_v27, %v9699_v7  ;;  %v5801_v49 = vrot.slane %v12833_v61, 4  ;;  %9203 = vrcp.f32 %v12826_v51 }
 0xd57   :  { %v6348_v4 = vand.u32 2147483647, %v12760_v48  ;;  %v5771_v44 = vsel %vm623_vm13, %v5770_v53, %v5596_v50  ;;  %v6385_v18 = vmul.f32 %v12828_v36, %v12798_v10  ;;  %v5721_v32 = vperm.slane %v5717_v62, %v9699_v7 }
 0xd58   :  { %v5735_v35 = vrot.slane %v12821_v52, 4  ;;  %v5748_v24 = vsel %vm623_vm13, %v5732_v0, %v5747_v1  ;;  %v6343_v11 = vadd.f32 %v12778_v42, %v6342_v22  ;;  %v6350_v56 = vand.u32 2147483648, %v12760_v48 }
 0xd59   :  { %v12854_v47 = vperm.slane %v5748_v24, %v9731_v38  ;;  %v5775_v59 = vperm.slane %v5771_v44, %v9699_v7  ;;  %v5789_v8 = vrot.slane %v5769_v19, 4  ;;  %v5802_v14 = vsel %vm623_vm13, %v5786_v15, %v5801_v49 }
 0xd5a   :  { %v5736_v29 = vsel %vm623_vm13, %v5721_v32, %v5735_v35  ;;  %v5745_v57 = vrot.slane %v5732_v0, 4  ;;  %v5810_v6 = vperm.slane %v5802_v14, %v9731_v38  ;;  %v6386_v26 = vsub.f32 1.0, %v6385_v18 }
 0xd5b   :  { %v5744_v43 = vperm.slane %v5736_v29, %v9731_v38  ;;  %v5761_v63 = vrot.slane %v12854_v47, 4  ;;  %v5790_v28 = vsel %vm623_vm13, %v5775_v59, %v5789_v8  ;;  %vm12872_vm5 = vcmp.eq.f32.partialorder %v6348_v4, 8.507059e+37 }
 0xd5c   :  { %v12862_v16 = vpop.eup %9203  ;;  %v6351_v22 = vor.u32 1.1754944e-38, %v6350_v56  ;;  %v5733_v21 = vrot.slane %v5721_v32, 4  ;;  %v6347_v48 = vsel %vm12868_vm4, %v12778_v42, %v6343_v11  ;;  %v5798_v3 = vperm.slane %v5790_v28, %v9731_v38 }
 0xd5d   :  { %v5762_v45 = vsel %vm623_vm13, %v5761_v63, %v5744_v43  ;;  %v5815_v39 = vrot.slane %v5810_v6, 4  ;;  %v6430_v60 = vmul.f32 %v12862_v16, %v12826_v51  ;;  %v5746_v58 = vsel %vm623_vm13, %v5745_v57, %v5726_v40 }
 0xd5e   :  { %v5831_v2 = vpack.c.bf16 %v5762_v45, %v5762_v45  ;;  %v5787_v34 = vrot.slane %v5775_v59, 4  ;;  %v5799_v17 = vrot.slane %v5786_v15, 4  ;;  %v6387_v53 = vmul.f32 %v12828_v36, %v6386_v26 }
 0xd5f   :  { %v5816_v42 = vsel %vm623_vm13, %v5815_v39, %v5798_v3  ;;  %v6393_v55 = vand.u32 2147483647, %v12798_v10  ;;  %v5734_v41 = vsel %vm623_vm13, %v5733_v21, %v12821_v52  ;;  %v6352_v1 = vsel %vm12872_vm5, %v6351_v22, %v6347_v48 }
 0xd60   :  { %v5832_v13 = vpack.c.bf16 %v5816_v42, %v5816_v42  ;;  %v6650_v30 = vunpack.c.l.b16 %v5831_v2  ;;  %v6395_v40 = vand.u32 2147483648, %v12798_v10  ;;  %v5740_v50 = vperm.slane %v5734_v41, %v9731_v38 }
 0xd61   :  { %v12881_v37 = vpop.xlane.xlu0 %6208  ;;  %v5752_v62 = vperm.slane %v5746_v58, %v9731_v38  ;;  %vm6390_vm7 = vweird.f32 %v12828_v36  ;;  %v6431_v0 = vsub.f32 1.0, %v6430_v60  ;;  %v5788_v15 = vsel %vm623_vm13, %v5787_v34, %v5769_v19 }
 0xd62   :  { %9205 = vrcp.f32 %v12881_v37  ;;  %v6651_v27 = vunpack.c.l.b16 %v5832_v13  ;;  %v6388_v49 = vadd.f32 %v12828_v36, %v6387_v53  ;;  %v5800_v52 = vsel %vm623_vm13, %v5799_v17, %v12833_v61  ;;  %vm12926_vm9 = vmor %vm6389_vm6, %vm6390_vm7 }
 0xd63   :  { %v5757_v4 = vrot.slane %v5752_v62, 4  ;;  %v5763_v44 = vrot.slane %v5744_v43, 4  ;;  %vm12905_vm8 = vcmp.eq.f32.partialorder %v6393_v55, 8.507059e+37  ;;  %v5794_v24 = vperm.slane %v5788_v15, %v9731_v38 }
 0xd64   :  { %v6652_v35 = vpack.c.b16 %v6651_v27, %v6650_v30  ;;  %v5806_v11 = vperm.slane %v5800_v52, %v9731_v38  ;;  %v5817_v56 = vrot.slane %v5798_v3, 4  ;;  %v12912_v19 = vmul.f32 %v12628_v25, %v6352_v1 }
 0xd65   :  { %v6396_v29 = vor.u32 1.1754944e-38, %v6395_v40  ;;  %v5758_v59 = vsel %vm623_vm13, %v5757_v4, %v5740_v50  ;;  %v6432_v14 = vmul.f32 %v12862_v16, %v6431_v0  ;;  %v5764_v63 = vsel %vm623_vm13, %v12854_v47, %v5763_v44 }
 0xd66   :  { %6664 = vmatpush.bf16.msra.mxu0 %v6652_v35  ;;  %v5811_v57 = vrot.slane %v5806_v11, 4  ;;  %v5827_v43 = vpack.c.bf16 %v5758_v59, %v5758_v59  ;;  %v5818_v28 = vsel %vm623_vm13, %v5810_v6, %v5817_v56  ;;  %v5833_v5 = vpack.c.bf16 %v5764_v63, %v5764_v63 }
 0xd67   :  { %v5759_v33 = vrot.slane %v5740_v50, 4  ;;  %v6392_v22 = vsel %vm12926_vm9, %v12828_v36, %v6388_v49  ;;  %vm6434_vm10 = vweird.f32 %v12826_v51  ;;  %v5834_v45 = vpack.c.bf16 %v5818_v28, %v5818_v28 }
 0xd68   :  { %v12903_v18 = vpop.eup %9205  ;;  %v5812_v47 = vsel %vm623_vm13, %v5811_v57, %v5794_v24  ;;  %v6594_v10 = vunpack.c.l.b16 %v5827_v43  ;;  %v6678_v48 = vunpack.c.l.b16 %v5833_v5  ;;  %vm6435_vm11 = vweird.f32 %v12862_v16 }
 0xd69   :  { %v6400_v61 = vmul.f32 %v12903_v18, %v12881_v37  ;;  %v12917_v8 = vpop.xlane.xlu0 %6199  ;;  %v5828_v21 = vpack.c.bf16 %v5812_v47, %v5812_v47  ;;  %v5760_v3 = vsel %vm623_vm13, %v5752_v62, %v5759_v33  ;;  %v6679_v6 = vunpack.c.l.b16 %v5834_v45  ;;  %vm12956_vm1 = vmor %vm6434_vm10, %vm6435_vm11 }
 0xd6a   :  { %v5813_v2 = vrot.slane %v5794_v24, 4  ;;  %v5829_v60 = vpack.c.bf16 %v5760_v3, %v5760_v3  ;;  %v6433_v58 = vadd.f32 %v12862_v16, %v6432_v14  ;;  %9207 = vrcp.f32 %v12917_v8 }
 0xd6b   :  { %v6401_v26 = vsub.f32 1.0, %v6400_v61  ;;  %v6595_v34 = vunpack.c.l.b16 %v5828_v21  ;;  %v6438_v17 = vand.u32 2147483647, %v12826_v51  ;;  %v6440_v53 = vand.u32 2147483648, %v12826_v51 }
 0xd6c   :  { %v6680_v42 = vpack.c.b16 %v6679_v6, %v6678_v48  ;;  %v5814_v55 = vsel %vm623_vm13, %v5806_v11, %v5813_v2  ;;  %v6397_v13 = vsel %vm12905_vm8, %v6396_v29, %v6392_v22  ;;  %v6622_v1 = vunpack.c.l.b16 %v5829_v60 }
 0xd6d   :  { %v12937_v39 = vpop.xlane.xlu1 %6202  ;;  %v6402_v36 = vmul.f32 %v12903_v18, %v6401_v26  ;;  %v6596_v30 = vpack.c.b16 %v6595_v34, %v6594_v10  ;;  %v5830_v41 = vpack.c.bf16 %v5814_v55, %v5814_v55  ;;  %v6467_v50 = vpack.c.bf16 %v12912_v19, %v12912_v19 }
 0xd6e   :  { %6692 = vmatpush.bf16.msrb.mxu1 %v6680_v42  ;;  %9209 = vrcp.f32 %v12937_v39  ;;  %v6437_v0 = vsel %vm12956_vm1, %v12862_v16, %v6433_v58  ;;  %vm6405_vm2 = vweird.f32 %v12903_v18  ;;  %v12967_v49 = vmul.f32 %v12633_v31, %v6397_v13 }
 0xd6f   :  { %v6403_v27 = vadd.f32 %v12903_v18, %v6402_v36  ;;  %6608 = vmatpush.bf16.msrb.mxu2 %v6596_v30  ;;  %v6623_v15 = vunpack.c.l.b16 %v5830_v41  ;;  %v6441_v51 = vor.u32 1.1754944e-38, %v6440_v53  ;;  %v6410_v4 = vand.u32 2147483648, %v12881_v37 }
 0xd70   :  { %v9208_v52 = vpop.eup %9207  ;;  %vm6439_vm3 = vcmp.eq.f32.partialorder %v6438_v17, 8.507059e+37  ;;  %vm6404_vm4 = vweird.f32 %v12881_v37  ;;  %v6408_v16 = vand.u32 2147483647, %v12881_v37  ;;  %v12980_v11 = vunpack.c.l.b16 %v6467_v50 }
 0xd71   :  { %v12948_v40 = vpop.xlane.xlu0 %6217  ;;  %v6624_v44 = vpack.c.b16 %v6623_v15, %v6622_v1  ;;  %v6442_v35 = vsel %vm6439_vm3, %v6441_v51, %v6437_v0  ;;  %vm12975_vm5 = vmor %vm6404_vm4, %vm6405_vm2  ;;  %v6355_v31 = vmul.f32 %v9208_v52, %v12917_v8  ;;  %v6363_v19 = vand.u32 2147483647, %v12917_v8 }
 0xd72   :  { %9211 = vrcp.f32 %v12948_v40  ;;  %v6407_v56 = vsel %vm12975_vm5, %v12903_v18, %v6403_v27  ;;  %v6470_v29 = vpack.c.bf16 %v12967_v49, %v12967_v49  ;;  %v6411_v61 = vor.u32 1.1754944e-38, %v6410_v4 }
 0xd73   :  { %6636 = vmatpush.bf16.msrb.mxu3 %v6624_v44  ;;  %v6356_v59 = vsub.f32 1.0, %v6355_v31  ;;  %v6365_v14 = vand.u32 2147483648, %v12917_v8  ;;  %v12991_v57 = vmul.f32 %v12639_v9, %v6442_v35  ;;  %vm6409_vm6 = vcmp.eq.f32.partialorder %v6408_v16, 8.507059e+37 }
 0xd74   :  { %v9210_v37 = vpop.eup %9209  ;;  %vm6359_vm7 = vweird.f32 %v12917_v8  ;;  %v6412_v63 = vsel %vm6409_vm6, %v6411_v61, %v6407_v56  ;;  %vm6360_vm8 = vweird.f32 %v9208_v52  ;;  %v6378_v26 = vand.u32 2147483647, %v12937_v39 }
 0xd75   :  { %v12973_v32 = vpop.xlane.xlu1 %6211  ;;  %v6370_v18 = vmul.f32 %v9210_v37, %v12937_v39  ;;  %v6357_v25 = vmul.f32 %v9208_v52, %v6356_v59  ;;  %vm12996_vm9 = vcmp.eq.f32.partialorder %v6363_v19, 8.507059e+37  ;;  %vm6374_vm10 = vweird.f32 %v12937_v39  ;;  %vm6361_vm11 = vmor %vm6359_vm7, %vm6360_vm8 }
 0xd76   :  { %9213 = vrcp.f32 %v12973_v32  ;;  %v6366_v22 = vor.u32 1.1754944e-38, %v6365_v14  ;;  %v6380_v47 = vand.u32 2147483648, %v12937_v39  ;;  %v6455_v45 = vand.u32 2147483648, %v12948_v40 }
 0xd77   :  { %v6371_v5 = vsub.f32 1.0, %v6370_v18  ;;  %v6358_v33 = vadd.f32 %v9208_v52, %v6357_v25  ;;  %vm6375_vm1 = vweird.f32 %v9210_v37  ;;  %vm6449_vm2 = vweird.f32 %v12948_v40 }
 0xd78   :  { %v9212_v43 = vpop.eup %9211  ;;  %vm13007_vm3 = vcmp.eq.f32.partialorder %v6378_v26, 8.507059e+37  ;;  %v6453_v2 = vand.u32 2147483647, %v12948_v40  ;;  %vm6376_vm5 = vmor %vm6374_vm10, %vm6375_vm1  ;;  %v6381_v17 = vor.u32 1.1754944e-38, %v6380_v47  ;;  %v6456_v53 = vor.u32 1.1754944e-38, %v6455_v45 }
 0xd79   :  { %v6445_v9 = vmul.f32 %v9212_v43, %v12948_v40  ;;  %v6372_v10 = vmul.f32 %v9210_v37, %v6371_v5  ;;  %v6362_v3 = vsel %vm6361_vm11, %v9208_v52, %v6358_v33  ;;  %vm6450_vm4 = vweird.f32 %v9212_v43 }
 0xd7a   :  { %v6367_v58 = vsel %vm12996_vm9, %v6366_v22, %v6362_v3  ;;  %v6423_v30 = vand.u32 2147483647, %v12973_v32  ;;  %v6425_v41 = vand.u32 2147483648, %v12973_v32  ;;  %vm6451_vm6 = vmor %vm6449_vm2, %vm6450_vm4  ;;  %v6413_v39 = vmul.f32 %v12646_v23, %v6412_v63 }
 0xd7b   :  { %v6446_v48 = vsub.f32 1.0, %v6445_v9  ;;  %v6373_v36 = vadd.f32 %v9210_v37, %v6372_v10  ;;  %v6368_v34 = vmul.f32 %v12652_v54, %v6367_v58  ;;  %vm6454_vm8 = vcmp.eq.f32.partialorder %v6453_v2, 8.507059e+37 }
 0xd7c   :  { %v9214_v21 = vpop.eup %9213  ;;  %vm6419_vm9 = vweird.f32 %v12973_v32  ;;  %v6473_v4 = vpack.c.bf16 %v12991_v57, %v12991_v57  ;;  %v6426_v16 = vor.u32 1.1754944e-38, %v6425_v41  ;;  %vm6424_vm11 = vcmp.eq.f32.partialorder %v6423_v30, 8.507059e+37 }
 0xd7d   :  { %v6415_v60 = vmul.f32 %v9214_v21, %v12973_v32  ;;  %v6447_v8 = vmul.f32 %v9212_v43, %v6446_v48  ;;  %v6377_v55 = vsel %vm6376_vm5, %v9210_v37, %v6373_v36  ;;  %v6468_v1 = vpack.c.bf16 %v6368_v34, %v6368_v34 }
 0xd7e   :  { %v6382_v50 = vsel %vm13007_vm3, %v6381_v17, %v6377_v55  ;;  %vm6420_vm7 = vweird.f32 %v9214_v21  ;;  %v6471_v32 = vpack.c.bf16 %v6413_v39, %v6413_v39  ;;  %v6673_v19 = vunpack.c.l.b16 %v6473_v4 }
 0xd7f   :  { %v6416_v42 = vsub.f32 1.0, %v6415_v60  ;;  %v6448_v13 = vadd.f32 %v9212_v43, %v6447_v8  ;;  %v6383_v62 = vmul.f32 %v12656_v12, %v6382_v50  ;;  %v6590_v27 = vunpack.c.l.b16 %v6468_v1  ;;  %vm6421_vm10 = vmor %vm6419_vm9, %vm6420_vm7 }
 0xd80   :  { %v6618_v12 = vunpack.c.l.b16 %v6470_v29 }
 0xd81   :  { %v6417_v54 = vmul.f32 %v9214_v21, %v6416_v42  ;;  %v6452_v0 = vsel %vm6451_vm6, %v9212_v43, %v6448_v13  ;;  %v6469_v52 = vpack.c.bf16 %v6383_v62, %v6383_v62  ;;  %v6591_v44 = vpack.c.b16 %v6590_v27, %v12980_v11 }
 0xd82   :  { %v6457_v15 = vsel %vm6454_vm8, %v6456_v53, %v6452_v0  ;;  %v6645_v11 = vunpack.c.l.b16 %v6471_v32 }
 0xd83   :  { %v6418_v51 = vadd.f32 %v9214_v21, %v6417_v54  ;;  %v6458_v40 = vmul.f32 %v12660_v46, %v6457_v15  ;;  %v6617_v35 = vunpack.c.l.b16 %v6469_v52  ;;  %8401 = vmatmul.msk.bf16.vlgmr.msrb.gmra.mxu2 %vm2312_vm15, %v6591_v44 }
 0xd85   :  { %v6422_v23 = vsel %vm6421_vm10, %v9214_v21, %v6418_v51  ;;  %v6474_v24 = vpack.c.bf16 %v6458_v40, %v6458_v40  ;;  %v6619_v46 = vpack.c.b16 %v6618_v12, %v6617_v35 }
 0xd86   :  { %v6427_v31 = vsel %vm6424_vm11, %v6426_v16, %v6422_v23 }
 0xd87   :  { %v6428_v56 = vmul.f32 %v12664_v20, %v6427_v31  ;;  %v6674_v37 = vunpack.c.l.b16 %v6474_v24  ;;  %8402 = vmatmul.msk.bf16.vlgmr.msrb.gmra.mxu3 %vm2312_vm15, %v6619_v46 }
 0xd89   :  { %v6472_v61 = vpack.c.bf16 %v6428_v56, %v6428_v56  ;;  %v6675_v59 = vpack.c.b16 %v6674_v37, %v6673_v19 }
 0xd8b   :  { %v6646_v14 = vunpack.c.l.b16 %v6472_v61  ;;  %8404 = vmatmul.msk.bf16.vlgmr.msrb.gmra.mxu1 %vm2312_vm15, %v6675_v59 }
 0xd8d   :  { %v6647_v49 = vpack.c.b16 %v6646_v14, %v6645_v11 }
 0xd8f   :  { %8403 = vmatmul.msk.bf16.vlgmr.msra.gmra.mxu0 %vm2312_vm15, %v6647_v49 }
 0xdb2   :  { %v6582_v57 = vpop.f32.mrf.mxu1 }
 0xdb3   :  { %v6711_v26 = vrot.slane %v6582_v57, 4 }
 0xdb9   :  { %v6554_v29 = vpop.f32.mrf.mxu0 }
 0xdba   :  { %v6699_v18 = vrot.slane %v6554_v29, 4  ;;  %v6584_v36 = vpop.f32.mrf.mxu1 }
 0xdbb   :  { %v6767_v54 = vrot.slane %v6584_v36, 4 }
 0xdc1   :  { %v6498_v20 = vpop.f32.mrf.mxu2  ;;  %v6556_v9 = vpop.f32.mrf.mxu0 }
 0xdc2   :  { %v6700_v43 = vsel %vm623_vm13, %v6699_v18, %v6498_v20  ;;  %v6701_v63 = vrot.slane %v6498_v20, 4  ;;  %v6755_v10 = vrot.slane %v6556_v9, 4 }
 0xdc3   :  { %v6706_v25 = vperm.slane %v6700_v43, %v9699_v7 }
 0xdc4   :  { %v6702_v28 = vsel %vm623_vm13, %v6554_v29, %v6701_v63 }
 0xdc5   :  { %v6710_v5 = vperm.slane %v6702_v28, %v9699_v7  ;;  %v6725_v45 = vrot.slane %v6706_v25, 4 }
 0xdc7   :  { %v6737_v3 = vrot.slane %v6710_v5, 4 }
 0xdc8   :  { %v6526_v33 = vpop.f32.mrf.mxu3 }
 0xdc9   :  { %v6712_v22 = vsel %vm623_vm13, %v6711_v26, %v6526_v33  ;;  %v6713_v47 = vrot.slane %v6526_v33, 4  ;;  %v6500_v58 = vpop.f32.mrf.mxu2 }
 0xdca   :  { %v6718_v21 = vperm.slane %v6712_v22, %v9699_v7  ;;  %v6756_v34 = vsel %vm623_vm13, %v6755_v10, %v6500_v58  ;;  %v6757_v17 = vrot.slane %v6500_v58, 4 }
 0xdcb   :  { %v6714_v48 = vsel %vm623_vm13, %v6582_v57, %v6713_v47  ;;  %v6762_v13 = vperm.slane %v6756_v34, %v9699_v7 }
 0xdcc   :  { %v6722_v6 = vperm.slane %v6714_v48, %v9699_v7  ;;  %v6723_v2 = vrot.slane %v6718_v21, 4  ;;  %v6726_v60 = vsel %vm623_vm13, %v6718_v21, %v6725_v45  ;;  %v6758_v50 = vsel %vm623_vm13, %v6556_v9, %v6757_v17 }
 0xdcd   :  { %v6734_v8 = vperm.slane %v6726_v60, %v9731_v38  ;;  %v6766_v62 = vperm.slane %v6758_v50, %v9699_v7  ;;  %v6781_v16 = vrot.slane %v6762_v13, 4 }
 0xdce   :  { %v6724_v53 = vsel %vm623_vm13, %v6723_v2, %v6706_v25  ;;  %v6735_v42 = vrot.slane %v6722_v6, 4  ;;  %v6738_v55 = vsel %vm623_vm13, %v6722_v6, %v6737_v3 }
 0xdcf   :  { %v6730_v30 = vperm.slane %v6724_v53, %v9731_v38  ;;  %v6746_v41 = vperm.slane %v6738_v55, %v9731_v38  ;;  %v6749_v1 = vrot.slane %v6734_v8, 4  ;;  %v6793_v37 = vrot.slane %v6766_v62, 4 }
 0xdd0   :  { %v6736_v39 = vsel %vm623_vm13, %v6735_v42, %v6710_v5  ;;  %v6528_v0 = vpop.f32.mrf.mxu3 }
 0xdd1   :  { %v6742_v27 = vperm.slane %v6736_v39, %v9731_v38  ;;  %v6747_v15 = vrot.slane %v6730_v30, 4  ;;  %v6750_v51 = vsel %vm623_vm13, 0.0, %v6749_v1  ;;  %v6753_v4 = vrot.slane %v6746_v41, 4 }
 0xdd2   :  { %v6923_v52 = vsel %vm623_vm13, %v6749_v1, %v6730_v30  ;;  %v6928_v40 = vrot.slane %v6750_v51, 4  ;;  %v6768_v44 = vsel %vm623_vm13, %v6767_v54, %v6528_v0  ;;  %v6769_v19 = vrot.slane %v6528_v0, 4 }
 0xdd3   :  { %v6748_v23 = vsel %vm623_vm13, 0.0, %v6747_v15  ;;  %v6751_v12 = vrot.slane %v6742_v27, 4  ;;  %v6754_v35 = vsel %vm623_vm13, 0.0, %v6753_v4  ;;  %v6927_v24 = vperm.slane %v6923_v52, %v9699_v7 }
 0xdd4   :  { %v6929_v31 = vsel %vm623_vm13, %v6928_v40, %v6748_v23  ;;  %v6934_v32 = vsel %vm623_vm13, %v6753_v4, %v6742_v27  ;;  %v6939_v56 = vrot.slane %v6754_v35, 4  ;;  %v6774_v61 = vperm.slane %v6768_v44, %v9699_v7 }
 0xdd5   :  { %v6933_v46 = vperm.slane %v6929_v31, %v9699_v7  ;;  %v6752_v59 = vsel %vm623_vm13, 0.0, %v6751_v12  ;;  %v6947_v11 = vrot.slane %v6927_v24, 4  ;;  %v6770_v14 = vsel %vm623_vm13, %v6584_v36, %v6769_v19 }
 0xdd6   :  { %v6938_v49 = vperm.slane %v6934_v32, %v9699_v7  ;;  %v6940_v29 = vsel %vm623_vm13, %v6939_v56, %v6752_v59  ;;  %v6778_v57 = vperm.slane %v6770_v14, %v9699_v7  ;;  %v6779_v18 = vrot.slane %v6774_v61, 4 }
 0xdd7   :  { %v6782_v20 = vsel %vm623_vm13, %v6774_v61, %v6781_v16  ;;  %v6944_v43 = vperm.slane %v6940_v29, %v9699_v7  ;;  %v6945_v9 = vrot.slane %v6933_v46, 4  ;;  %v6948_v45 = vsel %vm623_vm13, %v6933_v46, %v6947_v11 }
 0xdd8   :  { %v6790_v63 = vperm.slane %v6782_v20, %v9731_v38  ;;  %v6959_v25 = vrot.slane %v6938_v49, 4  ;;  %v6780_v26 = vsel %vm623_vm13, %v6779_v18, %v6762_v13  ;;  %v6791_v28 = vrot.slane %v6778_v57, 4 }
 0xdd9   :  { %v6794_v5 = vsel %vm623_vm13, %v6778_v57, %v6793_v37  ;;  %v6786_v33 = vperm.slane %v6780_v26, %v9731_v38  ;;  %v6956_v36 = vperm.slane %v6948_v45, %v9731_v38  ;;  %v6946_v8 = vsel %vm623_vm13, %v6945_v9, %v6927_v24 }
 0xdda   :  { %v6802_v22 = vperm.slane %v6794_v5, %v9731_v38  ;;  %v6805_v47 = vrot.slane %v6790_v63, 4  ;;  %v6792_v21 = vsel %vm623_vm13, %v6791_v28, %v6766_v62  ;;  %v6960_v10 = vsel %vm623_vm13, %v6944_v43, %v6959_v25 }
 0xddb   :  { %v6798_v48 = vperm.slane %v6792_v21, %v9731_v38  ;;  %v6803_v3 = vrot.slane %v6786_v33, 4  ;;  %v6968_v41 = vperm.slane %v6960_v10, %v9731_v38  ;;  %v6975_v62 = vrot.slane %v6956_v36, 4 }
 0xddc   :  { %v6806_v6 = vsel %vm623_vm13, 0.0, %v6805_v47  ;;  %v6809_v2 = vrot.slane %v6802_v22, 4  ;;  %v6977_v60 = vsel %vm623_vm13, %v6805_v47, %v6786_v33  ;;  %v6952_v27 = vperm.slane %v6946_v8, %v9731_v38 }
 0xddd   :  { %v6982_v58 = vrot.slane %v6806_v6, 4  ;;  %v6804_v34 = vsel %vm623_vm13, 0.0, %v6803_v3  ;;  %v6807_v17 = vrot.slane %v6798_v48, 4  ;;  %v6981_v42 = vperm.slane %v6977_v60, %v9699_v7 }
 0xdde   :  { %v6810_v53 = vsel %vm623_vm13, 0.0, %v6809_v2  ;;  %v6988_v13 = vsel %vm623_vm13, %v6809_v2, %v6798_v48  ;;  %v6957_v15 = vrot.slane %v6944_v43, 4  ;;  %v6973_v44 = vrot.slane %v6968_v41, 4 }
 0xddf   :  { %v6983_v55 = vsel %vm623_vm13, %v6982_v58, %v6804_v34  ;;  %v6993_v30 = vrot.slane %v6810_v53, 4  ;;  %v7001_v50 = vrot.slane %v6981_v42, 4  ;;  %v6808_v54 = vsel %vm623_vm13, 0.0, %v6807_v17 }
 0xde0   :  { %v6987_v1 = vperm.slane %v6983_v55, %v9699_v7  ;;  %v6992_v39 = vperm.slane %v6988_v13, %v9699_v7  ;;  %v6958_v23 = vsel %vm623_vm13, %v6957_v15, %v6938_v49  ;;  %v6971_v19 = vrot.slane %v6952_v27, 4 }
 0xde1   :  { %v6994_v0 = vsel %vm623_vm13, %v6993_v30, %v6808_v54  ;;  %v6964_v35 = vperm.slane %v6958_v23, %v9731_v38  ;;  %v6976_v37 = vsel %vm623_vm13, %v6968_v41, %v6975_v62  ;;  %v6974_v18 = vsel %vm623_vm13, %v6973_v44, %v6956_v36 }
 0xde2   :  { %v6998_v51 = vperm.slane %v6994_v0, %v9699_v7  ;;  %v7002_v4 = vsel %vm623_vm13, %v6987_v1, %v7001_v50  ;;  %v7013_v52 = vrot.slane %v6992_v39, 4  ;;  %v6999_v40 = vrot.slane %v6987_v1, 4 }
 0xde3   :  { %v7010_v16 = vperm.slane %v7002_v4, %v9731_v38  ;;  %v6969_v61 = vrot.slane %v6964_v35, 4  ;;  %v6972_v63 = vsel %vm623_vm13, %v6964_v35, %v6971_v19 }
 0xde4   :  { %v7014_v12 = vsel %vm623_vm13, %v6998_v51, %v7013_v52  ;;  %v7000_v24 = vsel %vm623_vm13, %v6999_v40, %v6981_v42  ;;  %v7011_v31 = vrot.slane %v6998_v51, 4 }
 0xde5   :  { %v7022_v32 = vperm.slane %v7014_v12, %v9731_v38  ;;  %v7029_v56 = vrot.slane %v7010_v16, 4  ;;  %v7006_v46 = vperm.slane %v7000_v24, %v9731_v38  ;;  %v13115_v20 = vsel %vm623_vm13, %v6969_v61, %v6952_v27 }
 0xde6   :  { %v7012_v59 = vsel %vm623_vm13, %v7011_v31, %v6992_v39 }
 0xde7   :  { %v7030_v11 = vsel %vm623_vm13, %v7022_v32, %v7029_v56  ;;  %v7027_v14 = vrot.slane %v7022_v32, 4  ;;  %v7018_v49 = vperm.slane %v7012_v59, %v9731_v38  ;;  %v7025_v29 = vrot.slane %v7006_v46, 4 }
 0xde8   :  { %v9011_v57 = vpack.i.bf16 %v7030_v11, %v6976_v37 }
 0xde9   :  { %v7028_v43 = vsel %vm623_vm13, %v7027_v14, %v7010_v16  ;;  %v7023_v25 = vrot.slane %v7018_v49, 4  ;;  %v7026_v26 = vsel %vm623_vm13, %v7018_v49, %v7025_v29 }
 0xdea   :  { %9012 = vrot.lane.b32.xlu0 %v9011_v57, %s9274_s29  ;;  %v9006_v28 = vpack.i.bf16 %v7028_v43, %v6974_v18  ;;  %v9001_v5 = vpack.i.bf16 %v7026_v26, %v6972_v63 }
 0xdeb   :  { %v13122_v9 = vsel %vm623_vm13, %v7023_v25, %v7006_v46 }
 0xdec   :  { %9007 = vrot.lane.b32.xlu2 %v9006_v28, %s9276_s18  ;;  %9002 = vrot.lane.b32.xlu1 %v9001_v5, %s9275_s0 }
 0xe06   :  { %v6610_v22 = vpop.f32.mrf.mxu2 }
 0xe07   :  { %v6813_v45 = vrot.slane %v6610_v22, 4 }
 0xe08   :  { %v6694_v33 = vpop.f32.mrf.mxu1 }
 0xe09   :  { %v6823_v47 = vrot.slane %v6694_v33, 4 }
 0xe0a   :  { %v6638_v10 = vpop.f32.mrf.mxu3 }
 0xe0b   :  { %v6824_v6 = vsel %vm623_vm13, %v6823_v47, %v6638_v10  ;;  %v6825_v2 = vrot.slane %v6638_v10, 4 }
 0xe0c   :  { %v6666_v21 = vpop.f32.mrf.mxu0  ;;  %v6830_v58 = vperm.slane %v6824_v6, %v9699_v7 }
 0xe0d   :  { %v6811_v48 = vrot.slane %v6666_v21, 4  ;;  %v6814_v3 = vsel %vm623_vm13, %v6666_v21, %v6813_v45  ;;  %v6826_v8 = vsel %vm623_vm13, %v6694_v33, %v6825_v2 }
 0xe0e   :  { %v6822_v60 = vperm.slane %v6814_v3, %v9699_v7  ;;  %v6834_v53 = vperm.slane %v6826_v8, %v9699_v7  ;;  %v6835_v42 = vrot.slane %v6830_v58, 4  ;;  %v6612_v30 = vpop.f32.mrf.mxu2 }
 0xe0f   :  { %v6812_v36 = vsel %vm623_vm13, %v6811_v48, %v6610_v22  ;;  %v6869_v27 = vrot.slane %v6612_v30, 4 }
 0xe10   :  { %v6818_v34 = vperm.slane %v6812_v36, %v9699_v7  ;;  %v6849_v17 = vrot.slane %v6822_v60, 4  ;;  %v6696_v55 = vpop.f32.mrf.mxu1  ;;  %v6847_v1 = vrot.slane %v6834_v53, 4 }
 0xe11   :  { %v6879_v41 = vrot.slane %v6696_v55, 4 }
 0xe12   :  { %v6837_v13 = vrot.slane %v6818_v34, 4  ;;  %v6836_v50 = vsel %vm623_vm13, %v6835_v42, %v6818_v34  ;;  %v6850_v54 = vsel %vm623_vm13, %v6834_v53, %v6849_v17  ;;  %v6848_v4 = vsel %vm623_vm13, %v6847_v1, %v6822_v60  ;;  %v6640_v52 = vpop.f32.mrf.mxu3 }
 0xe13   :  { %v6842_v62 = vperm.slane %v6836_v50, %v9731_v38  ;;  %v6858_v0 = vperm.slane %v6850_v54, %v9731_v38  ;;  %v6854_v16 = vperm.slane %v6848_v4, %v9731_v38  ;;  %v6880_v23 = vsel %vm623_vm13, %v6879_v41, %v6640_v52 }
 0xe14   :  { %v6838_v39 = vsel %vm623_vm13, %v6830_v58, %v6837_v13  ;;  %v6668_v15 = vpop.f32.mrf.mxu0  ;;  %v6881_v31 = vrot.slane %v6640_v52, 4  ;;  %v6886_v32 = vperm.slane %v6880_v23, %v9699_v7 }
 0xe15   :  { %v6846_v51 = vperm.slane %v6838_v39, %v9731_v38  ;;  %v6867_v40 = vrot.slane %v6668_v15, 4  ;;  %v6865_v44 = vrot.slane %v6858_v0, 4  ;;  %v6870_v12 = vsel %vm623_vm13, %v6668_v15, %v6869_v27 }
 0xe16   :  { %v6859_v35 = vrot.slane %v6842_v62, 4  ;;  %v6863_v56 = vrot.slane %v6854_v16, 4  ;;  %v6882_v57 = vsel %vm623_vm13, %v6696_v55, %v6881_v31  ;;  %v6891_v18 = vrot.slane %v6886_v32, 4 }
 0xe17   :  { %v6861_v24 = vrot.slane %v6846_v51, 4  ;;  %v6866_v19 = vsel %vm623_vm13, 0.0, %v6865_v44  ;;  %v7042_v46 = vsel %vm623_vm13, %v6865_v44, %v6854_v16  ;;  %v6868_v37 = vsel %vm623_vm13, %v6867_v40, %v6612_v30 }
 0xe18   :  { %v7046_v11 = vperm.slane %v7042_v46, %v9699_v7  ;;  %v7047_v14 = vrot.slane %v6866_v19, 4  ;;  %v6864_v49 = vsel %vm623_vm13, 0.0, %v6863_v56  ;;  %v6860_v43 = vsel %vm623_vm13, 0.0, %v6859_v35 }
 0xe19   :  { %v6862_v61 = vsel %vm623_vm13, 0.0, %v6861_v24  ;;  %v7031_v59 = vsel %vm623_vm13, %v6861_v24, %v6842_v62  ;;  %v6890_v25 = vperm.slane %v6882_v57, %v9699_v7  ;;  %v6874_v26 = vperm.slane %v6868_v37, %v9699_v7  ;;  %v8749_v37 = vld [vmem:[%s13507_s7 + $0x78] sm:$0xff] }
 0xe1a   :  { %v7036_v29 = vrot.slane %v6862_v61, 4  ;;  %v7048_v63 = vsel %vm623_vm13, %v7047_v14, %v6864_v49  ;;  %v7067_v28 = vrot.slane %v7046_v11, 4  ;;  %v6878_v5 = vperm.slane %v6870_v12, %v9699_v7  ;;  %7271 = vmatpush.bf16.msra.mxu2 %v8749_v37 }
 0xe1b   :  { %v7035_v33 = vperm.slane %v7031_v59, %v9699_v7  ;;  %v6903_v47 = vrot.slane %v6890_v25, 4  ;;  %v6892_v45 = vsel %vm623_vm13, %v6891_v18, %v6874_v26  ;;  %v6893_v21 = vrot.slane %v6874_v26, 4 }
 0xe1c   :  { %v7037_v22 = vsel %vm623_vm13, %v7036_v29, %v6860_v43  ;;  %v7052_v48 = vperm.slane %v7048_v63, %v9699_v7  ;;  %v6898_v3 = vperm.slane %v6892_v45, %v9731_v38  ;;  %v6905_v6 = vrot.slane %v6878_v5, 4  ;;  %v8748_v29 = vld [vmem:[%s13507_s7 + $0x70] sm:$0xff] }
 0xe1d   :  { %v7041_v10 = vperm.slane %v7037_v22, %v9699_v7  ;;  %v7055_v2 = vrot.slane %v7035_v33, 4  ;;  %v6894_v60 = vsel %vm623_vm13, %v6886_v32, %v6893_v21  ;;  %v6904_v58 = vsel %vm623_vm13, %v6903_v47, %v6878_v5  ;;  %v8747_v21 = vld [vmem:[%s13507_s7 + $0x68] sm:$0xff] }
 0xe1e   :  { %v6902_v8 = vperm.slane %v6894_v60, %v9731_v38  ;;  %v6906_v34 = vsel %vm623_vm13, %v6890_v25, %v6905_v6  ;;  %v6910_v17 = vperm.slane %v6904_v58, %v9731_v38  ;;  %v6915_v53 = vrot.slane %v6898_v3, 4  ;;  %7272 = vmatpush.bf16.msra.mxu2 %v8748_v29  ;;  %v9039_v29 = vld [vmem:[%s13508_s8 + $0x1] ss:$0 sm:$0xff] }
 0xe1f   :  { %v7053_v36 = vrot.slane %v7041_v10, 4  ;;  %v6914_v42 = vperm.slane %v6906_v34, %v9731_v38  ;;  %v7056_v55 = vsel %vm623_vm13, %v7041_v10, %v7055_v2  ;;  %v7068_v30 = vsel %vm623_vm13, %v7052_v48, %v7067_v28 }
 0xe20   :  { %v6917_v13 = vrot.slane %v6902_v8, 4  ;;  %v6919_v41 = vrot.slane %v6910_v17, 4  ;;  %v7065_v54 = vrot.slane %v7052_v48, 4  ;;  %v6916_v39 = vsel %vm623_vm13, 0.0, %v6915_v53 }
 0xe21   :  { %v6921_v1 = vrot.slane %v6914_v42, 4  ;;  %v7054_v50 = vsel %vm623_vm13, %v7053_v36, %v7035_v33  ;;  %v7064_v27 = vperm.slane %v7056_v55, %v9731_v38  ;;  %v7076_v19 = vperm.slane %v7068_v30, %v9731_v38  ;;  %v8745_v42 = vld [vmem:[%s13507_s7 + $0x58] sm:$0xff]  ;;  %v8744_v55 = vld [vmem:[%s13507_s7 + $0x50] sm:$0xff]  ;;  %v8742_v30 = vld [vmem:[%s13507_s7 + $0x40] sm:$0xff] }
 0xe22   :  { %v6918_v62 = vsel %vm623_vm13, 0.0, %v6917_v13  ;;  %v7085_v0 = vsel %vm623_vm13, %v6917_v13, %v6898_v3  ;;  %v7060_v44 = vperm.slane %v7054_v50, %v9731_v38  ;;  %v7066_v23 = vsel %vm623_vm13, %v7065_v54, %v7046_v11  ;;  %7273 = vmatpush.bf16.msra.mxu2 %v8747_v21  ;;  %v8743_v13 = vld [vmem:[%s13507_s7 + $0x48] sm:$0xff] }
 0xe23   :  { %v6922_v15 = vsel %vm623_vm13, 0.0, %v6921_v1  ;;  %v7090_v51 = vrot.slane %v6918_v62, 4  ;;  %v7096_v4 = vsel %vm623_vm13, %v6921_v1, %v6910_v17  ;;  %v7089_v52 = vperm.slane %v7085_v0, %v9699_v7  ;;  %v8746_v17 = vld [vmem:[%s13507_s7 + $0x60] sm:$0xff] }
 0xe24   :  { %v7100_v40 = vperm.slane %v7096_v4, %v9699_v7  ;;  %v7101_v16 = vrot.slane %v6922_v15, 4  ;;  %v6920_v12 = vsel %vm623_vm13, 0.0, %v6919_v41  ;;  %v7072_v31 = vperm.slane %v7066_v23, %v9731_v38 }
 0xe25   :  { %v7091_v35 = vsel %vm623_vm13, %v7090_v51, %v6916_v39  ;;  %v7109_v24 = vrot.slane %v7089_v52, 4  ;;  %v7083_v14 = vrot.slane %v7064_v27, 4  ;;  %v7081_v25 = vrot.slane %v7076_v19, 4 }
 0xe26   :  { %v7102_v32 = vsel %vm623_vm13, %v7101_v16, %v6920_v12  ;;  %v7121_v56 = vrot.slane %v7100_v40, 4  ;;  %v7095_v46 = vperm.slane %v7091_v35, %v9699_v7  ;;  %v7077_v59 = vrot.slane %v7072_v31, 4  ;;  %7274 = vmatpush.bf16.msra.mxu2 %v8746_v17 }
 0xe27   :  { %v7106_v61 = vperm.slane %v7102_v32, %v9699_v7  ;;  %v7079_v5 = vrot.slane %v7060_v44, 4  ;;  %v7084_v10 = vsel %vm623_vm13, %v7076_v19, %v7083_v14  ;;  %v7082_v6 = vsel %vm623_vm13, %v7081_v25, %v7064_v27 }
 0xe28   :  { %v7110_v11 = vsel %vm623_vm13, %v7095_v46, %v7109_v24  ;;  %v7107_v49 = vrot.slane %v7095_v46, 4  ;;  %v13200_v63 = vsel %vm623_vm13, %v7077_v59, %v7060_v44 }
 0xe29   :  { %v7118_v57 = vperm.slane %v7110_v11, %v9731_v38  ;;  %v7122_v18 = vsel %vm623_vm13, %v7106_v61, %v7121_v56  ;;  %v7119_v43 = vrot.slane %v7106_v61, 4  ;;  %v7080_v8 = vsel %vm623_vm13, %v7072_v31, %v7079_v5 }
 0xe2a   :  { %v7130_v7 = vperm.slane %v7122_v18, %v9731_v38  ;;  %v7108_v26 = vsel %vm623_vm13, %v7107_v49, %v7089_v52  ;;  %7275 = vmatpush.bf16.msra.mxu2 %v8745_v42 }
 0xe2b   :  { %v7137_v28 = vrot.slane %v7118_v57, 4  ;;  %v7114_v33 = vperm.slane %v7108_v26, %v9731_v38  ;;  %v7120_v22 = vsel %vm623_vm13, %v7119_v43, %v7100_v40  ;;  %v13684_v43 = vld [vmem:[#allocation18_spill] sm:$0xff]  ;;  %v13685_v26 = vld [vmem:[#allocation12_spill] sm:$0xff] }
 0xe2c   :  { %v7135_v47 = vrot.slane %v7130_v7, 4  ;;  %v7126_v45 = vperm.slane %v7120_v22, %v9731_v38  ;;  %v13686_v22 = vld [vmem:[#allocation19_spill] sm:$0xff] }
 0xe2d   :  { %v7138_v48 = vsel %vm623_vm13, %v7130_v7, %v7137_v28  ;;  %v7133_v3 = vrot.slane %v7114_v33, 4 }
 0xe2e   :  { %v7136_v2 = vsel %vm623_vm13, %v7135_v47, %v7118_v57  ;;  %v9026_v60 = vpack.i.bf16 %v7138_v48, %v7084_v10  ;;  %v7131_v58 = vrot.slane %v7126_v45, 4  ;;  %7276 = vmatpush.bf16.msra.mxu2 %v8744_v55  ;;  %v13687_v10 = vld [vmem:[#allocation20_spill] sm:$0xff] }
 0xe2f   :  { %v9021_v36 = vpack.i.bf16 %v7136_v2, %v7082_v6  ;;  %v7134_v38 = vsel %vm623_vm13, %v7126_v45, %v7133_v3  ;;  %v13688_v6 = vld [vmem:[#allocation9_spill] sm:$0xff] }
 0xe30   :  { %9027 = vrot.lane.b32.xlu2 %v9026_v60, %s9274_s29  ;;  %v9016_v34 = vpack.i.bf16 %v7134_v38, %v7080_v8  ;;  %v7132_v53 = vsel %vm623_vm13, %v7131_v58, %v7114_v33 }
 0xe31   :  { %9022 = vrot.lane.b32.xlu1 %v9021_v36, %s9276_s18 }
 0xe32   :  { %9017 = vrot.lane.b32.xlu0 %v9016_v34, %s9275_s0  ;;  %7277 = vmatpush.bf16.msra.mxu2 %v8743_v13 }
 0xe36   :  { %7278 = vmatpush.bf16.msra.mxu2 %v8742_v30 }
 0xe46   :  { %v9008_v41 = vpop.permute.xlu2 %9007 }
 0xe47   :  { %v9010_v62 = vunpack.i.h.bf16 %v9008_v41  ;;  %v9009_v0 = vunpack.i.l.bf16 %v9008_v41 }
 0xe5c   :  { %v9013_v1 = vpop.permute.xlu0 %9012 }
 0xe5d   :  { %v9015_v27 = vunpack.i.h.bf16 %v9013_v1  ;;  %v9014_v15 = vunpack.i.l.bf16 %v9013_v1 }
 0xe5e   :  { %v9003_v50 = vpop.permute.xlu1 %9002 }
 0xe5f   :  { %v9005_v54 = vunpack.i.h.bf16 %v9003_v50  ;;  %v9004_v39 = vunpack.i.l.bf16 %v9003_v50  ;;  %v8531_v50 = vld [vmem:[%s13511_s11 + $0xf0] sm:$0xf] }
 0xe61   :  { %v7187_v51 = vsel %vm2081_vm14, %v13115_v20, %v9004_v39  ;;  %v7188_v4 = vsel %vm2081_vm14, %v13122_v9, %v9005_v54  ;;  %v8765_v54 = vld [vmem:[%s13511_s11 + $0xf4] sm:$0xf0]  ;;  %v8764_v39 = vld [vmem:[%s13511_s11 + $0xf4] sm:$0xf] }
 0xe62   :  { %v7191_v52 = vsel %vm3429_vm12, %v7187_v51, %v9009_v0  ;;  %v7192_v40 = vsel %vm3429_vm12, %v7188_v4, %v9010_v62  ;;  %v8532_v62 = vor.u32 %v8765_v54, %v8531_v50  ;;  %v8533_v0 = vld [vmem:[%s13511_s11 + $0xf8] sm:$0xf0]  ;;  %v8763_v51 = vld [vmem:[%s13511_s11 + $0xe4] sm:$0xf0]  ;;  %v8762_v4 = vld [vmem:[%s13511_s11 + $0xe4] sm:$0xf] }
 0xe63   :  { %v7195_v16 = vsel %vm3434_vm0, %v7191_v52, %v9014_v15  ;;  %v7196_v44 = vsel %vm3434_vm0, %v7192_v40, %v9015_v27  ;;  %v8536_v27 = vor.u32 %v8764_v39, %v8533_v0  ;;  %v8523_v15 = vld [vmem:[%s13511_s11 + $0xe0] sm:$0xf]  ;;  %v8525_v40 = vld [vmem:[%s13511_s11 + $0xe8] sm:$0xf0] }
 0xe64   :  { %v7199_v23 = vpack.c.bf16 %v7196_v44, %v7195_v16  ;;  %7498 = vmatpush.bf16.msra.mxu3 %v8532_v62  ;;  %v8524_v52 = vor.u32 %v8763_v51, %v8523_v15  ;;  %v8528_v16 = vor.u32 %v8762_v4, %v8525_v40  ;;  %v8515_v44 = vld [vmem:[%s13511_s11 + $0xd0] sm:$0xf] }
 0xe65   :  { %7517 = vmatpush.bf16.msrb.mxu0 %v8536_v27 }
 0xe66   :  { %7279 = vmatmul.bf16.vlgmr.msra.gmra.mxu2 %v7199_v23  ;;  %v8761_v23 = vld [vmem:[%s13511_s11 + $0xd4] sm:$0xf0] }
 0xe68   :  { %7499 = vmatpush.bf16.msra.mxu3 %v8524_v52 }
 0xe69   :  { %7518 = vmatpush.bf16.msrb.mxu0 %v8528_v16  ;;  %v9040_v16 = vld [vmem:[%s13509_s9 + $0x1] ss:$0 sm:$0xff] }
 0xe8a   :  { %v9028_v35 = vpop.permute.xlu2 %9027 }
 0xe8b   :  { %v9030_v19 = vunpack.i.h.bf16 %v9028_v35  ;;  %v9029_v46 = vunpack.i.l.bf16 %v9028_v35  ;;  %v8516_v35 = vor.u32 %v8761_v23, %v8515_v44 }
 0xe8d   :  { %7500 = vmatpush.bf16.msra.mxu3 %v8516_v35  ;;  %v9041_v35 = vld [vmem:[%s13510_s10 + $0x1] ss:$0 sm:$0xff] }
 0xea3   :  { %v9023_v12 = vpop.permute.xlu1 %9022 }
 0xea4   :  { %v9018_v24 = vpop.permute.xlu0 %9017  ;;  %v9025_v56 = vunpack.i.h.bf16 %v9023_v12  ;;  %v9024_v20 = vunpack.i.l.bf16 %v9023_v12  ;;  %v8760_v12 = vld [vmem:[%s13511_s11 + $0xd4] sm:$0xf] }
 0xea5   :  { %v9020_v31 = vunpack.i.h.bf16 %v9018_v24  ;;  %v9019_v32 = vunpack.i.l.bf16 %v9018_v24  ;;  %v8517_v24 = vld [vmem:[%s13511_s11 + $0xd8] sm:$0xf0] }
 0xea7   :  { %v7189_v9 = vsel %vm2081_vm14, %v13200_v63, %v9019_v32  ;;  %v7190_v37 = vsel %vm2081_vm14, %v7132_v53, %v9020_v31  ;;  %v8520_v31 = vor.u32 %v8760_v12, %v8517_v24 }
 0xea8   :  { %v7193_v61 = vsel %vm3429_vm12, %v7189_v9, %v9024_v20  ;;  %v7194_v59 = vsel %vm3429_vm12, %v7190_v37, %v9025_v56  ;;  %v8507_v20 = vld [vmem:[%s13511_s11 + $0xc0] sm:$0xf]  ;;  %v8509_v37 = vld [vmem:[%s13511_s11 + $0xc8] sm:$0xf0] }
 0xea9   :  { %v7197_v11 = vsel %vm3434_vm0, %v7193_v61, %v9029_v46  ;;  %v7198_v14 = vsel %vm3434_vm0, %v7194_v59, %v9030_v19  ;;  %7519 = vmatpush.bf16.msrb.mxu0 %v8520_v31  ;;  %v8759_v19 = vld [vmem:[%s13511_s11 + $0xc4] sm:$0xf0]  ;;  %v8758_v46 = vld [vmem:[%s13511_s11 + $0xc4] sm:$0xf] }
 0xeaa   :  { %v7200_v49 = vpack.c.bf16 %v7198_v14, %v7197_v11  ;;  %v8508_v9 = vor.u32 %v8759_v19, %v8507_v20  ;;  %v8512_v59 = vor.u32 %v8758_v46, %v8509_v37  ;;  %v8499_v11 = vld [vmem:[%s13511_s11 + $0xb0] sm:$0xf]  ;;  %v8757_v14 = vld [vmem:[%s13511_s11 + $0xb4] sm:$0xf0] }
 0xeac   :  { %7284 = vmatmul.bf16.gmra.mxu2 %v7200_v49  ;;  %7501 = vmatpush.bf16.msra.mxu3 %v8508_v9  ;;  %v8500_v49 = vor.u32 %v8757_v14, %v8499_v11 }
 0xead   :  { %7520 = vmatpush.bf16.msrb.mxu0 %v8512_v59 }
 0xeb0   :  { %7502 = vmatpush.bf16.msra.mxu3 %v8500_v49 }
 0xee9   :  { %v7280_v57 = vpop.f32.mrf.mxu2 }
 0xeea   :  { %v7281_v18 = vadd.f32 %v9039_v29, %v7280_v57  ;;  %v8501_v57 = vld [vmem:[%s13511_s11 + $0xb8] sm:$0xf0] }
 0xeec   :  { %v13254_v63 = vadd.f32 %v7281_v18, %v13684_v43  ;;  %v8491_v43 = vld [vmem:[%s13511_s11 + $0xa0] sm:$0xf] }
 0xeee   :  { %7298 = vadd.xlane.f32.xlu0 %v13254_v63 }
 0xef1   :  { %v7282_v25 = vpop.f32.mrf.mxu2 }
 0xef2   :  { %v7283_v7 = vadd.f32 %v9039_v29, %v7282_v25  ;;  %v8755_v25 = vld [vmem:[%s13511_s11 + $0xa4] sm:$0xf0] }
 0xef4   :  { %v13258_v28 = vadd.f32 %v7283_v7, %v13685_v26  ;;  %v8754_v7 = vld [vmem:[%s13511_s11 + $0xa4] sm:$0xf]  ;;  %v8493_v26 = vld [vmem:[%s13511_s11 + $0xa8] sm:$0xf0] }
 0xef6   :  { %7300 = vadd.xlane.f32.xlu1 %v13258_v28 }
 0xf2f   :  { %v7285_v5 = vpop.f32.mrf.mxu2 }
 0xf30   :  { %v7286_v33 = vadd.f32 %v9039_v29, %v7285_v5 }
 0xf32   :  { %v13262_v47 = vadd.f32 %v7286_v33, %v13686_v22  ;;  %v8492_v33 = vor.u32 %v8755_v25, %v8491_v43 }
 0xf34   :  { %7302 = vadd.xlane.f32.xlu2 %v13262_v47  ;;  %7503 = vmatpush.bf16.msra.mxu3 %v8492_v33 }
 0xf37   :  { %v7287_v45 = vpop.f32.mrf.mxu2 }
 0xf38   :  { %v7288_v21 = vadd.f32 %v9039_v29, %v7287_v45  ;;  %v8756_v29 = vld [vmem:[%s13511_s11 + $0xb4] sm:$0xf]  ;;  %v8496_v45 = vor.u32 %v8754_v7, %v8493_v26 }
 0xf39   :  { %v8504_v18 = vor.u32 %v8756_v29, %v8501_v57 }
 0xf3a   :  { %v13266_v48 = vadd.f32 %v7288_v21, %v13687_v10  ;;  %v8483_v21 = vld [vmem:[%s13511_s11 + $0x90] sm:$0xf]  ;;  %v8753_v10 = vld [vmem:[%s13511_s11 + $0x94] sm:$0xf0] }
 0xf3b   :  { %7521 = vmatpush.bf16.msrb.mxu0 %v8504_v18 }
 0xf3c   :  { %7304 = vadd.xlane.f32.xlu0 %v13266_v48 }
 0xf3f   :  { %7522 = vmatpush.bf16.msrb.mxu0 %v8496_v45 }
 0xf61   :  { %v7299_v3 = vpop.xlane.xlu0 %7298 }
 0xf62   :  { %v7306_v2 = vmul.f32 %v7299_v3, %v13688_v6  ;;  %v8752_v3 = vld [vmem:[%s13511_s11 + $0x94] sm:$0xf] }
 0xf64   :  { %v13271_v60 = vsub.f32 %v13254_v63, %v7306_v2  ;;  %v8485_v2 = vld [vmem:[%s13511_s11 + $0x98] sm:$0xf0] }
 0xf66   :  { %v7314_v58 = vmul.f32 %v13271_v60, %v13271_v60 }
 0xf68   :  { %7318 = vadd.xlane.f32.xlu1 %v7314_v58 }
 0xf69   :  { %v7301_v36 = vpop.xlane.xlu1 %7300 }
 0xf6a   :  { %v7307_v8 = vmul.f32 %v7301_v36, %v13688_v6 }
 0xf6c   :  { %v13277_v38 = vsub.f32 %v13258_v28, %v7307_v8 }
 0xf6e   :  { %v7315_v34 = vmul.f32 %v13277_v38, %v13277_v38 }
 0xf70   :  { %7320 = vadd.xlane.f32.xlu2 %v7315_v34  ;;  %v8484_v34 = vor.u32 %v8753_v10, %v8483_v21 }
 0xf72   :  { %7504 = vmatpush.bf16.msra.mxu3 %v8484_v34  ;;  %v8472_v34 = vld [vmem:[%s13512_s12 + $0x2] sm:$0x3]  ;;  %s7894_s12 = sshll.u32 %s13517_s17, 4  ;;  %s7895_s12 = int_to_ptr.hbm [resolvable:$true] %s7894_s12 }
 0xfa7   :  { %v7303_v17 = vpop.xlane.xlu2 %7302 }
 0xfa8   :  { %v7308_v53 = vmul.f32 %v7303_v17, %v13688_v6  ;;  %v8488_v17 = vor.u32 %v8752_v3, %v8485_v2 }
 0xfaa   :  { %v13283_v42 = vsub.f32 %v13262_v47, %v7308_v53  ;;  %v8475_v53 = vld [vmem:[%s13511_s11 + $0x80] sm:$0xf]  ;;  %7523 = vmatpush.bf16.msrb.mxu0 %v8488_v17  ;;  %v8779_v17 = vld [vmem:[%s13513_s13 + $0xe8] sm:$0xff] }
 0xfac   :  { %v7316_v55 = vmul.f32 %v13283_v42, %v13283_v42 }
 0xfae   :  { %7322 = vadd.xlane.f32.xlu0 %v7316_v55  ;;  %v8751_v55 = vld [vmem:[%s13511_s11 + $0x84] sm:$0xf0] }
 0xfaf   :  { %v7305_v13 = vpop.xlane.xlu0 %7304  ;;  %v8476_v54 = vor.u32 %v8751_v55, %v8475_v53  ;;  %v13418_v53 = vperm.slane %v8472_v34, 1  ;;  %v8772_v55 = vld [vmem:[%s13513_s13 + $0xb0] sm:$0xff] }
 0xfb0   :  { %v7309_v30 = vmul.f32 %v7305_v13, %v13688_v6 }
 0xfb1   :  { %7505 = vmatpush.bf16.msra.mxu3 %v8476_v54 }
 0xfb2   :  { %v13289_v41 = vsub.f32 %v13266_v48, %v7309_v30  ;;  %v8750_v30 = vld [vmem:[%s13511_s11 + $0x84] sm:$0xf] }
 0xfb4   :  { %v7317_v1 = vmul.f32 %v13289_v41, %v13289_v41 }
 0xfb6   :  { %7324 = vadd.xlane.f32.xlu1 %v7317_v1  ;;  %v8477_v1 = vld [vmem:[%s13511_s11 + $0x88] sm:$0xf0] }
 0xfb7   :  { %v8480_v39 = vor.u32 %v8750_v30, %v8477_v1 }
 0xfb9   :  { %7524 = vmatpush.bf16.msrb.mxu0 %v8480_v39  ;;  %v13430_v39 = vperm.slane %v8472_v34, 0 }
 0xfdb   :  { %v7319_v32 = vpop.xlane.xlu1 %7318 }
 0xfdc   :  { %v7326_v56 = vmul.f32 %v7319_v32, %v13688_v6 }
 0xfde   :  { %v7330_v61 = vadd.f32 1e-06, %v7326_v56 }
 0xfe0   :  { %9215 = vrsqrt.f32 %v7330_v61  ;;  %vm7340_vm14 = vweird.f32 %v7330_v61 }
 0xfe3   :  { %v7321_v5 = vpop.xlane.xlu2 %7320 }
 0xfe4   :  { %v7327_v22 = vmul.f32 %v7321_v5, %v13688_v6 }
 0xfe6   :  { %v9216_v58 = vpop.eup %9215  ;;  %v7331_v36 = vadd.f32 1e-06, %v7327_v22 }
 0xfe7   :  { %v7335_v8 = vmul.f32 %v9216_v58, %v7330_v61  ;;  %vm7341_vm13 = vweird.f32 %v9216_v58 }
 0xfe8   :  { %9217 = vrsqrt.f32 %v7331_v36  ;;  %vm7342_vm15 = vmor %vm7340_vm14, %vm7341_vm13  ;;  %vm7350_vm0 = vweird.f32 %v7331_v36 }
 0xfe9   :  { %v7336_v13 = vmul.f32 %v9216_v58, %v7335_v8  ;;  %v8781_v8 = vld [vmem:[%s13513_s13 + $0xf8] sm:$0xff] }
 0xfea   :  { %7765 = vmatpush.bf16.msrb.mxu2 %v8781_v8 }
 0xfeb   :  { %v7337_v50 = vmul.f32 0.5, %v7336_v13  ;;  %v8778_v13 = vld [vmem:[%s13513_s13 + $0xe0] sm:$0xff] }
 0xfed   :  { %v7338_v62 = vsub.f32 1.5, %v7337_v50  ;;  %v8771_v50 = vld [vmem:[%s13513_s13 + $0xa8] sm:$0xff] }
 0xfee   :  { %v9218_v0 = vpop.eup %9217 }
 0xfef   :  { %v7339_v27 = vmul.f32 %v9216_v58, %v7338_v62  ;;  %v7345_v15 = vmul.f32 %v9218_v0, %v7331_v36  ;;  %vm7351_vm12 = vweird.f32 %v9218_v0  ;;  %v8777_v62 = vld [vmem:[%s13513_s13 + $0xd8] sm:$0xff] }
 0xff0   :  { %vm7352_vm1 = vmor %vm7350_vm0, %vm7351_vm12 }
 0xff1   :  { %v7346_v51 = vmul.f32 %v9218_v0, %v7345_v15  ;;  %v7343_v4 = vsel %vm7342_vm15, %v9216_v58, %v7339_v27  ;;  %v8770_v27 = vld [vmem:[%s13513_s13 + $0xa0] sm:$0xff] }
 0xff2   :  { %v7374_v44 = vmul.f32 %v7343_v4, %v13271_v60 }
 0xff3   :  { %v7347_v52 = vmul.f32 0.5, %v7346_v51 }
 0xff4   :  { %v7381_v24 = vmul.f32 %v9040_v16, %v7374_v44 }
 0xff5   :  { %v7348_v40 = vsub.f32 1.5, %v7347_v52  ;;  %v8776_v52 = vld [vmem:[%s13513_s13 + $0xd0] sm:$0xff] }
 0xff6   :  { %v7388_v56 = vadd.f32 %v9041_v35, %v7381_v24 }
 0xff7   :  { %v7349_v23 = vmul.f32 %v9218_v0, %v7348_v40 }
 0xff9   :  { %v7353_v12 = vsel %vm7352_vm1, %v9218_v0, %v7349_v23 }
 0xffa   :  { %v7375_v31 = vmul.f32 %v7353_v12, %v13277_v38 }
 0xffc   :  { %v7382_v32 = vmul.f32 %v9040_v16, %v7375_v31 }
 0xffe   :  { %v7389_v20 = vadd.f32 %v9041_v35, %v7382_v32 }
0x1000   :  { %v7392_v19 = vpack.c.bf16 %v7389_v20, %v7388_v56  ;;  %v8768_v56 = vld [vmem:[%s13513_s13 + $0x90] sm:$0xff] }
0x1002   :  { %7506 = vmatmul.bf16.vlgmr.msra.gmra.mxu3 %v7392_v19  ;;  %7525 = vmatmul.bf16.vlgmr.msrb.gmra.mxu0 %v7392_v19 }
0x1021   :  { %v7323_v46 = vpop.xlane.xlu0 %7322 }
0x1022   :  { %v7328_v60 = vmul.f32 %v7323_v46, %v13688_v6  ;;  %v8774_v46 = vld [vmem:[%s13513_s13 + $0xc0] sm:$0xff] }
0x1024   :  { %v7332_v9 = vadd.f32 1e-06, %v7328_v60 }
0x1026   :  { %9219 = vrsqrt.f32 %v7332_v9  ;;  %vm7360_vm3 = vweird.f32 %v7332_v9 }
0x1029   :  { %v7325_v37 = vpop.xlane.xlu1 %7324 }
0x102a   :  { %v7329_v61 = vmul.f32 %v7325_v37, %v13688_v6 }
0x102c   :  { %v9220_v59 = vpop.eup %9219  ;;  %v7333_v11 = vadd.f32 1e-06, %v7329_v61 }
0x102d   :  { %v7355_v14 = vmul.f32 %v9220_v59, %v7332_v9  ;;  %vm7361_vm2 = vweird.f32 %v9220_v59 }
0x102e   :  { %9221 = vrsqrt.f32 %v7333_v11  ;;  %vm7362_vm4 = vmor %vm7360_vm3, %vm7361_vm2  ;;  %vm7370_vm6 = vweird.f32 %v7333_v11 }
0x102f   :  { %v7356_v49 = vmul.f32 %v9220_v59, %v7355_v14 }
0x1031   :  { %v7357_v38 = vmul.f32 0.5, %v7356_v49 }
0x1033   :  { %v7358_v29 = vsub.f32 1.5, %v7357_v38 }
0x1034   :  { %v9222_v57 = vpop.eup %9221 }
0x1035   :  { %v7359_v18 = vmul.f32 %v9220_v59, %v7358_v29  ;;  %v7365_v43 = vmul.f32 %v9222_v57, %v7333_v11  ;;  %vm7371_vm5 = vweird.f32 %v9222_v57 }
0x1036   :  { %vm7372_vm7 = vmor %vm7370_vm6, %vm7371_vm5 }
0x1037   :  { %v7366_v25 = vmul.f32 %v9222_v57, %v7365_v43  ;;  %v7363_v7 = vsel %vm7362_vm4, %v9220_v59, %v7359_v18  ;;  %v8767_v59 = vld [vmem:[%s13513_s13 + $0x88] sm:$0xff] }
0x1038   :  { %v7376_v33 = vmul.f32 %v7363_v7, %v13283_v42  ;;  %v8780_v42 = vld [vmem:[%s13513_s13 + $0xf0] sm:$0xff] }
0x1039   :  { %v7367_v26 = vmul.f32 0.5, %v7366_v25  ;;  %7766 = vmatpush.bf16.msrb.mxu2 %v8780_v42 }
0x103a   :  { %v7383_v10 = vmul.f32 %v9040_v16, %v7376_v33 }
0x103b   :  { %v7368_v5 = vsub.f32 1.5, %v7367_v26 }
0x103c   :  { %v7390_v2 = vadd.f32 %v9041_v35, %v7383_v10 }
0x103d   :  { %v7369_v22 = vmul.f32 %v9222_v57, %v7368_v5  ;;  %7767 = vmatpush.bf16.msrb.mxu2 %v8779_v17 }
0x103f   :  { %v7373_v45 = vsel %vm7372_vm7, %v9222_v57, %v7369_v22  ;;  %v8766_v57 = vld [vmem:[%s13513_s13 + $0x80] sm:$0xff] }
0x1040   :  { %v7377_v21 = vmul.f32 %v7373_v45, %v13289_v41  ;;  %v8773_v41 = vld [vmem:[%s13513_s13 + $0xb8] sm:$0xff] }
0x1041   :  { %7746 = vmatpush.bf16.msra.mxu1 %v8773_v41  ;;  %7768 = vmatpush.bf16.msrb.mxu2 %v8778_v13 }
0x1042   :  { %v7384_v3 = vmul.f32 %v9040_v16, %v7377_v21  ;;  %v8769_v16 = vld [vmem:[%s13513_s13 + $0x98] sm:$0xff] }
0x1044   :  { %v7391_v58 = vadd.f32 %v9041_v35, %v7384_v3  ;;  %v8775_v35 = vld [vmem:[%s13513_s13 + $0xc8] sm:$0xff] }
0x1045   :  { %7747 = vmatpush.bf16.msra.mxu1 %v8772_v55  ;;  %7769 = vmatpush.bf16.msrb.mxu2 %v8777_v62 }
0x1046   :  { %v7393_v36 = vpack.c.bf16 %v7391_v58, %v7390_v2 }
0x1048   :  { %7511 = vmatmul.bf16.gmra.mxu3 %v7393_v36  ;;  %7530 = vmatmul.bf16.gmra.mxu0 %v7393_v36 }
0x1049   :  { %7748 = vmatpush.bf16.msra.mxu1 %v8771_v50  ;;  %7770 = vmatpush.bf16.msrb.mxu2 %v8776_v52 }
0x104d   :  { %7749 = vmatpush.bf16.msra.mxu1 %v8770_v27  ;;  %7771 = vmatpush.bf16.msrb.mxu2 %v8775_v35 }
0x1051   :  { %7750 = vmatpush.bf16.msra.mxu1 %v8769_v16  ;;  %7772 = vmatpush.bf16.msrb.mxu2 %v8774_v46 }
0x1055   :  { %7751 = vmatpush.bf16.msra.mxu1 %v8768_v56 }
0x1059   :  { %7752 = vmatpush.bf16.msra.mxu1 %v8767_v59 }
0x105d   :  { %7753 = vmatpush.bf16.msra.mxu1 %v8766_v57 }
0x107f   :  { %v7526_v30 = vpop.f32.mrf.mxu0 }
0x1080   :  { %v7527_v1 = vadd.f32 %v7526_v30, %v13418_v53 }
0x1082   :  { %v7537_v54 = vmul.f32 %v7527_v1, %v7527_v1 }
0x1084   :  { %v7545_v0 = vmul.f32 %v7537_v54, %v7527_v1 }
0x1085   :  { %v7507_v15 = vpop.f32.mrf.mxu3 }
0x1086   :  { %v7553_v51 = vmul.f32 0.044715, %v7545_v0  ;;  %v7508_v4 = vadd.f32 %v7507_v15, %v13430_v39 }
0x1087   :  { %v7528_v40 = vpop.f32.mrf.mxu0 }
0x1088   :  { %v7561_v44 = vadd.f32 %v7553_v51, %v7527_v1  ;;  %v7536_v23 = vmul.f32 %v7508_v4, %v7508_v4  ;;  %v7529_v12 = vadd.f32 %v7528_v40, %v13418_v53 }
0x108a   :  { %v7569_v24 = vmul.f32 0.7978846, %v7561_v44  ;;  %v7544_v31 = vmul.f32 %v7536_v23, %v7508_v4  ;;  %v7539_v32 = vmul.f32 %v7529_v12, %v7529_v12 }
0x108c   :  { %v7552_v20 = vmul.f32 0.044715, %v7544_v31  ;;  %v7547_v19 = vmul.f32 %v7539_v32, %v7529_v12  ;;  %9223 = vtanh.f32 %v7569_v24 }
0x108d   :  { %v7509_v60 = vpop.f32.mrf.mxu3 }
0x108e   :  { %v7560_v9 = vadd.f32 %v7552_v20, %v7508_v4  ;;  %v7555_v37 = vmul.f32 0.044715, %v7547_v19  ;;  %v7510_v61 = vadd.f32 %v7509_v60, %v13430_v39 }
0x1090   :  { %v7568_v11 = vmul.f32 0.7978846, %v7560_v9  ;;  %v7563_v14 = vadd.f32 %v7555_v37, %v7529_v12  ;;  %v7538_v49 = vmul.f32 %v7510_v61, %v7510_v61 }
0x1092   :  { %v7571_v38 = vmul.f32 0.7978846, %v7563_v14  ;;  %v7546_v29 = vmul.f32 %v7538_v49, %v7510_v61  ;;  %9225 = vtanh.f32 %v7568_v11  ;;  %v9224_v18 = vpop.eup %9223 }
0x1093   :  { %v7585_v7 = vadd.f32 1.0, %v9224_v18 }
0x1094   :  { %9227 = vtanh.f32 %v7571_v38  ;;  %v7554_v43 = vmul.f32 0.044715, %v7546_v29 }
0x1095   :  { %v7593_v22 = vmul.f32 0.5, %v7585_v7 }
0x1096   :  { %v7562_v25 = vadd.f32 %v7554_v43, %v7510_v61 }
0x1097   :  { %v7601_v3 = vmul.f32 %v7593_v22, %v7527_v1 }
0x1098   :  { %v7570_v26 = vmul.f32 0.7978846, %v7562_v25  ;;  %v9226_v5 = vpop.eup %9225 }
0x1099   :  { %v7584_v21 = vadd.f32 1.0, %v9226_v5 }
0x109a   :  { %v9228_v33 = vpop.eup %9227  ;;  %9229 = vtanh.f32 %v7570_v26 }
0x109b   :  { %v7587_v45 = vadd.f32 1.0, %v9228_v33  ;;  %v7592_v36 = vmul.f32 0.5, %v7584_v21 }
0x109d   :  { %v7595_v10 = vmul.f32 0.5, %v7587_v45  ;;  %v7600_v34 = vmul.f32 %v7592_v36, %v7508_v4  ;;  %v9042_v45 = vld [vmem:[%s13514_s14 + $0x1] ss:$0 sm:$0xff] }
0x109f   :  { %v7603_v2 = vmul.f32 %v7595_v10, %v7529_v12 }
0x10a0   :  { %v9230_v58 = vpop.eup %9229 }
0x10a1   :  { %v7609_v8 = vpack.c.bf16 %v7603_v2, %v7601_v3  ;;  %v7586_v42 = vadd.f32 1.0, %v9230_v58 }
0x10a3   :  { %v7594_v41 = vmul.f32 0.5, %v7586_v42  ;;  %7773 = vmatmul.bf16.vlgmr.msrb.gmra.mxu2 %v7609_v8 }
0x10a5   :  { %v7602_v17 = vmul.f32 %v7594_v41, %v7510_v61 }
0x10a7   :  { %v7608_v55 = vpack.c.bf16 %v7602_v17, %v7600_v34 }
0x10a9   :  { %7754 = vmatmul.bf16.vlgmr.msra.gmra.mxu1 %v7608_v55 }
0x10c5   :  { %v7531_v13 = vpop.f32.mrf.mxu0 }
0x10c6   :  { %v7532_v30 = vadd.f32 %v7531_v13, %v13418_v53 }
0x10c8   :  { %v7541_v50 = vmul.f32 %v7532_v30, %v7532_v30 }
0x10ca   :  { %v7549_v54 = vmul.f32 %v7541_v50, %v7532_v30 }
0x10cb   :  { %v7512_v62 = vpop.f32.mrf.mxu3 }
0x10cc   :  { %v7557_v0 = vmul.f32 0.044715, %v7549_v54  ;;  %v7513_v1 = vadd.f32 %v7512_v62, %v13430_v39 }
0x10cd   :  { %v7533_v27 = vpop.f32.mrf.mxu0 }
0x10ce   :  { %v7565_v15 = vadd.f32 %v7557_v0, %v7532_v30  ;;  %v7540_v51 = vmul.f32 %v7513_v1, %v7513_v1  ;;  %v7534_v52 = vadd.f32 %v7533_v27, %v13418_v53 }
0x10d0   :  { %v7573_v40 = vmul.f32 0.7978846, %v7565_v15  ;;  %v7548_v16 = vmul.f32 %v7540_v51, %v7513_v1  ;;  %v7543_v4 = vmul.f32 %v7534_v52, %v7534_v52 }
0x10d2   :  { %v7556_v44 = vmul.f32 0.044715, %v7548_v16  ;;  %v7551_v23 = vmul.f32 %v7543_v4, %v7534_v52  ;;  %9231 = vtanh.f32 %v7573_v40 }
0x10d3   :  { %v7514_v12 = vpop.f32.mrf.mxu3 }
0x10d4   :  { %v7564_v35 = vadd.f32 %v7556_v44, %v7513_v1  ;;  %v7559_v24 = vmul.f32 0.044715, %v7551_v23  ;;  %v7515_v31 = vadd.f32 %v7514_v12, %v13430_v39 }
0x10d6   :  { %v7572_v32 = vmul.f32 0.7978846, %v7564_v35  ;;  %v7567_v56 = vadd.f32 %v7559_v24, %v7534_v52  ;;  %v7542_v20 = vmul.f32 %v7515_v31, %v7515_v31 }
0x10d8   :  { %v7575_v19 = vmul.f32 0.7978846, %v7567_v56  ;;  %v7550_v46 = vmul.f32 %v7542_v20, %v7515_v31  ;;  %9233 = vtanh.f32 %v7572_v32  ;;  %v9232_v60 = vpop.eup %9231 }
0x10d9   :  { %v7589_v37 = vadd.f32 1.0, %v9232_v60 }
0x10da   :  { %9235 = vtanh.f32 %v7575_v19  ;;  %v7558_v53 = vmul.f32 0.044715, %v7550_v46 }
0x10db   :  { %v7597_v49 = vmul.f32 0.5, %v7589_v37 }
0x10dc   :  { %v7566_v9 = vadd.f32 %v7558_v53, %v7515_v31 }
0x10dd   :  { %v7605_v39 = vmul.f32 %v7597_v49, %v7532_v30 }
0x10de   :  { %v7574_v61 = vmul.f32 0.7978846, %v7566_v9  ;;  %v9234_v59 = vpop.eup %9233 }
0x10df   :  { %v7588_v29 = vadd.f32 1.0, %v9234_v59 }
0x10e0   :  { %v9236_v11 = vpop.eup %9235  ;;  %9237 = vtanh.f32 %v7574_v61 }
0x10e1   :  { %v7591_v14 = vadd.f32 1.0, %v9236_v11  ;;  %v7596_v7 = vmul.f32 0.5, %v7588_v29 }
0x10e3   :  { %v7599_v38 = vmul.f32 0.5, %v7591_v14  ;;  %v7604_v5 = vmul.f32 %v7596_v7, %v7513_v1 }
0x10e5   :  { %v7607_v57 = vmul.f32 %v7599_v38, %v7534_v52  ;;  %v9043_v38 = vld [vmem:[%s13515_s15] ss:$0 sm:$0xff]  ;;  %s9279_s15 = smov [#allocation2]  }
0x10e6   :  { %v9238_v18 = vpop.eup %9237 }
0x10e7   :  { %v7611_v43 = vpack.c.bf16 %v7607_v57, %v7605_v39  ;;  %v7590_v25 = vadd.f32 1.0, %v9238_v18  ;;  %v9044_v57 = vld [vmem:[%s13516_s16] ss:$0 sm:$0xff]  ;;  %s7892_s16 = sshll.u32 %s9279_s15, 4  ;;  %s7893_s16 = int_to_ptr.vmem [resolvable:$true] %s7892_s16 }
0x10e9   :  { %7778 = vmatmul.bf16.gmra.mxu2 %v7611_v43  ;;  %v7598_v26 = vmul.f32 0.5, %v7590_v25 }
0x10eb   :  { %v7606_v33 = vmul.f32 %v7598_v26, %v7515_v31 }
0x10ed   :  { %v7610_v22 = vpack.c.bf16 %v7606_v33, %v7604_v5 }
0x10ef   :  { %7759 = vmatmul.bf16.gmra.mxu1 %v7610_v22 }
0x1126   :  { %v7755_v21 = vpop.f32.mrf.mxu1  ;;  %v7774_v10 = vpop.f32.mrf.mxu2 }
0x1127   :  { %v7756_v3 = vadd.f32 %v9042_v45, %v7755_v21 }
0x1129   :  { %v7775_v2 = vadd.f32 %v7774_v10, %v7756_v3 }
0x112b   :  { %v7784_v58 = vadd.f32 %v7775_v2, %v13254_v63 }
0x112d   :  { %7790 = vadd.xlane.f32.xlu2 %v7784_v58 }
0x112e   :  { %v7757_v36 = vpop.f32.mrf.mxu1  ;;  %v7776_v42 = vpop.f32.mrf.mxu2 }
0x112f   :  { %v7758_v8 = vadd.f32 %v9042_v45, %v7757_v36 }
0x1131   :  { %v7777_v41 = vadd.f32 %v7776_v42, %v7758_v8 }
0x1133   :  { %v7785_v34 = vadd.f32 %v7777_v41, %v13258_v28 }
0x1135   :  { %7792 = vadd.xlane.f32.xlu0 %v7785_v34 }
0x116c   :  { %v7760_v17 = vpop.f32.mrf.mxu1  ;;  %v7779_v55 = vpop.f32.mrf.mxu2 }
0x116d   :  { %v7761_v13 = vadd.f32 %v9042_v45, %v7760_v17 }
0x116f   :  { %v7780_v30 = vadd.f32 %v7779_v55, %v7761_v13 }
0x1171   :  { %v7786_v50 = vadd.f32 %v7780_v30, %v13262_v47 }
0x1173   :  { %7794 = vadd.xlane.f32.xlu1 %v7786_v50 }
0x1174   :  { %v7762_v54 = vpop.f32.mrf.mxu1  ;;  %v7781_v0 = vpop.f32.mrf.mxu2 }
0x1175   :  { %v7763_v62 = vadd.f32 %v9042_v45, %v7762_v54 }
0x1177   :  { %v7782_v1 = vadd.f32 %v7781_v0, %v7763_v62 }
0x1179   :  { %v7787_v63 = vadd.f32 %v7782_v1, %v13266_v48 }
0x117b   :  { %7796 = vadd.xlane.f32.xlu2 %v7787_v63 }
0x11a0   :  { %v7791_v27 = vpop.xlane.xlu2 %7790 }
0x11a1   :  { %v7798_v15 = vmul.f32 %v7791_v27, %v13688_v6 }
0x11a3   :  { %v7802_v51 = vsub.f32 %v7784_v58, %v7798_v15 }
0x11a5   :  { %v7806_v28 = vmul.f32 %v7802_v51, %v7802_v51 }
0x11a7   :  { %7810 = vadd.xlane.f32.xlu0 %v7806_v28 }
0x11a8   :  { %v7793_v52 = vpop.xlane.xlu0 %7792 }
0x11a9   :  { %v7799_v40 = vmul.f32 %v7793_v52, %v13688_v6 }
0x11ab   :  { %v7803_v16 = vsub.f32 %v7785_v34, %v7799_v40 }
0x11ad   :  { %v7807_v4 = vmul.f32 %v7803_v16, %v7803_v16 }
0x11af   :  { %7812 = vadd.xlane.f32.xlu1 %v7807_v4 }
0x11e6   :  { %v7795_v47 = vpop.xlane.xlu1 %7794 }
0x11e7   :  { %v7800_v44 = vmul.f32 %v7795_v47, %v13688_v6 }
0x11e9   :  { %v13476_v23 = vsub.f32 %v7786_v50, %v7800_v44 }
0x11eb   :  { %v7808_v48 = vmul.f32 %v13476_v23, %v13476_v23 }
0x11ed   :  { %7814 = vadd.xlane.f32.xlu2 %v7808_v48 }
0x11ee   :  { %v7797_v12 = vpop.xlane.xlu2 %7796 }
0x11ef   :  { %v7801_v35 = vmul.f32 %v7797_v12, %v13688_v6 }
0x11f1   :  { %v13481_v24 = vsub.f32 %v7787_v63, %v7801_v35 }
0x11f3   :  { %v7809_v31 = vmul.f32 %v13481_v24, %v13481_v24 }
0x11f5   :  { %7816 = vadd.xlane.f32.xlu0 %v7809_v31 }
0x121a   :  { %v7811_v32 = vpop.xlane.xlu0 %7810 }
0x121b   :  { %v7818_v56 = vmul.f32 %v7811_v32, %v13688_v6 }
0x121d   :  { %v7822_v20 = vadd.f32 1e-06, %v7818_v56 }
0x121f   :  { %9239 = vrsqrt.f32 %v7822_v20  ;;  %vm7832_vm9 = vweird.f32 %v7822_v20 }
0x1222   :  { %v7813_v19 = vpop.xlane.xlu1 %7812 }
0x1223   :  { %v7819_v46 = vmul.f32 %v7813_v19, %v13688_v6 }
0x1225   :  { %v9240_v60 = vpop.eup %9239  ;;  %v7823_v53 = vadd.f32 1e-06, %v7819_v46 }
0x1226   :  { %v7827_v9 = vmul.f32 %v9240_v60, %v7822_v20  ;;  %vm7833_vm8 = vweird.f32 %v9240_v60 }
0x1227   :  { %9241 = vrsqrt.f32 %v7823_v53  ;;  %vm7834_vm10 = vmor %vm7832_vm9, %vm7833_vm8  ;;  %vm7842_vm13 = vweird.f32 %v7823_v53 }
0x1228   :  { %v7828_v37 = vmul.f32 %v9240_v60, %v7827_v9 }
0x122a   :  { %v7829_v61 = vmul.f32 0.5, %v7828_v37 }
0x122c   :  { %v7830_v59 = vsub.f32 1.5, %v7829_v61 }
0x122d   :  { %v9242_v11 = vpop.eup %9241 }
0x122e   :  { %v7831_v14 = vmul.f32 %v9240_v60, %v7830_v59  ;;  %v7837_v49 = vmul.f32 %v9242_v11, %v7823_v53  ;;  %vm7843_vm11 = vweird.f32 %v9242_v11 }
0x122f   :  { %vm7844_vm14 = vmor %vm7842_vm13, %vm7843_vm11 }
0x1230   :  { %v7835_v29 = vsel %vm7834_vm10, %v9240_v60, %v7831_v14  ;;  %v7838_v39 = vmul.f32 %v9242_v11, %v7837_v49 }
0x1231   :  { %v7866_v18 = vmul.f32 %v7835_v29, %v7802_v51 }
0x1232   :  { %v7839_v43 = vmul.f32 0.5, %v7838_v39 }
0x1233   :  { %v7873_v25 = vmul.f32 %v9043_v38, %v7866_v18 }
0x1234   :  { %v7840_v7 = vsub.f32 1.5, %v7839_v43 }
0x1235   :  { %v7880_v26 = vadd.f32 %v9044_v57, %v7873_v25 }
0x1236   :  { %v7841_v5 = vmul.f32 %v9242_v11, %v7840_v7 }
0x1237   :  { %7884 = vst [vmem:[#allocation2] sm:$0xff] %v7880_v26 }
0x1238   :  { %v7845_v33 = vsel %vm7844_vm14, %v9242_v11, %v7841_v5 }
0x1239   :  { %v7867_v22 = vmul.f32 %v7845_v33, %v7803_v16 }
0x123b   :  { %v7874_v45 = vmul.f32 %v9043_v38, %v7867_v22 }
0x123d   :  { %v7881_v21 = vadd.f32 %v9044_v57, %v7874_v45 }
0x123f   :  { %7885 = vst [vmem:[#allocation2 + $0x8] sm:$0xff] %v7881_v21 }
0x1260   :  { %v7815_v10 = vpop.xlane.xlu2 %7814 }
0x1261   :  { %v7820_v3 = vmul.f32 %v7815_v10, %v13688_v6 }
0x1263   :  { %v7824_v2 = vadd.f32 1e-06, %v7820_v3 }
0x1265   :  { %9243 = vrsqrt.f32 %v7824_v2  ;;  %vm7852_vm12 = vweird.f32 %v7824_v2 }
0x1268   :  { %v7817_v58 = vpop.xlane.xlu0 %7816 }
0x1269   :  { %v7821_v36 = vmul.f32 %v7817_v58, %v13688_v6 }
0x126b   :  { %v9244_v8 = vpop.eup %9243  ;;  %v7825_v42 = vadd.f32 1e-06, %v7821_v36 }
0x126c   :  { %v7847_v41 = vmul.f32 %v9244_v8, %v7824_v2  ;;  %vm7853_vm15 = vweird.f32 %v9244_v8 }
0x126d   :  { %9245 = vrsqrt.f32 %v7825_v42  ;;  %vm7854_vm0 = vmor %vm7852_vm12, %vm7853_vm15  ;;  %vm7862_vm2 = vweird.f32 %v7825_v42 }
0x126e   :  { %v7848_v34 = vmul.f32 %v9244_v8, %v7847_v41 }
0x1270   :  { %v7849_v17 = vmul.f32 0.5, %v7848_v34 }
0x1272   :  { %v7850_v55 = vsub.f32 1.5, %v7849_v17 }
0x1273   :  { %v9246_v13 = vpop.eup %9245 }
0x1274   :  { %v7851_v30 = vmul.f32 %v9244_v8, %v7850_v55  ;;  %v7857_v50 = vmul.f32 %v9246_v13, %v7825_v42  ;;  %vm7863_vm1 = vweird.f32 %v9246_v13 }
0x1275   :  { %vm7864_vm3 = vmor %vm7862_vm2, %vm7863_vm1 }
0x1276   :  { %v7855_v54 = vsel %vm7854_vm0, %v9244_v8, %v7851_v30  ;;  %v7858_v62 = vmul.f32 %v9246_v13, %v7857_v50 }
0x1277   :  { %v7868_v0 = vmul.f32 %v7855_v54, %v13476_v23 }
0x1278   :  { %v7859_v1 = vmul.f32 0.5, %v7858_v62 }
0x1279   :  { %v7875_v63 = vmul.f32 %v9043_v38, %v7868_v0 }
0x127a   :  { %v7860_v6 = vsub.f32 1.5, %v7859_v1 }
0x127b   :  { %v7882_v27 = vadd.f32 %v9044_v57, %v7875_v63 }
0x127c   :  { %v7861_v15 = vmul.f32 %v9246_v13, %v7860_v6 }
0x127d   :  { %7886 = vst [vmem:[#allocation2 + $0x10] sm:$0xff] %v7882_v27 }
0x127e   :  { %v7865_v51 = vsel %vm7864_vm3, %v9246_v13, %v7861_v15 }
0x127f   :  { %v7869_v28 = vmul.f32 %v7865_v51, %v13481_v24 }
0x1281   :  { %v7876_v52 = vmul.f32 %v9043_v38, %v7869_v28 }
0x1283   :  { %v7883_v40 = vadd.f32 %v9044_v57, %v7876_v52 }
0x1285   :  { %7887 = vst [vmem:[#allocation2 + $0x18] sm:$0xff] %v7883_v40 }
0x1286   :  { %7900 = dma.vmem_to_hbm [thread:$0]  %s7893_s16, 512, %s7895_s12, [#allocation3], %s9280_s23, %s9280_s23, %s9281_s24  }
0x1287   :  { %9271 = dma.done.wait [#allocation3], 512  }
0x1288   :  { %9272 = vsyncadd [#allocation3], 4294966784 }
0x1289   :  { %7905 = vsyncpa [#allocation3], 1 }

</bundles_post_ra>
